<compile_context>
chip_gen: v6e
topology: v6e:2x2x1
jax: 0.10.0
libtpu: 0.0.40
codegen_flags: <defaults>
</compile_context>

<pallas_src>
import math
import functools

import jax
import jax.numpy as jnp
import numpy as np
from jax.experimental import pallas as pl
from jax.experimental.pallas import tpu as pltpu


# ----------------------------- config ------------------------------------- #
class GPTConfig:
    # small synthetic config consistent with the module's structure,
    # chosen lane-dense (C, 4C, vocab multiples of 128)
    block_size: int = 64
    vocab_size: int = 256
    n_layer: int = 2
    n_head: int = 4
    n_embd: int = 128


# ----------------------------- in-kernel helpers --------------------------- #
_GELU_C = 0.7978845608028654  # sqrt(2/pi)


def _ln(x, g, b, eps=1e-5):
    mu = jnp.mean(x, axis=-1, keepdims=True)
    var = jnp.mean(jnp.square(x - mu), axis=-1, keepdims=True)
    return (x - mu) * jax.lax.rsqrt(var + eps) * g + b


def _gelu_tanh(x):
    # matches nn.GELU(approximate='tanh')
    return 0.5 * x * (1.0 + jnp.tanh(_GELU_C * (x + 0.044715 * x * x * x)))


# ----------------------------- Pallas kernels ------------------------------ #
def _block_kernel(x_ref, ln1g_ref, ln1b_ref, wqkv_ref, bqkv_ref,
                  wap_ref, bap_ref, ln2g_ref, ln2b_ref,
                  wfc_ref, bfc_ref, wmp_ref, bmp_ref,
                  o_ref, x_scr, qkv_scr, *, n_head, batch, seq):
    """One grid step = one layer over ALL rows (B*T).  Residual stream and the
    bf16 QKV activations live in VMEM scratch across the layer loop."""
    layer = pl.program_id(0)

    @pl.when(layer == 0)
    def _():
        x_scr[...] = x_ref[...]

    x = x_scr[...]                                    # (B*T, C) f32, VMEM-resident
    _, C = x.shape
    Dh = C // n_head

    # ---- causal self-attention ----
    h = _ln(x, ln1g_ref[...], ln1b_ref[...])
    qkv_scr[...] = (
        jnp.dot(h.astype(jnp.bfloat16), wqkv_ref[...],
                preferred_element_type=jnp.float32) + bqkv_ref[...]
    ).astype(jnp.bfloat16)                            # (B*T, 3C) bf16 scratch

    row = jax.lax.broadcasted_iota(jnp.int32, (seq, seq), 0)
    col = jax.lax.broadcasted_iota(jnp.int32, (seq, seq), 1)
    causal = col <= row

    for b in range(batch):                            # static unroll over sequences
        r0 = b * seq
        acc = jnp.zeros((seq, C), jnp.float32)        # projected attention output
        for hh in range(n_head):                      # static unroll over heads
            c0 = hh * Dh
            # per-head operands sliced straight from the bf16 ref (small live set)
            q = qkv_scr[r0:r0 + seq, c0:c0 + Dh]               # scale prefolded
            k = qkv_scr[r0:r0 + seq, C + c0:C + c0 + Dh]
            v = qkv_scr[r0:r0 + seq, 2 * C + c0:2 * C + c0 + Dh]
            # q @ k^T without materializing a transpose
            s = jax.lax.dot_general(q, k, (((1,), (1,)), ((), ())),
                                    preferred_element_type=jnp.float32)
            s = jnp.where(causal, s, jnp.float32(-1e30))
            m = jnp.max(s, axis=-1, keepdims=True)
            p = jnp.exp(s - m)
            p = p * pl.reciprocal(jnp.sum(p, axis=-1, keepdims=True), approx=True)
            hv = jnp.dot(p.astype(jnp.bfloat16), v,
                         preferred_element_type=jnp.float32)   # (T, Dh)
            # fold the output projection into the head loop (no lane concat)
            acc = acc + jnp.dot(hv.astype(jnp.bfloat16), wap_ref[c0:c0 + Dh, :],
                                preferred_element_type=jnp.float32)
        # fused residual add, per-sequence row block written back to scratch
        x_scr[r0:r0 + seq, :] = x[r0:r0 + seq, :] + acc + bap_ref[...]

    x = x_scr[...]                                    # post-attention residual

    # ---- MLP ----
    h = _ln(x, ln2g_ref[...], ln2b_ref[...])
    h = jnp.dot(h.astype(jnp.bfloat16), wfc_ref[...],
                preferred_element_type=jnp.float32) + bfc_ref[...]
    h = _gelu_tanh(h)
    h = jnp.dot(h.astype(jnp.bfloat16), wmp_ref[...],
                preferred_element_type=jnp.float32) + bmp_ref[...]
    x = x + h                                         # residual fused in-kernel
    x_scr[...] = x

    @pl.when(layer == pl.num_programs(0) - 1)
    def _():
        o_ref[...] = x


def _final_ln_lm_head_kernel(x_ref, g_ref, b_ref, wt_ref, o_ref):
    """Fused final LayerNorm + bias-free tied lm_head tile (x @ wte^T tile)."""
    h = _ln(x_ref[...], g_ref[...], b_ref[...])
    o_ref[...] = jnp.dot(h.astype(jnp.bfloat16), wt_ref[...],
                         preferred_element_type=jnp.float32)


# ----------------------------- wrappers ------------------------------------ #
def transformer_blocks(x_flat, kp, B, T, cfg):
    C, L, H = cfg.n_embd, cfg.n_layer, cfg.n_head
    N = B * T
    kern = functools.partial(_block_kernel, n_head=H, batch=B, seq=T)

    def wspec(shape):
        # per-layer stacked weight: squeeze the leading layer dim in the kernel;
        # block index depends only on l -> fetched exactly once per layer.
        return pl.BlockSpec((None,) + shape, lambda l: (l, 0, 0))

    in_specs = [
        pl.BlockSpec((N, C), lambda l: (0, 0)),        # full residual row block
        wspec((1, C)), wspec((1, C)),                  # ln1 gamma / beta (f32)
        wspec((C, 3 * C)), wspec((1, 3 * C)),          # qkv W^T (bf16) / bias (f32)
        wspec((C, C)), wspec((1, C)),                  # attn proj W^T (bf16) / bias
        wspec((1, C)), wspec((1, C)),                  # ln2 gamma / beta
        wspec((C, 4 * C)), wspec((1, 4 * C)),          # fc W^T (bf16) / bias
        wspec((4 * C, C)), wspec((1, C)),              # mlp proj W^T (bf16) / bias
    ]
    return pl.pallas_call(
        kern,
        grid=(L,),
        in_specs=in_specs,
        out_specs=pl.BlockSpec((N, C), lambda l: (0, 0)),
        out_shape=jax.ShapeDtypeStruct((N, C), jnp.float32),
        scratch_shapes=[pltpu.VMEM((N, C), jnp.float32),        # residual stream
                        pltpu.VMEM((N, 3 * C), jnp.bfloat16)],  # qkv activations
        compiler_params=pltpu.CompilerParams(
            dimension_semantics=("arbitrary",),
            vmem_limit_bytes=32 * 1024 * 1024),
        # TODO(synk): on v7x (2 TCs) add a 2-way "parallel" row-split axis once
        # B*T is large enough to split without starving MXU row fill.
    )(x_flat,
      kp["ln1_g"], kp["ln1_b"],
      kp["w_qkv"], kp["b_qkv"],
      kp["w_attn_proj"], kp["b_attn_proj"],
      kp["ln2_g"], kp["ln2_b"],
      kp["w_fc"], kp["b_fc"],
      kp["w_mlp_proj"], kp["b_mlp_proj"])


def final_ln_lm_head(x_flat, kp, cfg, *, tm=128, tv=128):
    N, C = x_flat.shape
    V = cfg.vocab_size
    tm = min(tm, N)
    tv = min(tv, V)
    return pl.pallas_call(
        _final_ln_lm_head_kernel,
        grid=(N // tm, V // tv),
        in_specs=[
            pl.BlockSpec((tm, C), lambda i, j: (i, 0)),
            pl.BlockSpec((1, C), lambda i, j: (0, 0)),
            pl.BlockSpec((1, C), lambda i, j: (0, 0)),
            pl.BlockSpec((C, tv), lambda i, j: (0, j)),   # vocab-tiled wte^T (bf16)
        ],
        out_specs=pl.BlockSpec((tm, tv), lambda i, j: (i, j)),
        out_shape=jax.ShapeDtypeStruct((N, V), jnp.float32),
        compiler_params=pltpu.CompilerParams(
            dimension_semantics=("parallel", "parallel"),
            vmem_limit_bytes=32 * 1024 * 1024),
    )(x_flat, kp["lnf_g"], kp["lnf_b"], kp["wte_t"])


# ----------------------------- parameter init ------------------------------ #
def init_params(cfg, key):
    """f32 master parameters (nanoGPT init), weights pre-transposed (Cin, Cout)."""
    std = 0.02
    proj_std = 0.02 * (2 * cfg.n_layer) ** (-0.5)
    C, L, V = cfg.n_embd, cfg.n_layer, cfg.vocab_size
    ks = jax.random.split(key, 6)
    wte = jax.random.normal(ks[0], (V, C), jnp.float32) * std
    return {
        "wte": wte,                       # (V, C) embedding table (tied head)
        "wpe": jax.random.normal(ks[1], (cfg.block_size, C), jnp.float32) * std,
        "lnf_g": jnp.ones((1, C), jnp.float32),
        "lnf_b": jnp.zeros((1, C), jnp.float32),
        "ln1_g": jnp.ones((L, 1, C), jnp.float32),
        "ln1_b": jnp.zeros((L, 1, C), jnp.float32),
        "w_qkv": jax.random.normal(ks[2], (L, C, 3 * C), jnp.float32) * std,
        "b_qkv": jnp.zeros((L, 1, 3 * C), jnp.float32),
        "w_attn_proj": jax.random.normal(ks[3], (L, C, C), jnp.float32) * proj_std,
        "b_attn_proj": jnp.zeros((L, 1, C), jnp.float32),
        "ln2_g": jnp.ones((L, 1, C), jnp.float32),
        "ln2_b": jnp.zeros((L, 1, C), jnp.float32),
        "w_fc": jax.random.normal(ks[4], (L, C, 4 * C), jnp.float32) * std,
        "b_fc": jnp.zeros((L, 1, 4 * C), jnp.float32),
        "w_mlp_proj": jax.random.normal(ks[5], (L, 4 * C, C), jnp.float32) * proj_std,
        "b_mlp_proj": jnp.zeros((L, 1, C), jnp.float32),
    }


def prepare_kernel_params(p, cfg):
    """One-time weight transform for the kernels: fold 1/sqrt(Dh) into the Q
    third of w_qkv/b_qkv, cast matmul weights to bf16, pre-transpose wte."""
    C, H = cfg.n_embd, cfg.n_head
    scale = 1.0 / math.sqrt(C // H)
    w_qkv = p["w_qkv"].at[:, :, :C].multiply(scale)
    b_qkv = p["b_qkv"].at[:, :, :C].multiply(scale)
    return {
        "wte": p["wte"],                                  # f32 gather table
        "wpe": p["wpe"],
        "wte_t": jnp.transpose(p["wte"]).astype(jnp.bfloat16),
        "lnf_g": p["lnf_g"], "lnf_b": p["lnf_b"],
        "ln1_g": p["ln1_g"], "ln1_b": p["ln1_b"],
        "ln2_g": p["ln2_g"], "ln2_b": p["ln2_b"],
        "w_qkv": w_qkv.astype(jnp.bfloat16),
        "b_qkv": b_qkv,                                   # f32 (added post-accum)
        "w_attn_proj": p["w_attn_proj"].astype(jnp.bfloat16),
        "b_attn_proj": p["b_attn_proj"],
        "w_fc": p["w_fc"].astype(jnp.bfloat16),
        "b_fc": p["b_fc"],
        "w_mlp_proj": p["w_mlp_proj"].astype(jnp.bfloat16),
        "b_mlp_proj": p["b_mlp_proj"],
    }


# ----------------------------- forward pass -------------------------------- #
def gpt_forward(kparams, idx, cfg):
    B, T = idx.shape
    C = cfg.n_embd
    # embedding gathers are JAX glue (no clean Pallas gather needed at this size)
    x = kparams["wte"][idx] + kparams["wpe"][:T][None, :, :]   # (B, T, C)
    x = x.reshape(B * T, C).astype(jnp.float32)
    x = transformer_blocks(x, kparams, B, T, cfg)              # fused blocks
    logits = final_ln_lm_head(x, kparams, cfg)                 # fused LN_f + lm_head
    return logits.reshape(B, T, cfg.vocab_size)
    # TODO(synk): cross-entropy loss path (targets != None) not needed for forward-only kernel.


# ----------------------------- pure-JAX f32 reference ----------------------- #
def gpt_forward_ref(params, idx, cfg):
    B, T = idx.shape
    C, H, L = cfg.n_embd, cfg.n_head, cfg.n_layer
    Dh = C // H
    x = params["wte"][idx] + params["wpe"][:T][None]

    def ln(x, g, b):
        mu = jnp.mean(x, axis=-1, keepdims=True)
        var = jnp.mean(jnp.square(x - mu), axis=-1, keepdims=True)
        return (x - mu) * jax.lax.rsqrt(var + 1e-5) * g + b

    for l in range(L):
        h = ln(x, params["ln1_g"][l, 0], params["ln1_b"][l, 0])
        qkv = h @ params["w_qkv"][l] + params["b_qkv"][l, 0]
        q, k, v = jnp.split(qkv, 3, axis=-1)
        q = q.reshape(B, T, H, Dh).transpose(0, 2, 1, 3)
        k = k.reshape(B, T, H, Dh).transpose(0, 2, 1, 3)
        v = v.reshape(B, T, H, Dh).transpose(0, 2, 1, 3)
        s = jnp.einsum("bhqd,bhkd->bhqk", q, k) / math.sqrt(Dh)
        mask = jnp.tril(jnp.ones((T, T), bool))
        s = jnp.where(mask[None, None], s, -jnp.inf)
        p = jax.nn.softmax(s, axis=-1)
        y = jnp.einsum("bhqk,bhkd->bhqd", p, v)
        y = y.transpose(0, 2, 1, 3).reshape(B, T, C)
        x = x + (y @ params["w_attn_proj"][l] + params["b_attn_proj"][l, 0])

        h = ln(x, params["ln2_g"][l, 0], params["ln2_b"][l, 0])
        h = jax.nn.gelu(h @ params["w_fc"][l] + params["b_fc"][l, 0], approximate=True)
        x = x + (h @ params["w_mlp_proj"][l] + params["b_mlp_proj"][l, 0])

    x = ln(x, params["lnf_g"][0], params["lnf_b"][0])
    return x @ params["wte"].T


# ----------------------------- main ----------------------------------------- #
if __name__ == "__main__":
    cfg = GPTConfig()
    key = jax.random.PRNGKey(0)
    k_params, k_idx = jax.random.split(key)

    params = init_params(cfg, k_params)             # f32 masters (reference)
    kparams = prepare_kernel_params(params, cfg)    # bf16 / folded / transposed

    B, T = 2, 64
    idx = jax.random.randint(k_idx, (B, T), 0, cfg.vocab_size, dtype=jnp.int32)

    logits = jax.block_until_ready(gpt_forward(kparams, idx, cfg))
    ref = jax.block_until_ready(gpt_forward_ref(params, idx, cfg))

    # bf16 matmul operands + approx softmax reciprocal vs the pure-f32 reference:
    # errors are O(1e-3) on logits of O(0.1-1); 2e-2 still catches real bugs.
    np.testing.assert_allclose(np.asarray(logits), np.asarray(ref),
                               rtol=2e-2, atol=2e-2)
    assert logits.shape == (B, T, cfg.vocab_size)
    print("KERNEL_OK")
</pallas_src>

<mosaic_0001>
module attributes {stable_mosaic.version = 11 : i64} {
  func.func @_block_kernel(%arg0: i32, %arg1: memref<128x128xf32, #tpu.memory_space<vmem>>, %arg2: memref<1x1x128xf32, #tpu.memory_space<vmem>>, %arg3: memref<1x1x128xf32, #tpu.memory_space<vmem>>, %arg4: memref<1x128x384xbf16, #tpu.memory_space<vmem>>, %arg5: memref<1x1x384xf32, #tpu.memory_space<vmem>>, %arg6: memref<1x128x128xbf16, #tpu.memory_space<vmem>>, %arg7: memref<1x1x128xf32, #tpu.memory_space<vmem>>, %arg8: memref<1x1x128xf32, #tpu.memory_space<vmem>>, %arg9: memref<1x1x128xf32, #tpu.memory_space<vmem>>, %arg10: memref<1x128x512xbf16, #tpu.memory_space<vmem>>, %arg11: memref<1x1x512xf32, #tpu.memory_space<vmem>>, %arg12: memref<1x512x128xbf16, #tpu.memory_space<vmem>>, %arg13: memref<1x1x128xf32, #tpu.memory_space<vmem>>, %arg14: memref<128x128xf32, #tpu.memory_space<vmem>>, %arg15: memref<128x128xf32, #tpu.memory_space<vmem>>, %arg16: memref<128x384xbf16, #tpu.memory_space<vmem>>) attributes {dimension_semantics = [#tpu.dimension_semantics<arbitrary>], iteration_bounds = array<i64: 2>, scalar_prefetch = 0 : i64, scratch_operands = 2 : i64, tpu.core_type = #tpu.core_type<tc>, window_params = [{pipeline_mode = #tpu.pipeline_mode<synchronous>, transform_indices = @transform_0, window_bounds = array<i64: 128, 128>}, {transform_indices = @transform_1, window_bounds = array<i64: 1, 1, 128>}, {transform_indices = @transform_2, window_bounds = array<i64: 1, 1, 128>}, {transform_indices = @transform_3, window_bounds = array<i64: 1, 128, 384>}, {transform_indices = @transform_4, window_bounds = array<i64: 1, 1, 384>}, {transform_indices = @transform_5, window_bounds = array<i64: 1, 128, 128>}, {transform_indices = @transform_6, window_bounds = array<i64: 1, 1, 128>}, {transform_indices = @transform_7, window_bounds = array<i64: 1, 1, 128>}, {transform_indices = @transform_8, window_bounds = array<i64: 1, 1, 128>}, {transform_indices = @transform_9, window_bounds = array<i64: 1, 128, 512>}, {transform_indices = @transform_10, window_bounds = array<i64: 1, 1, 512>}, {transform_indices = @transform_11, window_bounds = array<i64: 1, 512, 128>}, {transform_indices = @transform_12, window_bounds = array<i64: 1, 1, 128>}, {pipeline_mode = #tpu.pipeline_mode<synchronous>, transform_indices = @transform_13, window_bounds = array<i64: 128, 128>}]} {
    %c0_i32 = arith.constant 0 : i32
    %0 = arith.cmpi eq, %arg0, %c0_i32 : i32
    %1 = arith.extui %0 : i1 to i32
    %c0_i32_0 = arith.constant 0 : i32
    %2 = arith.cmpi ne, %1, %c0_i32_0 : i32
    scf.if %2 {
      %c0_176 = arith.constant 0 : index
      %c0_177 = arith.constant 0 : index
      %304 = vector.load %arg1[%c0_176, %c0_177] : memref<128x128xf32, #tpu.memory_space<vmem>>, vector<128x128xf32>
      %c0_178 = arith.constant 0 : index
      %c0_179 = arith.constant 0 : index
      %305 = vector.load %arg15[%c0_178, %c0_179] : memref<128x128xf32, #tpu.memory_space<vmem>>, vector<128x128xf32>
      tpu.vector_store %arg15[%c0_178, %c0_179], %304 {strides = array<i32>} : memref<128x128xf32, #tpu.memory_space<vmem>>, vector<128x128xf32>,
    } else {
    }
    %c0 = arith.constant 0 : index
    %c0_1 = arith.constant 0 : index
    %3 = vector.load %arg15[%c0, %c0_1] : memref<128x128xf32, #tpu.memory_space<vmem>>, vector<128x128xf32>
    %c0_2 = arith.constant 0 : index
    %c0_3 = arith.constant 0 : index
    %c0_4 = arith.constant 0 : index
    %4 = vector.load %arg2[%c0_2, %c0_3, %c0_4] : memref<1x1x128xf32, #tpu.memory_space<vmem>>, vector<1x1x128xf32>
    %5 = vector.shape_cast %4 : vector<1x1x128xf32> to vector<1x128xf32>
    %c0_5 = arith.constant 0 : index
    %c0_6 = arith.constant 0 : index
    %c0_7 = arith.constant 0 : index
    %6 = vector.load %arg3[%c0_5, %c0_6, %c0_7] : memref<1x1x128xf32, #tpu.memory_space<vmem>>, vector<1x1x128xf32>
    %7 = vector.shape_cast %6 : vector<1x1x128xf32> to vector<1x128xf32>
    %cst = arith.constant dense<0.000000e+00> : vector<128xf32>
    %8 = vector.multi_reduction <add>, %3, %cst [1] : vector<128x128xf32> to vector<128xf32>
    %9 = vector.shape_cast %8 : vector<128xf32> to vector<128x1xf32>
    %cst_8 = arith.constant 1.280000e+02 : f32
    %10 = vector.broadcast %cst_8 : f32 to vector<128x1xf32>
    %11 = arith.divf %9, %10 : vector<128x1xf32>
    %12 = vector.broadcast %11 : vector<128x1xf32> to vector<128x128xf32>
    %13 = arith.subf %3, %12 : vector<128x128xf32>
    %14 = arith.mulf %13, %13 : vector<128x128xf32>
    %cst_9 = arith.constant dense<0.000000e+00> : vector<128xf32>
    %15 = vector.multi_reduction <add>, %14, %cst_9 [1] : vector<128x128xf32> to vector<128xf32>
    %16 = vector.shape_cast %15 : vector<128xf32> to vector<128x1xf32>
    %cst_10 = arith.constant 1.280000e+02 : f32
    %17 = vector.broadcast %cst_10 : f32 to vector<128x1xf32>
    %18 = arith.divf %16, %17 : vector<128x1xf32>
    %19 = vector.broadcast %11 : vector<128x1xf32> to vector<128x128xf32>
    %20 = arith.subf %3, %19 : vector<128x128xf32>
    %cst_11 = arith.constant 9.99999974E-6 : f32
    %21 = vector.broadcast %cst_11 : f32 to vector<128x1xf32>
    %22 = arith.addf %18, %21 : vector<128x1xf32>
    %23 = math.rsqrt %22 : vector<128x1xf32>
    %24 = vector.broadcast %23 : vector<128x1xf32> to vector<128x128xf32>
    %25 = arith.mulf %20, %24 : vector<128x128xf32>
    %26 = vector.broadcast %5 : vector<1x128xf32> to vector<128x128xf32>
    %27 = arith.mulf %25, %26 : vector<128x128xf32>
    %28 = vector.broadcast %7 : vector<1x128xf32> to vector<128x128xf32>
    %29 = arith.addf %27, %28 : vector<128x128xf32>
    %30 = arith.truncf %29 : vector<128x128xf32> to vector<128x128xbf16>
    %c0_12 = arith.constant 0 : index
    %c0_13 = arith.constant 0 : index
    %c0_14 = arith.constant 0 : index
    %31 = vector.load %arg4[%c0_12, %c0_13, %c0_14] : memref<1x128x384xbf16, #tpu.memory_space<vmem>>, vector<1x128x384xbf16>
    %32 = vector.shape_cast %31 : vector<1x128x384xbf16> to vector<128x384xbf16>
    %cst_15 = arith.constant dense<0.000000e+00> : vector<128x384xf32>
    %33 = tpu.matmul %30, %32, %cst_15 {dimension_numbers = #tpu.dot_dimension_numbers<[1], [0], [0], [1], [0, 0, 1, 1], [], []>} : vector<128x128xbf16>, vector<128x384xbf16>, vector<128x384xf32> -> vector<128x384xf32>
    %c0_16 = arith.constant 0 : index
    %c0_17 = arith.constant 0 : index
    %c0_18 = arith.constant 0 : index
    %34 = vector.load %arg5[%c0_16, %c0_17, %c0_18] : memref<1x1x384xf32, #tpu.memory_space<vmem>>, vector<1x1x384xf32>
    %35 = vector.shape_cast %34 : vector<1x1x384xf32> to vector<1x384xf32>
    %36 = vector.broadcast %35 : vector<1x384xf32> to vector<128x384xf32>
    %37 = arith.addf %33, %36 : vector<128x384xf32>
    %38 = arith.truncf %37 : vector<128x384xf32> to vector<128x384xbf16>
    %c0_19 = arith.constant 0 : index
    %c0_20 = arith.constant 0 : index
    %39 = vector.load %arg16[%c0_19, %c0_20] : memref<128x384xbf16, #tpu.memory_space<vmem>>, vector<128x384xbf16>
    tpu.vector_store %arg16[%c0_19, %c0_20], %38 {strides = array<i32>} : memref<128x384xbf16, #tpu.memory_space<vmem>>, vector<128x384xbf16>,
    %40 = tpu.iota {dimensions = array<i32: 0>} : vector<64x64xi32>
    %41 = tpu.iota {dimensions = array<i32: 1>} : vector<64x64xi32>
    %42 = arith.cmpi sle, %41, %40 : vector<64x64xi32>
    %cst_21 = arith.constant 0.000000e+00 : f32
    %43 = vector.broadcast %cst_21 : f32 to vector<64x128xf32>
    %c0_22 = arith.constant 0 : index
    %c0_23 = arith.constant 0 : index
    %44 = vector.load %arg16[%c0_22, %c0_23] : memref<128x384xbf16, #tpu.memory_space<vmem>>, vector<64x32xbf16>
    %c0_24 = arith.constant 0 : index
    %c128 = arith.constant 128 : index
    %45 = vector.load %arg16[%c0_24, %c128] : memref<128x384xbf16, #tpu.memory_space<vmem>>, vector<64x32xbf16>
    %c0_25 = arith.constant 0 : index
    %c256 = arith.constant 256 : index
    %46 = vector.load %arg16[%c0_25, %c256] : memref<128x384xbf16, #tpu.memory_space<vmem>>, vector<64x32xbf16>
    %cst_26 = arith.constant dense<0.000000e+00> : vector<64x64xf32>
    %47 = tpu.matmul %44, %45, %cst_26 {dimension_numbers = #tpu.dot_dimension_numbers<[1], [1], [0], [0], [0, 0, 1, 0], [], []>} : vector<64x32xbf16>, vector<64x32xbf16>, vector<64x64xf32> -> vector<64x64xf32>
    %cst_27 = arith.constant -1.000000e+30 : f32
    %48 = vector.broadcast %cst_27 : f32 to vector<64x64xf32>
    %49 = arith.select %42, %47, %48 : vector<64x64xi1>, vector<64x64xf32>
    %cst_28 = arith.constant dense<0xFF800000> : vector<64xf32>
    %50 = vector.multi_reduction <maximumf>, %49, %cst_28 [1] : vector<64x64xf32> to vector<64xf32>
    %51 = vector.shape_cast %50 : vector<64xf32> to vector<64x1xf32>
    %52 = vector.broadcast %51 : vector<64x1xf32> to vector<64x64xf32>
    %53 = arith.subf %49, %52 : vector<64x64xf32>
    %54 = math.exp %53 : vector<64x64xf32>
    %cst_29 = arith.constant dense<0.000000e+00> : vector<64xf32>
    %55 = vector.multi_reduction <add>, %54, %cst_29 [1] : vector<64x64xf32> to vector<64xf32>
    %56 = vector.shape_cast %55 : vector<64xf32> to vector<64x1xf32>
    %57 = tpu.reciprocal %56 {approx = true} : vector<64x1xf32> -> vector<64x1xf32>
    %58 = vector.broadcast %57 : vector<64x1xf32> to vector<64x64xf32>
    %59 = arith.mulf %54, %58 : vector<64x64xf32>
    %60 = arith.truncf %59 : vector<64x64xf32> to vector<64x64xbf16>
    %cst_30 = arith.constant dense<0.000000e+00> : vector<64x32xf32>
    %61 = tpu.matmul %60, %46, %cst_30 {dimension_numbers = #tpu.dot_dimension_numbers<[1], [0], [0], [1], [0, 0, 1, 1], [], []>} : vector<64x64xbf16>, vector<64x32xbf16>, vector<64x32xf32> -> vector<64x32xf32>
    %62 = arith.truncf %61 : vector<64x32xf32> to vector<64x32xbf16>
    %c0_31 = arith.constant 0 : index
    %c0_32 = arith.constant 0 : index
    %c0_33 = arith.constant 0 : index
    %63 = vector.load %arg6[%c0_31, %c0_32, %c0_33] : memref<1x128x128xbf16, #tpu.memory_space<vmem>>, vector<1x32x128xbf16>
    %64 = vector.shape_cast %63 : vector<1x32x128xbf16> to vector<32x128xbf16>
    %cst_34 = arith.constant dense<0.000000e+00> : vector<64x128xf32>
    %65 = tpu.matmul %62, %64, %cst_34 {dimension_numbers = #tpu.dot_dimension_numbers<[1], [0], [0], [1], [0, 0, 1, 1], [], []>} : vector<64x32xbf16>, vector<32x128xbf16>, vector<64x128xf32> -> vector<64x128xf32>
    %66 = arith.addf %43, %65 : vector<64x128xf32>
    %c0_35 = arith.constant 0 : index
    %c32 = arith.constant 32 : index
    %67 = vector.load %arg16[%c0_35, %c32] : memref<128x384xbf16, #tpu.memory_space<vmem>>, vector<64x32xbf16>
    %c0_36 = arith.constant 0 : index
    %c160 = arith.constant 160 : index
    %68 = vector.load %arg16[%c0_36, %c160] : memref<128x384xbf16, #tpu.memory_space<vmem>>, vector<64x32xbf16>
    %c0_37 = arith.constant 0 : index
    %c288 = arith.constant 288 : index
    %69 = vector.load %arg16[%c0_37, %c288] : memref<128x384xbf16, #tpu.memory_space<vmem>>, vector<64x32xbf16>
    %cst_38 = arith.constant dense<0.000000e+00> : vector<64x64xf32>
    %70 = tpu.matmul %67, %68, %cst_38 {dimension_numbers = #tpu.dot_dimension_numbers<[1], [1], [0], [0], [0, 0, 1, 0], [], []>} : vector<64x32xbf16>, vector<64x32xbf16>, vector<64x64xf32> -> vector<64x64xf32>
    %cst_39 = arith.constant -1.000000e+30 : f32
    %71 = vector.broadcast %cst_39 : f32 to vector<64x64xf32>
    %72 = arith.select %42, %70, %71 : vector<64x64xi1>, vector<64x64xf32>
    %cst_40 = arith.constant dense<0xFF800000> : vector<64xf32>
    %73 = vector.multi_reduction <maximumf>, %72, %cst_40 [1] : vector<64x64xf32> to vector<64xf32>
    %74 = vector.shape_cast %73 : vector<64xf32> to vector<64x1xf32>
    %75 = vector.broadcast %74 : vector<64x1xf32> to vector<64x64xf32>
    %76 = arith.subf %72, %75 : vector<64x64xf32>
    %77 = math.exp %76 : vector<64x64xf32>
    %cst_41 = arith.constant dense<0.000000e+00> : vector<64xf32>
    %78 = vector.multi_reduction <add>, %77, %cst_41 [1] : vector<64x64xf32> to vector<64xf32>
    %79 = vector.shape_cast %78 : vector<64xf32> to vector<64x1xf32>
    %80 = tpu.reciprocal %79 {approx = true} : vector<64x1xf32> -> vector<64x1xf32>
    %81 = vector.broadcast %80 : vector<64x1xf32> to vector<64x64xf32>
    %82 = arith.mulf %77, %81 : vector<64x64xf32>
    %83 = arith.truncf %82 : vector<64x64xf32> to vector<64x64xbf16>
    %cst_42 = arith.constant dense<0.000000e+00> : vector<64x32xf32>
    %84 = tpu.matmul %83, %69, %cst_42 {dimension_numbers = #tpu.dot_dimension_numbers<[1], [0], [0], [1], [0, 0, 1, 1], [], []>} : vector<64x64xbf16>, vector<64x32xbf16>, vector<64x32xf32> -> vector<64x32xf32>
    %85 = arith.truncf %84 : vector<64x32xf32> to vector<64x32xbf16>
    %c0_43 = arith.constant 0 : index
    %c32_44 = arith.constant 32 : index
    %c0_45 = arith.constant 0 : index
    %86 = vector.load %arg6[%c0_43, %c32_44, %c0_45] : memref<1x128x128xbf16, #tpu.memory_space<vmem>>, vector<1x32x128xbf16>
    %87 = vector.shape_cast %86 : vector<1x32x128xbf16> to vector<32x128xbf16>
    %cst_46 = arith.constant dense<0.000000e+00> : vector<64x128xf32>
    %88 = tpu.matmul %85, %87, %cst_46 {dimension_numbers = #tpu.dot_dimension_numbers<[1], [0], [0], [1], [0, 0, 1, 1], [], []>} : vector<64x32xbf16>, vector<32x128xbf16>, vector<64x128xf32> -> vector<64x128xf32>
    %89 = arith.addf %66, %88 : vector<64x128xf32>
    %c0_47 = arith.constant 0 : index
    %c64 = arith.constant 64 : index
    %90 = vector.load %arg16[%c0_47, %c64] : memref<128x384xbf16, #tpu.memory_space<vmem>>, vector<64x32xbf16>
    %c0_48 = arith.constant 0 : index
    %c192 = arith.constant 192 : index
    %91 = vector.load %arg16[%c0_48, %c192] : memref<128x384xbf16, #tpu.memory_space<vmem>>, vector<64x32xbf16>
    %c0_49 = arith.constant 0 : index
    %c320 = arith.constant 320 : index
    %92 = vector.load %arg16[%c0_49, %c320] : memref<128x384xbf16, #tpu.memory_space<vmem>>, vector<64x32xbf16>
    %cst_50 = arith.constant dense<0.000000e+00> : vector<64x64xf32>
    %93 = tpu.matmul %90, %91, %cst_50 {dimension_numbers = #tpu.dot_dimension_numbers<[1], [1], [0], [0], [0, 0, 1, 0], [], []>} : vector<64x32xbf16>, vector<64x32xbf16>, vector<64x64xf32> -> vector<64x64xf32>
    %cst_51 = arith.constant -1.000000e+30 : f32
    %94 = vector.broadcast %cst_51 : f32 to vector<64x64xf32>
    %95 = arith.select %42, %93, %94 : vector<64x64xi1>, vector<64x64xf32>
    %cst_52 = arith.constant dense<0xFF800000> : vector<64xf32>
    %96 = vector.multi_reduction <maximumf>, %95, %cst_52 [1] : vector<64x64xf32> to vector<64xf32>
    %97 = vector.shape_cast %96 : vector<64xf32> to vector<64x1xf32>
    %98 = vector.broadcast %97 : vector<64x1xf32> to vector<64x64xf32>
    %99 = arith.subf %95, %98 : vector<64x64xf32>
    %100 = math.exp %99 : vector<64x64xf32>
    %cst_53 = arith.constant dense<0.000000e+00> : vector<64xf32>
    %101 = vector.multi_reduction <add>, %100, %cst_53 [1] : vector<64x64xf32> to vector<64xf32>
    %102 = vector.shape_cast %101 : vector<64xf32> to vector<64x1xf32>
    %103 = tpu.reciprocal %102 {approx = true} : vector<64x1xf32> -> vector<64x1xf32>
    %104 = vector.broadcast %103 : vector<64x1xf32> to vector<64x64xf32>
    %105 = arith.mulf %100, %104 : vector<64x64xf32>
    %106 = arith.truncf %105 : vector<64x64xf32> to vector<64x64xbf16>
    %cst_54 = arith.constant dense<0.000000e+00> : vector<64x32xf32>
    %107 = tpu.matmul %106, %92, %cst_54 {dimension_numbers = #tpu.dot_dimension_numbers<[1], [0], [0], [1], [0, 0, 1, 1], [], []>} : vector<64x64xbf16>, vector<64x32xbf16>, vector<64x32xf32> -> vector<64x32xf32>
    %108 = arith.truncf %107 : vector<64x32xf32> to vector<64x32xbf16>
    %c0_55 = arith.constant 0 : index
    %c64_56 = arith.constant 64 : index
    %c0_57 = arith.constant 0 : index
    %109 = vector.load %arg6[%c0_55, %c64_56, %c0_57] : memref<1x128x128xbf16, #tpu.memory_space<vmem>>, vector<1x32x128xbf16>
    %110 = vector.shape_cast %109 : vector<1x32x128xbf16> to vector<32x128xbf16>
    %cst_58 = arith.constant dense<0.000000e+00> : vector<64x128xf32>
    %111 = tpu.matmul %108, %110, %cst_58 {dimension_numbers = #tpu.dot_dimension_numbers<[1], [0], [0], [1], [0, 0, 1, 1], [], []>} : vector<64x32xbf16>, vector<32x128xbf16>, vector<64x128xf32> -> vector<64x128xf32>
    %112 = arith.addf %89, %111 : vector<64x128xf32>
    %c0_59 = arith.constant 0 : index
    %c96 = arith.constant 96 : index
    %113 = vector.load %arg16[%c0_59, %c96] : memref<128x384xbf16, #tpu.memory_space<vmem>>, vector<64x32xbf16>
    %c0_60 = arith.constant 0 : index
    %c224 = arith.constant 224 : index
    %114 = vector.load %arg16[%c0_60, %c224] : memref<128x384xbf16, #tpu.memory_space<vmem>>, vector<64x32xbf16>
    %c0_61 = arith.constant 0 : index
    %c352 = arith.constant 352 : index
    %115 = vector.load %arg16[%c0_61, %c352] : memref<128x384xbf16, #tpu.memory_space<vmem>>, vector<64x32xbf16>
    %cst_62 = arith.constant dense<0.000000e+00> : vector<64x64xf32>
    %116 = tpu.matmul %113, %114, %cst_62 {dimension_numbers = #tpu.dot_dimension_numbers<[1], [1], [0], [0], [0, 0, 1, 0], [], []>} : vector<64x32xbf16>, vector<64x32xbf16>, vector<64x64xf32> -> vector<64x64xf32>
    %cst_63 = arith.constant -1.000000e+30 : f32
    %117 = vector.broadcast %cst_63 : f32 to vector<64x64xf32>
    %118 = arith.select %42, %116, %117 : vector<64x64xi1>, vector<64x64xf32>
    %cst_64 = arith.constant dense<0xFF800000> : vector<64xf32>
    %119 = vector.multi_reduction <maximumf>, %118, %cst_64 [1] : vector<64x64xf32> to vector<64xf32>
    %120 = vector.shape_cast %119 : vector<64xf32> to vector<64x1xf32>
    %121 = vector.broadcast %120 : vector<64x1xf32> to vector<64x64xf32>
    %122 = arith.subf %118, %121 : vector<64x64xf32>
    %123 = math.exp %122 : vector<64x64xf32>
    %cst_65 = arith.constant dense<0.000000e+00> : vector<64xf32>
    %124 = vector.multi_reduction <add>, %123, %cst_65 [1] : vector<64x64xf32> to vector<64xf32>
    %125 = vector.shape_cast %124 : vector<64xf32> to vector<64x1xf32>
    %126 = tpu.reciprocal %125 {approx = true} : vector<64x1xf32> -> vector<64x1xf32>
    %127 = vector.broadcast %126 : vector<64x1xf32> to vector<64x64xf32>
    %128 = arith.mulf %123, %127 : vector<64x64xf32>
    %129 = arith.truncf %128 : vector<64x64xf32> to vector<64x64xbf16>
    %cst_66 = arith.constant dense<0.000000e+00> : vector<64x32xf32>
    %130 = tpu.matmul %129, %115, %cst_66 {dimension_numbers = #tpu.dot_dimension_numbers<[1], [0], [0], [1], [0, 0, 1, 1], [], []>} : vector<64x64xbf16>, vector<64x32xbf16>, vector<64x32xf32> -> vector<64x32xf32>
    %131 = arith.truncf %130 : vector<64x32xf32> to vector<64x32xbf16>
    %c0_67 = arith.constant 0 : index
    %c96_68 = arith.constant 96 : index
    %c0_69 = arith.constant 0 : index
    %132 = vector.load %arg6[%c0_67, %c96_68, %c0_69] : memref<1x128x128xbf16, #tpu.memory_space<vmem>>, vector<1x32x128xbf16>
    %133 = vector.shape_cast %132 : vector<1x32x128xbf16> to vector<32x128xbf16>
    %cst_70 = arith.constant dense<0.000000e+00> : vector<64x128xf32>
    %134 = tpu.matmul %131, %133, %cst_70 {dimension_numbers = #tpu.dot_dimension_numbers<[1], [0], [0], [1], [0, 0, 1, 1], [], []>} : vector<64x32xbf16>, vector<32x128xbf16>, vector<64x128xf32> -> vector<64x128xf32>
    %135 = arith.addf %112, %134 : vector<64x128xf32>
    %136 = vector.extract_strided_slice %3 {offsets = [0, 0], sizes = [64, 128], strides = [1, 1]} : vector<128x128xf32> to vector<64x128xf32>
    %137 = arith.addf %136, %135 : vector<64x128xf32>
    %c0_71 = arith.constant 0 : index
    %c0_72 = arith.constant 0 : index
    %c0_73 = arith.constant 0 : index
    %138 = vector.load %arg7[%c0_71, %c0_72, %c0_73] : memref<1x1x128xf32, #tpu.memory_space<vmem>>, vector<1x1x128xf32>
    %139 = vector.shape_cast %138 : vector<1x1x128xf32> to vector<1x128xf32>
    %140 = vector.broadcast %139 : vector<1x128xf32> to vector<64x128xf32>
    %141 = arith.addf %137, %140 : vector<64x128xf32>
    %c0_74 = arith.constant 0 : index
    %c0_75 = arith.constant 0 : index
    %142 = vector.load %arg15[%c0_74, %c0_75] : memref<128x128xf32, #tpu.memory_space<vmem>>, vector<64x128xf32>
    tpu.vector_store %arg15[%c0_74, %c0_75], %141 {strides = array<i32>} : memref<128x128xf32, #tpu.memory_space<vmem>>, vector<64x128xf32>,
    %cst_76 = arith.constant 0.000000e+00 : f32
    %143 = vector.broadcast %cst_76 : f32 to vector<64x128xf32>
    %c64_77 = arith.constant 64 : index
    %c0_78 = arith.constant 0 : index
    %144 = vector.load %arg16[%c64_77, %c0_78] : memref<128x384xbf16, #tpu.memory_space<vmem>>, vector<64x32xbf16>
    %c64_79 = arith.constant 64 : index
    %c128_80 = arith.constant 128 : index
    %145 = vector.load %arg16[%c64_79, %c128_80] : memref<128x384xbf16, #tpu.memory_space<vmem>>, vector<64x32xbf16>
    %c64_81 = arith.constant 64 : index
    %c256_82 = arith.constant 256 : index
    %146 = vector.load %arg16[%c64_81, %c256_82] : memref<128x384xbf16, #tpu.memory_space<vmem>>, vector<64x32xbf16>
    %cst_83 = arith.constant dense<0.000000e+00> : vector<64x64xf32>
    %147 = tpu.matmul %144, %145, %cst_83 {dimension_numbers = #tpu.dot_dimension_numbers<[1], [1], [0], [0], [0, 0, 1, 0], [], []>} : vector<64x32xbf16>, vector<64x32xbf16>, vector<64x64xf32> -> vector<64x64xf32>
    %cst_84 = arith.constant -1.000000e+30 : f32
    %148 = vector.broadcast %cst_84 : f32 to vector<64x64xf32>
    %149 = arith.select %42, %147, %148 : vector<64x64xi1>, vector<64x64xf32>
    %cst_85 = arith.constant dense<0xFF800000> : vector<64xf32>
    %150 = vector.multi_reduction <maximumf>, %149, %cst_85 [1] : vector<64x64xf32> to vector<64xf32>
    %151 = vector.shape_cast %150 : vector<64xf32> to vector<64x1xf32>
    %152 = vector.broadcast %151 : vector<64x1xf32> to vector<64x64xf32>
    %153 = arith.subf %149, %152 : vector<64x64xf32>
    %154 = math.exp %153 : vector<64x64xf32>
    %cst_86 = arith.constant dense<0.000000e+00> : vector<64xf32>
    %155 = vector.multi_reduction <add>, %154, %cst_86 [1] : vector<64x64xf32> to vector<64xf32>
    %156 = vector.shape_cast %155 : vector<64xf32> to vector<64x1xf32>
    %157 = tpu.reciprocal %156 {approx = true} : vector<64x1xf32> -> vector<64x1xf32>
    %158 = vector.broadcast %157 : vector<64x1xf32> to vector<64x64xf32>
    %159 = arith.mulf %154, %158 : vector<64x64xf32>
    %160 = arith.truncf %159 : vector<64x64xf32> to vector<64x64xbf16>
    %cst_87 = arith.constant dense<0.000000e+00> : vector<64x32xf32>
    %161 = tpu.matmul %160, %146, %cst_87 {dimension_numbers = #tpu.dot_dimension_numbers<[1], [0], [0], [1], [0, 0, 1, 1], [], []>} : vector<64x64xbf16>, vector<64x32xbf16>, vector<64x32xf32> -> vector<64x32xf32>
    %162 = arith.truncf %161 : vector<64x32xf32> to vector<64x32xbf16>
    %c0_88 = arith.constant 0 : index
    %c0_89 = arith.constant 0 : index
    %c0_90 = arith.constant 0 : index
    %163 = vector.load %arg6[%c0_88, %c0_89, %c0_90] : memref<1x128x128xbf16, #tpu.memory_space<vmem>>, vector<1x32x128xbf16>
    %164 = vector.shape_cast %163 : vector<1x32x128xbf16> to vector<32x128xbf16>
    %cst_91 = arith.constant dense<0.000000e+00> : vector<64x128xf32>
    %165 = tpu.matmul %162, %164, %cst_91 {dimension_numbers = #tpu.dot_dimension_numbers<[1], [0], [0], [1], [0, 0, 1, 1], [], []>} : vector<64x32xbf16>, vector<32x128xbf16>, vector<64x128xf32> -> vector<64x128xf32>
    %166 = arith.addf %143, %165 : vector<64x128xf32>
    %c64_92 = arith.constant 64 : index
    %c32_93 = arith.constant 32 : index
    %167 = vector.load %arg16[%c64_92, %c32_93] : memref<128x384xbf16, #tpu.memory_space<vmem>>, vector<64x32xbf16>
    %c64_94 = arith.constant 64 : index
    %c160_95 = arith.constant 160 : index
    %168 = vector.load %arg16[%c64_94, %c160_95] : memref<128x384xbf16, #tpu.memory_space<vmem>>, vector<64x32xbf16>
    %c64_96 = arith.constant 64 : index
    %c288_97 = arith.constant 288 : index
    %169 = vector.load %arg16[%c64_96, %c288_97] : memref<128x384xbf16, #tpu.memory_space<vmem>>, vector<64x32xbf16>
    %cst_98 = arith.constant dense<0.000000e+00> : vector<64x64xf32>
    %170 = tpu.matmul %167, %168, %cst_98 {dimension_numbers = #tpu.dot_dimension_numbers<[1], [1], [0], [0], [0, 0, 1, 0], [], []>} : vector<64x32xbf16>, vector<64x32xbf16>, vector<64x64xf32> -> vector<64x64xf32>
    %cst_99 = arith.constant -1.000000e+30 : f32
    %171 = vector.broadcast %cst_99 : f32 to vector<64x64xf32>
    %172 = arith.select %42, %170, %171 : vector<64x64xi1>, vector<64x64xf32>
    %cst_100 = arith.constant dense<0xFF800000> : vector<64xf32>
    %173 = vector.multi_reduction <maximumf>, %172, %cst_100 [1] : vector<64x64xf32> to vector<64xf32>
    %174 = vector.shape_cast %173 : vector<64xf32> to vector<64x1xf32>
    %175 = vector.broadcast %174 : vector<64x1xf32> to vector<64x64xf32>
    %176 = arith.subf %172, %175 : vector<64x64xf32>
    %177 = math.exp %176 : vector<64x64xf32>
    %cst_101 = arith.constant dense<0.000000e+00> : vector<64xf32>
    %178 = vector.multi_reduction <add>, %177, %cst_101 [1] : vector<64x64xf32> to vector<64xf32>
    %179 = vector.shape_cast %178 : vector<64xf32> to vector<64x1xf32>
    %180 = tpu.reciprocal %179 {approx = true} : vector<64x1xf32> -> vector<64x1xf32>
    %181 = vector.broadcast %180 : vector<64x1xf32> to vector<64x64xf32>
    %182 = arith.mulf %177, %181 : vector<64x64xf32>
    %183 = arith.truncf %182 : vector<64x64xf32> to vector<64x64xbf16>
    %cst_102 = arith.constant dense<0.000000e+00> : vector<64x32xf32>
    %184 = tpu.matmul %183, %169, %cst_102 {dimension_numbers = #tpu.dot_dimension_numbers<[1], [0], [0], [1], [0, 0, 1, 1], [], []>} : vector<64x64xbf16>, vector<64x32xbf16>, vector<64x32xf32> -> vector<64x32xf32>
    %185 = arith.truncf %184 : vector<64x32xf32> to vector<64x32xbf16>
    %c0_103 = arith.constant 0 : index
    %c32_104 = arith.constant 32 : index
    %c0_105 = arith.constant 0 : index
    %186 = vector.load %arg6[%c0_103, %c32_104, %c0_105] : memref<1x128x128xbf16, #tpu.memory_space<vmem>>, vector<1x32x128xbf16>
    %187 = vector.shape_cast %186 : vector<1x32x128xbf16> to vector<32x128xbf16>
    %cst_106 = arith.constant dense<0.000000e+00> : vector<64x128xf32>
    %188 = tpu.matmul %185, %187, %cst_106 {dimension_numbers = #tpu.dot_dimension_numbers<[1], [0], [0], [1], [0, 0, 1, 1], [], []>} : vector<64x32xbf16>, vector<32x128xbf16>, vector<64x128xf32> -> vector<64x128xf32>
    %189 = arith.addf %166, %188 : vector<64x128xf32>
    %c64_107 = arith.constant 64 : index
    %c64_108 = arith.constant 64 : index
    %190 = vector.load %arg16[%c64_107, %c64_108] : memref<128x384xbf16, #tpu.memory_space<vmem>>, vector<64x32xbf16>
    %c64_109 = arith.constant 64 : index
    %c192_110 = arith.constant 192 : index
    %191 = vector.load %arg16[%c64_109, %c192_110] : memref<128x384xbf16, #tpu.memory_space<vmem>>, vector<64x32xbf16>
    %c64_111 = arith.constant 64 : index
    %c320_112 = arith.constant 320 : index
    %192 = vector.load %arg16[%c64_111, %c320_112] : memref<128x384xbf16, #tpu.memory_space<vmem>>, vector<64x32xbf16>
    %cst_113 = arith.constant dense<0.000000e+00> : vector<64x64xf32>
    %193 = tpu.matmul %190, %191, %cst_113 {dimension_numbers = #tpu.dot_dimension_numbers<[1], [1], [0], [0], [0, 0, 1, 0], [], []>} : vector<64x32xbf16>, vector<64x32xbf16>, vector<64x64xf32> -> vector<64x64xf32>
    %cst_114 = arith.constant -1.000000e+30 : f32
    %194 = vector.broadcast %cst_114 : f32 to vector<64x64xf32>
    %195 = arith.select %42, %193, %194 : vector<64x64xi1>, vector<64x64xf32>
    %cst_115 = arith.constant dense<0xFF800000> : vector<64xf32>
    %196 = vector.multi_reduction <maximumf>, %195, %cst_115 [1] : vector<64x64xf32> to vector<64xf32>
    %197 = vector.shape_cast %196 : vector<64xf32> to vector<64x1xf32>
    %198 = vector.broadcast %197 : vector<64x1xf32> to vector<64x64xf32>
    %199 = arith.subf %195, %198 : vector<64x64xf32>
    %200 = math.exp %199 : vector<64x64xf32>
    %cst_116 = arith.constant dense<0.000000e+00> : vector<64xf32>
    %201 = vector.multi_reduction <add>, %200, %cst_116 [1] : vector<64x64xf32> to vector<64xf32>
    %202 = vector.shape_cast %201 : vector<64xf32> to vector<64x1xf32>
    %203 = tpu.reciprocal %202 {approx = true} : vector<64x1xf32> -> vector<64x1xf32>
    %204 = vector.broadcast %203 : vector<64x1xf32> to vector<64x64xf32>
    %205 = arith.mulf %200, %204 : vector<64x64xf32>
    %206 = arith.truncf %205 : vector<64x64xf32> to vector<64x64xbf16>
    %cst_117 = arith.constant dense<0.000000e+00> : vector<64x32xf32>
    %207 = tpu.matmul %206, %192, %cst_117 {dimension_numbers = #tpu.dot_dimension_numbers<[1], [0], [0], [1], [0, 0, 1, 1], [], []>} : vector<64x64xbf16>, vector<64x32xbf16>, vector<64x32xf32> -> vector<64x32xf32>
    %208 = arith.truncf %207 : vector<64x32xf32> to vector<64x32xbf16>
    %c0_118 = arith.constant 0 : index
    %c64_119 = arith.constant 64 : index
    %c0_120 = arith.constant 0 : index
    %209 = vector.load %arg6[%c0_118, %c64_119, %c0_120] : memref<1x128x128xbf16, #tpu.memory_space<vmem>>, vector<1x32x128xbf16>
    %210 = vector.shape_cast %209 : vector<1x32x128xbf16> to vector<32x128xbf16>
    %cst_121 = arith.constant dense<0.000000e+00> : vector<64x128xf32>
    %211 = tpu.matmul %208, %210, %cst_121 {dimension_numbers = #tpu.dot_dimension_numbers<[1], [0], [0], [1], [0, 0, 1, 1], [], []>} : vector<64x32xbf16>, vector<32x128xbf16>, vector<64x128xf32> -> vector<64x128xf32>
    %212 = arith.addf %189, %211 : vector<64x128xf32>
    %c64_122 = arith.constant 64 : index
    %c96_123 = arith.constant 96 : index
    %213 = vector.load %arg16[%c64_122, %c96_123] : memref<128x384xbf16, #tpu.memory_space<vmem>>, vector<64x32xbf16>
    %c64_124 = arith.constant 64 : index
    %c224_125 = arith.constant 224 : index
    %214 = vector.load %arg16[%c64_124, %c224_125] : memref<128x384xbf16, #tpu.memory_space<vmem>>, vector<64x32xbf16>
    %c64_126 = arith.constant 64 : index
    %c352_127 = arith.constant 352 : index
    %215 = vector.load %arg16[%c64_126, %c352_127] : memref<128x384xbf16, #tpu.memory_space<vmem>>, vector<64x32xbf16>
    %cst_128 = arith.constant dense<0.000000e+00> : vector<64x64xf32>
    %216 = tpu.matmul %213, %214, %cst_128 {dimension_numbers = #tpu.dot_dimension_numbers<[1], [1], [0], [0], [0, 0, 1, 0], [], []>} : vector<64x32xbf16>, vector<64x32xbf16>, vector<64x64xf32> -> vector<64x64xf32>
    %cst_129 = arith.constant -1.000000e+30 : f32
    %217 = vector.broadcast %cst_129 : f32 to vector<64x64xf32>
    %218 = arith.select %42, %216, %217 : vector<64x64xi1>, vector<64x64xf32>
    %cst_130 = arith.constant dense<0xFF800000> : vector<64xf32>
    %219 = vector.multi_reduction <maximumf>, %218, %cst_130 [1] : vector<64x64xf32> to vector<64xf32>
    %220 = vector.shape_cast %219 : vector<64xf32> to vector<64x1xf32>
    %221 = vector.broadcast %220 : vector<64x1xf32> to vector<64x64xf32>
    %222 = arith.subf %218, %221 : vector<64x64xf32>
    %223 = math.exp %222 : vector<64x64xf32>
    %cst_131 = arith.constant dense<0.000000e+00> : vector<64xf32>
    %224 = vector.multi_reduction <add>, %223, %cst_131 [1] : vector<64x64xf32> to vector<64xf32>
    %225 = vector.shape_cast %224 : vector<64xf32> to vector<64x1xf32>
    %226 = tpu.reciprocal %225 {approx = true} : vector<64x1xf32> -> vector<64x1xf32>
    %227 = vector.broadcast %226 : vector<64x1xf32> to vector<64x64xf32>
    %228 = arith.mulf %223, %227 : vector<64x64xf32>
    %229 = arith.truncf %228 : vector<64x64xf32> to vector<64x64xbf16>
    %cst_132 = arith.constant dense<0.000000e+00> : vector<64x32xf32>
    %230 = tpu.matmul %229, %215, %cst_132 {dimension_numbers = #tpu.dot_dimension_numbers<[1], [0], [0], [1], [0, 0, 1, 1], [], []>} : vector<64x64xbf16>, vector<64x32xbf16>, vector<64x32xf32> -> vector<64x32xf32>
    %231 = arith.truncf %230 : vector<64x32xf32> to vector<64x32xbf16>
    %c0_133 = arith.constant 0 : index
    %c96_134 = arith.constant 96 : index
    %c0_135 = arith.constant 0 : index
    %232 = vector.load %arg6[%c0_133, %c96_134, %c0_135] : memref<1x128x128xbf16, #tpu.memory_space<vmem>>, vector<1x32x128xbf16>
    %233 = vector.shape_cast %232 : vector<1x32x128xbf16> to vector<32x128xbf16>
    %cst_136 = arith.constant dense<0.000000e+00> : vector<64x128xf32>
    %234 = tpu.matmul %231, %233, %cst_136 {dimension_numbers = #tpu.dot_dimension_numbers<[1], [0], [0], [1], [0, 0, 1, 1], [], []>} : vector<64x32xbf16>, vector<32x128xbf16>, vector<64x128xf32> -> vector<64x128xf32>
    %235 = arith.addf %212, %234 : vector<64x128xf32>
    %236 = vector.extract_strided_slice %3 {offsets = [64, 0], sizes = [64, 128], strides = [1, 1]} : vector<128x128xf32> to vector<64x128xf32>
    %237 = arith.addf %236, %235 : vector<64x128xf32>
    %c0_137 = arith.constant 0 : index
    %c0_138 = arith.constant 0 : index
    %c0_139 = arith.constant 0 : index
    %238 = vector.load %arg7[%c0_137, %c0_138, %c0_139] : memref<1x1x128xf32, #tpu.memory_space<vmem>>, vector<1x1x128xf32>
    %239 = vector.shape_cast %238 : vector<1x1x128xf32> to vector<1x128xf32>
    %240 = vector.broadcast %239 : vector<1x128xf32> to vector<64x128xf32>
    %241 = arith.addf %237, %240 : vector<64x128xf32>
    %c64_140 = arith.constant 64 : index
    %c0_141 = arith.constant 0 : index
    %242 = vector.load %arg15[%c64_140, %c0_141] : memref<128x128xf32, #tpu.memory_space<vmem>>, vector<64x128xf32>
    tpu.vector_store %arg15[%c64_140, %c0_141], %241 {strides = array<i32>} : memref<128x128xf32, #tpu.memory_space<vmem>>, vector<64x128xf32>,
    %c0_142 = arith.constant 0 : index
    %c0_143 = arith.constant 0 : index
    %243 = vector.load %arg15[%c0_142, %c0_143] : memref<128x128xf32, #tpu.memory_space<vmem>>, vector<128x128xf32>
    %c0_144 = arith.constant 0 : index
    %c0_145 = arith.constant 0 : index
    %c0_146 = arith.constant 0 : index
    %244 = vector.load %arg8[%c0_144, %c0_145, %c0_146] : memref<1x1x128xf32, #tpu.memory_space<vmem>>, vector<1x1x128xf32>
    %245 = vector.shape_cast %244 : vector<1x1x128xf32> to vector<1x128xf32>
    %c0_147 = arith.constant 0 : index
    %c0_148 = arith.constant 0 : index
    %c0_149 = arith.constant 0 : index
    %246 = vector.load %arg9[%c0_147, %c0_148, %c0_149] : memref<1x1x128xf32, #tpu.memory_space<vmem>>, vector<1x1x128xf32>
    %247 = vector.shape_cast %246 : vector<1x1x128xf32> to vector<1x128xf32>
    %cst_150 = arith.constant dense<0.000000e+00> : vector<128xf32>
    %248 = vector.multi_reduction <add>, %243, %cst_150 [1] : vector<128x128xf32> to vector<128xf32>
    %249 = vector.shape_cast %248 : vector<128xf32> to vector<128x1xf32>
    %cst_151 = arith.constant 1.280000e+02 : f32
    %250 = vector.broadcast %cst_151 : f32 to vector<128x1xf32>
    %251 = arith.divf %249, %250 : vector<128x1xf32>
    %252 = vector.broadcast %251 : vector<128x1xf32> to vector<128x128xf32>
    %253 = arith.subf %243, %252 : vector<128x128xf32>
    %254 = arith.mulf %253, %253 : vector<128x128xf32>
    %cst_152 = arith.constant dense<0.000000e+00> : vector<128xf32>
    %255 = vector.multi_reduction <add>, %254, %cst_152 [1] : vector<128x128xf32> to vector<128xf32>
    %256 = vector.shape_cast %255 : vector<128xf32> to vector<128x1xf32>
    %cst_153 = arith.constant 1.280000e+02 : f32
    %257 = vector.broadcast %cst_153 : f32 to vector<128x1xf32>
    %258 = arith.divf %256, %257 : vector<128x1xf32>
    %259 = vector.broadcast %251 : vector<128x1xf32> to vector<128x128xf32>
    %260 = arith.subf %243, %259 : vector<128x128xf32>
    %cst_154 = arith.constant 9.99999974E-6 : f32
    %261 = vector.broadcast %cst_154 : f32 to vector<128x1xf32>
    %262 = arith.addf %258, %261 : vector<128x1xf32>
    %263 = math.rsqrt %262 : vector<128x1xf32>
    %264 = vector.broadcast %263 : vector<128x1xf32> to vector<128x128xf32>
    %265 = arith.mulf %260, %264 : vector<128x128xf32>
    %266 = vector.broadcast %245 : vector<1x128xf32> to vector<128x128xf32>
    %267 = arith.mulf %265, %266 : vector<128x128xf32>
    %268 = vector.broadcast %247 : vector<1x128xf32> to vector<128x128xf32>
    %269 = arith.addf %267, %268 : vector<128x128xf32>
    %270 = arith.truncf %269 : vector<128x128xf32> to vector<128x128xbf16>
    %c0_155 = arith.constant 0 : index
    %c0_156 = arith.constant 0 : index
    %c0_157 = arith.constant 0 : index
    %271 = vector.load %arg10[%c0_155, %c0_156, %c0_157] : memref<1x128x512xbf16, #tpu.memory_space<vmem>>, vector<1x128x512xbf16>
    %272 = vector.shape_cast %271 : vector<1x128x512xbf16> to vector<128x512xbf16>
    %cst_158 = arith.constant dense<0.000000e+00> : vector<128x512xf32>
    %273 = tpu.matmul %270, %272, %cst_158 {dimension_numbers = #tpu.dot_dimension_numbers<[1], [0], [0], [1], [0, 0, 1, 1], [], []>} : vector<128x128xbf16>, vector<128x512xbf16>, vector<128x512xf32> -> vector<128x512xf32>
    %c0_159 = arith.constant 0 : index
    %c0_160 = arith.constant 0 : index
    %c0_161 = arith.constant 0 : index
    %274 = vector.load %arg11[%c0_159, %c0_160, %c0_161] : memref<1x1x512xf32, #tpu.memory_space<vmem>>, vector<1x1x512xf32>
    %275 = vector.shape_cast %274 : vector<1x1x512xf32> to vector<1x512xf32>
    %276 = vector.broadcast %275 : vector<1x512xf32> to vector<128x512xf32>
    %277 = arith.addf %273, %276 : vector<128x512xf32>
    %cst_162 = arith.constant 5.000000e-01 : f32
    %278 = vector.broadcast %cst_162 : f32 to vector<128x512xf32>
    %279 = arith.mulf %278, %277 : vector<128x512xf32>
    %cst_163 = arith.constant 4.471500e-02 : f32
    %280 = vector.broadcast %cst_163 : f32 to vector<128x512xf32>
    %281 = arith.mulf %280, %277 : vector<128x512xf32>
    %282 = arith.mulf %281, %277 : vector<128x512xf32>
    %283 = arith.mulf %282, %277 : vector<128x512xf32>
    %284 = arith.addf %277, %283 : vector<128x512xf32>
    %cst_164 = arith.constant 0.797884583 : f32
    %285 = vector.broadcast %cst_164 : f32 to vector<128x512xf32>
    %286 = arith.mulf %285, %284 : vector<128x512xf32>
    %287 = math.tanh %286 : vector<128x512xf32>
    %cst_165 = arith.constant 1.000000e+00 : f32
    %288 = vector.broadcast %cst_165 : f32 to vector<128x512xf32>
    %289 = arith.addf %288, %287 : vector<128x512xf32>
    %290 = arith.mulf %279, %289 : vector<128x512xf32>
    %291 = arith.truncf %290 : vector<128x512xf32> to vector<128x512xbf16>
    %c0_166 = arith.constant 0 : index
    %c0_167 = arith.constant 0 : index
    %c0_168 = arith.constant 0 : index
    %292 = vector.load %arg12[%c0_166, %c0_167, %c0_168] : memref<1x512x128xbf16, #tpu.memory_space<vmem>>, vector<1x512x128xbf16>
    %293 = vector.shape_cast %292 : vector<1x512x128xbf16> to vector<512x128xbf16>
    %cst_169 = arith.constant dense<0.000000e+00> : vector<128x128xf32>
    %294 = tpu.matmul %291, %293, %cst_169 {dimension_numbers = #tpu.dot_dimension_numbers<[1], [0], [0], [1], [0, 0, 1, 1], [], []>} : vector<128x512xbf16>, vector<512x128xbf16>, vector<128x128xf32> -> vector<128x128xf32>
    %c0_170 = arith.constant 0 : index
    %c0_171 = arith.constant 0 : index
    %c0_172 = arith.constant 0 : index
    %295 = vector.load %arg13[%c0_170, %c0_171, %c0_172] : memref<1x1x128xf32, #tpu.memory_space<vmem>>, vector<1x1x128xf32>
    %296 = vector.shape_cast %295 : vector<1x1x128xf32> to vector<1x128xf32>
    %297 = vector.broadcast %296 : vector<1x128xf32> to vector<128x128xf32>
    %298 = arith.addf %294, %297 : vector<128x128xf32>
    %299 = arith.addf %243, %298 : vector<128x128xf32>
    %c0_173 = arith.constant 0 : index
    %c0_174 = arith.constant 0 : index
    %300 = vector.load %arg15[%c0_173, %c0_174] : memref<128x128xf32, #tpu.memory_space<vmem>>, vector<128x128xf32>
    tpu.vector_store %arg15[%c0_173, %c0_174], %299 {strides = array<i32>} : memref<128x128xf32, #tpu.memory_space<vmem>>, vector<128x128xf32>,
    %c1_i32 = arith.constant 1 : i32
    %301 = arith.cmpi eq, %arg0, %c1_i32 : i32
    %302 = arith.extui %301 : i1 to i32
    %c0_i32_175 = arith.constant 0 : i32
    %303 = arith.cmpi ne, %302, %c0_i32_175 : i32
    scf.if %303 {
      %c0_176 = arith.constant 0 : index
      %c0_177 = arith.constant 0 : index
      %304 = vector.load %arg14[%c0_176, %c0_177] : memref<128x128xf32, #tpu.memory_space<vmem>>, vector<128x128xf32>
      tpu.vector_store %arg14[%c0_176, %c0_177], %299 {strides = array<i32>} : memref<128x128xf32, #tpu.memory_space<vmem>>, vector<128x128xf32>,
    } else {
    }
    return
  }
  func.func @transform_0(%arg0: i32) -> (i32, i32) {
    %c0_i32 = arith.constant 0 : i32
    %c0_i32_0 = arith.constant 0 : i32
    %c0_i32_1 = arith.constant 0 : i32
    return %c0_i32, %c0_i32_0 : i32, i32
  }
  func.func @transform_1(%arg0: i32) -> (i32, i32, i32) {
    %c0_i32 = arith.constant 0 : i32
    %c0_i32_0 = arith.constant 0 : i32
    %c0_i32_1 = arith.constant 0 : i32
    return %arg0, %c0_i32, %c0_i32_0 : i32, i32, i32
  }
  func.func @transform_2(%arg0: i32) -> (i32, i32, i32) {
    %c0_i32 = arith.constant 0 : i32
    %c0_i32_0 = arith.constant 0 : i32
    %c0_i32_1 = arith.constant 0 : i32
    return %arg0, %c0_i32, %c0_i32_0 : i32, i32, i32
  }
  func.func @transform_3(%arg0: i32) -> (i32, i32, i32) {
    %c0_i32 = arith.constant 0 : i32
    %c0_i32_0 = arith.constant 0 : i32
    %c0_i32_1 = arith.constant 0 : i32
    return %arg0, %c0_i32, %c0_i32_0 : i32, i32, i32
  }
  func.func @transform_4(%arg0: i32) -> (i32, i32, i32) {
    %c0_i32 = arith.constant 0 : i32
    %c0_i32_0 = arith.constant 0 : i32
    %c0_i32_1 = arith.constant 0 : i32
    return %arg0, %c0_i32, %c0_i32_0 : i32, i32, i32
  }
  func.func @transform_5(%arg0: i32) -> (i32, i32, i32) {
    %c0_i32 = arith.constant 0 : i32
    %c0_i32_0 = arith.constant 0 : i32
    %c0_i32_1 = arith.constant 0 : i32
    return %arg0, %c0_i32, %c0_i32_0 : i32, i32, i32
  }
  func.func @transform_6(%arg0: i32) -> (i32, i32, i32) {
    %c0_i32 = arith.constant 0 : i32
    %c0_i32_0 = arith.constant 0 : i32
    %c0_i32_1 = arith.constant 0 : i32
    return %arg0, %c0_i32, %c0_i32_0 : i32, i32, i32
  }
  func.func @transform_7(%arg0: i32) -> (i32, i32, i32) {
    %c0_i32 = arith.constant 0 : i32
    %c0_i32_0 = arith.constant 0 : i32
    %c0_i32_1 = arith.constant 0 : i32
    return %arg0, %c0_i32, %c0_i32_0 : i32, i32, i32
  }
  func.func @transform_8(%arg0: i32) -> (i32, i32, i32) {
    %c0_i32 = arith.constant 0 : i32
    %c0_i32_0 = arith.constant 0 : i32
    %c0_i32_1 = arith.constant 0 : i32
    return %arg0, %c0_i32, %c0_i32_0 : i32, i32, i32
  }
  func.func @transform_9(%arg0: i32) -> (i32, i32, i32) {
    %c0_i32 = arith.constant 0 : i32
    %c0_i32_0 = arith.constant 0 : i32
    %c0_i32_1 = arith.constant 0 : i32
    return %arg0, %c0_i32, %c0_i32_0 : i32, i32, i32
  }
  func.func @transform_10(%arg0: i32) -> (i32, i32, i32) {
    %c0_i32 = arith.constant 0 : i32
    %c0_i32_0 = arith.constant 0 : i32
    %c0_i32_1 = arith.constant 0 : i32
    return %arg0, %c0_i32, %c0_i32_0 : i32, i32, i32
  }
  func.func @transform_11(%arg0: i32) -> (i32, i32, i32) {
    %c0_i32 = arith.constant 0 : i32
    %c0_i32_0 = arith.constant 0 : i32
    %c0_i32_1 = arith.constant 0 : i32
    return %arg0, %c0_i32, %c0_i32_0 : i32, i32, i32
  }
  func.func @transform_12(%arg0: i32) -> (i32, i32, i32) {
    %c0_i32 = arith.constant 0 : i32
    %c0_i32_0 = arith.constant 0 : i32
    %c0_i32_1 = arith.constant 0 : i32
    return %arg0, %c0_i32, %c0_i32_0 : i32, i32, i32
  }
  func.func @transform_13(%arg0: i32) -> (i32, i32) {
    %c0_i32 = arith.constant 0 : i32
    %c0_i32_0 = arith.constant 0 : i32
    %c0_i32_1 = arith.constant 0 : i32
    return %c0_i32, %c0_i32_0 : i32, i32
  }
}

</mosaic_0001>

<bundles_post_ra>
// kernel: tpu_custom_call.1
= control target key start
LH: loop header
LB: loop body
LE: loop exit
PB: predicated region body
PF: predicated region fallthrough
CT: control target
= control target key end

     0   :  { %s12266_s0 = inlined_call_operand.hbm [shape: f32[128,128], index: 0, kind: input, shape index: {}]   ;;  %s12267_s1 = inlined_call_operand.hbm [shape: f32[2,1,128], index: 1, kind: input, shape index: {}]   ;;  %s12268_s2 = inlined_call_operand.hbm [shape: f32[2,1,128], index: 2, kind: input, shape index: {}]   ;;  %s12269_s3 = inlined_call_operand.hbm [shape: bf16[2,128,384], index: 3, kind: input, shape index: {}]   ;;  %s12270_s4 = inlined_call_operand.vmem [shape: f32[2,1,384], index: 4, kind: input, shape index: {}]   ;;  %s12271_s5 = inlined_call_operand.hbm [shape: bf16[2,128,128], index: 5, kind: input, shape index: {}]   ;;  %s12272_s6 = inlined_call_operand.vmem [shape: f32[2,1,128], index: 6, kind: input, shape index: {}]   ;;  %s12273_s7 = inlined_call_operand.hbm [shape: f32[2,1,128], index: 7, kind: input, shape index: {}]   ;;  %s12274_s8 = inlined_call_operand.hbm [shape: f32[2,1,128], index: 8, kind: input, shape index: {}]   ;;  %s12275_s9 = inlined_call_operand.hbm [shape: bf16[2,128,512], index: 9, kind: input, shape index: {}]   ;;  %s12276_s10 = inlined_call_operand.vmem [shape: f32[2,1,512], index: 10, kind: input, shape index: {}]   ;;  %s12277_s11 = inlined_call_operand.hbm [shape: bf16[2,512,128], index: 11, kind: input, shape index: {}]   ;;  %s12278_s12 = inlined_call_operand.vmem [shape: f32[2,1,128], index: 12, kind: input, shape index: {}]   ;;  %s12279_s13 = inlined_call_operand.hbm [shape: f32[128,128], index: 13, kind: output, shape index: {}]  }
   0x1   :  { %12321 = sst [smem:[#allocation45_spill]] %s12266_s0 }
   0x2   :  { %12322 = sst [smem:[#allocation46_spill]] %s12267_s1 }
   0x3   :  { %12323 = sst [smem:[#allocation47_spill]] %s12269_s3 }
   0x4   :  { %12324 = sst [smem:[#allocation48_spill]] %s12270_s4 }
   0x5   :  { %12325 = sst [smem:[#allocation49_spill]] %s12272_s6 }
   0x6   :  { %12326 = sst [smem:[#allocation50_spill]] %s12273_s7 }
   0x7   :  { %12327 = sst [smem:[#allocation51_spill]] %s12275_s9 }
   0x8   :  { %12328 = sst [smem:[#allocation52_spill]] %s12276_s10 }
   0x9   :  { %12329 = sst [smem:[#allocation53_spill]] %s12278_s12 }
   0xa   :  { %12330 = sst [smem:[#allocation54_spill]] %s12279_s13 }
   0xb   :  { %18 = vsyncpa [#allocation5], 0 }
   0xc   :  { %19 = vsyncpa [#allocation8], 0 }
   0xd   :  { %21 = vsyncpa [#allocation8 + $0x1], 0 }
   0xe   :  { %22 = vsyncpa [#allocation11], 0 }
   0xf   :  { %24 = vsyncpa [#allocation11 + $0x1], 0 }
  0x10   :  { %25 = vsyncpa [#allocation14], 0 }
  0x11   :  { %27 = vsyncpa [#allocation14 + $0x1], 0 }
  0x12   :  { %28 = vsyncpa [#allocation17], 0 }
  0x13   :  { %30 = vsyncpa [#allocation17 + $0x1], 0 }
  0x14   :  { %31 = vsyncpa [#allocation6], 0  ;;  %s9283_s25 = smov 0   ;;  %s9285_s26 = smov 0  }
  0x15   :  { %s9287_s27 = smov 0   ;;  %s9289_s28 = smov 0  }
  0x16 LB: > { %12331 = sst [smem:[#allocation26_spill]] %s9183_s27  ;;  %s9304_s29 = sadd.s32 1, %s9187_s28   ;;  %s9187_s28 = sphi %s9289_s28, %s12436_s28   ;;  %s9183_s27 = sphi %s9287_s27, %s12438_s27   ;;  %s9179_s26 = sphi %s9285_s26, %s12440_s26   ;;  %s9175_s25 = sphi %s9283_s25, %s12439_s25  }
  0x17   : > { %12332 = sst [smem:[#allocation27_spill]] %s9304_s29  ;;  %s65_s30 = sadd.s32 1, %s9183_s27 }
  0x18   : > { %s62_s14 = ssub.s32 %s9187_s28, %s9304_s29  ;;  %p72_p0 = scmp.ne.s32.totalorder %s9183_s27, %s9179_s26 }
  0x19   : > { %p63_p1 = scmp.eq.s32.totalorder %s62_s14, 0  ;;  %p73_p2 = scmp.eq.s32.totalorder %s9187_s28, 0 }
  0x1a   : > { %p8169_p3 = scmp.lt.s32.totalorder %s9187_s28, 2  ;;  %s9317_s16 = sand.u32 1, %s9187_s28  }
  0x1b   : > { %s9314_s15 = scalar_select %p63_p1, %s9183_s27, %s65_s30  }
  0x1c   : > { %p74_p4 = por %p73_p2, %p72_p0  ;;  %s9320_s17 = sand.u32 1, %s9183_s27  }
  0x1d   : > { %12333 = sst [smem:[#allocation28_spill]] %s9314_s15  ;;  %s9323_s18 = sshll.u32 %s9187_s28, 4 }
  0x1e   : > { %s12334_s1 = sld [smem:[#allocation46_spill]]  ;;  %s425_s22 = scalar_lea.vmem [#allocation7], %s9320_s17 }
  0x1f   : > { %s432_s23 = sshll.u32 %s425_s22, 4  ;;  %p9334_p5 = pnand %p8169_p3, %p74_p4  ;;  %s9332_s23 = int_to_ptr.vmem [resolvable:$true] %s432_s23 }
  0x20   : > { %s8112_s14 = smul.u32 3072, %s9187_s28 }
  0x21   : > { %p9345_p7 = pneg %p9334_p5 }
  0x24   : > { %s9329_s21 = scalar_lea.hbm %s12334_s1, %s9323_s18  ;;  %s8864_s29 = scalar_lea.hbm %s12334_s1, 32 }
  0x25   : > { %s8859_s27 = scalar_lea.hbm %s9329_s21, 16  ;;  %p8865_p10 = scmp.lt.s32.totalorder %s9329_s21, %s12334_s1 }
  0x26   : > { %p8860_p6 = scmp.ne.s32.totalorder %s9329_s21, %s8859_s27  ;;  %p8866_p11 = scmp.lt.s32.totalorder %s8864_s29, %s8859_s27 }
  0x28   : > { %p8862_p8 = pnand %p9345_p7, %p8860_p6  ;;  %p8867_p12 = por %p8866_p11, %p8865_p10 }
  0x2a   : > { %p8863_p9 = pneg %p8862_p8 }
  0x2c   : > { %p8868_p13 = pnand %p8867_p12, %p8863_p9 }
  0x2e   : > { %8871 = shalt.err (!%p8868_p13)
}
  0x2f   : > { %s8872_s30 = scalar_lea.vmem %s9332_s23, 16  ;;  %s9189_s15 = smov [#allocation7]  }
  0x30   : > { %p8873_p0 = scmp.ne.s32.totalorder %s9332_s23, %s8872_s30  ;;  %s8877_s20 = sshll.u32 %s9189_s15, 4  ;;  %s8878_s20 = int_to_ptr.vmem [resolvable:$false] %s8877_s20 }
  0x31   : > { %s8879_s22 = scalar_lea.vmem %s8878_s20, 32  ;;  %p8880_p3 = scmp.lt.s32.totalorder %s9332_s23, %s8878_s20 }
  0x32   : > { %p8875_p1 = pnand %p8873_p0, %p9345_p7  ;;  %p8881_p4 = scmp.lt.s32.totalorder %s8879_s22, %s8872_s30 }
  0x34   : > { %p8876_p2 = pneg %p8875_p1  ;;  %p8882_p6 = por %p8881_p4, %p8880_p3 }
  0x36   : > { %p8883_p8 = pnand %p8882_p6, %p8876_p2 }
  0x38   : > { %8886 = shalt.err (!%p8883_p8)
}
  0x39   : > { %s12337_s10 = scalar_lea.sflag [#allocation8], %s9317_s16  ;;  %s12338_s3 = sld [smem:[#allocation47_spill]] }
  0x3a   : > { %8146 = dma.hbm_to_vmem [thread:$0]  (!%p9334_p5), %s9329_s21, 16, %s9332_s23, %s12337_s10  }
  0x3b   : > { %s12339_s15 = smul.u32 192, %s9320_s17  ;;  %s12286_s22 = scalar_lea.sflag [#allocation11], %s9317_s16 }
  0x3d   : > { %s460_s30 = scalar_lea.vmem [#allocation10], %s12339_s15 }
  0x3e   : > { %s467_s20 = sshll.u32 %s460_s30, 4  ;;  %s9376_s20 = int_to_ptr.vmem [resolvable:$true] %s467_s20 }
  0x3f   : > { %s9372_s29 = scalar_lea.hbm %s12338_s3, %s8112_s14  ;;  %s8892_s10 = scalar_lea.hbm %s12338_s3, 6144 }
  0x40   : > { %s8887_s1 = scalar_lea.hbm %s9372_s29, 3072  ;;  %p8893_p12 = scmp.lt.s32.totalorder %s9372_s29, %s12338_s3 }
  0x41   : > { %p8888_p9 = scmp.ne.s32.totalorder %s9372_s29, %s8887_s1  ;;  %p8894_p13 = scmp.lt.s32.totalorder %s8892_s10, %s8887_s1 }
  0x43   : > { %p8890_p10 = pnand %p8888_p9, %p9345_p7  ;;  %p8895_p0 = por %p8894_p13, %p8893_p12 }
  0x45   : > { %p8891_p11 = pneg %p8890_p10 }
  0x47   : > { %p8896_p1 = pnand %p8895_p0, %p8891_p11 }
  0x49   : > { %8899 = shalt.err (!%p8896_p1)
}
  0x4a   : > { %s8900_s27 = scalar_lea.vmem %s9376_s20, 3072  ;;  %s9190_s15 = smov [#allocation10]  }
  0x4b   : > { %p8901_p2 = scmp.ne.s32.totalorder %s9376_s20, %s8900_s27  ;;  %s8905_s30 = sshll.u32 %s9190_s15, 4  ;;  %s8906_s30 = int_to_ptr.vmem [resolvable:$false] %s8905_s30 }
  0x4c   : > { %s8907_s21 = scalar_lea.vmem %s8906_s30, 6144  ;;  %p8908_p6 = scmp.lt.s32.totalorder %s9376_s20, %s8906_s30 }
  0x4d   : > { %p8903_p3 = pnand %p8901_p2, %p9345_p7  ;;  %p8909_p8 = scmp.lt.s32.totalorder %s8907_s21, %s8900_s27 }
  0x4f   : > { %p8904_p4 = pneg %p8903_p3  ;;  %p8910_p9 = por %p8909_p8, %p8908_p6 }
  0x51   : > { %p8911_p10 = pnand %p8910_p9, %p8904_p4 }
  0x53   : > { %8914 = shalt.err (!%p8911_p10)
}
  0x54   : > { %s9191_s1 = smov 192   ;;  %s9192_s23 = smov 12  }
  0x55   : > { %8152 = dma.hbm_to_vmem [thread:$0]  (!%p9334_p5), %s9372_s29, 3072, %s9376_s20, %s12286_s22, %s9191_s1, %s9191_s1, %s9192_s23  }
  0x56   : > { %s12340_s7 = sld [smem:[#allocation50_spill]]  ;;  %s514_s27 = scalar_lea.vmem [#allocation13], %s9320_s17 }
  0x57   : > { %s521_s15 = sshll.u32 %s514_s27, 4  ;;  %s12283_s30 = scalar_lea.sflag [#allocation14], %s9317_s16  ;;  %s522_s15 = int_to_ptr.vmem [resolvable:$true] %s521_s15 }
  0x5c   : > { %s9405_s13 = scalar_lea.hbm %s12340_s7, %s9323_s18  ;;  %s8920_s29 = scalar_lea.hbm %s12340_s7, 32 }
  0x5d   : > { %s8915_s21 = scalar_lea.hbm %s9405_s13, 16  ;;  %p8921_p0 = scmp.lt.s32.totalorder %s9405_s13, %s12340_s7 }
  0x5e   : > { %p8916_p11 = scmp.ne.s32.totalorder %s9405_s13, %s8915_s21  ;;  %p8922_p1 = scmp.lt.s32.totalorder %s8920_s29, %s8915_s21 }
  0x60   : > { %p8918_p12 = pnand %p8916_p11, %p9345_p7  ;;  %p8923_p2 = por %p8922_p1, %p8921_p0 }
  0x62   : > { %p8919_p13 = pneg %p8918_p12 }
  0x64   : > { %p8924_p3 = pnand %p8923_p2, %p8919_p13 }
  0x66   : > { %8927 = shalt.err (!%p8924_p3)
}
  0x67   : > { %s8928_s23 = scalar_lea.vmem %s522_s15, 16  ;;  %s9193_s10 = smov [#allocation13]  }
  0x68   : > { %p8929_p4 = scmp.ne.s32.totalorder %s522_s15, %s8928_s23  ;;  %s8933_s14 = sshll.u32 %s9193_s10, 4  ;;  %s8934_s14 = int_to_ptr.vmem [resolvable:$false] %s8933_s14 }
  0x69   : > { %s8935_s27 = scalar_lea.vmem %s8934_s14, 32  ;;  %p8936_p9 = scmp.lt.s32.totalorder %s522_s15, %s8934_s14 }
  0x6a   : > { %p8931_p6 = pnand %p8929_p4, %p9345_p7  ;;  %p8937_p10 = scmp.lt.s32.totalorder %s8935_s27, %s8928_s23 }
  0x6c   : > { %p8932_p8 = pneg %p8931_p6  ;;  %p8938_p11 = por %p8937_p10, %p8936_p9 }
  0x6e   : > { %p8939_p12 = pnand %p8938_p11, %p8932_p8 }
  0x70   : > { %8942 = shalt.err (!%p8939_p12)
}
  0x71   : > { %8158 = dma.hbm_to_vmem [thread:$0]  (!%p9334_p5), %s9405_s13, 16, %s522_s15, %s12283_s30  }
  0x72   : > { %s7059_s3 = sshll.u32 %s9320_s17, 8  ;;  %s7341_s4 = sshll.u32 %s9187_s28, 12 }
  0x73   : > { %s12341_s9 = sld [smem:[#allocation51_spill]]  ;;  %s549_s1 = scalar_lea.vmem [#allocation16], %s7059_s3 }
  0x74   : > { %s556_s23 = sshll.u32 %s549_s1, 4  ;;  %s12284_s10 = scalar_lea.sflag [#allocation17], %s9317_s16  ;;  %s9438_s23 = int_to_ptr.vmem [resolvable:$true] %s556_s23 }
  0x79   : > { %s9434_s20 = scalar_lea.hbm %s12341_s9, %s7341_s4  ;;  %s8948_s27 = scalar_lea.hbm %s12341_s9, 8192 }
  0x7a   : > { %s8943_s14 = scalar_lea.hbm %s9434_s20, 4096  ;;  %p8949_p2 = scmp.lt.s32.totalorder %s9434_s20, %s12341_s9 }
  0x7b   : > { %p8944_p13 = scmp.ne.s32.totalorder %s9434_s20, %s8943_s14  ;;  %p8950_p3 = scmp.lt.s32.totalorder %s8948_s27, %s8943_s14 }
  0x7d   : > { %p8946_p0 = pnand %p8944_p13, %p9345_p7  ;;  %p8951_p4 = por %p8950_p3, %p8949_p2 }
  0x7f   : > { %p8947_p1 = pneg %p8946_p0 }
  0x81   : > { %p8952_p6 = pnand %p8951_p4, %p8947_p1 }
  0x83   : > { %8955 = shalt.err (!%p8952_p6)
}
  0x84   : > { %s8956_s1 = scalar_lea.vmem %s9438_s23, 4096  ;;  %s9194_s30 = smov [#allocation16]  }
  0x85   : > { %p8957_p8 = scmp.ne.s32.totalorder %s9438_s23, %s8956_s1  ;;  %s8961_s13 = sshll.u32 %s9194_s30, 4  ;;  %s8962_s13 = int_to_ptr.vmem [resolvable:$false] %s8961_s13 }
  0x86   : > { %s8963_s15 = scalar_lea.vmem %s8962_s13, 8192  ;;  %p8964_p11 = scmp.lt.s32.totalorder %s9438_s23, %s8962_s13 }
  0x87   : > { %p8959_p9 = pnand %p8957_p8, %p9345_p7  ;;  %p8965_p12 = scmp.lt.s32.totalorder %s8963_s15, %s8956_s1 }
  0x89   : > { %p8960_p10 = pneg %p8959_p9  ;;  %p8966_p13 = por %p8965_p12, %p8964_p11 }
  0x8b   : > { %p8967_p0 = pnand %p8966_p13, %p8960_p10 }
  0x8d   : > { %8970 = shalt.err (!%p8967_p0)
}
  0x8e   : > { %s9195_s14 = smov 256   ;;  %s9196_s30 = smov 16  }
  0x8f   : > { %8164 = dma.hbm_to_vmem [thread:$0]  (!%p9334_p5), %s9434_s20, 4096, %s9438_s23, %s12284_s10, %s9195_s14, %s9195_s14, %s9196_s30  }
  0x90   : > { %s9468_s29 = scalar_lea.hbm %s12277_s11, %s7341_s4  ;;  %s9472_s1 = scalar_lea.vmem [#allocation18], %s7059_s3 }
  0x91   : > { %s9476_s15 = sadd.s32 4294967295, %s9187_s28   ;;  %p78_p1 = scmp.ne.s32.totalorder %s9179_s26, %s9175_s25 }
  0x92   : > { %p12287_p2 = scmp.eq.s32.totalorder %s9476_s15, 0  ;;  %p7048_p3 = scmp.ge.s32.totalorder %s9187_s28, 1 }
  0x93   : > { %p396_p4 = scmp.lt.s32.totalorder %s9187_s28, 3  ;;  %s9197_s20 = smov [#allocation4]  }
  0x94   : > { %p9486_p8 = por %p12287_p2, %p78_p1  ;;  %s408_s23 = sshll.u32 %s9197_s20, 4  ;;  %s409_s23 = int_to_ptr.vmem [resolvable:$true] %s408_s23 }
  0x95   : > { %p9490_p9 = pnand %p7048_p3, %p396_p4  ;;  %s9500_s30 = scalar_lea.hbm %s12268_s2, %s9323_s18 }
  0x96   : > { %s12342_s4 = scalar_select %p9486_p8, 1, 0 }
  0x97   : > { %s12343_s3 = scalar_select %p9490_p9, 1, 0 }
  0x98   : > { %p8139_p10 = pneg %p9490_p9  ;;  %s442_s21 = scalar_lea.vmem [#allocation9], %s9320_s17 }
  0x99   : > { %s449_s10 = sshll.u32 %s442_s21, 4  ;;  %s8982_s20 = scalar_lea.vmem %s409_s23, 2048  ;;  %s9509_s10 = int_to_ptr.vmem [resolvable:$true] %s449_s10 }
  0x9a   : > { %p9504_p11 = pnand %p8139_p10, %p12287_p2  ;;  %p8983_p13 = scmp.ne.s32.totalorder %s409_s23, %s8982_s20 }
  0x9b   : > { %p8990_p3 = scmp.lt.s32.totalorder %s409_s23, %s409_s23  ;;  %p8991_p4 = scmp.lt.s32.totalorder %s8982_s20, %s8982_s20 }
  0x9c   : > { %p8973_p12 = pneg %p9504_p11 }
  0x9d   : > { %p8992_p6 = por %p8991_p4, %p8990_p3 }
  0x9e   : > { %p8985_p0 = pnand %p8983_p13, %p8973_p12 }
  0xa0   : > { %p8986_p1 = pneg %p8985_p0 }
  0xa2   : > { %p8993_p8 = pnand %p8992_p6, %p8986_p1 }
  0xa4   : > { %8996 = shalt.err (!%p8993_p8)
}
  0xa5   : > { %s9198_s25 = smov 128   ;;  %s9199_s14 = smov 8  }
  0xa6   : > { %s12345_s0 = sld [smem:[#allocation45_spill]]  ;;  %s8997_s13 = scalar_lea.hbm %s9500_s30, 16 }
  0xa7   : > { %p8998_p10 = scmp.ne.s32.totalorder %s9500_s30, %s8997_s13  ;;  %s9002_s9 = scalar_lea.hbm %s12268_s2, 32 }
  0xa8   : > { %p9003_p6 = scmp.lt.s32.totalorder %s9500_s30, %s12268_s2  ;;  %p9004_p8 = scmp.lt.s32.totalorder %s9002_s9, %s8997_s13 }
  0xa9   : > { %p9000_p12 = pnand %p8998_p10, %p9345_p7 }
  0xaa   : > { %p9005_p0 = por %p9004_p8, %p9003_p6 }
  0xab   : > { %p9001_p13 = pneg %p9000_p12 }
  0xac   : > { %8142 = dma.hbm_to_vmem [thread:$0]  (!%p9504_p11), %s12345_s0, 2048, %s409_s23, [#allocation5], %s9198_s25, %s9198_s25, %s9199_s14  }
  0xad   : > { %p9006_p1 = pnand %p9005_p0, %p9001_p13 }
  0xaf   : > { %9009 = shalt.err (!%p9006_p1)
}
  0xb0   : > { %s9010_s22 = scalar_lea.vmem %s9509_s10, 16  ;;  %s9200_s23 = smov [#allocation9]  }
  0xb1   : > { %p9011_p11 = scmp.ne.s32.totalorder %s9509_s10, %s9010_s22  ;;  %s9015_s7 = sshll.u32 %s9200_s23, 4  ;;  %s9016_s7 = int_to_ptr.vmem [resolvable:$false] %s9015_s7 }
  0xb2   : > { %s9017_s27 = scalar_lea.vmem %s9016_s7, 32  ;;  %p9018_p10 = scmp.lt.s32.totalorder %s9509_s10, %s9016_s7 }
  0xb3   : > { %p9013_p3 = pnand %p9011_p11, %p9345_p7  ;;  %p9019_p12 = scmp.lt.s32.totalorder %s9017_s27, %s9010_s22 }
  0xb5   : > { %p9014_p4 = pneg %p9013_p3  ;;  %p9020_p2 = por %p9019_p12, %p9018_p10 }
  0xb7   : > { %p9021_p9 = pnand %p9020_p2, %p9014_p4 }
  0xb9   : > { %9024 = shalt.err (!%p9021_p9)
}
  0xba   : > { %s12346_s6 = scalar_lea.sflag [#allocation8], %s9317_s16  ;;  %s7340_s9 = sshll.u32 %s9187_s28, 10 }
  0xbb   : > { %8149 = dma.hbm_to_vmem [thread:$0]  (!%p9334_p5), %s9500_s30, 16, %s9509_s10, %s12346_s6  }
  0xbc   : > { %s12347_s12 = sshll.u32 %s9320_s17, 6  ;;  %s9547_s20 = scalar_lea.hbm %s12271_s5, %s7340_s9 }
  0xbd   : > { %s488_s13 = scalar_lea.vmem [#allocation12], %s12347_s12  ;;  %s9025_s22 = scalar_lea.hbm %s9547_s20, 1024 }
  0xbe   : > { %s495_s25 = sshll.u32 %s488_s13, 4  ;;  %p9026_p2 = scmp.ne.s32.totalorder %s9547_s20, %s9025_s22  ;;  %s9549_s25 = int_to_ptr.vmem [resolvable:$true] %s495_s25 }
  0xbf   : > { %s9030_s30 = scalar_lea.hbm %s12271_s5, 2048  ;;  %p9031_p6 = scmp.lt.s32.totalorder %s9547_s20, %s12271_s5 }
  0xc0   : > { %p9028_p9 = pnand %p9026_p2, %p9345_p7  ;;  %p9032_p8 = scmp.lt.s32.totalorder %s9030_s30, %s9025_s22 }
  0xc2   : > { %p9029_p13 = pneg %p9028_p9  ;;  %p9033_p0 = por %p9032_p8, %p9031_p6 }
  0xc4   : > { %p9034_p1 = pnand %p9033_p0, %p9029_p13 }
  0xc6   : > { %9037 = shalt.err (!%p9034_p1)
}
  0xc7   : > { %s9038_s27 = scalar_lea.vmem %s9549_s25, 1024  ;;  %s9201_s6 = smov [#allocation12]  }
  0xc8   : > { %p9039_p11 = scmp.ne.s32.totalorder %s9549_s25, %s9038_s27  ;;  %s9043_s9 = sshll.u32 %s9201_s6, 4  ;;  %s9044_s9 = int_to_ptr.vmem [resolvable:$false] %s9043_s9 }
  0xc9   : > { %s9045_s12 = scalar_lea.vmem %s9044_s9, 2048  ;;  %p9046_p10 = scmp.lt.s32.totalorder %s9549_s25, %s9044_s9 }
  0xca   : > { %p9041_p3 = pnand %p9039_p11, %p9345_p7  ;;  %p9047_p12 = scmp.lt.s32.totalorder %s9045_s12, %s9038_s27 }
  0xcc   : > { %p9042_p4 = pneg %p9041_p3  ;;  %p9048_p2 = por %p9047_p12, %p9046_p10 }
  0xce   : > { %p9049_p9 = pnand %p9048_p2, %p9042_p4 }
  0xd0   : > { %9052 = shalt.err (!%p9049_p9)
}
  0xd1   : > { %s9202_s13 = smov 64   ;;  %s9203_s14 = smov 4  }
  0xd2   : > { %s12348_s21 = scalar_lea.sflag [#allocation11], %s9317_s16  ;;  %s9580_s28 = scalar_lea.hbm %s12274_s8, %s9323_s18 }
  0xd3   : > { %8155 = dma.hbm_to_vmem [thread:$0]  (!%p9334_p5), %s9547_s20, 1024, %s9549_s25, %s12348_s21, %s9202_s13, %s9202_s13, %s9203_s14  }
  0xd4   : > { %s12349_s30 = sshll.u32 %s9472_s1, 4  ;;  %s531_s23 = scalar_lea.vmem [#allocation15], %s9320_s17  ;;  %s9584_s30 = int_to_ptr.vmem [resolvable:$true] %s12349_s30 }
  0xd5   : > { %s538_s7 = sshll.u32 %s531_s23, 4  ;;  %s9053_s27 = scalar_lea.hbm %s9580_s28, 16  ;;  %s539_s7 = int_to_ptr.vmem [resolvable:$true] %s538_s7 }
  0xd6   : > { %p9054_p13 = scmp.ne.s32.totalorder %s9580_s28, %s9053_s27  ;;  %s9058_s6 = scalar_lea.hbm %s12274_s8, 32 }
  0xd7   : > { %p9059_p0 = scmp.lt.s32.totalorder %s9580_s28, %s12274_s8  ;;  %p9060_p1 = scmp.lt.s32.totalorder %s9058_s6, %s9053_s27 }
  0xd8   : > { %p9056_p6 = pnand %p9054_p13, %p9345_p7 }
  0xd9   : > { %p9061_p11 = por %p9060_p1, %p9059_p0 }
  0xda   : > { %p9057_p8 = pneg %p9056_p6 }
  0xdc   : > { %p9062_p3 = pnand %p9061_p11, %p9057_p8 }
  0xde   : > { %9065 = shalt.err (!%p9062_p3)
}
  0xdf   : > { %s9066_s17 = scalar_lea.vmem %s539_s7, 16  ;;  %s9204_s1 = smov [#allocation15]  }
  0xe0   : > { %p9067_p4 = scmp.ne.s32.totalorder %s539_s7, %s9066_s17  ;;  %s9071_s12 = sshll.u32 %s9204_s1, 4  ;;  %s9072_s12 = int_to_ptr.vmem [resolvable:$false] %s9071_s12 }
  0xe1   : > { %s9073_s21 = scalar_lea.vmem %s9072_s12, 32  ;;  %p9074_p2 = scmp.lt.s32.totalorder %s539_s7, %s9072_s12 }
  0xe2   : > { %p9069_p10 = pnand %p9067_p4, %p9345_p7  ;;  %p9075_p9 = scmp.lt.s32.totalorder %s9073_s21, %s9066_s17 }
  0xe4   : > { %p9070_p12 = pneg %p9069_p10  ;;  %p9076_p13 = por %p9075_p9, %p9074_p2 }
  0xe6   : > { %p9077_p6 = pnand %p9076_p13, %p9070_p12 }
  0xe8   : > { %9080 = shalt.err (!%p9077_p6)
}
  0xe9   : > { %s12350_s22 = scalar_lea.sflag [#allocation14], %s9317_s16  ;;  %s9081_s10 = scalar_lea.hbm %s9468_s29, 4096 }
  0xea   : > { %8161 = dma.hbm_to_vmem [thread:$0]  (!%p9334_p5), %s9580_s28, 16, %s539_s7, %s12350_s22  }
  0xeb   : > { %p9082_p8 = scmp.ne.s32.totalorder %s9468_s29, %s9081_s10  ;;  %s9086_s25 = scalar_lea.hbm %s12277_s11, 8192 }
  0xec   : > { %p9087_p11 = scmp.lt.s32.totalorder %s9468_s29, %s12277_s11  ;;  %p9088_p3 = scmp.lt.s32.totalorder %s9086_s25, %s9081_s10 }
  0xed   : > { %p9084_p0 = pnand %p9082_p8, %p9345_p7 }
  0xee   : > { %p9089_p4 = por %p9088_p3, %p9087_p11 }
  0xef   : > { %p9085_p1 = pneg %p9084_p0 }
  0xf1   : > { %p9090_p10 = pnand %p9089_p4, %p9085_p1 }
  0xf3   : > { %9093 = shalt.err (!%p9090_p10)
}
  0xf4   : > { %s9094_s28 = scalar_lea.vmem %s9584_s30, 4096  ;;  %s9205_s7 = smov [#allocation18]  }
  0xf5   : > { %p9095_p12 = scmp.ne.s32.totalorder %s9584_s30, %s9094_s28  ;;  %s9099_s18 = sshll.u32 %s9205_s7, 4  ;;  %s9100_s18 = int_to_ptr.vmem [resolvable:$false] %s9099_s18 }
  0xf6   : > { %s9101_s9 = scalar_lea.vmem %s9100_s18, 8192  ;;  %p9102_p13 = scmp.lt.s32.totalorder %s9584_s30, %s9100_s18 }
  0xf7   : > { %p9097_p2 = pnand %p9095_p12, %p9345_p7  ;;  %p9103_p6 = scmp.lt.s32.totalorder %s9101_s9, %s9094_s28 }
  0xf9   : > { %p9098_p9 = pneg %p9097_p2  ;;  %p9104_p8 = por %p9103_p6, %p9102_p13 }
  0xfb   : > { %p9105_p0 = pnand %p9104_p8, %p9098_p9 }
  0xfd   : > { %9108 = shalt.err (!%p9105_p0)
}
  0xfe   : > { %s12351_s17 = scalar_lea.sflag [#allocation17], %s9317_s16  ;;  %p12352_p7 = scmp.ne.s32.totalorder %s12343_s3, 0 }
  0xff   : > { %8167 = dma.hbm_to_vmem [thread:$0]  (!%p9334_p5), %s9468_s29, 4096, %s9584_s30, %s12351_s17, %s9202_s13, %s9202_s13, %s9203_s14  }
 0x100   : > { %602 = sbr.rel (%p12352_p7) target bundleno = 5686 (0x1636), region = 72 }
 0x105   : > { %p12353_p1 = scmp.eq.s32.totalorder %s9476_s15, 0 }
 0x107   : > { %9150 = dma.done.wait (%p12353_p1), [#allocation5], 2048   ;;  %p12354_p11 = pmov %p12353_p1 }
 0x108   : > { %s608_s24 = sand.u32 1, %s9476_s15   ;;  %s9638_s19 = sand.u32 1, %s9179_s26  }
 0x109   : > { %9152 = vsyncadd (%p12354_p11), [#allocation5], 4294965248  ;;  %s609_s16 = scalar_lea.sflag [#allocation8], %s608_s24  ;;  %p12355_p3 = scmp.ne.s32.totalorder %s12342_s4, 0 }
 0x10b   : > { %9154 = dma.done.wait (%p12355_p3), %s609_s16, 32  }
 0x10c   : > { %9156 = vsyncadd (%p12355_p3), %s609_s16, 4294967264  ;;  %s8113_s29 = smul.u32 192, %s9638_s19  ;;  %s625_s13 = scalar_lea.sflag [#allocation11], %s608_s24 }
 0x10e   : > { %s9647_s14 = scalar_lea.vmem [#allocation10], %s8113_s29 }
 0x10f   : > { %9158 = dma.done.wait (%p12355_p3), %s625_s13, 4096  }
 0x110   : > { %9160 = vsyncadd (%p12355_p3), %s625_s13, 4294963200  ;;  %s7067_s30 = sshll.u32 %s9638_s19, 6  ;;  %s643_s21 = scalar_lea.sflag [#allocation14], %s608_s24 }
 0x111   : > { %s9654_s12 = scalar_lea.vmem [#allocation12], %s7067_s30 }
 0x112   : > { %9162 = dma.done.wait (%p12355_p3), %s643_s21, 32  }
 0x113   : > { %9164 = vsyncadd (%p12355_p3), %s643_s21, 4294967264  ;;  %s7068_s10 = sshll.u32 %s9638_s19, 8  ;;  %s659_s27 = scalar_lea.sflag [#allocation17], %s608_s24 }
 0x114   : > { %s9663_s25 = scalar_lea.vmem [#allocation16], %s7068_s10 }
 0x115   : > { %9166 = dma.done.wait (%p12355_p3), %s659_s27, 8192  }
 0x116   : > { %9168 = vsyncadd (%p12355_p3), %s659_s27, 4294959104  ;;  %p754_p5 = scmp.lt.s32.totalorder %s9476_s15, 1  ;;  %s12356_s18 = sld [smem:[#allocation49_spill]] }
 0x117   : > { %s12357_s4 = sld [smem:[#allocation53_spill]]  ;;  %s9695_s0 = scalar_lea.vmem [#allocation18], %s7068_s10 }
 0x118   : > { %s9671_s20 = scalar_select %p754_p5, %s9476_s15, 1 }
 0x119   : > { %s12358_s21 = sld [smem:[#allocation48_spill]]  ;;  %p12360_p4 = scmp.ne.s32.totalorder %s9476_s15, 0 }
 0x11a   : > { %s8114_s6 = smul.u32 3, %s9671_s20  ;;  %s7070_s17 = sshll.u32 %s9671_s20, 2 }
 0x11b   : > { %s12359_s3 = sld [smem:[#allocation52_spill]] }
 0x11c   : > { %s9678_s9 = scalar_lea.vmem %s12356_s18, %s9671_s20 }
 0x11d   : > { %s767_s29 = scalar_lea.vmem %s12357_s4, %s9671_s20  ;;  %772 = sbr.rel (%p12360_p4) target bundleno = 299 (0x12b), region = 112 }
 0x11f   : > { %s9688_s27 = scalar_lea.vmem %s12358_s21, %s8114_s6 }
 0x121   : > { %s9693_s1 = scalar_lea.vmem %s12359_s3, %s7070_s17 }
 0x122   : > { %v773_v0 = vld [vmem:[#allocation4] sm:$0xff]  ;;  %v774_v1 = vld [vmem:[#allocation4 + $0x8] sm:$0xff]  ;;  %v775_v2 = vld [vmem:[#allocation4 + $0x10] sm:$0xff] }
 0x123   : > { %789 = vst [vmem:[#allocation2 + $0x30] sm:$0xff] %v773_v0  ;;  %790 = vst [vmem:[#allocation2] sm:$0xff] %v774_v1  ;;  %v776_v3 = vld [vmem:[#allocation4 + $0x18] sm:$0xff]  ;;  %v777_v4 = vld [vmem:[#allocation4 + $0x20] sm:$0xff] }
 0x124   : > { %791 = vst [vmem:[#allocation2 + $0x58] sm:$0xff] %v775_v2  ;;  %v778_v5 = vld [vmem:[#allocation4 + $0x28] sm:$0xff]  ;;  %792 = vst [vmem:[#allocation2 + $0x18] sm:$0xff] %v776_v3  ;;  %v779_v6 = vld [vmem:[#allocation4 + $0x30] sm:$0xff] }
 0x125   : > { %793 = vst [vmem:[#allocation2 + $0x50] sm:$0xff] %v777_v4  ;;  %794 = vst [vmem:[#allocation2 + $0x68] sm:$0xff] %v778_v5  ;;  %v780_v7 = vld [vmem:[#allocation4 + $0x38] sm:$0xff]  ;;  %v781_v8 = vld [vmem:[#allocation4 + $0x40] sm:$0xff] }
 0x126   : > { %795 = vst [vmem:[#allocation2 + $0x8] sm:$0xff] %v779_v6  ;;  %796 = vst [vmem:[#allocation2 + $0x48] sm:$0xff] %v780_v7  ;;  %v782_v9 = vld [vmem:[#allocation4 + $0x48] sm:$0xff]  ;;  %v783_v10 = vld [vmem:[#allocation4 + $0x50] sm:$0xff] }
 0x127   : > { %797 = vst [vmem:[#allocation2 + $0x40] sm:$0xff] %v781_v8  ;;  %v784_v11 = vld [vmem:[#allocation4 + $0x58] sm:$0xff]  ;;  %798 = vst [vmem:[#allocation2 + $0x20] sm:$0xff] %v782_v9  ;;  %v785_v12 = vld [vmem:[#allocation4 + $0x60] sm:$0xff] }
 0x128   : > { %799 = vst [vmem:[#allocation2 + $0x10] sm:$0xff] %v783_v10  ;;  %800 = vst [vmem:[#allocation2 + $0x38] sm:$0xff] %v784_v11  ;;  %v786_v13 = vld [vmem:[#allocation4 + $0x68] sm:$0xff]  ;;  %v787_v14 = vld [vmem:[#allocation4 + $0x70] sm:$0xff] }
 0x129   : > { %801 = vst [vmem:[#allocation2 + $0x60] sm:$0xff] %v785_v12  ;;  %802 = vst [vmem:[#allocation2 + $0x70] sm:$0xff] %v786_v13  ;;  %v788_v15 = vld [vmem:[#allocation4 + $0x78] sm:$0xff] }
 0x12a   : > { %803 = vst [vmem:[#allocation2 + $0x78] sm:$0xff] %v787_v14  ;;  %804 = vst [vmem:[#allocation2 + $0x28] sm:$0xff] %v788_v15 }
 0x12b PF: > { %v805_v16 = vld [vmem:[#allocation2 + $0x30] sm:$0xff]  ;;  %v807_v17 = vld [vmem:[#allocation2 + $0x58] sm:$0xff]  ;;  %v806_v18 = vld [vmem:[#allocation2] sm:$0xff]  ;;  %s12361_s3 = scalar_lea.vmem [#allocation7], %s9638_s19  ;;  %vm1714_vm0 = vcmask 261120   ;;  %s9207_s22 = smov 96  }
 0x12c   : > { %823 = vadd.xlane.f32.xlu0 %v805_v16  ;;  %827 = vadd.xlane.f32.xlu1 %v807_v17  ;;  %v808_v19 = vld [vmem:[#allocation2 + $0x18] sm:$0xff]  ;;  %v809_v20 = vld [vmem:[#allocation2 + $0x50] sm:$0xff]  ;;  %v810_v21 = vld [vmem:[#allocation2 + $0x68] sm:$0xff]  ;;  %vm1812_vm2 = vcmask 523264   ;;  %s9208_s10 = smov 64   ;;  %s9209_s23 = smov 32  }
 0x12d   : > { %v811_v22 = vld [vmem:[#allocation2 + $0x8] sm:$0xff]  ;;  %v8221_v24 = vld [vmem:[%s9647_s14 + $0xac] ss:$12 sps:$4 sm:$0xff]   ;;  %v8224_v57 = vld [vmem:[%s9647_s14 + $0x94] ss:$12 sps:$4 sm:$0xff]   ;;  %p7335_p10 = scmp.ne.s32.totalorder %s9476_s15, 1 }
 0x12e   : > { %v812_v23 = vld [vmem:[#allocation2 + $0x48] sm:$0xff]  ;;  %1229 = vmatprep.subr.bf16.mxu0 %v8221_v24  ;;  %v8226_v58 = vld [vmem:[%s9647_s14 + $0xb0] ss:$12 sps:$4 sm:$0xff]   ;;  %v8234_v4 = vld [vmem:[%s9647_s14 + $0x80] ss:$12 sps:$4 sm:$0xff]  }
 0x12f   : > { %v8223_v25 = vld [vmem:[%s9647_s14 + $0xa8] ss:$12 sps:$4 sm:$0xff]   ;;  %v8227_v59 = vld [vmem:[%s9647_s14 + $0x90] ss:$12 sps:$4 sm:$0xff]   ;;  %7695 = vmatprep.subr.bf16.mxu1 %v8226_v58  ;;  %v8230_v63 = vld [vmem:[%s9647_s14 + $0x98] ss:$12 sps:$4 sm:$0xff]  }
 0x130   : > { %825 = vadd.xlane.f32.xlu0 %v806_v18  ;;  %829 = vadd.xlane.f32.xlu1 %v808_v19  ;;  %v9736_v61 = vld [vmem:[#allocation2 + $0x40] sm:$0xff]  ;;  %v8231_v0 = vld [vmem:[%s9647_s14 + $0x78] ss:$12 sps:$4 sm:$0xff]   ;;  %v9744_v2 = vld [vmem:[#allocation2 + $0x10] sm:$0xff] }
 0x131   : > { %1230 = vmatpush1.bf16.msra.mxu0 %v8223_v25  ;;  %7696 = vmatpush3.bf16.msra.mxu1 %v8226_v58  ;;  %v8228_v62 = vld [vmem:[%s9647_s14 + $0x7c] ss:$12 sps:$4 sm:$0xff]   ;;  %v8232_v3 = vld [vmem:[%s9647_s14 + $0x64] ss:$12 sps:$4 sm:$0xff]   ;;  %v8235_v5 = vld [vmem:[%s9647_s14 + $0x60] ss:$12 sps:$4 sm:$0xff]  }
 0x132   : > { %1231 = vmatprep.subr.bf16.mxu0 %v8224_v57  ;;  %v9742_v1 = vld [vmem:[#allocation2 + $0x20] sm:$0xff]  ;;  %7697 = vmatprep.subr.bf16.mxu1 %v8230_v63  ;;  %v9751_v6 = vld [vmem:[#allocation2 + $0x38] sm:$0xff]  ;;  %v9760_v11 = vld [vmem:[#allocation2 + $0x70] sm:$0xff] }
 0x133   : > { %v9753_v7 = vld [vmem:[#allocation2 + $0x60] sm:$0xff]  ;;  %v8236_v8 = vld [vmem:[%s9647_s14 + $0x4c] ss:$12 sps:$4 sm:$0xff]   ;;  %v8238_v9 = vld [vmem:[%s9647_s14 + $0x68] ss:$12 sps:$4 sm:$0xff]  }
 0x134   : > { %831 = vadd.xlane.f32.xlu0 %v809_v20  ;;  %833 = vadd.xlane.f32.xlu1 %v810_v21  ;;  %v8239_v10 = vld [vmem:[%s9647_s14 + $0x48] ss:$12 sps:$4 sm:$0xff]   ;;  %v8242_v14 = vld [vmem:[%s9647_s14 + $0x50] ss:$12 sps:$4 sm:$0xff]  }
 0x135   : > { %1232 = vmatpush1.bf16.msra.mxu0 %v8227_v59  ;;  %7698 = vmatpush3.bf16.msra.mxu1 %v8230_v63  ;;  %v9762_v12 = vld [vmem:[#allocation2 + $0x78] sm:$0xff]  ;;  %v8243_v15 = vld [vmem:[%s9647_s14 + $0x30] ss:$12 sps:$4 sm:$0xff]  }
 0x136   : > { %1233 = vmatprep.subr.bf16.mxu0 %v8228_v62  ;;  %7699 = vmatprep.subr.bf16.mxu1 %v8234_v4  ;;  %v8240_v13 = vld [vmem:[%s9647_s14 + $0x34] ss:$12 sps:$4 sm:$0xff]  }
 0x137   : > { %v8252_v24 = vld [vmem:[%s9647_s14 + $0x8] ss:$12 sps:$4 sm:$0xff]  }
 0x138   : > { %835 = vadd.xlane.f32.xlu0 %v811_v22  ;;  %837 = vadd.xlane.f32.xlu1 %v812_v23 }
 0x139   : > { %1234 = vmatpush1.bf16.msra.mxu0 %v8231_v0  ;;  %7700 = vmatpush3.bf16.msra.mxu1 %v8234_v4 }
 0x13a   : > { %1235 = vmatprep.subr.bf16.mxu0 %v8232_v3  ;;  %7701 = vmatprep.subr.bf16.mxu1 %v8238_v9 }
 0x13d   : > { %1236 = vmatpush1.bf16.msra.mxu0 %v8235_v5  ;;  %7702 = vmatpush3.bf16.msra.mxu1 %v8238_v9 }
 0x13e   : > { %1237 = vmatprep.subr.bf16.mxu0 %v8236_v8  ;;  %7703 = vmatprep.subr.bf16.mxu1 %v8242_v14 }
 0x141   : > { %1238 = vmatpush1.bf16.msra.mxu0 %v8239_v10  ;;  %7704 = vmatpush3.bf16.msra.mxu1 %v8242_v14 }
 0x142   : > { %1239 = vmatprep.subr.bf16.mxu0 %v8240_v13 }
 0x145   : > { %1240 = vmatpush1.bf16.msra.mxu0 %v8243_v15 }
 0x1b5   : > { %v824_v26 = vpop.xlane.xlu0 %823  ;;  %v828_v27 = vpop.xlane.xlu1 %827 }
 0x1b6   : > { %v856_v28 = vmul.f32 0.0078125, %v824_v26  ;;  %v858_v29 = vmul.f32 0.0078125, %v828_v27 }
 0x1b8   : > { %v9701_v30 = vsub.f32 %v805_v16, %v856_v28  ;;  %v9703_v31 = vsub.f32 %v807_v17, %v858_v29  ;;  %v9769_v16 = vld [vmem:[#allocation2 + $0x28] sm:$0xff] }
 0x1b9   : > { %v826_v32 = vpop.xlane.xlu0 %825  ;;  %v830_v33 = vpop.xlane.xlu1 %829  ;;  %v8244_v17 = vld [vmem:[%s9647_s14 + $0x1c] ss:$12 sps:$4 sm:$0xff]  }
 0x1ba   : > { %v857_v34 = vmul.f32 0.0078125, %v826_v32  ;;  %v888_v35 = vmul.f32 %v9701_v30, %v9701_v30  ;;  %v859_v36 = vmul.f32 0.0078125, %v830_v33  ;;  %v890_v37 = vmul.f32 %v9703_v31, %v9703_v31  ;;  %1241 = vmatprep.subr.bf16.mxu0 %v8244_v17 }
 0x1bc   : > { %904 = vadd.xlane.f32.xlu0 %v888_v35  ;;  %v9709_v38 = vsub.f32 %v806_v18, %v857_v34  ;;  %v9711_v39 = vsub.f32 %v808_v19, %v859_v36  ;;  %v8246_v18 = vld [vmem:[%s9647_s14 + $0x38] ss:$12 sps:$4 sm:$0xff]  }
 0x1bd   : > { %v832_v40 = vpop.xlane.xlu0 %831  ;;  %v834_v41 = vpop.xlane.xlu1 %833  ;;  %v8247_v19 = vld [vmem:[%s9647_s14 + $0x18] ss:$12 sps:$4 sm:$0xff]   ;;  %7705 = vmatprep.subr.bf16.mxu1 %v8246_v18 }
 0x1be   : > { %v860_v42 = vmul.f32 0.0078125, %v832_v40  ;;  %v889_v43 = vmul.f32 %v9709_v38, %v9709_v38  ;;  %v861_v44 = vmul.f32 0.0078125, %v834_v41  ;;  %v891_v45 = vmul.f32 %v9711_v39, %v9711_v39  ;;  %1242 = vmatpush1.bf16.msra.mxu0 %v8247_v19  ;;  %7706 = vmatpush3.bf16.msra.mxu1 %v8246_v18 }
 0x1c0   : > { %908 = vadd.xlane.f32.xlu0 %v890_v37  ;;  %906 = vadd.xlane.f32.xlu1 %v889_v43  ;;  %v9717_v46 = vsub.f32 %v809_v20, %v860_v42  ;;  %v9719_v47 = vsub.f32 %v810_v21, %v861_v44  ;;  %v8248_v20 = vld [vmem:[%s9647_s14 + $0x4] ss:$12 sps:$4 sm:$0xff]   ;;  %v8250_v21 = vld [vmem:[%s9647_s14 + $0x20] ss:$12 sps:$4 sm:$0xff]  }
 0x1c1   : > { %v836_v48 = vpop.xlane.xlu0 %835  ;;  %v838_v49 = vpop.xlane.xlu1 %837  ;;  %1243 = vmatprep.subr.bf16.mxu0 %v8248_v20  ;;  %7707 = vmatprep.subr.bf16.mxu1 %v8250_v21 }
 0x1c2   : > { %v862_v50 = vmul.f32 0.0078125, %v836_v48  ;;  %v892_v51 = vmul.f32 %v9717_v46, %v9717_v46  ;;  %v863_v52 = vmul.f32 0.0078125, %v838_v49  ;;  %v893_v53 = vmul.f32 %v9719_v47, %v9719_v47  ;;  %7708 = vmatpush3.bf16.msra.mxu1 %v8250_v21 }
 0x1c3   : > { %7709 = vmatprep.subr.bf16.mxu1 %v8252_v24 }
 0x1c4   : > { %910 = vadd.xlane.f32.xlu1 %v891_v45  ;;  %912 = vadd.xlane.f32.xlu0 %v892_v51  ;;  %v9725_v54 = vsub.f32 %v811_v22, %v862_v50  ;;  %v9727_v55 = vsub.f32 %v812_v23, %v863_v52  ;;  %v12292_v22 = vmov 0   ;;  %v8251_v23 = vld [vmem:[%s9647_s14] ss:$12 sps:$4 sm:$0xff]   ;;  %s12362_s14 = scalar_lea.vmem [#allocation9], %s9638_s19 }
 0x1c5   : > { %1261 = vmatprep.mubr.bf16.mxu0 %v12292_v22  ;;  %1244 = vmatpush1.bf16.msra.mxu0 %v8251_v23  ;;  %v9793_v14 = vld [vmem:[%s12362_s14] ss:$0 sm:$0xff] }
 0x1c6   : > { %v894_v56 = vmul.f32 %v9725_v54, %v9725_v54  ;;  %v895_v60 = vmul.f32 %v9727_v55, %v9727_v55  ;;  %7710 = vmatpush3.bf16.msra.mxu1 %v8252_v24 }
 0x1c8   : > { %914 = vadd.xlane.f32.xlu1 %v893_v53  ;;  %916 = vadd.xlane.f32.xlu0 %v894_v56 }
 0x1cc   : > { %918 = vadd.xlane.f32.xlu1 %v895_v60  ;;  %839 = vadd.xlane.f32.xlu0 %v9736_v61  ;;  %v9782_v60 = vld [vmem:[%s12361_s3] ss:$0 sm:$0xff] }
 0x1d0   : > { %841 = vadd.xlane.f32.xlu1 %v9742_v1  ;;  %843 = vadd.xlane.f32.xlu0 %v9744_v2 }
 0x1d4   : > { %845 = vadd.xlane.f32.xlu1 %v9751_v6  ;;  %847 = vadd.xlane.f32.xlu0 %v9753_v7 }
 0x1d8   : > { %849 = vadd.xlane.f32.xlu1 %v9760_v11  ;;  %851 = vadd.xlane.f32.xlu0 %v9762_v12 }
 0x1dc   : > { %853 = vadd.xlane.f32.xlu1 %v9769_v16 }
 0x245   : > { %v905_v25 = vpop.xlane.xlu0 %904 }
 0x246   : > { %v936_v26 = vmul.f32 0.0078125, %v905_v25 }
 0x248   : > { %v952_v27 = vadd.f32 1e-05, %v936_v26 }
 0x249   : > { %v907_v28 = vpop.xlane.xlu1 %906  ;;  %v909_v29 = vpop.xlane.xlu0 %908 }
 0x24a   : > { %8373 = vrsqrt.f32 %v952_v27  ;;  %v937_v32 = vmul.f32 0.0078125, %v907_v28  ;;  %v938_v33 = vmul.f32 0.0078125, %v909_v29 }
 0x24c   : > { %v953_v34 = vadd.f32 1e-05, %v937_v32  ;;  %v954_v35 = vadd.f32 1e-05, %v938_v33 }
 0x24d   : > { %v911_v36 = vpop.xlane.xlu1 %910  ;;  %v913_v37 = vpop.xlane.xlu0 %912 }
 0x24e   : > { %8375 = vrsqrt.f32 %v953_v34  ;;  %v939_v40 = vmul.f32 0.0078125, %v911_v36  ;;  %v940_v41 = vmul.f32 0.0078125, %v913_v37 }
 0x24f   : > { %8377 = vrsqrt.f32 %v954_v35 }
 0x250   : > { %v955_v42 = vadd.f32 1e-05, %v939_v40  ;;  %v956_v43 = vadd.f32 1e-05, %v940_v41 }
 0x251   : > { %v915_v44 = vpop.xlane.xlu1 %914  ;;  %v917_v45 = vpop.xlane.xlu0 %916 }
 0x252   : > { %8379 = vrsqrt.f32 %v955_v42  ;;  %v941_v48 = vmul.f32 0.0078125, %v915_v44  ;;  %v942_v49 = vmul.f32 0.0078125, %v917_v45 }
 0x253   : > { %8381 = vrsqrt.f32 %v956_v43 }
 0x254   : > { %v957_v50 = vadd.f32 1e-05, %v941_v48  ;;  %v958_v51 = vadd.f32 1e-05, %v942_v49 }
 0x255   : > { %v919_v52 = vpop.xlane.xlu1 %918  ;;  %v840_v53 = vpop.xlane.xlu0 %839 }
 0x256   : > { %8383 = vrsqrt.f32 %v957_v50  ;;  %v943_v56 = vmul.f32 0.0078125, %v919_v52  ;;  %v864_v57 = vmul.f32 0.0078125, %v840_v53 }
 0x257   : > { %v8374_v58 = vpop.eup %8373  ;;  %8385 = vrsqrt.f32 %v958_v51 }
 0x258   : > { %v959_v59 = vadd.f32 1e-05, %v943_v56  ;;  %v984_v62 = vmul.f32 %v8374_v58, %v9701_v30  ;;  %v9786_v63 = vsub.f32 %v9736_v61, %v864_v57 }
 0x259   : > { %v842_v0 = vpop.xlane.xlu1 %841  ;;  %v844_v3 = vpop.xlane.xlu0 %843 }
 0x25a   : > { %8387 = vrsqrt.f32 %v959_v59  ;;  %v865_v4 = vmul.f32 0.0078125, %v842_v0  ;;  %v896_v5 = vmul.f32 %v9786_v63, %v9786_v63  ;;  %v1006_v9 = vmul.f32 %v9782_v60, %v984_v62 }
 0x25b   : > { %v8376_v8 = vpop.eup %8375  ;;  %v866_v10 = vmul.f32 0.0078125, %v844_v3 }
 0x25c   : > { %v8378_v13 = vpop.eup %8377  ;;  %v985_v30 = vmul.f32 %v8376_v8, %v9709_v38  ;;  %v9797_v61 = vsub.f32 %v9742_v1, %v865_v4  ;;  %920 = vadd.xlane.f32.xlu0 %v896_v5  ;;  %v1028_v38 = vadd.f32 %v9793_v14, %v1006_v9 }
 0x25d   : > { %v986_v15 = vmul.f32 %v8378_v13, %v9703_v31  ;;  %v846_v17 = vpop.xlane.xlu1 %845  ;;  %v9801_v18 = vsub.f32 %v9744_v2, %v866_v10  ;;  %v848_v19 = vpop.xlane.xlu0 %847 }
 0x25e   : > { %v1007_v20 = vmul.f32 %v9782_v60, %v985_v30  ;;  %v897_v21 = vmul.f32 %v9797_v61, %v9797_v61  ;;  %v867_v23 = vmul.f32 0.0078125, %v846_v17  ;;  %v868_v24 = vmul.f32 0.0078125, %v848_v19 }
 0x25f   : > { %v8380_v25 = vpop.eup %8379  ;;  %v1008_v1 = vmul.f32 %v9782_v60, %v986_v15  ;;  %v898_v31 = vmul.f32 %v9801_v18, %v9801_v18 }
 0x260   : > { %v8382_v26 = vpop.eup %8381  ;;  %v1029_v2 = vadd.f32 %v9793_v14, %v1007_v20  ;;  %v987_v27 = vmul.f32 %v8380_v25, %v9711_v39  ;;  %922 = vadd.xlane.f32.xlu1 %v897_v21  ;;  %v9813_v28 = vsub.f32 %v9751_v6, %v867_v23  ;;  %v9816_v29 = vsub.f32 %v9753_v7, %v868_v24 }
 0x261   : > { %v988_v32 = vmul.f32 %v8382_v26, %v9717_v46  ;;  %924 = vadd.xlane.f32.xlu0 %v898_v31  ;;  %v850_v33 = vpop.xlane.xlu1 %849  ;;  %v852_v34 = vpop.xlane.xlu0 %851  ;;  %v1030_v41 = vadd.f32 %v9793_v14, %v1008_v1 }
 0x262   : > { %v1044_v35 = vpack.c.bf16 %v1029_v2, %v1028_v38  ;;  %v1009_v36 = vmul.f32 %v9782_v60, %v987_v27  ;;  %v899_v37 = vmul.f32 %v9813_v28, %v9813_v28  ;;  %v869_v40 = vmul.f32 0.0078125, %v850_v33 }
 0x263   : > { %v8384_v39 = vpop.eup %8383  ;;  %v1010_v6 = vmul.f32 %v9782_v60, %v988_v32  ;;  %v900_v7 = vmul.f32 %v9816_v29, %v9816_v29  ;;  %v870_v42 = vmul.f32 0.0078125, %v852_v34 }
 0x264   : > { %v8386_v46 = vpop.eup %8385  ;;  %1262 = vmatmul.mubr.bf16.vlgmr.msra.gmra.mxu0 %v1044_v35  ;;  %7711 = vmatprep.mubr.bf16.mxu1 %v1044_v35  ;;  %v1031_v43 = vadd.f32 %v9793_v14, %v1009_v36  ;;  %v989_v44 = vmul.f32 %v8384_v39, %v9719_v47  ;;  %v9829_v45 = vsub.f32 %v9760_v11, %v869_v40 }
 0x265   : > { %1271 = vmatprep.mubr.bf16.mxu0 %v12292_v22  ;;  %v990_v48 = vmul.f32 %v8386_v46, %v9725_v54  ;;  %926 = vadd.xlane.f32.xlu1 %v899_v37  ;;  %v854_v49 = vpop.xlane.xlu1 %853  ;;  %v9834_v50 = vsub.f32 %v9762_v12, %v870_v42  ;;  %v1032_v11 = vadd.f32 %v9793_v14, %v1010_v6 }
 0x266   : > { %v1045_v51 = vpack.c.bf16 %v1031_v43, %v1030_v41  ;;  %v1011_v52 = vmul.f32 %v9782_v60, %v989_v44  ;;  %v901_v53 = vmul.f32 %v9829_v45, %v9829_v45  ;;  %928 = vadd.xlane.f32.xlu0 %v900_v7  ;;  %v871_v47 = vmul.f32 0.0078125, %v854_v49 }
 0x267   : > { %v8388_v56 = vpop.eup %8387  ;;  %v902_v57 = vmul.f32 %v9834_v50, %v9834_v50  ;;  %v1012_v58 = vmul.f32 %v9782_v60, %v990_v48 }
 0x268   : > { %7712 = vmatmul.mubr.bf16.vlgmr.msra.gmra.mxu1 %v1045_v51  ;;  %v1033_v54 = vadd.f32 %v9793_v14, %v1011_v52  ;;  %v991_v12 = vmul.f32 %v8388_v56, %v9727_v55  ;;  %v9846_v59 = vsub.f32 %v9769_v16, %v871_v47 }
 0x269   : > { %930 = vadd.xlane.f32.xlu1 %v901_v53  ;;  %v1034_v4 = vadd.f32 %v9793_v14, %v1012_v58 }
 0x26a   : > { %v1046_v62 = vpack.c.bf16 %v1033_v54, %v1032_v11  ;;  %v1013_v0 = vmul.f32 %v9782_v60, %v991_v12  ;;  %v903_v3 = vmul.f32 %v9846_v59, %v9846_v59  ;;  %932 = vadd.xlane.f32.xlu0 %v902_v57 }
 0x26c   : > { %1272 = vmatmul.mubr.bf16.gmra.mxu0 %v1045_v51  ;;  %7715 = vmatprep.mubr.bf16.mxu1 %v1046_v62  ;;  %v1035_v5 = vadd.f32 %v9793_v14, %v1013_v0 }
 0x26d   : > { %1281 = vmatprep.mubr.bf16.mxu0 %v12292_v22  ;;  %934 = vadd.xlane.f32.xlu1 %v903_v3 }
 0x26e   : > { %v1047_v55 = vpack.c.bf16 %v1035_v5, %v1034_v4 }
 0x270   : > { %7716 = vmatmul.mubr.bf16.gmra.mxu1 %v1047_v55 }
 0x274   : > { %1282 = vmatmul.mubr.bf16.gmra.mxu0 %v1046_v62 }
 0x275   : > { %1291 = vmatprep.mubr.bf16.mxu0 %v12292_v22 }
 0x27c   : > { %1292 = vmatmul.mubr.bf16.gmra.mxu0 %v1047_v55 }
 0x27d   : > { %1301 = vmatprep.mubr.bf16.mxu0 %v12292_v22 }
 0x2e5   : > { %v921_v16 = vpop.xlane.xlu0 %920 }
 0x2e6   : > { %v944_v8 = vmul.f32 0.0078125, %v921_v16  ;;  %v1086_v16 = vlaneseq }
 0x2e8   : > { %v960_v9 = vadd.f32 1e-05, %v944_v8 }
 0x2e9   : > { %v923_v10 = vpop.xlane.xlu1 %922 }
 0x2ea   : > { %v945_v13 = vmul.f32 0.0078125, %v923_v10  ;;  %8389 = vrsqrt.f32 %v960_v9  ;;  %v925_v30 = vpop.xlane.xlu0 %924  ;;  %v1084_v9 = vld [vmem:[%s9688_s27] sm:$0x7] }
 0x2eb   : > { %v946_v15 = vmul.f32 0.0078125, %v925_v30 }
 0x2ec   : > { %v961_v17 = vadd.f32 1e-05, %v945_v13 }
 0x2ed   : > { %v962_v19 = vadd.f32 1e-05, %v946_v15 }
 0x2ee   : > { %8391 = vrsqrt.f32 %v961_v17  ;;  %v927_v20 = vpop.xlane.xlu1 %926 }
 0x2ef   : > { %v947_v21 = vmul.f32 0.0078125, %v927_v20  ;;  %8393 = vrsqrt.f32 %v962_v19  ;;  %v929_v23 = vpop.xlane.xlu0 %928 }
 0x2f0   : > { %v948_v24 = vmul.f32 0.0078125, %v929_v23 }
 0x2f1   : > { %v963_v25 = vadd.f32 1e-05, %v947_v21 }
 0x2f2   : > { %v931_v38 = vpop.xlane.xlu1 %930  ;;  %v964_v1 = vadd.f32 1e-05, %v948_v24 }
 0x2f3   : > { %8395 = vrsqrt.f32 %v963_v25  ;;  %v949_v31 = vmul.f32 0.0078125, %v931_v38  ;;  %v933_v26 = vpop.xlane.xlu0 %932 }
 0x2f4   : > { %8397 = vrsqrt.f32 %v964_v1  ;;  %v950_v2 = vmul.f32 0.0078125, %v933_v26 }
 0x2f5   : > { %v965_v27 = vadd.f32 1e-05, %v949_v31 }
 0x2f6   : > { %v935_v32 = vpop.xlane.xlu1 %934  ;;  %v966_v33 = vadd.f32 1e-05, %v950_v2 }
 0x2f7   : > { %v8390_v34 = vpop.eup %8389  ;;  %8399 = vrsqrt.f32 %v965_v27  ;;  %v951_v35 = vmul.f32 0.0078125, %v935_v32 }
 0x2f8   : > { %8401 = vrsqrt.f32 %v966_v33  ;;  %v992_v36 = vmul.f32 %v8390_v34, %v9786_v63 }
 0x2f9   : > { %v967_v37 = vadd.f32 1e-05, %v951_v35 }
 0x2fa   : > { %v1014_v40 = vmul.f32 %v9782_v60, %v992_v36 }
 0x2fb   : > { %v8392_v39 = vpop.eup %8391  ;;  %8403 = vrsqrt.f32 %v967_v37 }
 0x2fc   : > { %v8394_v41 = vpop.eup %8393  ;;  %v993_v6 = vmul.f32 %v8392_v39, %v9797_v61  ;;  %v1036_v46 = vadd.f32 %v9793_v14, %v1014_v40 }
 0x2fd   : > { %v994_v7 = vmul.f32 %v8394_v41, %v9801_v18 }
 0x2fe   : > { %v1015_v42 = vmul.f32 %v9782_v60, %v993_v6 }
 0x2ff   : > { %v1016_v43 = vmul.f32 %v9782_v60, %v994_v7 }
 0x300   : > { %v8396_v44 = vpop.eup %8395  ;;  %v1037_v48 = vadd.f32 %v9793_v14, %v1015_v42 }
 0x301   : > { %v8398_v63 = vpop.eup %8397  ;;  %v995_v49 = vmul.f32 %v8396_v44, %v9813_v28  ;;  %v1038_v61 = vadd.f32 %v9793_v14, %v1016_v43 }
 0x302   : > { %v1048_v51 = vpack.c.bf16 %v1037_v48, %v1036_v46  ;;  %v996_v52 = vmul.f32 %v8398_v63, %v9816_v29 }
 0x303   : > { %v1017_v53 = vmul.f32 %v9782_v60, %v995_v49 }
 0x304   : > { %v8400_v18 = vpop.eup %8399  ;;  %1302 = vmatmul.mubr.bf16.gmra.mxu0 %v1048_v51  ;;  %7719 = vmatprep.mubr.bf16.mxu1 %v1048_v51  ;;  %v1018_v47 = vmul.f32 %v9782_v60, %v996_v52 }
 0x305   : > { %v8402_v56 = vpop.eup %8401  ;;  %1311 = vmatprep.mubr.bf16.mxu0 %v12292_v22  ;;  %v1039_v11 = vadd.f32 %v9793_v14, %v1017_v53  ;;  %v997_v57 = vmul.f32 %v8400_v18, %v9829_v45 }
 0x306   : > { %v998_v28 = vmul.f32 %v8402_v56, %v9834_v50  ;;  %v1040_v12 = vadd.f32 %v9793_v14, %v1018_v47 }
 0x307   : > { %v1049_v54 = vpack.c.bf16 %v1039_v11, %v1038_v61  ;;  %v1019_v29 = vmul.f32 %v9782_v60, %v997_v57 }
 0x308   : > { %v8404_v58 = vpop.eup %8403  ;;  %v1020_v62 = vmul.f32 %v9782_v60, %v998_v28 }
 0x309   : > { %v1041_v0 = vadd.f32 %v9793_v14, %v1019_v29  ;;  %7720 = vmatmul.mubr.bf16.gmra.mxu1 %v1049_v54  ;;  %v999_v3 = vmul.f32 %v8404_v58, %v9846_v59  ;;  %v9884_v59 = vshrl.u32 %v1086_v16, 7 }
 0x30a   : > { %v1042_v45 = vadd.f32 %v9793_v14, %v1020_v62 }
 0x30b   : > { %v1050_v4 = vpack.c.bf16 %v1041_v0, %v1040_v12  ;;  %v1021_v5 = vmul.f32 %v9782_v60, %v999_v3  ;;  %12363 = vst [vmem:[#allocation29_spill] sm:$0xff] %v9884_v59  ;;  %v12291_v60 = vsub.s32 0, %v9884_v59  ;;  %v12289_v8 = vsub.s32 1, %v9884_v59 }
 0x30c   : > { %1312 = vmatmul.mubr.bf16.gmra.mxu0 %v1049_v54  ;;  %v12290_v10 = vsub.s32 2, %v9884_v59 }
 0x30d   : > { %1321 = vmatprep.mubr.bf16.mxu0 %v12292_v22  ;;  %7723 = vmatprep.mubr.bf16.mxu1 %v1050_v4  ;;  %v1043_v50 = vadd.f32 %v9793_v14, %v1021_v5  ;;  %v9892_v14 = vrot.slane %v1084_v9, %v12291_v60  ;;  %v9896_v13 = vrot.slane %v1084_v9, %v12289_v8 }
 0x30e   : > { %v9900_v15 = vrot.slane %v1084_v9, %v12290_v10 }
 0x30f   : > { %v1051_v55 = vpack.c.bf16 %v1043_v50, %v1042_v45 }
 0x311   : > { %7724 = vmatmul.mubr.bf16.gmra.mxu1 %v1051_v55 }
 0x314   : > { %1322 = vmatmul.mubr.bf16.gmra.mxu0 %v1050_v4 }
 0x315   : > { %1331 = vmatprep.mubr.bf16.mxu0 %v12292_v22 }
 0x31c   : > { %1332 = vmatmul.mubr.bf16.gmra.mxu0 %v1051_v55 }
 0x324   : > { %v1263_v30 = vpop.f32.mrf.mxu0 }
 0x325   : > { %v1264_v19 = vadd.f32 %v1263_v30, %v9892_v14 }
 0x326   : > { %v1265_v17 = vpop.f32.mrf.mxu0 }
 0x327   : > { %v1266_v20 = vadd.f32 %v1265_v17, %v9896_v13 }
 0x328   : > { %v1267_v21 = vpop.f32.mrf.mxu0  ;;  %v7713_v23 = vpop.f32.mrf.mxu1 }
 0x329   : > { %v7343_v24 = vpack.c.bf16 %v1266_v20, %v1264_v19  ;;  %v1385_v25 = vadd.f32 %v7713_v23, %v9900_v15  ;;  %v1268_v31 = vadd.f32 %v1267_v21, %v9892_v14 }
 0x32a   : > { %v1269_v38 = vpop.f32.mrf.mxu0  ;;  %v1376_v1 = vpop.f32.mrf.mxu1 }
 0x32b   : > { %1599 = vst [vmem:[#allocation3] sm:$0xff] %v7343_v24  ;;  %v7348_v26 = vpack.c.bf16 %v1385_v25, %v1385_v25  ;;  %v1270_v2 = vadd.f32 %v1269_v38, %v9896_v13  ;;  %v1377_v27 = vadd.f32 %v1376_v1, %v9900_v15 }
 0x32c   : > { %v1273_v32 = vpop.f32.mrf.mxu0  ;;  %v7714_v33 = vpop.f32.mrf.mxu1 }
 0x32d   : > { %1604 = vst [vmem:[#allocation3 + $0x20] sm:$0xf] %v7348_v26  ;;  %v7345_v34 = vpack.c.bf16 %v1270_v2, %v1268_v31  ;;  %v7344_v35 = vpack.c.bf16 %v1377_v27, %v1377_v27  ;;  %v1388_v36 = vadd.f32 %v7714_v33, %v9900_v15  ;;  %v1274_v39 = vadd.f32 %v1273_v32, %v9892_v14 }
 0x32e   : > { %v1275_v37 = vpop.f32.mrf.mxu0  ;;  %v1379_v40 = vpop.f32.mrf.mxu1 }
 0x32f   : > { %1601 = vst [vmem:[#allocation3 + $0xc] sm:$0xff] %v7345_v34  ;;  %1600 = vst [vmem:[#allocation3 + $0x8] sm:$0xf] %v7344_v35  ;;  %v7350_v41 = vpack.c.bf16 %v1388_v36, %v1388_v36  ;;  %v1276_v6 = vadd.f32 %v1275_v37, %v9896_v13  ;;  %v1380_v7 = vadd.f32 %v1379_v40, %v9900_v15 }
 0x330   : > { %v1277_v42 = vpop.f32.mrf.mxu0  ;;  %v7717_v46 = vpop.f32.mrf.mxu1 }
 0x331   : > { %1606 = vst [vmem:[#allocation3 + $0x2c] sm:$0xf] %v7350_v41  ;;  %v7347_v43 = vpack.c.bf16 %v1276_v6, %v1274_v39  ;;  %v7346_v44 = vpack.c.bf16 %v1380_v7, %v1380_v7  ;;  %v1401_v48 = vadd.f32 %v7717_v46, %v9900_v15  ;;  %v1278_v51 = vadd.f32 %v1277_v42, %v9892_v14 }
 0x332   : > { %v1279_v63 = vpop.f32.mrf.mxu0  ;;  %v1392_v49 = vpop.f32.mrf.mxu1 }
 0x333   : > { %1603 = vst [vmem:[#allocation3 + $0x18] sm:$0xff] %v7347_v43  ;;  %1602 = vst [vmem:[#allocation3 + $0x14] sm:$0xf] %v7346_v44  ;;  %v7356_v52 = vpack.c.bf16 %v1401_v48, %v1401_v48  ;;  %v1280_v53 = vadd.f32 %v1279_v63, %v9896_v13  ;;  %v1393_v61 = vadd.f32 %v1392_v49, %v9900_v15 }
 0x334   : > { %v1283_v18 = vpop.f32.mrf.mxu0  ;;  %v7718_v47 = vpop.f32.mrf.mxu1 }
 0x335   : > { %1612 = vst [vmem:[#allocation3 + $0x50] sm:$0xf] %v7356_v52  ;;  %v7349_v56 = vpack.c.bf16 %v1280_v53, %v1278_v51  ;;  %v7352_v11 = vpack.c.bf16 %v1393_v61, %v1393_v61  ;;  %v1404_v57 = vadd.f32 %v7718_v47, %v9900_v15  ;;  %v1284_v12 = vadd.f32 %v1283_v18, %v9892_v14 }
 0x336   : > { %v1285_v28 = vpop.f32.mrf.mxu0  ;;  %v1395_v54 = vpop.f32.mrf.mxu1  ;;  %v9917_v29 = vld [vmem:[#allocation3] ss:$12 sps:$4 sm:$0xff]   ;;  %v9938_v2 = vld [vmem:[#allocation3 + $0x4] ss:$12 sps:$4 sm:$0xff]  }
 0x337   : > { %1605 = vst [vmem:[#allocation3 + $0x24] sm:$0xff] %v7349_v56  ;;  %1608 = vst [vmem:[#allocation3 + $0x38] sm:$0xf] %v7352_v11  ;;  %v7358_v58 = vpack.c.bf16 %v1404_v57, %v1404_v57  ;;  %v1286_v62 = vadd.f32 %v1285_v28, %v9896_v13  ;;  %v1396_v0 = vadd.f32 %v1395_v54, %v9900_v15  ;;  %7735 = vmatprep.mubr.msk.bf16.mxu1 %vm1714_vm0, %v9917_v29 }
 0x338   : > { %v1287_v3 = vpop.f32.mrf.mxu0  ;;  %v1728_v40 = vsel %vm1714_vm0, %v9938_v2, 0  ;;  %v9987_v6 = vld [vmem:[#allocation3 + $0x20] ss:$12 sps:$4 sm:$0xff]  }
 0x339   : > { %1614 = vst [vmem:[#allocation3 + $0x5c] sm:$0xf] %v7358_v58  ;;  %v7351_v4 = vpack.c.bf16 %v1286_v62, %v1284_v12  ;;  %v7354_v5 = vpack.c.bf16 %v1396_v0, %v1396_v0  ;;  %v1288_v50 = vadd.f32 %v1287_v3, %v9892_v14 }
 0x33a   : > { %v1289_v45 = vpop.f32.mrf.mxu0  ;;  %v9993_v7 = vld [vmem:[#allocation3 + $0x8] ss:$12 sps:$4 sm:$0xff]  }
 0x33b   : > { %1607 = vst [vmem:[#allocation3 + $0x30] sm:$0xff] %v7351_v4  ;;  %1610 = vst [vmem:[#allocation3 + $0x44] sm:$0xf] %v7354_v5  ;;  %v1290_v55 = vadd.f32 %v1289_v45, %v9896_v13 }
 0x33c   : > { %v1293_v9 = vpop.f32.mrf.mxu0 }
 0x33d   : > { %v7353_v30 = vpack.c.bf16 %v1290_v55, %v1288_v50  ;;  %v1294_v19 = vadd.f32 %v1293_v9, %v9892_v14 }
 0x33e   : > { %v1295_v17 = vpop.f32.mrf.mxu0  ;;  %v9934_v26 = vld [vmem:[#allocation3 + $0x1c] ss:$12 sps:$4 sm:$0xff]   ;;  %v9952_v33 = vld [vmem:[#allocation3 + $0x18] ss:$12 sps:$4 sm:$0xff]  }
 0x33f   : > { %1609 = vst [vmem:[#allocation3 + $0x3c] sm:$0xff] %v7353_v30  ;;  %v1296_v20 = vadd.f32 %v1295_v17, %v9896_v13  ;;  %v1731_v37 = vsel %vm1714_vm0, %v9934_v26, 0 }
 0x340   : > { %v1297_v21 = vpop.f32.mrf.mxu0  ;;  %v9976_v39 = vld [vmem:[#allocation3 + $0x50] ss:$12 sps:$4 sm:$0xff]  }
 0x341   : > { %v7355_v23 = vpack.c.bf16 %v1296_v20, %v1294_v19  ;;  %v1298_v25 = vadd.f32 %v1297_v21, %v9892_v14 }
 0x342   : > { %v1299_v24 = vpop.f32.mrf.mxu0  ;;  %v9981_v41 = vld [vmem:[#allocation3 + $0x38] ss:$12 sps:$4 sm:$0xff]  }
 0x343   : > { %1611 = vst [vmem:[#allocation3 + $0x48] sm:$0xff] %v7355_v23  ;;  %v1300_v38 = vadd.f32 %v1299_v24, %v9896_v13 }
 0x345   : > { %v7357_v1 = vpack.c.bf16 %v1300_v38, %v1298_v25 }
 0x346   : > { %v9930_v31 = vld [vmem:[#allocation3 + $0x34] ss:$12 sps:$4 sm:$0xff]   ;;  %v9960_v35 = vld [vmem:[#allocation3 + $0x30] ss:$12 sps:$4 sm:$0xff]  }
 0x347   : > { %1613 = vst [vmem:[#allocation3 + $0x54] sm:$0xff] %v7357_v1  ;;  %2026 = vrot.lane.b32.xlu1 %v9930_v31, %s9207_s22  ;;  %v1734_v36 = vsel %vm1714_vm0, %v9930_v31, 0 }
 0x34b   : > { %2024 = vrot.lane.b32.xlu1 %v9934_v26, %s9207_s22 }
 0x34e   : > { %v9940_v27 = vld [vmem:[#allocation3 + $0x4c] ss:$12 sps:$4 sm:$0xff]   ;;  %v9958_v34 = vld [vmem:[#allocation3 + $0x48] ss:$12 sps:$4 sm:$0xff]  }
 0x34f   : > { %2022 = vrot.lane.b32.xlu1 %v9938_v2, %s9207_s22  ;;  %8079 = vmatprep.subr.msk.bf16.mxu1 %vm1714_vm0, %v9940_v27  ;;  %v1737_v32 = vsel %vm1714_vm0, %v9940_v27, 0 }
 0x350   : > { %2028 = vrot.lane.b32.xlu0 %v9940_v27, %s9207_s22  ;;  %7728 = vmatpush3.bf16.xpose.msra.mxu1 %v1737_v32 }
 0x351   : > { %8080 = vmatprep.subr.msk.bf16.mxu1 %vm1714_vm0, %v9930_v31 }
 0x353   : > { %2016 = vrot.lane.b32.xlu1 %v9952_v33, %s9207_s22 }
 0x354   : > { %2014 = vrot.lane.b32.xlu0 %v9917_v29, %s9207_s22 }
 0x357   : > { %2020 = vrot.lane.b32.xlu1 %v9958_v34, %s9207_s22 }
 0x358   : > { %2018 = vrot.lane.b32.xlu0 %v9960_v35, %s9207_s22  ;;  %7730 = vmatpush3.bf16.xpose.msra.mxu1 %v1734_v36 }
 0x359   : > { %8081 = vmatprep.subr.msk.bf16.mxu1 %vm1714_vm0, %v9934_v26 }
 0x360   : > { %7732 = vmatpush3.bf16.xpose.msra.mxu1 %v1731_v37 }
 0x361   : > { %8082 = vmatprep.subr.msk.bf16.mxu1 %vm1714_vm0, %v9938_v2 }
 0x368   : > { %7734 = vmatpush3.bf16.xpose.msra.mxu1 %v1728_v40 }
 0x369   : > { %7743 = vmatprep.subr.bf16.mxu1 %v9976_v39 }
 0x36f   : > { %7736 = vmatmul.mubr.msk.bf16.vlgmr.msra.gmra.mxu1 %vm1714_vm0, %v9952_v33 }
 0x370   : > { %7739 = vmatprep.mubr.msk.bf16.mxu1 %vm1714_vm0, %v9960_v35  ;;  %7744 = vmatpush3.bf16.msra.mxu1 %v9976_v39 }
 0x371   : > { %7745 = vmatprep.subr.bf16.mxu1 %v9981_v41 }
 0x374   : > { %7746 = vmatpush3.bf16.msra.mxu1 %v9981_v41 }
 0x375   : > { %7747 = vmatprep.subr.bf16.mxu1 %v9987_v6 }
 0x377   : > { %7740 = vmatmul.mubr.msk.bf16.gmra.mxu1 %vm1714_vm0, %v9958_v34 }
 0x378   : > { %7748 = vmatpush3.bf16.msra.mxu1 %v9987_v6 }
 0x379   : > { %7749 = vmatprep.subr.bf16.mxu1 %v9993_v7 }
 0x37c   : > { %7750 = vmatpush3.bf16.msra.mxu1 %v9993_v7 }
 0x3b9   : > { %v2027_v44 = vpop.permute.xlu1 %2026 }
 0x3ba   : > { %v2049_v28 = vsel %vm1714_vm0, %v2027_v44, 0 }
 0x3bd   : > { %v2025_v62 = vpop.permute.xlu1 %2024 }
 0x3be   : > { %v2046_v36 = vsel %vm1714_vm0, %v2025_v62, 0 }
 0x3c2   : > { %v2029_v42 = vpop.permute.xlu0 %2028 }
 0x3c3   : > { %8083 = vmatprep.subr.msk.bf16.mxu0 %vm1714_vm0, %v2029_v42  ;;  %v2052_v46 = vsel %vm1714_vm0, %v2029_v42, 0 }
 0x3c4   : > { %v1303_v43 = vpop.f32.mrf.mxu0  ;;  %7760 = vmatpush3.bf16.xpose.msra.mxu0 %v2052_v46  ;;  %v2023_v46 = vpop.permute.xlu1 %2022 }
 0x3c5   : > { %v1304_v48 = vadd.f32 %v1303_v43, %v9892_v14  ;;  %8084 = vmatprep.subr.msk.bf16.mxu0 %vm1714_vm0, %v2027_v44 }
 0x3c6   : > { %v1305_v63 = vpop.f32.mrf.mxu0  ;;  %v2015_v49 = vpop.permute.xlu0 %2014 }
 0x3c7   : > { %v1306_v51 = vadd.f32 %v1305_v63, %v9896_v13  ;;  %7767 = vmatprep.mubr.msk.bf16.mxu0 %vm1714_vm0, %v2015_v49 }
 0x3c8   : > { %v1307_v52 = vpop.f32.mrf.mxu0 }
 0x3c9   : > { %v7359_v53 = vpack.c.bf16 %v1306_v51, %v1304_v48  ;;  %v1308_v61 = vadd.f32 %v1307_v52, %v9892_v14  ;;  %v7721_v18 = vpop.f32.mrf.mxu1 }
 0x3ca   : > { %v1309_v47 = vpop.f32.mrf.mxu0  ;;  %v1417_v56 = vadd.f32 %v7721_v18, %v9900_v15 }
 0x3cb   : > { %1615 = vst [vmem:[#allocation3 + $0x60] sm:$0xff] %v7359_v53  ;;  %v1310_v11 = vadd.f32 %v1309_v47, %v9896_v13  ;;  %v1408_v57 = vpop.f32.mrf.mxu1 }
 0x3cc   : > { %v1313_v54 = vpop.f32.mrf.mxu0  ;;  %v7364_v12 = vpack.c.bf16 %v1417_v56, %v1417_v56  ;;  %v1409_v58 = vadd.f32 %v1408_v57, %v9900_v15  ;;  %7762 = vmatpush3.bf16.xpose.msra.mxu0 %v2049_v28 }
 0x3cd   : > { %v7361_v0 = vpack.c.bf16 %v1310_v11, %v1308_v61  ;;  %v1314_v3 = vadd.f32 %v1313_v54, %v9892_v14  ;;  %v7722_v4 = vpop.f32.mrf.mxu1  ;;  %8085 = vmatprep.subr.msk.bf16.mxu0 %vm1714_vm0, %v2025_v62 }
 0x3ce   : > { %v1315_v5 = vpop.f32.mrf.mxu0  ;;  %1620 = vst [vmem:[#allocation3 + $0x80] sm:$0xf] %v7364_v12  ;;  %v7360_v45 = vpack.c.bf16 %v1409_v58, %v1409_v58  ;;  %v1420_v50 = vadd.f32 %v7722_v4, %v9900_v15  ;;  %v2043_v12 = vsel %vm1714_vm0, %v2023_v46, 0 }
 0x3cf   : > { %1617 = vst [vmem:[#allocation3 + $0x6c] sm:$0xff] %v7361_v0  ;;  %v1316_v55 = vadd.f32 %v1315_v5, %v9896_v13  ;;  %v1411_v9 = vpop.f32.mrf.mxu1 }
 0x3d0   : > { %v1317_v30 = vpop.f32.mrf.mxu0  ;;  %1616 = vst [vmem:[#allocation3 + $0x68] sm:$0xf] %v7360_v45  ;;  %v7366_v17 = vpack.c.bf16 %v1420_v50, %v1420_v50  ;;  %v1412_v19 = vadd.f32 %v1411_v9, %v9900_v15 }
 0x3d1   : > { %v7363_v20 = vpack.c.bf16 %v1316_v55, %v1314_v3  ;;  %v1318_v21 = vadd.f32 %v1317_v30, %v9892_v14  ;;  %v7725_v23 = vpop.f32.mrf.mxu1  ;;  %v2017_v55 = vpop.permute.xlu1 %2016 }
 0x3d2   : > { %v1319_v24 = vpop.f32.mrf.mxu0  ;;  %1622 = vst [vmem:[#allocation3 + $0x8c] sm:$0xf] %v7366_v17  ;;  %v7362_v25 = vpack.c.bf16 %v1412_v19, %v1412_v19  ;;  %v1433_v38 = vadd.f32 %v7725_v23, %v9900_v15  ;;  %v2019_v30 = vpop.permute.xlu0 %2018 }
 0x3d3   : > { %1619 = vst [vmem:[#allocation3 + $0x78] sm:$0xff] %v7363_v20  ;;  %v1320_v1 = vadd.f32 %v1319_v24, %v9896_v13  ;;  %v1424_v32 = vpop.f32.mrf.mxu1  ;;  %v1634_v20 = vadd.s32 16, %v9884_v59  ;;  %v1635_v24 = vadd.s32 24, %v9884_v59 }
 0x3d4   : > { %v1323_v37 = vpop.f32.mrf.mxu0  ;;  %1618 = vst [vmem:[#allocation3 + $0x74] sm:$0xf] %v7362_v25  ;;  %v7372_v40 = vpack.c.bf16 %v1433_v38, %v1433_v38  ;;  %v1425_v42 = vadd.f32 %v1424_v32, %v9900_v15  ;;  %7764 = vmatpush3.bf16.xpose.msra.mxu0 %v2046_v36  ;;  %v1633_v25 = vadd.s32 8, %v9884_v59 }
 0x3d5   : > { %v7365_v43 = vpack.c.bf16 %v1320_v1, %v1318_v21  ;;  %v1324_v44 = vadd.f32 %v1323_v37, %v9892_v14  ;;  %v7726_v48 = vpop.f32.mrf.mxu1  ;;  %8086 = vmatprep.subr.msk.bf16.mxu0 %vm1714_vm0, %v2023_v46  ;;  %v2021_v19 = vpop.permute.xlu1 %2020  ;;  %v1641_v21 = vand.u32 127, %v1086_v16 }
 0x3d6   : > { %v1325_v63 = vpop.f32.mrf.mxu0  ;;  %1628 = vst [vmem:[#allocation3 + $0xb0] sm:$0xf] %v7372_v40  ;;  %v7368_v49 = vpack.c.bf16 %v1425_v42, %v1425_v42  ;;  %v1436_v51 = vadd.f32 %v7726_v48, %v9900_v15  ;;  %v1638_v40 = vadd.s32 48, %v9884_v59 }
 0x3d7   : > { %1621 = vst [vmem:[#allocation3 + $0x84] sm:$0xff] %v7365_v43  ;;  %v1326_v52 = vadd.f32 %v1325_v63, %v9896_v13  ;;  %v1427_v53 = vpop.f32.mrf.mxu1  ;;  %vm10036_vm1 = vcmp.le.s32.totalorder %v1641_v21, %v1634_v20  ;;  %vm10041_vm3 = vcmp.le.s32.totalorder %v1641_v21, %v9884_v59  ;;  %vm10057_vm4 = vcmp.le.s32.totalorder %v1641_v21, %v1635_v24 }
 0x3d8   : > { %v1327_v61 = vpop.f32.mrf.mxu0  ;;  %1624 = vst [vmem:[#allocation3 + $0x98] sm:$0xf] %v7368_v49  ;;  %v7374_v18 = vpack.c.bf16 %v1436_v51, %v1436_v51  ;;  %v1428_v47 = vadd.f32 %v1427_v53, %v9900_v15  ;;  %vm10062_vm5 = vcmp.le.s32.totalorder %v1641_v21, %v1633_v25  ;;  %vm10077_vm6 = vcmp.le.s32.totalorder %v1641_v21, %v1638_v40 }
 0x3d9   : > { %v7367_v56 = vpack.c.bf16 %v1326_v52, %v1324_v44  ;;  %v1328_v11 = vadd.f32 %v1327_v61, %v9892_v14  ;;  %v1639_v44 = vadd.s32 56, %v9884_v59  ;;  %v1636_v53 = vadd.s32 32, %v9884_v59 }
 0x3da   : > { %v1329_v57 = vpop.f32.mrf.mxu0  ;;  %1630 = vst [vmem:[#allocation3 + $0xbc] sm:$0xf] %v7374_v18  ;;  %v7370_v28 = vpack.c.bf16 %v1428_v47, %v1428_v47  ;;  %v1637_v61 = vadd.s32 40, %v9884_v59 }
 0x3db   : > { %1623 = vst [vmem:[#allocation3 + $0x90] sm:$0xff] %v7367_v56  ;;  %v1330_v54 = vadd.f32 %v1329_v57, %v9896_v13  ;;  %vm10087_vm7 = vcmp.le.s32.totalorder %v1641_v21, %v1639_v44  ;;  %vm10095_vm8 = vcmp.le.s32.totalorder %v1641_v21, %v1636_v53  ;;  %v12376_v57 = vmov 0 }
 0x3dc   : > { %v1333_v58 = vpop.f32.mrf.mxu0  ;;  %1626 = vst [vmem:[#allocation3 + $0xa4] sm:$0xf] %v7370_v28  ;;  %7766 = vmatpush3.bf16.xpose.msra.mxu0 %v2043_v12  ;;  %v12377_v57 = vsel %vm10095_vm8, 4294967295, %v12376_v57  ;;  %vm10099_vm9 = vcmp.le.s32.totalorder %v1641_v21, %v1637_v61 }
 0x3dd   : > { %v7369_v62 = vpack.c.bf16 %v1330_v54, %v1328_v11  ;;  %v1334_v0 = vadd.f32 %v1333_v58, %v9892_v14  ;;  %12378 = vst [vmem:[#allocation30_spill] sm:$0xff] %v12377_v57  ;;  %v12379_v54 = vmov 0 }
 0x3de   : > { %v1335_v3 = vpop.f32.mrf.mxu0  ;;  %v12380_v54 = vsel %vm10099_vm9, 4294967295, %v12379_v54 }
 0x3df   : > { %1625 = vst [vmem:[#allocation3 + $0x9c] sm:$0xff] %v7369_v62  ;;  %v1336_v15 = vadd.f32 %v1335_v3, %v9896_v13  ;;  %12381 = vst [vmem:[#allocation31_spill] sm:$0xff] %v12380_v54 }
 0x3e0   : > { %v1337_v4 = vpop.f32.mrf.mxu0 }
 0x3e1   : > { %v7371_v5 = vpack.c.bf16 %v1336_v15, %v1334_v0  ;;  %v1338_v45 = vadd.f32 %v1337_v4, %v9892_v14 }
 0x3e2   : > { %v1339_v50 = vpop.f32.mrf.mxu0 }
 0x3e3   : > { %1627 = vst [vmem:[#allocation3 + $0xa8] sm:$0xff] %v7371_v5  ;;  %v1340_v9 = vadd.f32 %v1339_v50, %v9896_v13  ;;  %7768 = vmatmul.mubr.msk.bf16.vlgmr.msra.gmra.mxu0 %vm1714_vm0, %v2017_v55 }
 0x3e4   : > { %7771 = vmatprep.mubr.msk.bf16.mxu0 %vm1714_vm0, %v2019_v30 }
 0x3e5   : > { %v7373_v17 = vpack.c.bf16 %v1340_v9, %v1338_v45 }
 0x3e7   : > { %1629 = vst [vmem:[#allocation3 + $0xb4] sm:$0xff] %v7373_v17 }
 0x3eb   : > { %7772 = vmatmul.mubr.msk.bf16.gmra.mxu0 %vm1714_vm0, %v2021_v19 }
 0x42f   : > { %v7737_v13 = vpop.f32.mrf.mxu1 }
 0x430   : > { %v10049_v38 = vsel %vm10036_vm1, %v7737_v13, -1e+30 }
 0x431   : > { %v1773_v16 = vpop.f32.mrf.mxu1  ;;  %v1819_v1 = vsel %vm1812_vm2, %v10049_v38, -inf }
 0x432   : > { %v10055_v32 = vsel %vm10041_vm3, %v1773_v16, -1e+30  ;;  %1820 = vmax.xlane.f32.xlu0 %v1819_v1 }
 0x433   : > { %v7738_v37 = vpop.f32.mrf.mxu1  ;;  %v1813_v43 = vsel %vm1812_vm2, %v10055_v32, -inf }
 0x434   : > { %v10071_v48 = vsel %vm10057_vm4, %v7738_v37, -1e+30 }
 0x435   : > { %v1776_v46 = vpop.f32.mrf.mxu1  ;;  %v1822_v47 = vsel %vm1812_vm2, %v10071_v48, -inf }
 0x436   : > { %1814 = vmax.xlane.f32.xlu0 %v1813_v43  ;;  %v10075_v63 = vsel %vm10062_vm5, %v1776_v46, -1e+30 }
 0x437   : > { %v7741_v51 = vpop.f32.mrf.mxu1  ;;  %v1816_v52 = vsel %vm1812_vm2, %v10075_v63, -inf }
 0x438   : > { %1817 = vmax.xlane.f32.xlu1 %v1816_v52  ;;  %v10093_v11 = vsel %vm10077_vm6, %v7741_v51, -1e+30 }
 0x439   : > { %v1789_v18 = vpop.f32.mrf.mxu1  ;;  %v1831_v62 = vsel %vm1812_vm2, %v10093_v11, -inf }
 0x43a   : > { %1823 = vmax.xlane.f32.xlu0 %v1822_v47  ;;  %v10113_v3 = vsel %vm10095_vm8, %v1789_v18, -1e+30 }
 0x43b   : > { %v7742_v28 = vpop.f32.mrf.mxu1  ;;  %v1825_v4 = vsel %vm1812_vm2, %v10113_v3, -inf }
 0x43c   : > { %v10105_v12 = vsel %vm10087_vm7, %v7742_v28, -1e+30 }
 0x43d   : > { %v1792_v58 = vpop.f32.mrf.mxu1  ;;  %v1834_v0 = vsel %vm1812_vm2, %v10105_v12, -inf }
 0x43e   : > { %1832 = vmax.xlane.f32.xlu0 %v1831_v62  ;;  %1835 = vmax.xlane.f32.xlu1 %v1834_v0  ;;  %v10117_v15 = vsel %vm10099_vm9, %v1792_v58, -1e+30 }
 0x43f   : > { %v1828_v5 = vsel %vm1812_vm2, %v10117_v15, -inf }
 0x442   : > { %1826 = vmax.xlane.f32.xlu0 %v1825_v4  ;;  %1829 = vmax.xlane.f32.xlu1 %v1828_v5 }
 0x4a3   : > { %v7769_v45 = vpop.f32.mrf.mxu0 }
 0x4a4   : > { %v10125_v50 = vsel %vm10036_vm1, %v7769_v45, -1e+30 }
 0x4a5   : > { %v2088_v55 = vpop.f32.mrf.mxu0  ;;  %v2133_v9 = vsel %vm1812_vm2, %v10125_v50, -inf }
 0x4a6   : > { %v10131_v30 = vsel %vm10041_vm3, %v2088_v55, -1e+30  ;;  %2134 = vmax.xlane.f32.xlu0 %v2133_v9 }
 0x4a7   : > { %v7770_v17 = vpop.f32.mrf.mxu0  ;;  %v2127_v21 = vsel %vm1812_vm2, %v10131_v30, -inf }
 0x4a8   : > { %v10135_v19 = vsel %vm10057_vm4, %v7770_v17, -1e+30 }
 0x4a9   : > { %v2091_v20 = vpop.f32.mrf.mxu0  ;;  %v2136_v13 = vsel %vm1812_vm2, %v10135_v19, -inf }
 0x4aa   : > { %2128 = vmax.xlane.f32.xlu0 %v2127_v21  ;;  %2137 = vmax.xlane.f32.xlu1 %v2136_v13  ;;  %v10143_v24 = vsel %vm10062_vm5, %v2091_v20, -1e+30 }
 0x4ab   : > { %v7773_v25 = vpop.f32.mrf.mxu0  ;;  %v2130_v37 = vsel %vm1812_vm2, %v10143_v24, -inf }
 0x4ac   : > { %v10147_v16 = vsel %vm10077_vm6, %v7773_v25, -1e+30 }
 0x4ad   : > { %v2104_v1 = vpop.f32.mrf.mxu0  ;;  %v2145_v40 = vsel %vm1812_vm2, %v10147_v16, -inf }
 0x4ae   : > { %v10155_v46 = vsel %vm10095_vm8, %v2104_v1, -1e+30  ;;  %2131 = vmax.xlane.f32.xlu1 %v2130_v37  ;;  %2146 = vmax.xlane.f32.xlu0 %v2145_v40 }
 0x4af   : > { %v7774_v43 = vpop.f32.mrf.mxu0  ;;  %v2139_v52 = vsel %vm1812_vm2, %v10155_v46, -inf }
 0x4b0   : > { %v10159_v44 = vsel %vm10087_vm7, %v7774_v43, -1e+30 }
 0x4b1   : > { %v2107_v51 = vpop.f32.mrf.mxu0  ;;  %v2148_v53 = vsel %vm1812_vm2, %v10159_v44, -inf }
 0x4b2   : > { %2140 = vmax.xlane.f32.xlu0 %v2139_v52  ;;  %2149 = vmax.xlane.f32.xlu1 %v2148_v53  ;;  %v10167_v61 = vsel %vm10099_vm9, %v2107_v51, -1e+30 }
 0x4b3   : > { %v2142_v18 = vsel %vm1812_vm2, %v10167_v61, -inf }
 0x4b6   : > { %2143 = vmax.xlane.f32.xlu1 %v2142_v18 }
 0x4bb   : > { %v1821_v47 = vpop.xlane.xlu0 %1820 }
 0x4bc   : > { %v1839_v62 = vsub.f32 %v10049_v38, %v1821_v47 }
 0x4be   : > { %v1849_v45 = vmul.f32 1.442695, %v1839_v62 }
 0x4bf   : > { %v1815_v28 = vpop.xlane.xlu0 %1814 }
 0x4c0   : > { %v1837_v0 = vsub.f32 %v10055_v32, %v1815_v28  ;;  %8405 = vpow2.f32 %v1849_v45 }
 0x4c1   : > { %v1818_v4 = vpop.xlane.xlu1 %1817 }
 0x4c2   : > { %v1845_v9 = vmul.f32 1.442695, %v1837_v0  ;;  %v1838_v17 = vsub.f32 %v10075_v63, %v1818_v4 }
 0x4c3   : > { %v1824_v58 = vpop.xlane.xlu0 %1823 }
 0x4c4   : > { %v1840_v55 = vsub.f32 %v10071_v48, %v1824_v58  ;;  %8407 = vpow2.f32 %v1845_v9 }
 0x4c6   : > { %v1851_v21 = vmul.f32 1.442695, %v1840_v55 }
 0x4c7   : > { %2223 = vrot.lane.b32.xlu1 %v9981_v41, %s9207_s22  ;;  %v1833_v5 = vpop.xlane.xlu0 %1832  ;;  %v1836_v20 = vpop.xlane.xlu1 %1835 }
 0x4c8   : > { %2225 = vrot.lane.b32.xlu0 %v9976_v39, %s9207_s22  ;;  %v1843_v41 = vsub.f32 %v10093_v11, %v1833_v5  ;;  %v1847_v39 = vmul.f32 1.442695, %v1838_v17  ;;  %v1844_v38 = vsub.f32 %v10105_v12, %v1836_v20  ;;  %8409 = vpow2.f32 %v1851_v21 }
 0x4ca   : > { %v1857_v32 = vmul.f32 1.442695, %v1843_v41  ;;  %8411 = vpow2.f32 %v1847_v39  ;;  %v1859_v48 = vmul.f32 1.442695, %v1844_v38 }
 0x4cb   : > { %v1827_v13 = vpop.xlane.xlu0 %1826  ;;  %v1830_v1 = vpop.xlane.xlu1 %1829 }
 0x4cc   : > { %v1841_v25 = vsub.f32 %v10113_v3, %v1827_v13  ;;  %8413 = vpow2.f32 %v1857_v32  ;;  %v1842_v63 = vsub.f32 %v10117_v15, %v1830_v1 }
 0x4cd   : > { %8415 = vpow2.f32 %v1859_v48  ;;  %v10183_v11 = vpop.eup %8405 }
 0x4ce   : > { %v1853_v37 = vmul.f32 1.442695, %v1841_v25  ;;  %v1855_v40 = vmul.f32 1.442695, %v1842_v63  ;;  %v1867_v12 = vsel %vm1812_vm2, %v10183_v11, 0.0 }
 0x4d0   : > { %8417 = vpow2.f32 %v1853_v37 }
 0x4d1   : > { %v10185_v43 = vpop.eup %8407  ;;  %8419 = vpow2.f32 %v1855_v40 }
 0x4d2   : > { %v1861_v15 = vsel %vm1812_vm2, %v10185_v43, 0.0 }
 0x4d5   : > { %v10189_v51 = vpop.eup %8409 }
 0x4d6   : > { %v1870_v52 = vsel %vm1812_vm2, %v10189_v51, 0.0 }
 0x4d7   : > { %v10191_v3 = vpop.eup %8411 }
 0x4d8   : > { %v1864_v47 = vsel %vm1812_vm2, %v10191_v3, 0.0 }
 0x4d9   : > { %v10197_v53 = vpop.eup %8413 }
 0x4da   : > { %v10199_v18 = vpop.eup %8415  ;;  %v1879_v28 = vsel %vm1812_vm2, %v10197_v53, 0.0 }
 0x4db   : > { %v1882_v62 = vsel %vm1812_vm2, %v10199_v18, 0.0 }
 0x4dd   : > { %v10205_v58 = vpop.eup %8417 }
 0x4de   : > { %v1873_v0 = vsel %vm1812_vm2, %v10205_v58, 0.0  ;;  %v10211_v4 = vpop.eup %8419 }
 0x4df   : > { %v1876_v5 = vsel %vm1812_vm2, %v10211_v4, 0.0 }
 0x4e7   : > { %1868 = vadd.xlane.f32.xlu0 %v1867_v12 }
 0x4eb   : > { %1862 = vadd.xlane.f32.xlu0 %v1861_v15  ;;  %1871 = vadd.xlane.f32.xlu1 %v1870_v52 }
 0x4ef   : > { %1865 = vadd.xlane.f32.xlu1 %v1864_v47  ;;  %1880 = vadd.xlane.f32.xlu0 %v1879_v28 }
 0x4f3   : > { %1883 = vadd.xlane.f32.xlu1 %v1882_v62  ;;  %1874 = vadd.xlane.f32.xlu0 %v1873_v0 }
 0x4f7   : > { %1877 = vadd.xlane.f32.xlu1 %v1876_v5 }
 0x52f   : > { %v2135_v45 = vpop.xlane.xlu0 %2134 }
 0x530   : > { %v2153_v55 = vsub.f32 %v10125_v50, %v2135_v45 }
 0x532   : > { %v2163_v9 = vmul.f32 1.442695, %v2153_v55 }
 0x533   : > { %v2138_v17 = vpop.xlane.xlu1 %2137  ;;  %v2129_v20 = vpop.xlane.xlu0 %2128 }
 0x534   : > { %8421 = vpow2.f32 %v2163_v9  ;;  %v2154_v21 = vsub.f32 %v10135_v19, %v2138_v17  ;;  %v2151_v41 = vsub.f32 %v10131_v30, %v2129_v20 }
 0x536   : > { %v2165_v13 = vmul.f32 1.442695, %v2154_v21  ;;  %v2159_v39 = vmul.f32 1.442695, %v2151_v41 }
 0x537   : > { %v2132_v38 = vpop.xlane.xlu1 %2131  ;;  %v2147_v32 = vpop.xlane.xlu0 %2146 }
 0x538   : > { %8423 = vpow2.f32 %v2165_v13  ;;  %v2152_v25 = vsub.f32 %v10143_v24, %v2132_v38  ;;  %v2157_v48 = vsub.f32 %v10147_v16, %v2147_v32  ;;  %v8266_v38 = vld [vmem:[%s9654_s12 + $0x10] sm:$0xff]  }
 0x539   : > { %8425 = vpow2.f32 %v2159_v39  ;;  %v8265_v39 = vld [vmem:[%s9654_s12 + $0x18] sm:$0xff]  }
 0x53a   : > { %v2161_v1 = vmul.f32 1.442695, %v2152_v25  ;;  %v2171_v19 = vmul.f32 1.442695, %v2157_v48  ;;  %7791 = vmatprep.subr.bf16.mxu0 %v8265_v39 }
 0x53b   : > { %v2150_v50 = vpop.xlane.xlu1 %2149  ;;  %v2141_v63 = vpop.xlane.xlu0 %2140  ;;  %7792 = vmatpush3.bf16.msra.mxu0 %v8265_v39 }
 0x53c   : > { %8427 = vpow2.f32 %v2161_v1  ;;  %v2155_v37 = vsub.f32 %v10155_v46, %v2141_v63  ;;  %v2158_v30 = vsub.f32 %v10159_v44, %v2150_v50  ;;  %7793 = vmatprep.subr.bf16.mxu0 %v8266_v38 }
 0x53e   : > { %v2167_v40 = vmul.f32 1.442695, %v2155_v37  ;;  %v2173_v46 = vmul.f32 1.442695, %v2158_v30 }
 0x53f   : > { %v2144_v12 = vpop.xlane.xlu1 %2143  ;;  %v10222_v15 = vpop.permute.xlu0 %2225  ;;  %7794 = vmatpush3.bf16.msra.mxu0 %v8266_v38 }
 0x540   : > { %v2156_v52 = vsub.f32 %v10167_v61, %v2144_v12  ;;  %7775 = vmatprep.subr.bf16.mxu1 %v10222_v15  ;;  %8429 = vpow2.f32 %v2167_v40 }
 0x541   : > { %v10226_v24 = vpop.eup %8421  ;;  %8431 = vpow2.f32 %v2171_v19 }
 0x542   : > { %v2169_v16 = vmul.f32 1.442695, %v2156_v52  ;;  %v2181_v47 = vsel %vm1812_vm2, %v10226_v24, 0.0 }
 0x543   : > { %2182 = vadd.xlane.f32.xlu0 %v2181_v47  ;;  %v2224_v32 = vpop.permute.xlu1 %2223 }
 0x544   : > { %8433 = vpow2.f32 %v2169_v16 }
 0x545   : > { %v10230_v28 = vpop.eup %8423  ;;  %8435 = vpow2.f32 %v2173_v46 }
 0x546   : > { %v10232_v44 = vpop.eup %8425  ;;  %v2184_v61 = vsel %vm1812_vm2, %v10230_v28, 0.0 }
 0x547   : > { %2185 = vadd.xlane.f32.xlu1 %v2184_v61  ;;  %v2175_v62 = vsel %vm1812_vm2, %v10232_v44, 0.0 }
 0x548   : > { %2176 = vadd.xlane.f32.xlu0 %v2175_v62 }
 0x549   : > { %v10238_v0 = vpop.eup %8427 }
 0x54a   : > { %v2178_v5 = vsel %vm1812_vm2, %v10238_v0, 0.0 }
 0x54b   : > { %2179 = vadd.xlane.f32.xlu1 %v2178_v5 }
 0x54d   : > { %v10242_v45 = vpop.eup %8429 }
 0x54e   : > { %v2187_v55 = vsel %vm1812_vm2, %v10242_v45, 0.0  ;;  %v10246_v9 = vpop.eup %8431 }
 0x54f   : > { %2188 = vadd.xlane.f32.xlu1 %v2187_v55  ;;  %v2193_v21 = vsel %vm1812_vm2, %v10246_v9, 0.0 }
 0x551   : > { %v10248_v17 = vpop.eup %8433 }
 0x552   : > { %v2190_v20 = vsel %vm1812_vm2, %v10248_v17, 0.0  ;;  %v10254_v41 = vpop.eup %8435 }
 0x553   : > { %2191 = vadd.xlane.f32.xlu0 %v2190_v20  ;;  %2194 = vadd.xlane.f32.xlu1 %v2193_v21  ;;  %v2196_v13 = vsel %vm1812_vm2, %v10254_v41, 0.0 }
 0x557   : > { %2197 = vadd.xlane.f32.xlu1 %v2196_v13 }
 0x568   : > { %2219 = vrot.lane.b32.xlu1 %v9993_v7, %s9207_s22 }
 0x569   : > { %2221 = vrot.lane.b32.xlu0 %v9987_v6, %s9207_s22 }
 0x56c   : > { %2506 = vrot.lane.b32.xlu1 %v9930_v31, %s9208_s10 }
 0x56d   : > { %2508 = vrot.lane.b32.xlu0 %v9940_v27, %s9208_s10 }
 0x570   : > { %v1869_v25 = vpop.xlane.xlu0 %1868  ;;  %2502 = vrot.lane.b32.xlu1 %v9938_v2, %s9208_s10 }
 0x571   : > { %2504 = vrot.lane.b32.xlu0 %v9934_v26, %s9208_s10 }
 0x574   : > { %v1872_v1 = vpop.xlane.xlu1 %1871  ;;  %v1863_v7 = vpop.xlane.xlu0 %1862  ;;  %2496 = vrot.lane.b32.xlu1 %v9952_v33, %s9208_s10 }
 0x575   : > { %2494 = vrot.lane.b32.xlu0 %v9917_v29, %s9208_s10  ;;  %8437 = vrcp.f32 %v1872_v1 }
 0x576   : > { %8439 = vrcp.f32 %v1863_v7  ;;  %v8267_v7 = vld [vmem:[%s9654_s12 + $0x8] sm:$0xff]  }
 0x577   : > { %8441 = vrcp.f32 %v1869_v25 }
 0x578   : > { %v1866_v6 = vpop.xlane.xlu1 %1865  ;;  %v1881_v48 = vpop.xlane.xlu0 %1880  ;;  %2500 = vrot.lane.b32.xlu1 %v9958_v34, %s9208_s10 }
 0x579   : > { %8443 = vrcp.f32 %v1866_v6  ;;  %2498 = vrot.lane.b32.xlu0 %v9960_v35, %s9208_s10 }
 0x57c   : > { %v1884_v50 = vpop.xlane.xlu1 %1883  ;;  %v1875_v63 = vpop.xlane.xlu0 %1874  ;;  %2905 = vrot.lane.b32.xlu1 %v9930_v31, %s9209_s23 }
 0x57d   : > { %2907 = vrot.lane.b32.xlu0 %v9940_v27, %s9209_s23  ;;  %8445 = vrcp.f32 %v1884_v50 }
 0x57e   : > { %8447 = vrcp.f32 %v1875_v63 }
 0x57f   : > { %8449 = vrcp.f32 %v1881_v48 }
 0x580   : > { %v1878_v37 = vpop.xlane.xlu1 %1877  ;;  %2901 = vrot.lane.b32.xlu1 %v9938_v2, %s9209_s23 }
 0x581   : > { %8451 = vrcp.f32 %v1878_v37  ;;  %2903 = vrot.lane.b32.xlu0 %v9934_v26, %s9209_s23 }
 0x582   : > { %v8438_v40 = vpop.eup %8437 }
 0x583   : > { %v8440_v19 = vpop.eup %8439  ;;  %v1896_v27 = vmul.f32 %v8438_v40, %v10189_v51 }
 0x584   : > { %v8442_v30 = vpop.eup %8441  ;;  %2895 = vrot.lane.b32.xlu1 %v9952_v33, %s9209_s23  ;;  %v1893_v12 = vmul.f32 %v8440_v19, %v10185_v43 }
 0x585   : > { %2893 = vrot.lane.b32.xlu0 %v9917_v29, %s9209_s23  ;;  %v1895_v2 = vmul.f32 %v8442_v30, %v10183_v11 }
 0x586   : > { %v8444_v31 = vpop.eup %8443 }
 0x587   : > { %v1894_v52 = vmul.f32 %v8444_v31, %v10191_v3  ;;  %v1902_v33 = vpack.c.bf16 %v1896_v27, %v1895_v2 }
 0x588   : > { %2899 = vrot.lane.b32.xlu1 %v9958_v34, %s9209_s23 }
 0x589   : > { %2897 = vrot.lane.b32.xlu0 %v9960_v35, %s9209_s23  ;;  %v1901_v26 = vpack.c.bf16 %v1894_v52, %v1893_v12 }
 0x58a   : > { %v8446_v16 = vpop.eup %8445 }
 0x58b   : > { %7751 = vmatprep.mubr.msk.bf16.mxu1 %vm1812_vm2, %v1901_v26  ;;  %v8448_v29 = vpop.eup %8447  ;;  %v1900_v11 = vmul.f32 %v8446_v16, %v10199_v18 }
 0x58c   : > { %7752 = vmatmul.mubr.msk.bf16.vlgmr.msra.gmra.mxu1 %vm1812_vm2, %v1902_v33  ;;  %v8450_v51 = vpop.eup %8449  ;;  %v1897_v34 = vmul.f32 %v8448_v29, %v10205_v58 }
 0x58d   : > { %7776 = vmatpush3.bf16.msra.mxu1 %v10222_v15  ;;  %v1899_v35 = vmul.f32 %v8450_v51, %v10197_v53 }
 0x58e   : > { %v8452_v43 = vpop.eup %8451  ;;  %7777 = vmatprep.subr.bf16.mxu1 %v2224_v32 }
 0x58f   : > { %v1898_v3 = vmul.f32 %v8452_v43, %v10211_v4  ;;  %v1904_v46 = vpack.c.bf16 %v1900_v11, %v1899_v35 }
 0x591   : > { %7778 = vmatpush3.bf16.msra.mxu1 %v2224_v32  ;;  %v1903_v47 = vpack.c.bf16 %v1898_v3, %v1897_v34 }
 0x593   : > { %7755 = vmatprep.mubr.msk.bf16.mxu1 %vm1812_vm2, %v1903_v47 }
 0x594   : > { %7756 = vmatmul.mubr.msk.bf16.gmra.mxu1 %vm1812_vm2, %v1904_v46 }
 0x5cc   : > { %v2183_v61 = vpop.xlane.xlu0 %2182 }
 0x5d0   : > { %v2186_v62 = vpop.xlane.xlu1 %2185 }
 0x5d1   : > { %v2177_v15 = vpop.xlane.xlu0 %2176 }
 0x5d2   : > { %8453 = vrcp.f32 %v2177_v15 }
 0x5d3   : > { %8455 = vrcp.f32 %v2186_v62 }
 0x5d4   : > { %v2180_v5 = vpop.xlane.xlu1 %2179 }
 0x5d5   : > { %8457 = vrcp.f32 %v2180_v5 }
 0x5d6   : > { %8459 = vrcp.f32 %v2183_v61 }
 0x5d8   : > { %v2189_v18 = vpop.xlane.xlu1 %2188 }
 0x5d9   : > { %8461 = vrcp.f32 %v2189_v18 }
 0x5dc   : > { %v2192_v58 = vpop.xlane.xlu0 %2191  ;;  %v2195_v4 = vpop.xlane.xlu1 %2194 }
 0x5dd   : > { %8463 = vrcp.f32 %v2192_v58 }
 0x5de   : > { %8465 = vrcp.f32 %v2195_v4 }
 0x5df   : > { %v8454_v53 = vpop.eup %8453 }
 0x5e0   : > { %v2222_v55 = vpop.permute.xlu0 %2221  ;;  %v8456_v20 = vpop.eup %8455  ;;  %v2207_v38 = vmul.f32 %v8454_v53, %v10232_v44  ;;  %v8268_v44 = vld [vmem:[%s9654_s12] sm:$0xff]  }
 0x5e1   : > { %v2198_v21 = vpop.xlane.xlu1 %2197  ;;  %7779 = vmatprep.subr.bf16.mxu1 %v2222_v55  ;;  %v2210_v25 = vmul.f32 %v8456_v20, %v10230_v28 }
 0x5e2   : > { %v8458_v13 = vpop.eup %8457  ;;  %8467 = vrcp.f32 %v2198_v21  ;;  %7780 = vmatpush3.bf16.msra.mxu1 %v2222_v55 }
 0x5e3   : > { %v8460_v39 = vpop.eup %8459  ;;  %v2208_v32 = vmul.f32 %v8458_v13, %v10238_v0 }
 0x5e4   : > { %v2509_v1 = vpop.permute.xlu0 %2508  ;;  %v2209_v50 = vmul.f32 %v8460_v39, %v10226_v24 }
 0x5e5   : > { %v2220_v6 = vpop.permute.xlu1 %2219  ;;  %8087 = vmatprep.subr.msk.bf16.mxu0 %vm1714_vm0, %v2509_v1  ;;  %v2215_v48 = vpack.c.bf16 %v2208_v32, %v2207_v38  ;;  %v2532_v62 = vsel %vm1714_vm0, %v2509_v1, 0 }
 0x5e6   : > { %7781 = vmatprep.subr.bf16.mxu1 %v2220_v6  ;;  %v8462_v63 = vpop.eup %8461  ;;  %v2216_v37 = vpack.c.bf16 %v2210_v25, %v2209_v50 }
 0x5e7   : > { %7782 = vmatpush3.bf16.msra.mxu1 %v2220_v6  ;;  %7783 = vmatprep.mubr.msk.bf16.mxu1 %vm1812_vm2, %v2215_v48  ;;  %v2211_v28 = vmul.f32 %v8462_v63, %v10242_v45 }
 0x5e8   : > { %7803 = vmatprep.subr.bf16.mxu1 %v8267_v7  ;;  %v2505_v18 = vpop.permute.xlu0 %2504 }
 0x5e9   : > { %v2507_v15 = vpop.permute.xlu1 %2506  ;;  %v2526_v39 = vsel %vm1714_vm0, %v2505_v18, 0 }
 0x5ea   : > { %v8464_v40 = vpop.eup %8463  ;;  %7784 = vmatmul.mubr.msk.bf16.vlgmr.msra.gmra.mxu1 %vm1812_vm2, %v2216_v37  ;;  %v2529_v20 = vsel %vm1714_vm0, %v2507_v15, 0 }
 0x5eb   : > { %v2212_v0 = vmul.f32 %v8464_v40, %v10248_v17  ;;  %7804 = vmatpush3.bf16.msra.mxu1 %v8267_v7  ;;  %v8466_v19 = vpop.eup %8465 }
 0x5ec   : > { %7805 = vmatprep.subr.bf16.mxu1 %v8268_v44  ;;  %v2213_v31 = vmul.f32 %v8466_v19, %v10246_v9  ;;  %v2495_v21 = vpop.permute.xlu0 %2494 }
 0x5ed   : > { %v2217_v30 = vpack.c.bf16 %v2212_v0, %v2211_v28  ;;  %v2503_v13 = vpop.permute.xlu1 %2502  ;;  %v10352_v0 = vld [vmem:[#allocation3 + $0xac] ss:$12 sps:$4 sm:$0xff]  }
 0x5ee   : > { %v2523_v25 = vsel %vm1714_vm0, %v2503_v13, 0 }
 0x5ef   : > { %v8468_v24 = vpop.eup %8467  ;;  %7787 = vmatprep.mubr.msk.bf16.mxu1 %vm1812_vm2, %v2217_v30  ;;  %7806 = vmatpush3.bf16.msra.mxu1 %v8268_v44 }
 0x5f0   : > { %v2214_v27 = vmul.f32 %v8468_v24, %v10254_v41  ;;  %v2499_v38 = vpop.permute.xlu0 %2498  ;;  %v3409_v24 = vsel %vm1714_vm0, %v10352_v0, 0 }
 0x5f1   : > { %v2497_v32 = vpop.permute.xlu1 %2496 }
 0x5f2   : > { %v2218_v12 = vpack.c.bf16 %v2214_v27, %v2213_v31  ;;  %v10359_v31 = vld [vmem:[#allocation3 + $0x94] ss:$12 sps:$4 sm:$0xff]  }
 0x5f4   : > { %7788 = vmatmul.mubr.msk.bf16.gmra.mxu1 %vm1812_vm2, %v2218_v12  ;;  %v2908_v1 = vpop.permute.xlu0 %2907  ;;  %v10364_v12 = vld [vmem:[#allocation3 + $0x60] ss:$12 sps:$4 sm:$0xff]  }
 0x5f5   : > { %v2501_v7 = vpop.permute.xlu1 %2500  ;;  %v2931_v6 = vsel %vm1714_vm0, %v2908_v1, 0 }
 0x5f8   : > { %v2904_v50 = vpop.permute.xlu0 %2903 }
 0x5f9   : > { %v2906_v48 = vpop.permute.xlu1 %2905  ;;  %v2925_v44 = vsel %vm1714_vm0, %v2904_v50, 0 }
 0x5fa   : > { %v2928_v37 = vsel %vm1714_vm0, %v2906_v48, 0 }
 0x5fc   : > { %v2894_v63 = vpop.permute.xlu0 %2893 }
 0x5fd   : > { %v2902_v40 = vpop.permute.xlu1 %2901 }
 0x5fe   : > { %v2922_v28 = vsel %vm1714_vm0, %v2902_v40, 0 }
 0x600   : > { %v2898_v30 = vpop.permute.xlu0 %2897 }
 0x601   : > { %v2896_v19 = vpop.permute.xlu1 %2895 }
 0x605   : > { %v2900_v27 = vpop.permute.xlu1 %2899 }
 0x64c   : > { %v7753_v52 = vpop.f32.mrf.mxu1 }
 0x64e   : > { %v1975_v2 = vpop.f32.mrf.mxu1 }
 0x650   : > { %v7754_v45 = vpop.f32.mrf.mxu1 }
 0x651   : > { %v2007_v33 = vpack.c.bf16 %v7754_v45, %v7753_v52  ;;  %v3406_v52 = vsel %vm1714_vm0, %v10359_v31, 0 }
 0x652   : > { %v1978_v26 = vpop.f32.mrf.mxu1 }
 0x653   : > { %v2006_v17 = vpack.c.bf16 %v1978_v26, %v1975_v2  ;;  %v10369_v2 = vld [vmem:[#allocation3 + $0x7c] ss:$12 sps:$4 sm:$0xff]   ;;  %v10377_v26 = vld [vmem:[#allocation3 + $0x64] ss:$12 sps:$4 sm:$0xff]  }
 0x654   : > { %v7757_v16 = vpop.f32.mrf.mxu1  ;;  %v3403_v45 = vsel %vm1714_vm0, %v10369_v2, 0 }
 0x655   : > { %7807 = vmatprep.mubr.msk.bf16.mxu1 %vm1714_vm0, %v2006_v17  ;;  %v3400_v17 = vsel %vm1714_vm0, %v10377_v26, 0 }
 0x656   : > { %v1991_v29 = vpop.f32.mrf.mxu1  ;;  %7808 = vmatmul.mubr.msk.bf16.vlgmr.msra.gmra.mxu1 %vm1714_vm0, %v2007_v33  ;;  %v10383_v33 = vld [vmem:[#allocation3 + $0x78] ss:$12 sps:$4 sm:$0xff]  }
 0x658   : > { %v7758_v51 = vpop.f32.mrf.mxu1 }
 0x659   : > { %v2009_v11 = vpack.c.bf16 %v7758_v51, %v7757_v16  ;;  %v10385_v16 = vld [vmem:[#allocation3 + $0x90] ss:$12 sps:$4 sm:$0xff]  }
 0x65a   : > { %v1994_v43 = vpop.f32.mrf.mxu1 }
 0x65b   : > { %v2008_v9 = vpack.c.bf16 %v1994_v43, %v1991_v29  ;;  %v10391_v29 = vld [vmem:[#allocation3 + $0xa8] ss:$12 sps:$4 sm:$0xff]  }
 0x65d   : > { %7811 = vmatprep.mubr.msk.bf16.mxu1 %vm1714_vm0, %v2008_v9 }
 0x65e   : > { %7812 = vmatmul.mubr.msk.bf16.gmra.mxu1 %vm1714_vm0, %v2009_v11 }
 0x6aa   : > { %v7785_v41 = vpop.f32.mrf.mxu1 }
 0x6ac   : > { %v2277_v34 = vpop.f32.mrf.mxu1 }
 0x6ae   : > { %v7786_v3 = vpop.f32.mrf.mxu1 }
 0x6af   : > { %v2309_v46 = vpack.c.bf16 %v7786_v3, %v7785_v41 }
 0x6b0   : > { %v2280_v35 = vpop.f32.mrf.mxu1 }
 0x6b1   : > { %v2308_v47 = vpack.c.bf16 %v2280_v35, %v2277_v34 }
 0x6b3   : > { %7795 = vmatprep.mubr.msk.bf16.mxu0 %vm1714_vm0, %v2308_v47 }
 0x6b4   : > { %v7789_v61 = vpop.f32.mrf.mxu1  ;;  %7796 = vmatmul.mubr.msk.bf16.vlgmr.msra.gmra.mxu0 %vm1714_vm0, %v2309_v46 }
 0x6b5   : > { %7816 = vmatpush3.bf16.xpose.msra.mxu0 %v2532_v62 }
 0x6b6   : > { %8088 = vmatprep.subr.msk.bf16.mxu0 %vm1714_vm0, %v2507_v15  ;;  %v2293_v5 = vpop.f32.mrf.mxu1 }
 0x6b8   : > { %v7790_v58 = vpop.f32.mrf.mxu1 }
 0x6b9   : > { %v2311_v55 = vpack.c.bf16 %v7790_v58, %v7789_v61 }
 0x6ba   : > { %v2296_v4 = vpop.f32.mrf.mxu1 }
 0x6bb   : > { %v2310_v53 = vpack.c.bf16 %v2296_v4, %v2293_v5 }
 0x6bd   : > { %7818 = vmatpush3.bf16.xpose.msra.mxu0 %v2529_v20  ;;  %7799 = vmatprep.mubr.msk.bf16.mxu0 %vm1714_vm0, %v2310_v53 }
 0x6be   : > { %8089 = vmatprep.subr.msk.bf16.mxu0 %vm1714_vm0, %v2505_v18  ;;  %7800 = vmatmul.mubr.msk.bf16.gmra.mxu0 %vm1714_vm0, %v2311_v55 }
 0x6bf   : > { %7823 = vmatprep.mubr.msk.bf16.mxu0 %vm1714_vm0, %v2495_v21 }
 0x6c5   : > { %7820 = vmatpush3.bf16.xpose.msra.mxu0 %v2526_v39 }
 0x6c6   : > { %8090 = vmatprep.subr.msk.bf16.mxu0 %vm1714_vm0, %v2503_v13 }
 0x6cd   : > { %7822 = vmatpush3.bf16.xpose.msra.mxu0 %v2523_v25 }
 0x6ce   : > { %8091 = vmatprep.subr.msk.bf16.mxu0 %vm1714_vm0, %v2908_v1 }
 0x6d4   : > { %7824 = vmatmul.mubr.msk.bf16.vlgmr.msra.gmra.mxu0 %vm1714_vm0, %v2497_v32 }
 0x6d5   : > { %7827 = vmatprep.mubr.msk.bf16.mxu0 %vm1714_vm0, %v2499_v38  ;;  %7860 = vmatpush3.bf16.xpose.msra.mxu0 %v2931_v6 }
 0x6d6   : > { %8092 = vmatprep.subr.msk.bf16.mxu0 %vm1714_vm0, %v2906_v48 }
 0x6dc   : > { %7828 = vmatmul.mubr.msk.bf16.gmra.mxu0 %vm1714_vm0, %v2501_v7 }
 0x6dd   : > { %7862 = vmatpush3.bf16.xpose.msra.mxu0 %v2928_v37  ;;  %7867 = vmatprep.mubr.msk.bf16.mxu0 %vm1714_vm0, %v2894_v63 }
 0x6de   : > { %8093 = vmatprep.subr.msk.bf16.mxu0 %vm1714_vm0, %v2904_v50 }
 0x6e5   : > { %7864 = vmatpush3.bf16.xpose.msra.mxu0 %v2925_v44 }
 0x6e6   : > { %8094 = vmatprep.subr.msk.bf16.mxu0 %vm1714_vm0, %v2902_v40 }
 0x6ed   : > { %7866 = vmatpush3.bf16.xpose.msra.mxu0 %v2922_v28 }
 0x6ee   : > { %8095 = vmatprep.subr.msk.bf16.mxu0 %vm1714_vm0, %v10352_v0 }
 0x6f4   : > { %7868 = vmatmul.mubr.msk.bf16.vlgmr.msra.gmra.mxu0 %vm1714_vm0, %v2896_v19 }
 0x6f5   : > { %7871 = vmatprep.mubr.msk.bf16.mxu0 %vm1714_vm0, %v2898_v30  ;;  %7904 = vmatpush3.bf16.xpose.msra.mxu0 %v3409_v24 }
 0x6f6   : > { %8096 = vmatprep.subr.msk.bf16.mxu0 %vm1714_vm0, %v10359_v31 }
 0x6fc   : > { %7872 = vmatmul.mubr.msk.bf16.gmra.mxu0 %vm1714_vm0, %v2900_v27 }
 0x6fd   : > { %7906 = vmatpush3.bf16.xpose.msra.mxu0 %v3406_v52  ;;  %7911 = vmatprep.mubr.msk.bf16.mxu0 %vm1714_vm0, %v10364_v12 }
 0x6fe   : > { %8097 = vmatprep.subr.msk.bf16.mxu0 %vm1714_vm0, %v10369_v2 }
 0x705   : > { %7908 = vmatpush3.bf16.xpose.msra.mxu0 %v3403_v45 }
 0x706   : > { %8098 = vmatprep.subr.msk.bf16.mxu0 %vm1714_vm0, %v10377_v26 }
 0x70d   : > { %7910 = vmatpush3.bf16.xpose.msra.mxu0 %v3400_v17 }
 0x714   : > { %7912 = vmatmul.mubr.msk.bf16.vlgmr.msra.gmra.mxu0 %vm1714_vm0, %v10383_v33 }
 0x715   : > { %7915 = vmatprep.mubr.msk.bf16.mxu0 %vm1714_vm0, %v10385_v16 }
 0x71c   : > { %7916 = vmatmul.mubr.msk.bf16.gmra.mxu0 %vm1714_vm0, %v10391_v29 }
 0x774   : > { %v10395_v51 = vpop.f32.mrf.mxu0 }
 0x776   : > { %v10397_v43 = vpop.f32.mrf.mxu0 }
 0x778   : > { %v10399_v9 = vpop.f32.mrf.mxu0 }
 0x77a   : > { %v10401_v11 = vpop.f32.mrf.mxu0 }
 0x77e   : > { %v10403_v41 = vpop.f32.mrf.mxu0 }
 0x780   : > { %v10405_v34 = vpop.f32.mrf.mxu0 }
 0x782   : > { %v10407_v3 = vpop.f32.mrf.mxu0 }
 0x784   : > { %v10409_v35 = vpop.f32.mrf.mxu0 }
 0x785   : > { %12382 = vst [vmem:[#allocation32_spill] sm:$0xff] %v10409_v35 }
 0x794   : > { %v7825_v47 = vpop.f32.mrf.mxu0 }
 0x795   : > { %v2601_v5 = vsel %vm10036_vm1, %v7825_v47, -1e+30 }
 0x796   : > { %v2568_v46 = vpop.f32.mrf.mxu0  ;;  %v2613_v53 = vsel %vm1812_vm2, %v2601_v5, -inf }
 0x797   : > { %v2599_v61 = vsel %vm10041_vm3, %v2568_v46, -1e+30 }
 0x798   : > { %v7826_v62 = vpop.f32.mrf.mxu0  ;;  %v2607_v15 = vsel %vm1812_vm2, %v2599_v61, -inf }
 0x799   : > { %2608 = vmax.xlane.f32.xlu0 %v2607_v15  ;;  %v2602_v20 = vsel %vm10057_vm4, %v7826_v62, -1e+30 }
 0x79a   : > { %v2571_v18 = vpop.f32.mrf.mxu0  ;;  %v2616_v39 = vsel %vm1812_vm2, %v2602_v20, -inf }
 0x79b   : > { %v2600_v58 = vsel %vm10062_vm5, %v2571_v18, -1e+30 }
 0x79c   : > { %v7829_v4 = vpop.f32.mrf.mxu0  ;;  %v2610_v55 = vsel %vm1812_vm2, %v2600_v58, -inf }
 0x79d   : > { %2614 = vmax.xlane.f32.xlu0 %v2613_v53  ;;  %2611 = vmax.xlane.f32.xlu1 %v2610_v55  ;;  %v2605_v6 = vsel %vm10077_vm6, %v7829_v4, -1e+30 }
 0x79e   : > { %v2584_v21 = vpop.f32.mrf.mxu0  ;;  %v2625_v50 = vsel %vm1812_vm2, %v2605_v6, -inf }
 0x79f   : > { %v2603_v38 = vsel %vm10095_vm8, %v2584_v21, -1e+30 }
 0x7a0   : > { %v7830_v13 = vpop.f32.mrf.mxu0  ;;  %v2619_v1 = vsel %vm1812_vm2, %v2603_v38, -inf }
 0x7a1   : > { %2617 = vmax.xlane.f32.xlu0 %v2616_v39  ;;  %v2606_v48 = vsel %vm10087_vm7, %v7830_v13, -1e+30 }
 0x7a2   : > { %v2587_v32 = vpop.f32.mrf.mxu0  ;;  %v2628_v63 = vsel %vm1812_vm2, %v2606_v48, -inf }
 0x7a3   : > { %v10427_v25 = vsel %vm10099_vm9, %v2587_v32, -1e+30 }
 0x7a4   : > { %v2622_v7 = vsel %vm1812_vm2, %v10427_v25, -inf }
 0x7a5   : > { %2620 = vmax.xlane.f32.xlu0 %v2619_v1  ;;  %2623 = vmax.xlane.f32.xlu1 %v2622_v7 }
 0x7a9   : > { %2626 = vmax.xlane.f32.xlu0 %v2625_v50  ;;  %2629 = vmax.xlane.f32.xlu1 %v2628_v63  ;;  %v10466_v50 = vld [vmem:[#allocation3 + $0x20] ss:$12 sps:$4 sm:$0xff]  }
 0x822   : > { %v2609_v37 = vpop.xlane.xlu0 %2608 }
 0x823   : > { %v2631_v44 = vsub.f32 %v2599_v61, %v2609_v37 }
 0x825   : > { %v2639_v27 = vmul.f32 1.442695, %v2631_v44  ;;  %v10470_v44 = vld [vmem:[#allocation3 + $0x50] ss:$12 sps:$4 sm:$0xff]  }
 0x826   : > { %v2612_v40 = vpop.xlane.xlu1 %2611  ;;  %v2615_v28 = vpop.xlane.xlu0 %2614 }
 0x827   : > { %v2633_v19 = vsub.f32 %v2601_v5, %v2615_v28  ;;  %v2632_v30 = vsub.f32 %v2600_v58, %v2612_v40 }
 0x829   : > { %v2643_v24 = vmul.f32 1.442695, %v2633_v19  ;;  %v2641_v17 = vmul.f32 1.442695, %v2632_v30 }
 0x82a   : > { %v2618_v52 = vpop.xlane.xlu0 %2617 }
 0x82b   : > { %v2634_v45 = vsub.f32 %v2602_v20, %v2618_v52  ;;  %8469 = vpow2.f32 %v2643_v24  ;;  %v7869_v24 = vpop.f32.mrf.mxu0 }
 0x82c   : > { %8471 = vpow2.f32 %v2639_v27 }
 0x82d   : > { %v2645_v47 = vmul.f32 1.442695, %v2634_v45  ;;  %v2967_v27 = vpop.f32.mrf.mxu0 }
 0x82e   : > { %v2621_v46 = vpop.xlane.xlu0 %2620  ;;  %v2624_v63 = vpop.xlane.xlu1 %2623 }
 0x82f   : > { %8473 = vpow2.f32 %v2645_v47  ;;  %v2635_v62 = vsub.f32 %v2603_v38, %v2621_v46  ;;  %v2636_v28 = vsub.f32 %v10427_v25, %v2624_v63  ;;  %v7870_v45 = vpop.f32.mrf.mxu0  ;;  %v10513_v63 = vld [vmem:[#allocation3 + $0x8] ss:$12 sps:$4 sm:$0xff]  }
 0x830   : > { %8475 = vpow2.f32 %v2641_v17 }
 0x831   : > { %v2647_v61 = vmul.f32 1.442695, %v2635_v62  ;;  %v2649_v30 = vmul.f32 1.442695, %v2636_v28  ;;  %v2970_v25 = vpop.f32.mrf.mxu0 }
 0x832   : > { %v2627_v15 = vpop.xlane.xlu0 %2626  ;;  %v2630_v37 = vpop.xlane.xlu1 %2629 }
 0x833   : > { %v2637_v18 = vsub.f32 %v2605_v6, %v2627_v15  ;;  %v10462_v6 = vld [vmem:[#allocation3 + $0x38] ss:$12 sps:$4 sm:$0xff]   ;;  %v2638_v40 = vsub.f32 %v2606_v48, %v2630_v37  ;;  %v10483_v48 = vsel %vm10041_vm3, %v2967_v27, -1e+30  ;;  %v10491_v15 = vsel %vm10036_vm1, %v7869_v24, -1e+30 }
 0x834   : > { %v3006_v62 = vsel %vm1812_vm2, %v10483_v48, -inf }
 0x835   : > { %v2651_v4 = vmul.f32 1.442695, %v2637_v18  ;;  %v2653_v19 = vmul.f32 1.442695, %v2638_v40  ;;  %v7873_v18 = vpop.f32.mrf.mxu0  ;;  %v10519_v40 = vsel %vm10062_vm5, %v2970_v25, -1e+30 }
 0x837   : > { %8477 = vpow2.f32 %v2651_v4  ;;  %v3012_v4 = vsel %vm1812_vm2, %v10491_v15, -inf }
 0x838   : > { %v10438_v53 = vpop.eup %8469  ;;  %8479 = vpow2.f32 %v2647_v61  ;;  %v10497_v61 = vsel %vm10057_vm4, %v7870_v45, -1e+30 }
 0x839   : > { %v2661_v5 = vsel %vm1812_vm2, %v10438_v53, 0.0  ;;  %v10442_v58 = vpop.eup %8471  ;;  %8481 = vpow2.f32 %v2653_v19  ;;  %v3009_v19 = vsel %vm1812_vm2, %v10519_v40, -inf }
 0x83a   : > { %2662 = vadd.xlane.f32.xlu0 %v2661_v5  ;;  %v2655_v13 = vsel %vm1812_vm2, %v10442_v58, 0.0  ;;  %8483 = vpow2.f32 %v2649_v30  ;;  %v2983_v5 = vpop.f32.mrf.mxu0 }
 0x83c   : > { %v10444_v55 = vpop.eup %8473  ;;  %v7874_v37 = vpop.f32.mrf.mxu0 }
 0x83d   : > { %v2664_v20 = vsel %vm1812_vm2, %v10444_v55, 0.0  ;;  %v10448_v21 = vpop.eup %8475  ;;  %v10531_v27 = vsel %vm10087_vm7, %v7874_v37, -1e+30 }
 0x83e   : > { %2665 = vadd.xlane.f32.xlu1 %v2664_v20  ;;  %2656 = vadd.xlane.f32.xlu0 %v2655_v13  ;;  %v2658_v39 = vsel %vm1812_vm2, %v10448_v21, 0.0  ;;  %v3015_v20 = vsel %vm1812_vm2, %v10497_v61, -inf  ;;  %v10503_v13 = vsel %vm10095_vm8, %v2983_v5, -1e+30  ;;  %v2986_v28 = vpop.f32.mrf.mxu0  ;;  %v3027_v45 = vsel %vm1812_vm2, %v10531_v27, -inf }
 0x83f   : > { %v10525_v30 = vsel %vm10099_vm9, %v2986_v28, -1e+30 }
 0x840   : > { %v3021_v24 = vsel %vm1812_vm2, %v10525_v30, -inf }
 0x842   : > { %2659 = vadd.xlane.f32.xlu1 %v2658_v39  ;;  %v3018_v39 = vsel %vm1812_vm2, %v10503_v13, -inf }
 0x844   : > { %v10454_v38 = vpop.eup %8477 }
 0x845   : > { %v2673_v32 = vsel %vm1812_vm2, %v10454_v38, 0.0  ;;  %v10458_v1 = vpop.eup %8479 }
 0x846   : > { %2674 = vadd.xlane.f32.xlu0 %v2673_v32  ;;  %v2667_v7 = vsel %vm1812_vm2, %v10458_v1, 0.0  ;;  %v10475_v52 = vpop.eup %8481  ;;  %v10509_v32 = vsel %vm10077_vm6, %v7873_v18, -1e+30 }
 0x847   : > { %v2676_v17 = vsel %vm1812_vm2, %v10475_v52, 0.0  ;;  %v10479_v47 = vpop.eup %8483 }
 0x848   : > { %v2670_v46 = vsel %vm1812_vm2, %v10479_v47, 0.0 }
 0x84a   : > { %2668 = vadd.xlane.f32.xlu0 %v2667_v7  ;;  %v3024_v7 = vsel %vm1812_vm2, %v10509_v32, -inf }
 0x853   : > { %2703 = vrot.lane.b32.xlu1 %v10462_v6, %s9208_s10 }
 0x857   : > { %2701 = vrot.lane.b32.xlu1 %v10466_v50, %s9208_s10 }
 0x860   : > { %2705 = vrot.lane.b32.xlu0 %v10470_v44, %s9208_s10 }
 0x87b   : > { %2677 = vadd.xlane.f32.xlu1 %v2676_v17 }
 0x87f   : > { %2671 = vadd.xlane.f32.xlu1 %v2670_v46  ;;  %3007 = vmax.xlane.f32.xlu0 %v3006_v62 }
 0x883   : > { %3013 = vmax.xlane.f32.xlu0 %v3012_v4 }
 0x887   : > { %3016 = vmax.xlane.f32.xlu0 %v3015_v20 }
 0x88b   : > { %3019 = vmax.xlane.f32.xlu0 %v3018_v39 }
 0x88f   : > { %3025 = vmax.xlane.f32.xlu0 %v3024_v7 }
 0x890   : > { %2699 = vrot.lane.b32.xlu1 %v10513_v63, %s9208_s10 }
 0x8b4   : > { %3010 = vmax.xlane.f32.xlu1 %v3009_v19 }
 0x8b8   : > { %3022 = vmax.xlane.f32.xlu1 %v3021_v24 }
 0x8bc   : > { %3028 = vmax.xlane.f32.xlu1 %v3027_v45 }
 0x8c3   : > { %v2663_v17 = vpop.xlane.xlu0 %2662 }
 0x8c7   : > { %v2666_v25 = vpop.xlane.xlu1 %2665  ;;  %v2657_v46 = vpop.xlane.xlu0 %2656 }
 0x8c8   : > { %8485 = vrcp.f32 %v2657_v46 }
 0x8cb   : > { %v2660_v62 = vpop.xlane.xlu1 %2659 }
 0x8cc   : > { %8487 = vrcp.f32 %v2660_v62 }
 0x8cd   : > { %8489 = vrcp.f32 %v2666_v25 }
 0x8ce   : > { %8491 = vrcp.f32 %v2663_v17 }
 0x8cf   : > { %v2675_v18 = vpop.xlane.xlu0 %2674  ;;  %v2704_v20 = vpop.permute.xlu1 %2703 }
 0x8d3   : > { %v2669_v4 = vpop.xlane.xlu0 %2668  ;;  %v2702_v24 = vpop.permute.xlu1 %2701 }
 0x8d5   : > { %v8486_v5 = vpop.eup %8485 }
 0x8d6   : > { %v2687_v37 = vmul.f32 %v8486_v5, %v10442_v58 }
 0x8d7   : > { %v2706_v39 = vpop.permute.xlu0 %2705 }
 0x8d8   : > { %7831 = vmatprep.subr.bf16.mxu1 %v2706_v39 }
 0x8d9   : > { %v8488_v7 = vpop.eup %8487  ;;  %7832 = vmatpush3.bf16.msra.mxu1 %v2706_v39 }
 0x8da   : > { %v2688_v28 = vmul.f32 %v8488_v7, %v10448_v21  ;;  %7833 = vmatprep.subr.bf16.mxu1 %v2704_v20  ;;  %v8490_v46 = vpop.eup %8489 }
 0x8db   : > { %v8492_v5 = vpop.eup %8491  ;;  %v2690_v21 = vmul.f32 %v8490_v46, %v10444_v55 }
 0x8dc   : > { %v2695_v19 = vpack.c.bf16 %v2688_v28, %v2687_v37  ;;  %v2689_v7 = vmul.f32 %v8492_v5, %v10438_v53 }
 0x8dd   : > { %7834 = vmatpush3.bf16.msra.mxu1 %v2704_v20 }
 0x8de   : > { %7839 = vmatprep.mubr.msk.bf16.mxu1 %vm1812_vm2, %v2695_v19  ;;  %7835 = vmatprep.subr.bf16.mxu1 %v2702_v24  ;;  %v2696_v25 = vpack.c.bf16 %v2690_v21, %v2689_v7 }
 0x8e1   : > { %7836 = vmatpush3.bf16.msra.mxu1 %v2702_v24 }
 0x904   : > { %v2678_v45 = vpop.xlane.xlu1 %2677 }
 0x905   : > { %8493 = vrcp.f32 %v2678_v45 }
 0x906   : > { %8495 = vrcp.f32 %v2669_v4 }
 0x907   : > { %8497 = vrcp.f32 %v2675_v18 }
 0x908   : > { %v2672_v62 = vpop.xlane.xlu1 %2671  ;;  %v3008_v58 = vpop.xlane.xlu0 %3007 }
 0x909   : > { %8499 = vrcp.f32 %v2672_v62  ;;  %v3030_v39 = vsub.f32 %v10483_v48, %v3008_v58 }
 0x90b   : > { %v3038_v4 = vmul.f32 1.442695, %v3030_v39 }
 0x90c   : > { %v2700_v20 = vpop.permute.xlu1 %2699  ;;  %v3014_v37 = vpop.xlane.xlu0 %3013 }
 0x90d   : > { %7837 = vmatprep.subr.bf16.mxu1 %v2700_v20  ;;  %v3032_v17 = vsub.f32 %v10491_v15, %v3014_v37 }
 0x90e   : > { %7838 = vmatpush3.bf16.msra.mxu1 %v2700_v20 }
 0x90f   : > { %v3042_v28 = vmul.f32 1.442695, %v3032_v17 }
 0x910   : > { %v3017_v18 = vpop.xlane.xlu0 %3016 }
 0x911   : > { %7840 = vmatmul.mubr.msk.bf16.vlgmr.msra.gmra.mxu1 %vm1812_vm2, %v2696_v25  ;;  %8501 = vpow2.f32 %v3042_v28  ;;  %v3033_v19 = vsub.f32 %v10497_v61, %v3017_v18 }
 0x912   : > { %v8494_v55 = vpop.eup %8493  ;;  %8503 = vpow2.f32 %v3038_v4 }
 0x913   : > { %v8496_v24 = vpop.eup %8495  ;;  %v3044_v48 = vmul.f32 1.442695, %v3033_v19  ;;  %v2694_v15 = vmul.f32 %v8494_v55, %v10475_v52  ;;  %v8277_v19 = vld [vmem:[%s9654_s12 + $0x28] sm:$0xff]   ;;  %v8278_v55 = vld [vmem:[%s9654_s12 + $0x20] sm:$0xff]  }
 0x914   : > { %v8498_v45 = vpop.eup %8497  ;;  %v3020_v53 = vpop.xlane.xlu0 %3019  ;;  %v2691_v62 = vmul.f32 %v8496_v24, %v10458_v1  ;;  %7847 = vmatprep.subr.bf16.mxu1 %v8277_v19 }
 0x915   : > { %8505 = vpow2.f32 %v3044_v48  ;;  %v3034_v5 = vsub.f32 %v10503_v13, %v3020_v53  ;;  %v2693_v21 = vmul.f32 %v8498_v45, %v10454_v38  ;;  %7848 = vmatpush3.bf16.msra.mxu1 %v8277_v19 }
 0x916   : > { %v8500_v46 = vpop.eup %8499  ;;  %7849 = vmatprep.subr.bf16.mxu1 %v8278_v55 }
 0x917   : > { %v2692_v58 = vmul.f32 %v8500_v46, %v10479_v47  ;;  %v2698_v7 = vpack.c.bf16 %v2694_v15, %v2693_v21  ;;  %v3046_v37 = vmul.f32 1.442695, %v3034_v5  ;;  %v7913_v15 = vpop.f32.mrf.mxu0 }
 0x918   : > { %v3026_v39 = vpop.xlane.xlu0 %3025  ;;  %v10591_v21 = vsel %vm10036_vm1, %v7913_v15, -1e+30  ;;  %v10629_v15 = vpop.f32.mrf.mxu1 }
 0x919   : > { %v2697_v61 = vpack.c.bf16 %v2692_v58, %v2691_v62  ;;  %v3036_v20 = vsub.f32 %v10509_v32, %v3026_v39  ;;  %7850 = vmatpush3.bf16.msra.mxu1 %v8278_v55  ;;  %v3445_v62 = vpop.f32.mrf.mxu0 }
 0x91a   : > { %v10583_v5 = vsel %vm10041_vm3, %v3445_v62, -1e+30 }
 0x91b   : > { %7843 = vmatprep.mubr.msk.bf16.mxu1 %vm1812_vm2, %v2697_v61  ;;  %v3050_v17 = vmul.f32 1.442695, %v3036_v20  ;;  %v7914_v58 = vpop.f32.mrf.mxu0  ;;  %v3490_v20 = vsel %vm1812_vm2, %v10591_v21, -inf }
 0x91c   : > { %7844 = vmatmul.mubr.msk.bf16.gmra.mxu1 %vm1812_vm2, %v2698_v7 }
 0x91d   : > { %8507 = vpow2.f32 %v3050_v17 }
 0x91e   : > { %v10552_v52 = vpop.eup %8501  ;;  %8509 = vpow2.f32 %v3046_v37 }
 0x91f   : > { %v3060_v1 = vsel %vm1812_vm2, %v10552_v52, 0.0  ;;  %v10556_v38 = vpop.eup %8503 }
 0x920   : > { %3061 = vadd.xlane.f32.xlu0 %v3060_v1  ;;  %v3054_v13 = vsel %vm1812_vm2, %v10556_v38, 0.0 }
 0x922   : > { %v10558_v47 = vpop.eup %8505 }
 0x923   : > { %v3063_v32 = vsel %vm1812_vm2, %v10558_v47, 0.0 }
 0x924   : > { %3055 = vadd.xlane.f32.xlu0 %v3054_v13  ;;  %3064 = vadd.xlane.f32.xlu1 %v3063_v32 }
 0x92a   : > { %v10564_v25 = vpop.eup %8507 }
 0x92b   : > { %v3072_v4 = vsel %vm1812_vm2, %v10564_v25, 0.0  ;;  %v10568_v28 = vpop.eup %8509 }
 0x92c   : > { %3073 = vadd.xlane.f32.xlu0 %v3072_v4  ;;  %v3066_v18 = vsel %vm1812_vm2, %v10568_v28, 0.0 }
 0x930   : > { %3067 = vadd.xlane.f32.xlu0 %v3066_v18 }
 0x93d   : > { %v3011_v24 = vpop.xlane.xlu1 %3010 }
 0x93e   : > { %v3031_v48 = vsub.f32 %v10519_v40, %v3011_v24  ;;  %v3448_v40 = vpop.f32.mrf.mxu0 }
 0x940   : > { %v3040_v45 = vmul.f32 1.442695, %v3031_v48  ;;  %v7917_v39 = vpop.f32.mrf.mxu0 }
 0x941   : > { %v3023_v61 = vpop.xlane.xlu1 %3022  ;;  %v10612_v32 = vsel %vm10077_vm6, %v7917_v39, -1e+30 }
 0x942   : > { %8511 = vpow2.f32 %v3040_v45  ;;  %v3461_v7 = vpop.f32.mrf.mxu0  ;;  %v3502_v4 = vsel %vm1812_vm2, %v10612_v32, -inf  ;;  %v3035_v18 = vsub.f32 %v10525_v30, %v3023_v61 }
 0x943   : > { %v10605_v17 = vsel %vm10095_vm8, %v3461_v7, -1e+30 }
 0x944   : > { %v3048_v55 = vmul.f32 1.442695, %v3035_v18  ;;  %v7918_v61 = vpop.f32.mrf.mxu0 }
 0x945   : > { %v3029_v1 = vpop.xlane.xlu1 %3028 }
 0x946   : > { %3104 = vrot.lane.b32.xlu0 %v10470_v44, %s9209_s23  ;;  %v3484_v44 = vsel %vm1812_vm2, %v10583_v5, -inf  ;;  %v3037_v13 = vsub.f32 %v10531_v27, %v3029_v1 }
 0x948   : > { %v3052_v19 = vmul.f32 1.442695, %v3037_v13 }
 0x94a   : > { %8513 = vpow2.f32 %v3052_v19 }
 0x94b   : > { %8515 = vpow2.f32 %v3048_v55 }
 0x94f   : > { %v10577_v53 = vpop.eup %8511 }
 0x950   : > { %v3057_v46 = vsel %vm1812_vm2, %v10577_v53, 0.0 }
 0x951   : > { %3058 = vadd.xlane.f32.xlu1 %v3057_v46 }
 0x957   : > { %v10617_v24 = vpop.eup %8513 }
 0x958   : > { %v3075_v27 = vsel %vm1812_vm2, %v10617_v24, 0.0  ;;  %v10621_v48 = vpop.eup %8515 }
 0x959   : > { %v3069_v45 = vsel %vm1812_vm2, %v10621_v48, 0.0 }
 0x962   : > { %3102 = vrot.lane.b32.xlu1 %v10462_v6, %s9209_s23  ;;  %v10599_v6 = vsel %vm10057_vm4, %v7914_v58, -1e+30  ;;  %v10633_v58 = vpop.f32.mrf.mxu1 }
 0x963   : > { %v3493_v37 = vsel %vm1812_vm2, %v10599_v6, -inf }
 0x964   : > { %v10637_v39 = vpop.f32.mrf.mxu1 }
 0x965   : > { %3485 = vmax.xlane.f32.xlu0 %v3484_v44 }
 0x966   : > { %3100 = vrot.lane.b32.xlu1 %v10466_v50, %s9209_s23  ;;  %v3496_v50 = vsel %vm1812_vm2, %v10605_v17, -inf  ;;  %v10639_v7 = vpop.f32.mrf.mxu1 }
 0x969   : > { %3491 = vmax.xlane.f32.xlu0 %v3490_v20 }
 0x96d   : > { %3494 = vmax.xlane.f32.xlu0 %v3493_v37  ;;  %v3464_v37 = vpop.f32.mrf.mxu0 }
 0x96e   : > { %v10651_v13 = vsel %vm10099_vm9, %v3464_v37, -1e+30 }
 0x971   : > { %3497 = vmax.xlane.f32.xlu0 %v3496_v50  ;;  %v10647_v50 = vpop.f32.mrf.mxu1 }
 0x973   : > { %v10655_v18 = vpop.f32.mrf.mxu1 }
 0x975   : > { %3503 = vmax.xlane.f32.xlu0 %v3502_v4  ;;  %v3499_v4 = vsel %vm1812_vm2, %v10651_v13, -inf  ;;  %v10663_v55 = vpop.f32.mrf.mxu1 }
 0x98a   : > { %3076 = vadd.xlane.f32.xlu1 %v3075_v27  ;;  %v10665_v27 = vpop.f32.mrf.mxu1 }
 0x98b   : > { %12383 = vst [vmem:[#allocation33_spill] sm:$0xff] %v10665_v27 }
 0x98e   : > { %3070 = vadd.xlane.f32.xlu1 %v3069_v45 }
 0x99f   : > { %3098 = vrot.lane.b32.xlu1 %v10513_v63, %s9209_s23  ;;  %v10643_v63 = vsel %vm10062_vm5, %v3448_v40, -1e+30  ;;  %v10659_v40 = vsel %vm10087_vm7, %v7918_v61, -1e+30 }
 0x9a0   : > { %v3487_v1 = vsel %vm1812_vm2, %v10643_v63, -inf  ;;  %v3505_v19 = vsel %vm1812_vm2, %v10659_v40, -inf }
 0x9a9   : > { %v10627_v30 = vpop.xlane.xlu0 %3061 }
 0x9ad   : > { %v3056_v46 = vpop.xlane.xlu0 %3055  ;;  %v3065_v8 = vpop.xlane.xlu1 %3064 }
 0x9ae   : > { %8517 = vrcp.f32 %v3056_v46 }
 0x9b5   : > { %v10631_v62 = vpop.xlane.xlu0 %3073 }
 0x9b9   : > { %v10635_v44 = vpop.xlane.xlu0 %3067 }
 0x9bd   : > { %v3105_v20 = vpop.permute.xlu0 %3104 }
 0x9be   : > { %7875 = vmatprep.subr.bf16.mxu1 %v3105_v20 }
 0x9c3   : > { %3488 = vmax.xlane.f32.xlu1 %v3487_v1 }
 0x9c7   : > { %3500 = vmax.xlane.f32.xlu1 %v3499_v4 }
 0x9cb   : > { %3506 = vmax.xlane.f32.xlu1 %v3505_v19 }
 0x9d1   : > { %v7841_v45 = vpop.f32.mrf.mxu1 }
 0x9d3   : > { %v2757_v37 = vpop.f32.mrf.mxu1 }
 0x9d5   : > { %v7842_v1 = vpop.f32.mrf.mxu1 }
 0x9d6   : > { %v2789_v22 = vpack.c.bf16 %v7842_v1, %v7841_v45 }
 0x9d7   : > { %v2760_v10 = vpop.f32.mrf.mxu1 }
 0x9d8   : > { %v2788_v60 = vpack.c.bf16 %v2760_v10, %v2757_v37 }
 0x9da   : > { %7851 = vmatprep.mubr.msk.bf16.mxu1 %vm1714_vm0, %v2788_v60  ;;  %v3059_v61 = vpop.xlane.xlu1 %3058  ;;  %v8518_v60 = vpop.eup %8517 }
 0x9db   : > { %8519 = vrcp.f32 %v3059_v61  ;;  %7852 = vmatmul.mubr.msk.bf16.vlgmr.msra.gmra.mxu1 %vm1714_vm0, %v2789_v22  ;;  %v3086_v22 = vmul.f32 %v8518_v60, %v10556_v38 }
 0x9dc   : > { %7876 = vmatpush3.bf16.msra.mxu1 %v3105_v20  ;;  %v7845_v4 = vpop.f32.mrf.mxu1 }
 0x9de   : > { %v2773_v59 = vpop.f32.mrf.mxu1  ;;  %v3103_v19 = vpop.permute.xlu1 %3102 }
 0x9df   : > { %7877 = vmatprep.subr.bf16.mxu1 %v3103_v19 }
 0x9e0   : > { %v7846_v27 = vpop.f32.mrf.mxu1  ;;  %7878 = vmatpush3.bf16.msra.mxu1 %v3103_v19 }
 0x9e1   : > { %v2791_v10 = vpack.c.bf16 %v7846_v27, %v7845_v4 }
 0x9e2   : > { %v2776_v35 = vpop.f32.mrf.mxu1  ;;  %v3101_v57 = vpop.permute.xlu1 %3100 }
 0x9e3   : > { %v2790_v54 = vpack.c.bf16 %v2776_v35, %v2773_v59  ;;  %7879 = vmatprep.subr.bf16.mxu1 %v3101_v57 }
 0x9e4   : > { %7880 = vmatpush3.bf16.msra.mxu1 %v3101_v57 }
 0x9e5   : > { %7855 = vmatprep.mubr.msk.bf16.mxu1 %vm1714_vm0, %v2790_v54 }
 0x9e6   : > { %7856 = vmatmul.mubr.msk.bf16.gmra.mxu1 %vm1714_vm0, %v2791_v10 }
 0x9e8   : > { %v8520_v46 = vpop.eup %8519 }
 0x9e9   : > { %v3087_v20 = vmul.f32 %v8520_v46, %v10577_v53 }
 0x9eb   : > { %v3094_v45 = vpack.c.bf16 %v3087_v20, %v3086_v22 }
 0x9ed   : > { %7883 = vmatprep.mubr.msk.bf16.mxu1 %vm1812_vm2, %v3094_v45 }
 0x9ee   : > { %v3486_v37 = vpop.xlane.xlu0 %3485 }
 0x9ef   : > { %v3508_v1 = vsub.f32 %v10583_v5, %v3486_v37 }
 0x9f1   : > { %v3516_v57 = vmul.f32 1.442695, %v3508_v1 }
 0x9f2   : > { %v3492_v59 = vpop.xlane.xlu0 %3491 }
 0x9f3   : > { %v3510_v35 = vsub.f32 %v10591_v21, %v3492_v59 }
 0x9f5   : > { %v3520_v27 = vmul.f32 1.442695, %v3510_v35 }
 0x9f6   : > { %v3495_v54 = vpop.xlane.xlu0 %3494 }
 0x9f7   : > { %8521 = vpow2.f32 %v3520_v27  ;;  %v3511_v61 = vsub.f32 %v10599_v6, %v3495_v54  ;;  %v8279_v27 = vld [vmem:[%s9654_s12 + $0x38] sm:$0xff]  }
 0x9f8   : > { %8523 = vpow2.f32 %v3516_v57 }
 0x9f9   : > { %v3522_v4 = vmul.f32 1.442695, %v3511_v61 }
 0x9fa   : > { %v3498_v38 = vpop.xlane.xlu0 %3497 }
 0x9fb   : > { %8525 = vpow2.f32 %v3522_v4  ;;  %v3512_v53 = vsub.f32 %v10605_v17, %v3498_v38  ;;  %v8280_v4 = vld [vmem:[%s9654_s12 + $0x30] sm:$0xff]  }
 0x9fd   : > { %v3524_v60 = vmul.f32 1.442695, %v3512_v53 }
 0x9fe   : > { %v3504_v19 = vpop.xlane.xlu0 %3503 }
 0x9ff   : > { %v3514_v10 = vsub.f32 %v10612_v32, %v3504_v19  ;;  %v10707_v19 = vld [vmem:[#allocation3 + $0xb0] ss:$12 sps:$4 sm:$0xff]  }
 0xa01   : > { %v3528_v5 = vmul.f32 1.442695, %v3514_v10 }
 0xa03   : > { %8527 = vpow2.f32 %v3528_v5 }
 0xa04   : > { %v10679_v46 = vpop.eup %8521  ;;  %8529 = vpow2.f32 %v3524_v60 }
 0xa05   : > { %v3538_v21 = vsel %vm1812_vm2, %v10679_v46, 0.0  ;;  %v10683_v22 = vpop.eup %8523  ;;  %8531 = vrcp.f32 %v3065_v8 }
 0xa06   : > { %3539 = vadd.xlane.f32.xlu0 %v3538_v21  ;;  %v3532_v17 = vsel %vm1812_vm2, %v10683_v22, 0.0  ;;  %8533 = vrcp.f32 %v10627_v30 }
 0xa08   : > { %v10685_v6 = vpop.eup %8525 }
 0xa09   : > { %v3541_v32 = vsel %vm1812_vm2, %v10685_v6, 0.0 }
 0xa0a   : > { %3533 = vadd.xlane.f32.xlu0 %v3532_v17  ;;  %3542 = vadd.xlane.f32.xlu1 %v3541_v32 }
 0xa10   : > { %v10692_v20 = vpop.eup %8527 }
 0xa11   : > { %v3550_v45 = vsel %vm1812_vm2, %v10692_v20, 0.0  ;;  %v10696_v37 = vpop.eup %8529 }
 0xa12   : > { %3551 = vadd.xlane.f32.xlu0 %v3550_v45  ;;  %v3544_v1 = vsel %vm1812_vm2, %v10696_v37, 0.0  ;;  %v8532_v59 = vpop.eup %8531 }
 0xa13   : > { %v3077_v8 = vpop.xlane.xlu1 %3076  ;;  %v8534_v35 = vpop.eup %8533  ;;  %v3089_v57 = vmul.f32 %v8532_v59, %v10558_v47 }
 0xa14   : > { %8535 = vrcp.f32 %v3077_v8  ;;  %v3088_v61 = vmul.f32 %v8534_v35, %v10552_v52 }
 0xa15   : > { %8537 = vrcp.f32 %v10635_v44 }
 0xa16   : > { %8539 = vrcp.f32 %v10631_v62  ;;  %3545 = vadd.xlane.f32.xlu0 %v3544_v1  ;;  %v3095_v44 = vpack.c.bf16 %v3089_v57, %v3088_v61 }
 0xa17   : > { %v3071_v30 = vpop.xlane.xlu1 %3070 }
 0xa18   : > { %8541 = vrcp.f32 %v3071_v30 }
 0xa1b   : > { %v3099_v54 = vpop.permute.xlu1 %3098 }
 0xa1c   : > { %7881 = vmatprep.subr.bf16.mxu1 %v3099_v54 }
 0xa1d   : > { %7882 = vmatpush3.bf16.msra.mxu1 %v3099_v54 }
 0xa1e   : > { %7891 = vmatprep.subr.bf16.mxu1 %v8279_v27 }
 0xa20   : > { %7884 = vmatmul.mubr.msk.bf16.vlgmr.msra.gmra.mxu1 %vm1812_vm2, %v3095_v44 }
 0xa21   : > { %7892 = vmatpush3.bf16.msra.mxu1 %v8279_v27  ;;  %v8536_v38 = vpop.eup %8535  ;;  %v2475_v27 = vadd.f32 %v10637_v39, %v10399_v9  ;;  %v2491_v9 = vadd.f32 %v10663_v55, %v10407_v3 }
 0xa22   : > { %7893 = vmatprep.subr.bf16.mxu1 %v8280_v4  ;;  %v8538_v62 = vpop.eup %8537  ;;  %v3093_v47 = vmul.f32 %v8536_v38, %v10617_v24 }
 0xa23   : > { %v8540_v53 = vpop.eup %8539  ;;  %v3090_v52 = vmul.f32 %v8538_v62, %v10568_v28 }
 0xa24   : > { %v3092_v5 = vmul.f32 %v8540_v53, %v10564_v25 }
 0xa25   : > { %v8542_v10 = vpop.eup %8541  ;;  %7894 = vmatpush3.bf16.msra.mxu1 %v8280_v4 }
 0xa26   : > { %7919 = vmatprep.subr.bf16.mxu1 %v10707_v19  ;;  %v3091_v60 = vmul.f32 %v8542_v10, %v10621_v48  ;;  %v3097_v17 = vpack.c.bf16 %v3093_v47, %v3092_v5 }
 0xa28   : > { %v3096_v21 = vpack.c.bf16 %v3091_v60, %v3090_v52 }
 0xa2a   : > { %7887 = vmatprep.mubr.msk.bf16.mxu1 %vm1812_vm2, %v3096_v21 }
 0xa2b   : > { %7888 = vmatmul.mubr.msk.bf16.gmra.mxu1 %vm1812_vm2, %v3097_v17  ;;  %v10781_v17 = vld [vmem:[#allocation3 + $0x80] ss:$12 sps:$4 sm:$0xff]  }
 0xa2c   : > { %3699 = vrot.lane.b32.xlu0 %v10352_v0, %s9207_s22 }
 0xa30   : > { %3685 = vrot.lane.b32.xlu0 %v10364_v12, %s9207_s22 }
 0xa34   : > { %3689 = vrot.lane.b32.xlu0 %v10385_v16, %s9207_s22 }
 0xa4c   : > { %v3489_v28 = vpop.xlane.xlu1 %3488 }
 0xa4d   : > { %v3509_v24 = vsub.f32 %v10643_v63, %v3489_v28 }
 0xa4f   : > { %v3518_v48 = vmul.f32 1.442695, %v3509_v24 }
 0xa50   : > { %v3501_v0 = vpop.xlane.xlu1 %3500 }
 0xa51   : > { %8543 = vpow2.f32 %v3518_v48  ;;  %v3513_v63 = vsub.f32 %v10651_v13, %v3501_v0  ;;  %v10785_v0 = vld [vmem:[#allocation3 + $0x68] ss:$12 sps:$4 sm:$0xff]  }
 0xa53   : > { %v3526_v8 = vmul.f32 1.442695, %v3513_v63 }
 0xa54   : > { %v3507_v12 = vpop.xlane.xlu1 %3506 }
 0xa55   : > { %v3515_v16 = vsub.f32 %v10659_v40, %v3507_v12  ;;  %v2464_v40 = vadd.f32 %v10633_v58, %v10397_v43  ;;  %v2488_v43 = vadd.f32 %v10647_v50, %v10403_v41  ;;  %v2480_v58 = vadd.f32 %v10655_v18, %v10405_v34 }
 0xa57   : > { %v3530_v45 = vmul.f32 1.442695, %v3515_v16 }
 0xa59   : > { %8545 = vpow2.f32 %v3530_v45 }
 0xa5a   : > { %8547 = vpow2.f32 %v3526_v8 }
 0xa5e   : > { %v10723_v25 = vpop.eup %8543 }
 0xa5f   : > { %v3535_v32 = vsel %vm1812_vm2, %v10723_v25, 0.0 }
 0xa60   : > { %3536 = vadd.xlane.f32.xlu1 %v3535_v32 }
 0xa66   : > { %v10733_v1 = vpop.eup %8545 }
 0xa67   : > { %v3553_v59 = vsel %vm1812_vm2, %v10733_v1, 0.0  ;;  %v10737_v30 = vpop.eup %8547 }
 0xa68   : > { %v3547_v35 = vsel %vm1812_vm2, %v10737_v30, 0.0 }
 0xa71   : > { %3697 = vrot.lane.b32.xlu1 %v10359_v31, %s9207_s22  ;;  %v2472_v31 = vadd.f32 %v10629_v15, %v10395_v51 }
 0xa75   : > { %3695 = vrot.lane.b32.xlu1 %v10369_v2, %s9207_s22 }
 0xa8f   : > { %v3540_v34 = vpop.xlane.xlu0 %3539 }
 0xa93   : > { %v3543_v3 = vpop.xlane.xlu1 %3542  ;;  %v3534_v10 = vpop.xlane.xlu0 %3533 }
 0xa94   : > { %8549 = vrcp.f32 %v3543_v3 }
 0xa95   : > { %8551 = vrcp.f32 %v3534_v10 }
 0xa96   : > { %8553 = vrcp.f32 %v3540_v34 }
 0xa99   : > { %3554 = vadd.xlane.f32.xlu1 %v3553_v59 }
 0xa9b   : > { %v7853_v2 = vpop.f32.mrf.mxu1 }
 0xa9c   : > { %v10743_v13 = vadd.f32 %v7853_v2, %v2472_v31 }
 0xa9d   : > { %v2854_v57 = vpop.f32.mrf.mxu1  ;;  %3548 = vadd.xlane.f32.xlu1 %v3547_v35 }
 0xa9e   : > { %v10749_v54 = vadd.f32 %v2854_v57, %v2464_v40 }
 0xa9f   : > { %v7854_v61 = vpop.f32.mrf.mxu1 }
 0xaa0   : > { %v10751_v44 = vadd.f32 %v7854_v61, %v2475_v27 }
 0xaa1   : > { %v10753_v51 = vpop.f32.mrf.mxu1  ;;  %v8550_v16 = vpop.eup %8549 }
 0xaa2   : > { %v8552_v63 = vpop.eup %8551  ;;  %v3567_v59 = vmul.f32 %v8550_v16, %v10685_v6 }
 0xaa3   : > { %v8554_v45 = vpop.eup %8553  ;;  %v3564_v2 = vmul.f32 %v8552_v63, %v10683_v22 }
 0xaa4   : > { %v3566_v35 = vmul.f32 %v8554_v45, %v10679_v46 }
 0xaa6   : > { %v7857_v15 = vpop.f32.mrf.mxu1  ;;  %v3573_v27 = vpack.c.bf16 %v3567_v59, %v3566_v35 }
 0xaa7   : > { %v10759_v4 = vadd.f32 %v7857_v15, %v2488_v43 }
 0xaa8   : > { %v2870_v38 = vpop.f32.mrf.mxu1 }
 0xaa9   : > { %v10763_v39 = vadd.f32 %v2870_v38, %v2480_v58 }
 0xaaa   : > { %v7858_v62 = vpop.f32.mrf.mxu1 }
 0xaab   : > { %v10765_v53 = vadd.f32 %v7858_v62, %v2491_v9 }
 0xaac   : > { %v10773_v41 = vpop.f32.mrf.mxu1 }
 0xaae   : > { %3693 = vrot.lane.b32.xlu1 %v10377_v26, %s9207_s22 }
 0xab2   : > { %3687 = vrot.lane.b32.xlu1 %v10383_v33, %s9207_s22  ;;  %v10777_v33 = vld [vmem:[#allocation3 + $0x98] ss:$12 sps:$4 sm:$0xff]  }
 0xab6   : > { %3691 = vrot.lane.b32.xlu1 %v10391_v29, %s9207_s22  ;;  %v3552_v29 = vpop.xlane.xlu0 %3551 }
 0xaba   : > { %v3546_v24 = vpop.xlane.xlu0 %3545 }
 0xabe   : > { %v3700_v31 = vpop.permute.xlu0 %3699 }
 0xabf   : > { %v3723_v61 = vsel %vm1714_vm0, %v3700_v31, 0 }
 0xae0   : > { %v7885_v50 = vpop.f32.mrf.mxu1 }
 0xae2   : > { %v3156_v18 = vpop.f32.mrf.mxu1 }
 0xae4   : > { %v7886_v55 = vpop.f32.mrf.mxu1 }
 0xae5   : > { %v3188_v60 = vpack.c.bf16 %v7886_v55, %v7885_v50 }
 0xae6   : > { %v3159_v47 = vpop.f32.mrf.mxu1 }
 0xae7   : > { %v3187_v52 = vpack.c.bf16 %v3159_v47, %v3156_v18 }
 0xae9   : > { %7895 = vmatprep.mubr.msk.bf16.mxu1 %vm1714_vm0, %v3187_v52  ;;  %v3537_v26 = vpop.xlane.xlu1 %3536 }
 0xaea   : > { %8555 = vrcp.f32 %v3537_v26  ;;  %7896 = vmatmul.mubr.msk.bf16.vlgmr.msra.gmra.mxu1 %vm1714_vm0, %v3188_v60  ;;  %v3686_v60 = vpop.permute.xlu0 %3685  ;;  %v8285_v26 = vld [vmem:[%s9654_s12 + $0x8] sm:$0xff]  }
 0xaeb   : > { %7920 = vmatpush3.bf16.msra.mxu1 %v10707_v19  ;;  %v7889_v5 = vpop.f32.mrf.mxu1 }
 0xaec   : > { %7921 = vmatprep.subr.bf16.mxu1 %v10777_v33 }
 0xaed   : > { %v3172_v21 = vpop.f32.mrf.mxu1  ;;  %v3698_v6 = vpop.permute.xlu1 %3697 }
 0xaee   : > { %v3720_v43 = vsel %vm1714_vm0, %v3698_v6, 0 }
 0xaef   : > { %7922 = vmatpush3.bf16.msra.mxu1 %v10777_v33  ;;  %v7890_v28 = vpop.f32.mrf.mxu1 }
 0xaf0   : > { %7923 = vmatprep.subr.bf16.mxu1 %v10781_v17  ;;  %v3190_v12 = vpack.c.bf16 %v7890_v28, %v7889_v5 }
 0xaf1   : > { %v3175_v48 = vpop.f32.mrf.mxu1  ;;  %v3696_v15 = vpop.permute.xlu1 %3695 }
 0xaf2   : > { %v3189_v32 = vpack.c.bf16 %v3175_v48, %v3172_v21  ;;  %v3717_v46 = vsel %vm1714_vm0, %v3696_v15, 0  ;;  %v7198_v21 = vld [vmem:[%s9678_s9] ss:$0 sm:$0xff]  ;;  %v8825_v48 = vld [vmem:[#allocation2 + $0x58] sm:$0xff] }
 0xaf3   : > { %7924 = vmatpush3.bf16.msra.mxu1 %v10781_v17 }
 0xaf4   : > { %7925 = vmatprep.subr.bf16.mxu1 %v10785_v0  ;;  %7899 = vmatprep.mubr.msk.bf16.mxu1 %vm1714_vm0, %v3189_v32 }
 0xaf5   : > { %7900 = vmatmul.mubr.msk.bf16.gmra.mxu1 %vm1714_vm0, %v3190_v12 }
 0xaf7   : > { %v8556_v8 = vpop.eup %8555  ;;  %7926 = vmatpush3.bf16.msra.mxu1 %v10785_v0 }
 0xaf8   : > { %8099 = vmatprep.subr.msk.bf16.mxu1 %vm1714_vm0, %v3700_v31  ;;  %v3565_v40 = vmul.f32 %v8556_v8, %v10723_v25  ;;  %v8826_v8 = vld [vmem:[#allocation2 + $0x30] sm:$0xff] }
 0xafa   : > { %v3572_v57 = vpack.c.bf16 %v3565_v40, %v3564_v2  ;;  %v8827_v40 = vld [vmem:[#allocation2 + $0x18] sm:$0xff] }
 0xafc   : > { %7927 = vmatprep.mubr.msk.bf16.mxu1 %vm1812_vm2, %v3572_v57 }
 0xafd   : > { %7928 = vmatmul.mubr.msk.bf16.vlgmr.msra.gmra.mxu1 %vm1812_vm2, %v3573_v27 }
 0xafe   : > { %7936 = vmatpush3.bf16.xpose.msra.mxu1 %v3723_v61 }
 0xaff   : > { %8100 = vmatprep.subr.msk.bf16.mxu1 %vm1714_vm0, %v3698_v6 }
 0xb06   : > { %7938 = vmatpush3.bf16.xpose.msra.mxu1 %v3720_v43  ;;  %v8829_v43 = vld [vmem:[#allocation2 + $0x8] sm:$0xff] }
 0xb07   : > { %8101 = vmatprep.subr.msk.bf16.mxu1 %vm1714_vm0, %v3696_v15 }
 0xb0e   : > { %7940 = vmatpush3.bf16.xpose.msra.mxu1 %v3717_v46 }
 0xb22   : > { %v3555_v22 = vpop.xlane.xlu1 %3554 }
 0xb23   : > { %8557 = vrcp.f32 %v3555_v22 }
 0xb24   : > { %8559 = vrcp.f32 %v3546_v24  ;;  %v2467_v24 = vadd.f32 %v10639_v7, %v10401_v11  ;;  %v8828_v7 = vld [vmem:[#allocation2] sm:$0xff] }
 0xb25   : > { %8561 = vrcp.f32 %v3552_v29 }
 0xb26   : > { %v3549_v25 = vpop.xlane.xlu1 %3548  ;;  %v2886_v63 = vadd.f32 %v10753_v51, %v2467_v24 }
 0xb27   : > { %8563 = vrcp.f32 %v3549_v25  ;;  %v8830_v25 = vld [vmem:[#allocation2 + $0x50] sm:$0xff] }
 0xb2a   : > { %v3694_v58 = vpop.permute.xlu1 %3693 }
 0xb2b   : > { %8102 = vmatprep.subr.msk.bf16.mxu1 %vm1714_vm0, %v3694_v58  ;;  %v3714_v38 = vsel %vm1714_vm0, %v3694_v58, 0 }
 0xb2c   : > { %7942 = vmatpush3.bf16.xpose.msra.mxu1 %v3714_v38 }
 0xb2d   : > { %7979 = vmatprep.subr.bf16.mxu1 %v8285_v26 }
 0xb2e   : > { %v3688_v29 = vpop.permute.xlu1 %3687 }
 0xb30   : > { %v8558_v9 = vpop.eup %8557 }
 0xb31   : > { %v8560_v62 = vpop.eup %8559  ;;  %v3571_v18 = vmul.f32 %v8558_v9, %v10733_v1  ;;  %v3690_v1 = vpop.permute.xlu0 %3689 }
 0xb32   : > { %v8562_v34 = vpop.eup %8561  ;;  %v3568_v3 = vmul.f32 %v8560_v62, %v10696_v37  ;;  %v3692_v37 = vpop.permute.xlu1 %3691 }
 0xb33   : > { %v3570_v10 = vmul.f32 %v8562_v34, %v10692_v20  ;;  %v8286_v20 = vld [vmem:[%s9654_s12] sm:$0xff]  }
 0xb34   : > { %v8564_v50 = vpop.eup %8563  ;;  %v8831_v34 = vld [vmem:[#allocation2 + $0x48] sm:$0xff] }
 0xb35   : > { %v3569_v55 = vmul.f32 %v8564_v50, %v10737_v30  ;;  %v3575_v52 = vpack.c.bf16 %v3571_v18, %v3570_v10 }
 0xb37   : > { %v3574_v47 = vpack.c.bf16 %v3569_v55, %v3568_v3 }
 0xb39   : > { %7931 = vmatprep.mubr.msk.bf16.mxu1 %vm1812_vm2, %v3574_v47 }
 0xb3a   : > { %7932 = vmatmul.mubr.msk.bf16.gmra.mxu1 %vm1812_vm2, %v3575_v52 }
 0xb3b   : > { %7943 = vmatprep.mubr.msk.bf16.mxu1 %vm1714_vm0, %v3686_v60 }
 0xb42   : > { %7944 = vmatmul.mubr.msk.bf16.vlgmr.msra.gmra.mxu1 %vm1714_vm0, %v3688_v29 }
 0xb43   : > { %7947 = vmatprep.mubr.msk.bf16.mxu1 %vm1714_vm0, %v3690_v1  ;;  %7980 = vmatpush3.bf16.msra.mxu1 %v8285_v26 }
 0xb44   : > { %7981 = vmatprep.subr.bf16.mxu1 %v8286_v20 }
 0xb47   : > { %7982 = vmatpush3.bf16.msra.mxu1 %v8286_v20 }
 0xb4a   : > { %7948 = vmatmul.mubr.msk.bf16.gmra.mxu1 %vm1714_vm0, %v3692_v37 }
 0xbaa   : > { %v7897_v30 = vpop.f32.mrf.mxu1 }
 0xbab   : > { %v3286_v5 = vadd.f32 %v7897_v30, %v10743_v13 }
 0xbac   : > { %v3253_v28 = vpop.f32.mrf.mxu1 }
 0xbad   : > { %v3294_v32 = vadd.f32 %v8825_v48, %v3286_v5  ;;  %v3284_v12 = vadd.f32 %v3253_v28, %v10749_v54 }
 0xbae   : > { %v7898_v16 = vpop.f32.mrf.mxu1 }
 0xbaf   : > { %v3309_v45 = vadd.f32 %v7198_v21, %v3294_v32  ;;  %v3292_v59 = vadd.f32 %v8826_v8, %v3284_v12  ;;  %v3287_v31 = vadd.f32 %v7898_v16, %v10751_v44 }
 0xbb0   : > { %v3256_v2 = vpop.f32.mrf.mxu1 }
 0xbb1   : > { %3317 = vst [vmem:[#allocation2 + $0x58] sm:$0xff] %v3309_v45  ;;  %v3307_v13 = vadd.f32 %v7198_v21, %v3292_v59  ;;  %v3295_v35 = vadd.f32 %v8827_v40, %v3287_v31  ;;  %v3285_v57 = vadd.f32 %v3256_v2, %v2886_v63 }
 0xbb3   : > { %3315 = vst [vmem:[#allocation2 + $0x30] sm:$0xff] %v3307_v13  ;;  %v3310_v11 = vadd.f32 %v7198_v21, %v3295_v35  ;;  %v3293_v27 = vadd.f32 %v8828_v7, %v3285_v57 }
 0xbb5   : > { %3318 = vst [vmem:[#allocation2 + $0x18] sm:$0xff] %v3310_v11  ;;  %v3308_v54 = vadd.f32 %v7198_v21, %v3293_v27  ;;  %v7901_v61 = vpop.f32.mrf.mxu1 }
 0xbb6   : > { %v3290_v51 = vadd.f32 %v7901_v61, %v10759_v4 }
 0xbb7   : > { %3316 = vst [vmem:[#allocation2] sm:$0xff] %v3308_v54  ;;  %v3269_v6 = vpop.f32.mrf.mxu1 }
 0xbb8   : > { %v3298_v15 = vadd.f32 %v8829_v43, %v3290_v51  ;;  %v3288_v44 = vadd.f32 %v3269_v6, %v10763_v39 }
 0xbb9   : > { %v7902_v46 = vpop.f32.mrf.mxu1 }
 0xbba   : > { %v3313_v22 = vadd.f32 %v7198_v21, %v3298_v15  ;;  %v3296_v58 = vadd.f32 %v8830_v25, %v3288_v44  ;;  %v3291_v38 = vadd.f32 %v7902_v46, %v10765_v53 }
 0xbbb   : > { %v10828_v9 = vpop.f32.mrf.mxu1 }
 0xbbc   : > { %3321 = vst [vmem:[#allocation2 + $0x8] sm:$0xff] %v3313_v22  ;;  %v10830_v62 = vadd.f32 %v7198_v21, %v3296_v58  ;;  %v3299_v50 = vadd.f32 %v8831_v34, %v3291_v38 }
 0xbbd   : > { %v7929_v4 = vpop.f32.mrf.mxu1 }
 0xbbe   : > { %12384 = vst [vmem:[#allocation34_spill] sm:$0xff] %v10830_v62  ;;  %v10832_v18 = vadd.f32 %v7198_v21, %v3299_v50 }
 0xbbf   : > { %v3646_v3 = vpop.f32.mrf.mxu1 }
 0xbc0   : > { %12385 = vst [vmem:[#allocation35_spill] sm:$0xff] %v10832_v18 }
 0xbc1   : > { %v7930_v55 = vpop.f32.mrf.mxu1 }
 0xbc2   : > { %v3678_v47 = vpack.c.bf16 %v7930_v55, %v7929_v4 }
 0xbc3   : > { %v3649_v10 = vpop.f32.mrf.mxu1 }
 0xbc4   : > { %v3677_v39 = vpack.c.bf16 %v3649_v10, %v3646_v3 }
 0xbc6   : > { %7983 = vmatprep.mubr.msk.bf16.mxu1 %vm1714_vm0, %v3677_v39 }
 0xbc7   : > { %7984 = vmatmul.mubr.msk.bf16.vlgmr.msra.gmra.mxu1 %vm1714_vm0, %v3678_v47 }
 0xbfa   : > { %v7933_v53 = vpop.f32.mrf.mxu1 }
 0xbfc   : > { %v3662_v52 = vpop.f32.mrf.mxu1 }
 0xbfe   : > { %v7934_v60 = vpop.f32.mrf.mxu1 }
 0xbff   : > { %v3680_v1 = vpack.c.bf16 %v7934_v60, %v7933_v53 }
 0xc00   : > { %v3665_v26 = vpop.f32.mrf.mxu1 }
 0xc01   : > { %v3679_v29 = vpack.c.bf16 %v3665_v26, %v3662_v52 }
 0xc02   : > { %v7945_v20 = vpop.f32.mrf.mxu1 }
 0xc03   : > { %7987 = vmatprep.mubr.msk.bf16.mxu1 %vm1714_vm0, %v3679_v29  ;;  %v3792_v28 = vsel %vm10036_vm1, %v7945_v20, -1e+30 }
 0xc04   : > { %v3759_v37 = vpop.f32.mrf.mxu1  ;;  %7988 = vmatmul.mubr.msk.bf16.gmra.mxu1 %vm1714_vm0, %v3680_v1  ;;  %v3804_v32 = vsel %vm1812_vm2, %v3792_v28, -inf }
 0xc05   : > { %v3790_v30 = vsel %vm10041_vm3, %v3759_v37, -1e+30 }
 0xc06   : > { %v3798_v5 = vsel %vm1812_vm2, %v3790_v30, -inf  ;;  %v7946_v21 = vpop.f32.mrf.mxu1 }
 0xc07   : > { %3799 = vmax.xlane.f32.xlu0 %v3798_v5  ;;  %v3793_v63 = vsel %vm10057_vm4, %v7946_v21, -1e+30 }
 0xc08   : > { %v3762_v24 = vpop.f32.mrf.mxu1  ;;  %v3807_v8 = vsel %vm1812_vm2, %v3793_v63, -inf }
 0xc09   : > { %v3791_v48 = vsel %vm10062_vm5, %v3762_v24, -1e+30 }
 0xc0a   : > { %v3801_v12 = vsel %vm1812_vm2, %v3791_v48, -inf  ;;  %v7949_v16 = vpop.f32.mrf.mxu1 }
 0xc0b   : > { %3805 = vmax.xlane.f32.xlu0 %v3804_v32  ;;  %3802 = vmax.xlane.f32.xlu1 %v3801_v12  ;;  %v3796_v31 = vsel %vm10077_vm6, %v7949_v16, -1e+30 }
 0xc0c   : > { %v3775_v45 = vpop.f32.mrf.mxu1  ;;  %v3816_v11 = vsel %vm1812_vm2, %v3796_v31, -inf }
 0xc0d   : > { %v3794_v27 = vsel %vm10095_vm8, %v3775_v45, -1e+30 }
 0xc0e   : > { %v7950_v59 = vpop.f32.mrf.mxu1  ;;  %v3810_v61 = vsel %vm1812_vm2, %v3794_v27, -inf }
 0xc0f   : > { %v3797_v2 = vsel %vm10087_vm7, %v7950_v59, -1e+30  ;;  %3808 = vmax.xlane.f32.xlu0 %v3807_v8 }
 0xc10   : > { %v3819_v13 = vsel %vm1812_vm2, %v3797_v2, -inf  ;;  %v3778_v40 = vpop.f32.mrf.mxu1 }
 0xc11   : > { %v3795_v57 = vsel %vm10099_vm9, %v3778_v40, -1e+30  ;;  %3820 = vmax.xlane.f32.xlu1 %v3819_v13  ;;  %v8832_v13 = vld [vmem:[#allocation3 + $0xac] ss:$12 sps:$4 sm:$0xff]   ;;  %v8833_v40 = vld [vmem:[#allocation3 + $0x7c] ss:$12 sps:$4 sm:$0xff]  }
 0xc12   : > { %v3813_v54 = vsel %vm1812_vm2, %v3795_v57, -inf }
 0xc13   : > { %3817 = vmax.xlane.f32.xlu0 %v3816_v11  ;;  %v8835_v11 = vld [vmem:[#allocation3 + $0x60] ss:$12 sps:$4 sm:$0xff]  }
 0xc15   : > { %3814 = vmax.xlane.f32.xlu1 %v3813_v54  ;;  %v8837_v54 = vld [vmem:[#allocation3 + $0x90] ss:$12 sps:$4 sm:$0xff]  }
 0xc17   : > { %3811 = vmax.xlane.f32.xlu0 %v3810_v61  ;;  %v8838_v61 = vld [vmem:[#allocation3 + $0x78] ss:$12 sps:$4 sm:$0xff]  }
 0xc26   : > { %3894 = vrot.lane.b32.xlu1 %v10777_v33, %s9207_s22 }
 0xc2d   : > { %3896 = vrot.lane.b32.xlu0 %v10707_v19, %s9207_s22 }
 0xc90   : > { %v3800_v51 = vpop.xlane.xlu0 %3799 }
 0xc91   : > { %v3822_v6 = vsub.f32 %v3790_v30, %v3800_v51  ;;  %v8839_v51 = vld [vmem:[#allocation3 + $0xa8] ss:$12 sps:$4 sm:$0xff]  }
 0xc93   : > { %v3830_v25 = vmul.f32 1.442695, %v3822_v6 }
 0xc94   : > { %v3803_v43 = vpop.xlane.xlu1 %3802  ;;  %v3806_v15 = vpop.xlane.xlu0 %3805 }
 0xc95   : > { %v3824_v44 = vsub.f32 %v3792_v28, %v3806_v15  ;;  %v3823_v46 = vsub.f32 %v3791_v48, %v3803_v43 }
 0xc97   : > { %v3834_v22 = vmul.f32 1.442695, %v3824_v44  ;;  %v3832_v50 = vmul.f32 1.442695, %v3823_v46 }
 0xc98   : > { %v3809_v58 = vpop.xlane.xlu0 %3808 }
 0xc99   : > { %v3825_v38 = vsub.f32 %v3793_v63, %v3809_v58  ;;  %8565 = vpow2.f32 %v3834_v22 }
 0xc9a   : > { %v3821_v34 = vpop.xlane.xlu1 %3820  ;;  %8567 = vpow2.f32 %v3830_v25 }
 0xc9b   : > { %v3836_v4 = vmul.f32 1.442695, %v3825_v38  ;;  %v3829_v52 = vsub.f32 %v3797_v2, %v3821_v34 }
 0xc9c   : > { %v3818_v3 = vpop.xlane.xlu0 %3817 }
 0xc9d   : > { %8569 = vpow2.f32 %v3836_v4  ;;  %v3828_v19 = vsub.f32 %v3796_v31, %v3818_v3  ;;  %v3844_v37 = vmul.f32 1.442695, %v3829_v52 }
 0xc9e   : > { %v3815_v55 = vpop.xlane.xlu1 %3814  ;;  %8571 = vpow2.f32 %v3832_v50 }
 0xc9f   : > { %v3827_v10 = vsub.f32 %v3795_v57, %v3815_v55  ;;  %v3842_v60 = vmul.f32 1.442695, %v3828_v19  ;;  %v8834_v57 = vld [vmem:[#allocation3 + $0x94] ss:$12 sps:$4 sm:$0xff]  }
 0xca0   : > { %v3812_v39 = vpop.xlane.xlu0 %3811 }
 0xca1   : > { %v3840_v47 = vmul.f32 1.442695, %v3827_v10  ;;  %v3826_v53 = vsub.f32 %v3794_v27, %v3812_v39  ;;  %v8836_v27 = vld [vmem:[#allocation3 + $0x64] ss:$12 sps:$4 sm:$0xff]   ;;  %v8287_v39 = vld [vmem:[%s9654_s12 + $0x18] sm:$0xff]  }
 0xca2   : > { %v3895_v1 = vpop.permute.xlu1 %3894 }
 0xca3   : > { %8573 = vpow2.f32 %v3840_v47  ;;  %v3838_v26 = vmul.f32 1.442695, %v3826_v53 }
 0xca4   : > { %v3897_v29 = vpop.permute.xlu0 %3896 }
 0xca5   : > { %8575 = vpow2.f32 %v3838_v26  ;;  %7951 = vmatprep.subr.bf16.mxu0 %v3897_v29 }
 0xca6   : > { %7952 = vmatpush3.bf16.msra.mxu0 %v3897_v29  ;;  %v10866_v20 = vpop.eup %8565  ;;  %8577 = vpow2.f32 %v3842_v60 }
 0xca7   : > { %7953 = vmatprep.subr.bf16.mxu0 %v3895_v1  ;;  %v3852_v30 = vsel %vm1812_vm2, %v10866_v20, 0.0  ;;  %v10870_v5 = vpop.eup %8567  ;;  %8579 = vpow2.f32 %v3844_v37 }
 0xca8   : > { %3853 = vadd.xlane.f32.xlu0 %v3852_v30  ;;  %v3846_v48 = vsel %vm1812_vm2, %v10870_v5, 0.0  ;;  %v8288_v30 = vld [vmem:[%s9654_s12 + $0x10] sm:$0xff]  }
 0xcaa   : > { %v10872_v21 = vpop.eup %8569  ;;  %7954 = vmatpush3.bf16.msra.mxu0 %v3895_v1 }
 0xcab   : > { %v3855_v28 = vsel %vm1812_vm2, %v10872_v21, 0.0  ;;  %v10876_v24 = vpop.eup %8571 }
 0xcac   : > { %3856 = vadd.xlane.f32.xlu1 %v3855_v28  ;;  %3847 = vadd.xlane.f32.xlu0 %v3846_v48  ;;  %v3849_v32 = vsel %vm1812_vm2, %v10876_v24, 0.0 }
 0xcb0   : > { %v10882_v12 = vpop.eup %8573  ;;  %3850 = vadd.xlane.f32.xlu1 %v3849_v32 }
 0xcb1   : > { %v3861_v16 = vsel %vm1812_vm2, %v10882_v12, 0.0 }
 0xcb2   : > { %v10886_v63 = vpop.eup %8575  ;;  %3862 = vadd.xlane.f32.xlu0 %v3861_v16 }
 0xcb3   : > { %v3858_v45 = vsel %vm1812_vm2, %v10886_v63, 0.0  ;;  %v10890_v8 = vpop.eup %8577 }
 0xcb4   : > { %3859 = vadd.xlane.f32.xlu1 %v3858_v45  ;;  %v3864_v59 = vsel %vm1812_vm2, %v10890_v8, 0.0  ;;  %v10894_v31 = vpop.eup %8579 }
 0xcb5   : > { %v3867_v2 = vsel %vm1812_vm2, %v10894_v31, 0.0 }
 0xcb8   : > { %3865 = vadd.xlane.f32.xlu1 %v3864_v59 }
 0xcbc   : > { %3868 = vadd.xlane.f32.xlu1 %v3867_v2 }
 0xcc8   : > { %3892 = vrot.lane.b32.xlu0 %v10781_v17, %s9207_s22 }
 0xccc   : > { %4179 = vrot.lane.b32.xlu0 %v8832_v13, %s9208_s10 }
 0xccd   : > { %3890 = vrot.lane.b32.xlu1 %v10785_v0, %s9207_s22 }
 0xcd0   : > { %4175 = vrot.lane.b32.xlu0 %v8833_v40, %s9208_s10 }
 0xcd1   : > { %4177 = vrot.lane.b32.xlu1 %v8834_v57, %s9208_s10 }
 0xcd4   : > { %4165 = vrot.lane.b32.xlu0 %v8835_v11, %s9208_s10 }
 0xcd5   : > { %4173 = vrot.lane.b32.xlu1 %v8836_v27, %s9208_s10 }
 0xcd8   : > { %4169 = vrot.lane.b32.xlu0 %v8837_v54, %s9208_s10 }
 0xcd9   : > { %4167 = vrot.lane.b32.xlu1 %v8838_v61, %s9208_s10 }
 0xcdc   : > { %4578 = vrot.lane.b32.xlu0 %v8832_v13, %s9209_s23 }
 0xcdd   : > { %4171 = vrot.lane.b32.xlu1 %v8839_v51, %s9208_s10 }
 0xce0   : > { %4574 = vrot.lane.b32.xlu0 %v8833_v40, %s9209_s23 }
 0xce1   : > { %4576 = vrot.lane.b32.xlu1 %v8834_v57, %s9209_s23 }
 0xce4   : > { %4564 = vrot.lane.b32.xlu0 %v8835_v11, %s9209_s23 }
 0xce5   : > { %4572 = vrot.lane.b32.xlu1 %v8836_v27, %s9209_s23 }
 0xce8   : > { %4568 = vrot.lane.b32.xlu0 %v8837_v54, %s9209_s23 }
 0xce9   : > { %4566 = vrot.lane.b32.xlu1 %v8838_v61, %s9209_s23 }
 0xced   : > { %4570 = vrot.lane.b32.xlu1 %v8839_v51, %s9209_s23 }
 0xd31   : > { %v3854_v6 = vpop.xlane.xlu0 %3853 }
 0xd35   : > { %v3857_v43 = vpop.xlane.xlu1 %3856  ;;  %v3848_v15 = vpop.xlane.xlu0 %3847 }
 0xd36   : > { %8581 = vrcp.f32 %v3857_v43 }
 0xd37   : > { %8583 = vrcp.f32 %v3848_v15 }
 0xd38   : > { %8585 = vrcp.f32 %v3854_v6 }
 0xd39   : > { %v3851_v44 = vpop.xlane.xlu1 %3850 }
 0xd3a   : > { %8587 = vrcp.f32 %v3851_v44 }
 0xd3b   : > { %v3863_v46 = vpop.xlane.xlu0 %3862 }
 0xd3c   : > { %8589 = vrcp.f32 %v3863_v46 }
 0xd3d   : > { %v3860_v22 = vpop.xlane.xlu1 %3859 }
 0xd3e   : > { %8591 = vrcp.f32 %v3860_v22 }
 0xd3f   : > { %v3893_v25 = vpop.permute.xlu0 %3892 }
 0xd40   : > { %7955 = vmatprep.subr.bf16.mxu0 %v3893_v25 }
 0xd41   : > { %v3866_v58 = vpop.xlane.xlu1 %3865  ;;  %7956 = vmatpush3.bf16.msra.mxu0 %v3893_v25 }
 0xd42   : > { %8593 = vrcp.f32 %v3866_v58 }
 0xd43   : > { %v8582_v38 = vpop.eup %8581  ;;  %v4180_v28 = vpop.permute.xlu0 %4179 }
 0xd44   : > { %v8584_v34 = vpop.eup %8583  ;;  %v3881_v55 = vmul.f32 %v8582_v38, %v10872_v21  ;;  %v4203_v13 = vsel %vm1714_vm0, %v4180_v28, 0 }
 0xd45   : > { %v3869_v50 = vpop.xlane.xlu1 %3868  ;;  %v8586_v4 = vpop.eup %8585  ;;  %v3878_v19 = vmul.f32 %v8584_v34, %v10870_v5 }
 0xd46   : > { %8595 = vrcp.f32 %v3869_v50  ;;  %v3880_v52 = vmul.f32 %v8586_v4, %v10866_v20 }
 0xd47   : > { %v8588_v3 = vpop.eup %8587 }
 0xd48   : > { %v3879_v10 = vmul.f32 %v8588_v3, %v10876_v24  ;;  %v3887_v29 = vpack.c.bf16 %v3881_v55, %v3880_v52  ;;  %v12388_v52 = vmov 0  }
 0xd49   : > { %v8590_v47 = vpop.eup %8589  ;;  %v3891_v53 = vpop.permute.xlu1 %3890 }
 0xd4a   : > { %7957 = vmatprep.subr.bf16.mxu0 %v3891_v53  ;;  %v3886_v60 = vpack.c.bf16 %v3879_v10, %v3878_v19  ;;  %v3883_v37 = vmul.f32 %v8590_v47, %v10882_v12 }
 0xd4b   : > { %v8592_v26 = vpop.eup %8591  ;;  %7958 = vmatpush3.bf16.msra.mxu0 %v3891_v53 }
 0xd4c   : > { %7959 = vmatprep.mubr.msk.bf16.mxu0 %vm1812_vm2, %v3886_v60  ;;  %7967 = vmatprep.subr.bf16.mxu0 %v8287_v39  ;;  %v3882_v1 = vmul.f32 %v8592_v26, %v10886_v63 }
 0xd4d   : > { %v4178_v57 = vpop.permute.xlu1 %4177 }
 0xd4e   : > { %7960 = vmatmul.mubr.msk.bf16.vlgmr.msra.gmra.mxu0 %vm1812_vm2, %v3887_v29  ;;  %v3888_v5 = vpack.c.bf16 %v3883_v37, %v3882_v1  ;;  %v4200_v61 = vsel %vm1714_vm0, %v4178_v57, 0 }
 0xd4f   : > { %7968 = vmatpush3.bf16.msra.mxu0 %v8287_v39  ;;  %v8594_v20 = vpop.eup %8593 }
 0xd50   : > { %7963 = vmatprep.mubr.msk.bf16.mxu0 %vm1812_vm2, %v3888_v5  ;;  %7969 = vmatprep.subr.bf16.mxu0 %v8288_v30  ;;  %v3884_v24 = vmul.f32 %v8594_v20, %v10890_v8 }
 0xd51   : > { %v4174_v43 = vpop.permute.xlu1 %4173 }
 0xd52   : > { %v4194_v22 = vsel %vm1714_vm0, %v4174_v43, 0 }
 0xd53   : > { %v8596_v21 = vpop.eup %8595  ;;  %7970 = vmatpush3.bf16.msra.mxu0 %v8288_v30 }
 0xd54   : > { %8103 = vmatprep.subr.msk.bf16.mxu0 %vm1714_vm0, %v4180_v28  ;;  %v3885_v48 = vmul.f32 %v8596_v21, %v10894_v31  ;;  %v4176_v31 = vpop.permute.xlu0 %4175 }
 0xd55   : > { %v4197_v15 = vsel %vm1714_vm0, %v4176_v31, 0  ;;  %v4168_v46 = vpop.permute.xlu1 %4167 }
 0xd56   : > { %v3889_v32 = vpack.c.bf16 %v3885_v48, %v3884_v24 }
 0xd58   : > { %7964 = vmatmul.mubr.msk.bf16.gmra.mxu0 %vm1812_vm2, %v3889_v32  ;;  %v4166_v6 = vpop.permute.xlu0 %4165 }
 0xd59   : > { %v4172_v58 = vpop.permute.xlu1 %4171 }
 0xd5c   : > { %v4170_v44 = vpop.permute.xlu0 %4169 }
 0xd5d   : > { %v4577_v34 = vpop.permute.xlu1 %4576 }
 0xd5e   : > { %v4599_v3 = vsel %vm1714_vm0, %v4577_v34, 0 }
 0xd60   : > { %v4579_v25 = vpop.permute.xlu0 %4578 }
 0xd61   : > { %v4602_v38 = vsel %vm1714_vm0, %v4579_v25, 0  ;;  %v4573_v19 = vpop.permute.xlu1 %4572 }
 0xd62   : > { %v4593_v10 = vsel %vm1714_vm0, %v4573_v19, 0 }
 0xd64   : > { %v4575_v50 = vpop.permute.xlu0 %4574 }
 0xd65   : > { %v4596_v55 = vsel %vm1714_vm0, %v4575_v50, 0  ;;  %v4567_v39 = vpop.permute.xlu1 %4566 }
 0xd68   : > { %v4565_v4 = vpop.permute.xlu0 %4564 }
 0xd69   : > { %v4571_v53 = vpop.permute.xlu1 %4570 }
 0xd6c   : > { %v4569_v47 = vpop.permute.xlu0 %4568 }
 0xe0e   : > { %v7961_v12 = vpop.f32.mrf.mxu0 }
 0xe10   : > { %v3948_v16 = vpop.f32.mrf.mxu0 }
 0xe12   : > { %v7962_v63 = vpop.f32.mrf.mxu0 }
 0xe13   : > { %v3980_v2 = vpack.c.bf16 %v7962_v63, %v7961_v12 }
 0xe14   : > { %v3951_v45 = vpop.f32.mrf.mxu0 }
 0xe15   : > { %v3979_v59 = vpack.c.bf16 %v3951_v45, %v3948_v16 }
 0xe17   : > { %7971 = vmatprep.mubr.msk.bf16.mxu0 %vm1714_vm0, %v3979_v59 }
 0xe18   : > { %v7965_v40 = vpop.f32.mrf.mxu0  ;;  %7972 = vmatmul.mubr.msk.bf16.vlgmr.msra.gmra.mxu0 %vm1714_vm0, %v3980_v2 }
 0xe19   : > { %7992 = vmatpush3.bf16.xpose.msra.mxu0 %v4203_v13 }
 0xe1a   : > { %8104 = vmatprep.subr.msk.bf16.mxu0 %vm1714_vm0, %v4178_v57  ;;  %v3964_v8 = vpop.f32.mrf.mxu0 }
 0xe1c   : > { %v7966_v11 = vpop.f32.mrf.mxu0 }
 0xe1d   : > { %v3982_v51 = vpack.c.bf16 %v7966_v11, %v7965_v40 }
 0xe1e   : > { %v3967_v27 = vpop.f32.mrf.mxu0 }
 0xe1f   : > { %v3981_v54 = vpack.c.bf16 %v3967_v27, %v3964_v8 }
 0xe21   : > { %7994 = vmatpush3.bf16.xpose.msra.mxu0 %v4200_v61  ;;  %7975 = vmatprep.mubr.msk.bf16.mxu0 %vm1714_vm0, %v3981_v54 }
 0xe22   : > { %8105 = vmatprep.subr.msk.bf16.mxu0 %vm1714_vm0, %v4176_v31  ;;  %7976 = vmatmul.mubr.msk.bf16.gmra.mxu0 %vm1714_vm0, %v3982_v51 }
 0xe23   : > { %7999 = vmatprep.mubr.msk.bf16.mxu0 %vm1714_vm0, %v4166_v6 }
 0xe29   : > { %7996 = vmatpush3.bf16.xpose.msra.mxu0 %v4197_v15 }
 0xe2a   : > { %8106 = vmatprep.subr.msk.bf16.mxu0 %vm1714_vm0, %v4174_v43 }
 0xe31   : > { %7998 = vmatpush3.bf16.xpose.msra.mxu0 %v4194_v22 }
 0xe32   : > { %8107 = vmatprep.subr.msk.bf16.mxu0 %vm1714_vm0, %v4579_v25 }
 0xe38   : > { %8000 = vmatmul.mubr.msk.bf16.vlgmr.msra.gmra.mxu0 %vm1714_vm0, %v4168_v46 }
 0xe39   : > { %8003 = vmatprep.mubr.msk.bf16.mxu0 %vm1714_vm0, %v4170_v44  ;;  %8036 = vmatpush3.bf16.xpose.msra.mxu0 %v4602_v38 }
 0xe3a   : > { %8108 = vmatprep.subr.msk.bf16.mxu0 %vm1714_vm0, %v4577_v34 }
 0xe40   : > { %8004 = vmatmul.mubr.msk.bf16.gmra.mxu0 %vm1714_vm0, %v4172_v58 }
 0xe41   : > { %8038 = vmatpush3.bf16.xpose.msra.mxu0 %v4599_v3  ;;  %8043 = vmatprep.mubr.msk.bf16.mxu0 %vm1714_vm0, %v4565_v4 }
 0xe42   : > { %8109 = vmatprep.subr.msk.bf16.mxu0 %vm1714_vm0, %v4575_v50 }
 0xe49   : > { %8040 = vmatpush3.bf16.xpose.msra.mxu0 %v4596_v55 }
 0xe4a   : > { %8110 = vmatprep.subr.msk.bf16.mxu0 %vm1714_vm0, %v4573_v19 }
 0xe51   : > { %8042 = vmatpush3.bf16.xpose.msra.mxu0 %v4593_v10 }
 0xe58   : > { %8044 = vmatmul.mubr.msk.bf16.vlgmr.msra.gmra.mxu0 %vm1714_vm0, %v4567_v39 }
 0xe59   : > { %8047 = vmatprep.mubr.msk.bf16.mxu0 %vm1714_vm0, %v4569_v47 }
 0xe60   : > { %8048 = vmatmul.mubr.msk.bf16.gmra.mxu0 %vm1714_vm0, %v4571_v53 }
 0xe61   : > { %5486 = vmatprep.mubr.bf16.mxu0 %v12388_v52 }
 0xed8   : > { %v10961_v60 = vpop.f32.mrf.mxu0 }
 0xeda   : > { %v10963_v26 = vpop.f32.mrf.mxu0 }
 0xedc   : > { %v10965_v29 = vpop.f32.mrf.mxu0 }
 0xede   : > { %v10967_v1 = vpop.f32.mrf.mxu0 }
 0xee2   : > { %v10969_v37 = vpop.f32.mrf.mxu0 }
 0xee4   : > { %v10971_v30 = vpop.f32.mrf.mxu0 }
 0xee6   : > { %v10973_v5 = vpop.f32.mrf.mxu0 }
 0xee8   : > { %v10975_v20 = vpop.f32.mrf.mxu0 }
 0xef8   : > { %v8001_v21 = vpop.f32.mrf.mxu0 }
 0xef9   : > { %v4272_v12 = vsel %vm10036_vm1, %v8001_v21, -1e+30 }
 0xefa   : > { %v4239_v28 = vpop.f32.mrf.mxu0  ;;  %v4284_v45 = vsel %vm1812_vm2, %v4272_v12, -inf }
 0xefb   : > { %v4270_v24 = vsel %vm10041_vm3, %v4239_v28, -1e+30 }
 0xefc   : > { %v4278_v48 = vsel %vm1812_vm2, %v4270_v24, -inf  ;;  %v8002_v32 = vpop.f32.mrf.mxu0 }
 0xefd   : > { %4279 = vmax.xlane.f32.xlu0 %v4278_v48  ;;  %v4273_v13 = vsel %vm10057_vm4, %v8002_v32, -1e+30 }
 0xefe   : > { %v4242_v16 = vpop.f32.mrf.mxu0  ;;  %v4287_v57 = vsel %vm1812_vm2, %v4273_v13, -inf }
 0xeff   : > { %v4271_v63 = vsel %vm10062_vm5, %v4242_v16, -1e+30 }
 0xf00   : > { %v4281_v59 = vsel %vm1812_vm2, %v4271_v63, -inf  ;;  %v8005_v2 = vpop.f32.mrf.mxu0 }
 0xf01   : > { %4285 = vmax.xlane.f32.xlu0 %v4284_v45  ;;  %4282 = vmax.xlane.f32.xlu1 %v4281_v59  ;;  %v4276_v51 = vsel %vm10077_vm6, %v8005_v2, -1e+30 }
 0xf02   : > { %v4255_v40 = vpop.f32.mrf.mxu0  ;;  %v4296_v43 = vsel %vm1812_vm2, %v4276_v51, -inf }
 0xf03   : > { %v4274_v31 = vsel %vm10095_vm8, %v4255_v40, -1e+30 }
 0xf04   : > { %v8006_v8 = vpop.f32.mrf.mxu0  ;;  %v4290_v54 = vsel %vm1812_vm2, %v4274_v31, -inf }
 0xf05   : > { %4288 = vmax.xlane.f32.xlu0 %v4287_v57  ;;  %v4277_v6 = vsel %vm10087_vm7, %v8006_v8, -1e+30 }
 0xf06   : > { %v4258_v11 = vpop.f32.mrf.mxu0  ;;  %v4299_v15 = vsel %vm1812_vm2, %v4277_v6, -inf }
 0xf07   : > { %v4275_v27 = vsel %vm10099_vm9, %v4258_v11, -1e+30  ;;  %v8840_v11 = vld [vmem:[#allocation3 + $0xb0] ss:$12 sps:$4 sm:$0xff]  }
 0xf08   : > { %v4293_v61 = vsel %vm1812_vm2, %v4275_v27, -inf }
 0xf09   : > { %4291 = vmax.xlane.f32.xlu0 %v4290_v54  ;;  %4294 = vmax.xlane.f32.xlu1 %v4293_v61 }
 0xf0d   : > { %4297 = vmax.xlane.f32.xlu0 %v4296_v43  ;;  %4300 = vmax.xlane.f32.xlu1 %v4299_v15 }
 0xf18   : > { %v8045_v15 = vpop.f32.mrf.mxu0 }
 0xf86   : > { %v4280_v44 = vpop.xlane.xlu0 %4279 }
 0xf87   : > { %v4302_v46 = vsub.f32 %v4270_v24, %v4280_v44  ;;  %v4638_v44 = vpop.f32.mrf.mxu0 }
 0xf89   : > { %v4310_v50 = vmul.f32 1.442695, %v4302_v46 }
 0xf8a   : > { %v4283_v22 = vpop.xlane.xlu1 %4282  ;;  %v4286_v25 = vpop.xlane.xlu0 %4285 }
 0xf8b   : > { %v4304_v58 = vsub.f32 %v4272_v12, %v4286_v25  ;;  %v4303_v38 = vsub.f32 %v4271_v63, %v4283_v22  ;;  %v8046_v22 = vpop.f32.mrf.mxu0  ;;  %v11038_v25 = vsel %vm10041_vm3, %v4638_v44, -1e+30  ;;  %v8289_v44 = vld [vmem:[%s9654_s12 + $0x28] sm:$0xff]  }
 0xf8c   : > { %v11052_v23 = vsel %vm10057_vm4, %v8046_v22, -1e+30 }
 0xf8d   : > { %v4314_v34 = vmul.f32 1.442695, %v4304_v58  ;;  %v4312_v55 = vmul.f32 1.442695, %v4303_v38  ;;  %v4677_v58 = vsel %vm1812_vm2, %v11038_v25, -inf }
 0xf8e   : > { %v4289_v4 = vpop.xlane.xlu0 %4288  ;;  %v11046_v38 = vsel %vm10036_vm1, %v8045_v15, -1e+30 }
 0xf8f   : > { %v4305_v3 = vsub.f32 %v4273_v13, %v4289_v4  ;;  %8597 = vpow2.f32 %v4314_v34 }
 0xf90   : > { %8599 = vpow2.f32 %v4310_v50  ;;  %v4683_v50 = vsel %vm1812_vm2, %v11046_v38, -inf }
 0xf91   : > { %v4316_v19 = vmul.f32 1.442695, %v4305_v3  ;;  %v4686_v3 = vsel %vm1812_vm2, %v11052_v23, -inf }
 0xf92   : > { %v4292_v10 = vpop.xlane.xlu0 %4291  ;;  %v4295_v8 = vpop.xlane.xlu1 %4294 }
 0xf93   : > { %8601 = vpow2.f32 %v4316_v19  ;;  %v4306_v39 = vsub.f32 %v4274_v31, %v4292_v10  ;;  %v4307_v61 = vsub.f32 %v4275_v27, %v4295_v8  ;;  %v4641_v27 = vpop.f32.mrf.mxu0 }
 0xf94   : > { %8603 = vpow2.f32 %v4312_v55  ;;  %v11073_v10 = vsel %vm10062_vm5, %v4641_v27, -1e+30 }
 0xf95   : > { %v4318_v28 = vmul.f32 1.442695, %v4306_v39  ;;  %v4320_v43 = vmul.f32 1.442695, %v4307_v61  ;;  %v8049_v34 = vpop.f32.mrf.mxu0  ;;  %v4680_v49 = vsel %vm1812_vm2, %v11073_v10, -inf }
 0xf96   : > { %v4298_v47 = vpop.xlane.xlu0 %4297  ;;  %v4301_v31 = vpop.xlane.xlu1 %4300  ;;  %v11064_v19 = vsel %vm10077_vm6, %v8049_v34, -1e+30 }
 0xf97   : > { %v4308_v53 = vsub.f32 %v4276_v51, %v4298_v47  ;;  %v4309_v54 = vsub.f32 %v4277_v6, %v4301_v31  ;;  %v4654_v4 = vpop.f32.mrf.mxu0  ;;  %v4695_v36 = vsel %vm1812_vm2, %v11064_v19, -inf }
 0xf98   : > { %v11058_v55 = vsel %vm10095_vm8, %v4654_v4, -1e+30 }
 0xf99   : > { %v4322_v21 = vmul.f32 1.442695, %v4308_v53  ;;  %v4324_v51 = vmul.f32 1.442695, %v4309_v54  ;;  %v4689_v14 = vsel %vm1812_vm2, %v11058_v55, -inf  ;;  %v8050_v7 = vpop.f32.mrf.mxu0 }
 0xf9b   : > { %8605 = vpow2.f32 %v4322_v21  ;;  %v4657_v39 = vpop.f32.mrf.mxu0 }
 0xf9c   : > { %v11001_v24 = vpop.eup %8597  ;;  %8607 = vpow2.f32 %v4318_v28  ;;  %v11079_v47 = vsel %vm10099_vm9, %v4657_v39, -1e+30 }
 0xf9d   : > { %v4332_v48 = vsel %vm1812_vm2, %v11001_v24, 0.0  ;;  %v11005_v32 = vpop.eup %8599  ;;  %8609 = vpow2.f32 %v4324_v51  ;;  %v4692_v53 = vsel %vm1812_vm2, %v11079_v47, -inf }
 0xf9e   : > { %4333 = vadd.xlane.f32.xlu0 %v4332_v48  ;;  %v4326_v45 = vsel %vm1812_vm2, %v11005_v32, 0.0  ;;  %8611 = vpow2.f32 %v4320_v43 }
 0xfa0   : > { %v11007_v12 = vpop.eup %8601 }
 0xfa1   : > { %v4335_v16 = vsel %vm1812_vm2, %v11007_v12, 0.0  ;;  %v11011_v63 = vpop.eup %8603 }
 0xfa2   : > { %4336 = vadd.xlane.f32.xlu1 %v4335_v16  ;;  %4327 = vadd.xlane.f32.xlu0 %v4326_v45  ;;  %v4329_v59 = vsel %vm1812_vm2, %v11011_v63, 0.0 }
 0xfa6   : > { %4330 = vadd.xlane.f32.xlu1 %v4329_v59 }
 0xfa8   : > { %v11017_v2 = vpop.eup %8605 }
 0xfa9   : > { %v4344_v13 = vsel %vm1812_vm2, %v11017_v2, 0.0  ;;  %v11021_v40 = vpop.eup %8607 }
 0xfaa   : > { %4345 = vadd.xlane.f32.xlu0 %v4344_v13  ;;  %v4338_v57 = vsel %vm1812_vm2, %v11021_v40, 0.0  ;;  %v11030_v46 = vpop.eup %8609 }
 0xfae   : > { %4339 = vadd.xlane.f32.xlu0 %v4338_v57 }
 0xfb7   : > { %4374 = vrot.lane.b32.xlu1 %v10777_v33, %s9208_s10  ;;  %v4347_v33 = vsel %vm1812_vm2, %v11030_v46, 0.0 }
 0xfbb   : > { %4372 = vrot.lane.b32.xlu1 %v10781_v17, %s9208_s10  ;;  %v11034_v17 = vpop.eup %8611 }
 0xfbc   : > { %v4341_v6 = vsel %vm1812_vm2, %v11034_v17, 0.0 }
 0xfc4   : > { %4376 = vrot.lane.b32.xlu0 %v8840_v11, %s9208_s10 }
 0xfdf   : > { %4348 = vadd.xlane.f32.xlu1 %v4347_v33 }
 0xfe3   : > { %4342 = vadd.xlane.f32.xlu1 %v4341_v6  ;;  %4678 = vmax.xlane.f32.xlu0 %v4677_v58 }
 0xfe7   : > { %4684 = vmax.xlane.f32.xlu0 %v4683_v50  ;;  %v8290_v50 = vld [vmem:[%s9654_s12 + $0x20] sm:$0xff]  }
 0xfeb   : > { %4687 = vmax.xlane.f32.xlu0 %v4686_v3 }
 0xfef   : > { %4690 = vmax.xlane.f32.xlu0 %v4689_v14 }
 0xff3   : > { %4696 = vmax.xlane.f32.xlu0 %v4695_v36 }
 0xff4   : > { %4370 = vrot.lane.b32.xlu1 %v10785_v0, %s9208_s10  ;;  %v11085_v0 = vsel %vm10087_vm7, %v8050_v7, -1e+30 }
 0xff5   : > { %v4698_v42 = vsel %vm1812_vm2, %v11085_v0, -inf }
0x1009   : > { %4775 = vrot.lane.b32.xlu0 %v8840_v11, %s9209_s23 }
0x1018   : > { %4681 = vmax.xlane.f32.xlu1 %v4680_v49 }
0x101c   : > { %4693 = vmax.xlane.f32.xlu1 %v4692_v53 }
0x1020   : > { %4699 = vmax.xlane.f32.xlu1 %v4698_v42 }
0x1027   : > { %v4334_v21 = vpop.xlane.xlu0 %4333 }
0x102b   : > { %v4337_v28 = vpop.xlane.xlu1 %4336  ;;  %v4328_v48 = vpop.xlane.xlu0 %4327 }
0x102c   : > { %8613 = vrcp.f32 %v4328_v48 }
0x102f   : > { %v4331_v35 = vpop.xlane.xlu1 %4330 }
0x1030   : > { %8615 = vrcp.f32 %v4331_v35 }
0x1031   : > { %8617 = vrcp.f32 %v4337_v28 }
0x1032   : > { %8619 = vrcp.f32 %v4334_v21 }
0x1033   : > { %v4346_v16 = vpop.xlane.xlu0 %4345  ;;  %v4375_v13 = vpop.permute.xlu1 %4374 }
0x1037   : > { %v4340_v45 = vpop.xlane.xlu0 %4339  ;;  %v4373_v54 = vpop.permute.xlu1 %4372 }
0x1039   : > { %v8614_v59 = vpop.eup %8613 }
0x103a   : > { %v4358_v56 = vmul.f32 %v8614_v59, %v11005_v32  ;;  %v8841_v59 = vld [vmem:[#allocation3 + $0x80] ss:$12 sps:$4 sm:$0xff]  }
0x103b   : > { %v4377_v57 = vpop.permute.xlu0 %4376 }
0x103c   : > { %8007 = vmatprep.subr.bf16.mxu1 %v4377_v57 }
0x103d   : > { %v8616_v8 = vpop.eup %8615  ;;  %8008 = vmatpush3.bf16.msra.mxu1 %v4377_v57 }
0x103e   : > { %v4359_v31 = vmul.f32 %v8616_v8, %v11011_v63  ;;  %8009 = vmatprep.subr.bf16.mxu1 %v4375_v13  ;;  %v8618_v51 = vpop.eup %8617 }
0x103f   : > { %v8620_v43 = vpop.eup %8619  ;;  %v4361_v15 = vmul.f32 %v8618_v51, %v11007_v12 }
0x1040   : > { %v4366_v11 = vpack.c.bf16 %v4359_v31, %v4358_v56  ;;  %v4360_v27 = vmul.f32 %v8620_v43, %v11001_v24  ;;  %v8842_v56 = vld [vmem:[#allocation3 + $0x68] ss:$12 sps:$4 sm:$0xff]  }
0x1041   : > { %8010 = vmatpush3.bf16.msra.mxu1 %v4375_v13 }
0x1042   : > { %8015 = vmatprep.mubr.msk.bf16.mxu1 %vm1812_vm2, %v4366_v11  ;;  %8011 = vmatprep.subr.bf16.mxu1 %v4373_v54  ;;  %v4367_v34 = vpack.c.bf16 %v4361_v15, %v4360_v27 }
0x1045   : > { %8012 = vmatpush3.bf16.msra.mxu1 %v4373_v54 }
0x1068   : > { %v4349_v61 = vpop.xlane.xlu1 %4348 }
0x1069   : > { %8621 = vrcp.f32 %v4349_v61 }
0x106a   : > { %8623 = vrcp.f32 %v4340_v45 }
0x106b   : > { %8625 = vrcp.f32 %v4346_v16 }
0x106c   : > { %v4343_v32 = vpop.xlane.xlu1 %4342  ;;  %v4679_v63 = vpop.xlane.xlu0 %4678 }
0x106d   : > { %8627 = vrcp.f32 %v4343_v32  ;;  %v4701_v22 = vsub.f32 %v11038_v25, %v4679_v63 }
0x106f   : > { %v4709_v4 = vmul.f32 1.442695, %v4701_v22 }
0x1070   : > { %v4371_v33 = vpop.permute.xlu1 %4370  ;;  %v4685_v6 = vpop.xlane.xlu0 %4684 }
0x1071   : > { %8013 = vmatprep.subr.bf16.mxu1 %v4371_v33  ;;  %v4703_v58 = vsub.f32 %v11046_v38, %v4685_v6 }
0x1072   : > { %8014 = vmatpush3.bf16.msra.mxu1 %v4371_v33 }
0x1073   : > { %8023 = vmatprep.subr.bf16.mxu1 %v8289_v44  ;;  %v4713_v3 = vmul.f32 1.442695, %v4703_v58  ;;  %v11146_v58 = vld [vmem:[#allocation2 + $0x30] sm:$0xff] }
0x1074   : > { %v4688_v14 = vpop.xlane.xlu0 %4687 }
0x1075   : > { %8016 = vmatmul.mubr.msk.bf16.vlgmr.msra.gmra.mxu1 %vm1812_vm2, %v4367_v34  ;;  %8629 = vpow2.f32 %v4713_v3  ;;  %v4704_v12 = vsub.f32 %v11052_v23, %v4688_v14  ;;  %v11158_v3 = vld [vmem:[#allocation2 + $0x8] sm:$0xff]  ;;  %v8843_v14 = vld [vmem:[#allocation3 + $0x98] ss:$12 sps:$4 sm:$0xff]  }
0x1076   : > { %8024 = vmatpush3.bf16.msra.mxu1 %v8289_v44  ;;  %v8622_v25 = vpop.eup %8621  ;;  %8631 = vpow2.f32 %v4709_v4  ;;  %v11154_v4 = vld [vmem:[#allocation2 + $0x18] sm:$0xff] }
0x1077   : > { %8025 = vmatprep.subr.bf16.mxu1 %v8290_v50  ;;  %v8624_v24 = vpop.eup %8623  ;;  %v4715_v36 = vmul.f32 1.442695, %v4704_v12  ;;  %v4365_v49 = vmul.f32 %v8622_v25, %v11030_v46  ;;  %v12389_v12 = vld [vmem:[#allocation32_spill] sm:$0xff]  ;;  %v12390_v25 = vld [vmem:[#allocation33_spill] sm:$0xff] }
0x1078   : > { %v8626_v7 = vpop.eup %8625  ;;  %v4691_v38 = vpop.xlane.xlu0 %4690  ;;  %v4362_v53 = vmul.f32 %v8624_v24, %v11021_v40  ;;  %v2483_v24 = vadd.f32 %v12390_v25, %v12389_v12 }
0x1079   : > { %8633 = vpow2.f32 %v4715_v36  ;;  %v4364_v21 = vmul.f32 %v8626_v7, %v11017_v2  ;;  %v4705_v31 = vsub.f32 %v11058_v55, %v4691_v38  ;;  %v8844_v38 = vld [vmem:[#allocation2 + $0x68] sm:$0xff] }
0x107a   : > { %v8628_v39 = vpop.eup %8627  ;;  %8026 = vmatpush3.bf16.msra.mxu1 %v8290_v50  ;;  %v11151_v50 = vld [vmem:[#allocation2 + $0x58] sm:$0xff]  ;;  %v2890_v36 = vadd.f32 %v10773_v41, %v2483_v24 }
0x107b   : > { %v4363_v42 = vmul.f32 %v8628_v39, %v11034_v17  ;;  %v4369_v48 = vpack.c.bf16 %v4365_v49, %v4364_v21  ;;  %v4717_v51 = vmul.f32 1.442695, %v4705_v31  ;;  %v11166_v49 = vld [vmem:[#allocation2] sm:$0xff]  ;;  %v11174_v21 = vpop.f32.mrf.mxu1 }
0x107c   : > { %v4697_v23 = vpop.xlane.xlu0 %4696  ;;  %v3289_v7 = vadd.f32 %v10828_v9, %v2890_v36 }
0x107d   : > { %v4368_v28 = vpack.c.bf16 %v4363_v42, %v4362_v53  ;;  %v4707_v13 = vsub.f32 %v11064_v19, %v4697_v23  ;;  %v8845_v53 = vld [vmem:[%s9678_s9] ss:$0 sm:$0xff]  ;;  %v11176_v23 = vpop.f32.mrf.mxu1 }
0x107e   : > { %v3297_v39 = vadd.f32 %v8844_v38, %v3289_v7 }
0x107f   : > { %8019 = vmatprep.mubr.msk.bf16.mxu1 %vm1812_vm2, %v4368_v28  ;;  %v4721_v11 = vmul.f32 1.442695, %v4707_v13  ;;  %v11178_v41 = vpop.f32.mrf.mxu1 }
0x1080   : > { %8020 = vmatmul.mubr.msk.bf16.gmra.mxu1 %vm1812_vm2, %v4369_v48  ;;  %v11106_v35 = vpop.permute.xlu0 %4775  ;;  %v11170_v42 = vadd.f32 %v8845_v53, %v3297_v39 }
0x1081   : > { %8051 = vmatprep.subr.bf16.mxu1 %v11106_v35  ;;  %v11180_v9 = vpop.f32.mrf.mxu1 }
0x1082   : > { %v11109_v16 = vpop.eup %8629  ;;  %12391 = vst [vmem:[#allocation31_spill] sm:$0xff] %v11170_v42 }
0x1083   : > { %v4731_v40 = vsel %vm1812_vm2, %v11109_v16, 0.0  ;;  %v11113_v46 = vpop.eup %8631  ;;  %v11182_v28 = vpop.f32.mrf.mxu1 }
0x1084   : > { %4732 = vadd.xlane.f32.xlu0 %v4731_v40  ;;  %v4725_v17 = vsel %vm1812_vm2, %v11113_v46, 0.0 }
0x1085   : > { %v11184_v48 = vpop.f32.mrf.mxu1 }
0x1086   : > { %v11115_v2 = vpop.eup %8633 }
0x1087   : > { %v4734_v45 = vsel %vm1812_vm2, %v11115_v2, 0.0  ;;  %v11186_v40 = vpop.f32.mrf.mxu1 }
0x1088   : > { %4726 = vadd.xlane.f32.xlu0 %v4725_v17  ;;  %4735 = vadd.xlane.f32.xlu1 %v4734_v45 }
0x1089   : > { %v11188_v17 = vpop.f32.mrf.mxu1 }
0x109e   : > { %4771 = vrot.lane.b32.xlu0 %v8841_v59, %s9209_s23 }
0x10a1   : > { %v4682_v57 = vpop.xlane.xlu1 %4681 }
0x10a2   : > { %v4702_v8 = vsub.f32 %v11073_v10, %v4682_v57  ;;  %4769 = vrot.lane.b32.xlu0 %v8842_v56, %s9209_s23 }
0x10a4   : > { %v4711_v54 = vmul.f32 1.442695, %v4702_v8 }
0x10a5   : > { %v4694_v61 = vpop.xlane.xlu1 %4693 }
0x10a6   : > { %8635 = vpow2.f32 %v4711_v54  ;;  %v4706_v19 = vsub.f32 %v11079_v47, %v4694_v61 }
0x10a7   : > { %8637 = vpow2.f32 %v4721_v11 }
0x10a8   : > { %8639 = vpow2.f32 %v4717_v51  ;;  %v4719_v15 = vmul.f32 1.442695, %v4706_v19 }
0x10a9   : > { %v4700_v32 = vpop.xlane.xlu1 %4699 }
0x10aa   : > { %v4708_v63 = vsub.f32 %v11085_v0, %v4700_v32 }
0x10ac   : > { %v4723_v43 = vmul.f32 1.442695, %v4708_v63 }
0x10ae   : > { %8641 = vpow2.f32 %v4723_v43 }
0x10af   : > { %8643 = vpow2.f32 %v4719_v15 }
0x10b3   : > { %v11128_v10 = vpop.eup %8635 }
0x10b4   : > { %v4728_v55 = vsel %vm1812_vm2, %v11128_v10, 0.0  ;;  %v11132_v44 = vpop.eup %8637 }
0x10b5   : > { %4729 = vadd.xlane.f32.xlu1 %v4728_v55  ;;  %v4743_v22 = vsel %vm1812_vm2, %v11132_v44, 0.0  ;;  %v11136_v33 = vpop.eup %8639 }
0x10b6   : > { %v4737_v47 = vsel %vm1812_vm2, %v11136_v33, 0.0 }
0x10b9   : > { %4744 = vadd.xlane.f32.xlu1 %v4743_v22 }
0x10bb   : > { %v11140_v0 = vpop.eup %8641 }
0x10bc   : > { %v4746_v27 = vsel %vm1812_vm2, %v11140_v0, 0.0  ;;  %v11144_v6 = vpop.eup %8643 }
0x10bd   : > { %4738 = vadd.xlane.f32.xlu1 %v4737_v47  ;;  %v4740_v34 = vsel %vm1812_vm2, %v11144_v6, 0.0 }
0x10c1   : > { %4747 = vadd.xlane.f32.xlu1 %v4746_v27  ;;  %5012 = vadd.xlane.f32.xlu0 %v11146_v58 }
0x10c5   : > { %4741 = vadd.xlane.f32.xlu1 %v4740_v34  ;;  %5016 = vadd.xlane.f32.xlu0 %v11151_v50 }
0x10c9   : > { %5018 = vadd.xlane.f32.xlu0 %v11154_v4 }
0x10cd   : > { %5020 = vadd.xlane.f32.xlu0 %v10830_v62 }
0x10d1   : > { %5024 = vadd.xlane.f32.xlu0 %v11158_v3 }
0x10d6   : > { %4773 = vrot.lane.b32.xlu1 %v8843_v14, %s9209_s23 }
0x10fa   : > { %5014 = vadd.xlane.f32.xlu1 %v11166_v49 }
0x10fe   : > { %5022 = vadd.xlane.f32.xlu1 %v11170_v42 }
0x1102   : > { %5026 = vadd.xlane.f32.xlu1 %v10832_v18 }
0x110d   : > { %v4733_v45 = vpop.xlane.xlu0 %4732 }
0x1111   : > { %v4736_v8 = vpop.xlane.xlu1 %4735  ;;  %v4727_v56 = vpop.xlane.xlu0 %4726 }
0x1112   : > { %8645 = vrcp.f32 %v4727_v56 }
0x1115   : > { %v4772_v24 = vpop.permute.xlu0 %4771 }
0x1119   : > { %v4770_v39 = vpop.permute.xlu0 %4769 }
0x111f   : > { %v8646_v47 = vpop.eup %8645 }
0x1135   : > { %v8017_v59 = vpop.f32.mrf.mxu1 }
0x1137   : > { %v4428_v13 = vpop.f32.mrf.mxu1 }
0x1139   : > { %v8018_v57 = vpop.f32.mrf.mxu1 }
0x113a   : > { %v4460_v54 = vpack.c.bf16 %v8018_v57, %v8017_v59 }
0x113b   : > { %v4431_v31 = vpop.f32.mrf.mxu1 }
0x113c   : > { %v4459_v11 = vpack.c.bf16 %v4431_v31, %v4428_v13 }
0x113e   : > { %8027 = vmatprep.mubr.msk.bf16.mxu1 %vm1714_vm0, %v4459_v11  ;;  %v4730_v61 = vpop.xlane.xlu1 %4729 }
0x113f   : > { %8647 = vrcp.f32 %v4730_v61  ;;  %8028 = vmatmul.mubr.msk.bf16.vlgmr.msra.gmra.mxu1 %vm1714_vm0, %v4460_v54  ;;  %v8291_v54 = vld [vmem:[%s9654_s12 + $0x38] sm:$0xff]  }
0x1140   : > { %8052 = vmatpush3.bf16.msra.mxu1 %v11106_v35  ;;  %v8021_v51 = vpop.f32.mrf.mxu1  ;;  %8649 = vrcp.f32 %v4736_v8  ;;  %v4757_v35 = vmul.f32 %v8646_v47, %v11113_v46 }
0x1141   : > { %8651 = vrcp.f32 %v4733_v45 }
0x1142   : > { %v4444_v32 = vpop.f32.mrf.mxu1  ;;  %v4745_v63 = vpop.xlane.xlu1 %4744 }
0x1144   : > { %v8022_v19 = vpop.f32.mrf.mxu1 }
0x1145   : > { %v4462_v22 = vpack.c.bf16 %v8022_v19, %v8021_v51  ;;  %v4135_v51 = vadd.f32 %v11176_v23, %v10963_v26  ;;  %v4151_v26 = vadd.f32 %v11184_v48, %v10971_v30 }
0x1146   : > { %v4447_v43 = vpop.f32.mrf.mxu1  ;;  %v4739_v15 = vpop.xlane.xlu1 %4738 }
0x1147   : > { %v4461_v55 = vpack.c.bf16 %v4447_v43, %v4444_v32  ;;  %8653 = vrcp.f32 %v4739_v15  ;;  %v4138_v43 = vadd.f32 %v11180_v9, %v10967_v1  ;;  %v4154_v1 = vadd.f32 %v11188_v17, %v10975_v20 }
0x1149   : > { %8031 = vmatprep.mubr.msk.bf16.mxu1 %vm1714_vm0, %v4461_v55 }
0x114a   : > { %8032 = vmatmul.mubr.msk.bf16.gmra.mxu1 %vm1714_vm0, %v4462_v22  ;;  %v4748_v27 = vpop.xlane.xlu1 %4747  ;;  %v5013_v17 = vpop.xlane.xlu0 %5012 }
0x114c   : > { %v8648_v34 = vpop.eup %8647 }
0x114d   : > { %v4758_v14 = vmul.f32 %v8648_v34, %v11128_v10  ;;  %v8650_v7 = vpop.eup %8649 }
0x114e   : > { %v4742_v12 = vpop.xlane.xlu1 %4741  ;;  %v8652_v38 = vpop.eup %8651  ;;  %v4760_v46 = vmul.f32 %v8650_v7, %v11115_v2 }
0x114f   : > { %8655 = vrcp.f32 %v4742_v12  ;;  %v4765_v25 = vpack.c.bf16 %v4758_v14, %v4757_v35  ;;  %v4759_v53 = vmul.f32 %v8652_v38, %v11109_v16 }
0x1150   : > { %8657 = vrcp.f32 %v4748_v27 }
0x1151   : > { %8059 = vmatprep.mubr.msk.bf16.mxu1 %vm1812_vm2, %v4765_v25  ;;  %8659 = vrcp.f32 %v4745_v63  ;;  %v4766_v59 = vpack.c.bf16 %v4760_v46, %v4759_v53  ;;  %v8846_v53 = vld [vmem:[#allocation2 + $0x40] sm:$0xff] }
0x1152   : > { %v4774_v36 = vpop.permute.xlu1 %4773 }
0x1153   : > { %8053 = vmatprep.subr.bf16.mxu1 %v4774_v36 }
0x1154   : > { %8054 = vmatpush3.bf16.msra.mxu1 %v4774_v36  ;;  %v8654_v10 = vpop.eup %8653 }
0x1155   : > { %8055 = vmatprep.subr.bf16.mxu1 %v4772_v24  ;;  %v4761_v13 = vmul.f32 %v8654_v10, %v11136_v33  ;;  %v8292_v33 = vld [vmem:[%s9654_s12 + $0x30] sm:$0xff]   ;;  %s12400_s12 = scalar_lea.vmem [#allocation13], %s9638_s19 }
0x1158   : > { %8056 = vmatpush3.bf16.msra.mxu1 %v4772_v24 }
0x1159   : > { %8057 = vmatprep.subr.bf16.mxu1 %v4770_v39 }
0x115c   : > { %v8656_v45 = vpop.eup %8655  ;;  %8058 = vmatpush3.bf16.msra.mxu1 %v4770_v39 }
0x115d   : > { %v4762_v57 = vmul.f32 %v8656_v45, %v11144_v6  ;;  %v8658_v8 = vpop.eup %8657  ;;  %8067 = vmatprep.subr.bf16.mxu1 %v8291_v54  ;;  %v4143_v6 = vadd.f32 %v11174_v21, %v10961_v60  ;;  %v4159_v60 = vadd.f32 %v11182_v28, %v10969_v37 }
0x115e   : > { %v8660_v31 = vpop.eup %8659  ;;  %v4764_v2 = vmul.f32 %v8658_v8, %v11140_v0 }
0x115f   : > { %8060 = vmatmul.mubr.msk.bf16.vlgmr.msra.gmra.mxu1 %vm1812_vm2, %v4766_v59  ;;  %v4767_v56 = vpack.c.bf16 %v4762_v57, %v4761_v13  ;;  %v4763_v11 = vmul.f32 %v8660_v31, %v11132_v44  ;;  %v4146_v44 = vadd.f32 %v11178_v41, %v10965_v29  ;;  %v4162_v29 = vadd.f32 %v11186_v40, %v10973_v5  ;;  %v5017_v59 = vpop.xlane.xlu0 %5016  ;;  %v7267_v13 = vld [vmem:[%s9678_s9] ss:$0 sm:$0xff] }
0x1160   : > { %8068 = vmatpush3.bf16.msra.mxu1 %v8291_v54  ;;  %v8848_v54 = vld [vmem:[#allocation2 + $0x20] sm:$0xff] }
0x1161   : > { %8063 = vmatprep.mubr.msk.bf16.mxu1 %vm1812_vm2, %v4767_v56  ;;  %v4768_v16 = vpack.c.bf16 %v4764_v2, %v4763_v11  ;;  %8069 = vmatprep.subr.bf16.mxu1 %v8292_v33  ;;  %v8847_v56 = vld [vmem:[#allocation2 + $0x10] sm:$0xff] }
0x1164   : > { %8070 = vmatpush3.bf16.msra.mxu1 %v8292_v33 }
0x1167   : > { %8064 = vmatmul.mubr.msk.bf16.gmra.mxu1 %vm1812_vm2, %v4768_v16 }
0x11ff   : > { %v8029_v61 = vpop.f32.mrf.mxu1 }
0x1200   : > { %v4558_v32 = vadd.f32 %v8029_v61, %v4143_v6  ;;  %v8849_v6 = vld [vmem:[#allocation2 + $0x38] sm:$0xff] }
0x1201   : > { %v4525_v0 = vpop.f32.mrf.mxu1 }
0x1202   : > { %v4556_v63 = vadd.f32 %v4525_v0, %v4135_v51 }
0x1203   : > { %v8030_v19 = vpop.f32.mrf.mxu1 }
0x1204   : > { %v4559_v15 = vadd.f32 %v8030_v19, %v4146_v44  ;;  %v5019_v19 = vpop.xlane.xlu0 %5018 }
0x1205   : > { %v4528_v55 = vpop.f32.mrf.mxu1 }
0x1206   : > { %v4557_v22 = vadd.f32 %v4528_v55, %v4138_v43 }
0x120a   : > { %v8033_v21 = vpop.f32.mrf.mxu1 }
0x120b   : > { %v4562_v23 = vadd.f32 %v8033_v21, %v4159_v60 }
0x120c   : > { %v4541_v47 = vpop.f32.mrf.mxu1 }
0x120d   : > { %v4560_v41 = vadd.f32 %v4541_v47, %v4151_v26  ;;  %v8851_v26 = vld [vmem:[#allocation2 + $0x78] sm:$0xff] }
0x120e   : > { %v8034_v27 = vpop.f32.mrf.mxu1 }
0x120f   : > { %v4563_v9 = vadd.f32 %v8034_v27, %v4162_v29 }
0x1210   : > { %v4544_v34 = vpop.f32.mrf.mxu1 }
0x1211   : > { %v4561_v35 = vadd.f32 %v4544_v34, %v4154_v1 }
0x121f   : > { %v8061_v14 = vpop.f32.mrf.mxu1 }
0x1221   : > { %v4827_v12 = vpop.f32.mrf.mxu1 }
0x1223   : > { %v8062_v37 = vpop.f32.mrf.mxu1 }
0x1224   : > { %v4859_v24 = vpack.c.bf16 %v8062_v37, %v8061_v14  ;;  %v5021_v37 = vpop.xlane.xlu0 %5020 }
0x1225   : > { %v4830_v28 = vpop.f32.mrf.mxu1 }
0x1226   : > { %v4858_v25 = vpack.c.bf16 %v4830_v28, %v4827_v12  ;;  %v5046_v12 = vmul.f32 0.0078125, %v5017_v59 }
0x1227   : > { %v8065_v30 = vpop.f32.mrf.mxu1 }
0x1228   : > { %8071 = vmatprep.mubr.msk.bf16.mxu1 %vm1714_vm0, %v4858_v25 }
0x1229   : > { %v4843_v48 = vpop.f32.mrf.mxu1  ;;  %8072 = vmatmul.mubr.msk.bf16.vlgmr.msra.gmra.mxu1 %vm1714_vm0, %v4859_v24  ;;  %v8853_v24 = vld [vmem:[#allocation2 + $0x28] sm:$0xff] }
0x122b   : > { %v8066_v5 = vpop.f32.mrf.mxu1 }
0x122c   : > { %v4861_v20 = vpack.c.bf16 %v8066_v5, %v8065_v30 }
0x122d   : > { %v4846_v40 = vpop.f32.mrf.mxu1 }
0x122e   : > { %v4860_v36 = vpack.c.bf16 %v4846_v40, %v4843_v48 }
0x1230   : > { %8075 = vmatprep.mubr.msk.bf16.mxu1 %vm1714_vm0, %v4860_v36 }
0x1231   : > { %8076 = vmatmul.mubr.msk.bf16.gmra.mxu1 %vm1714_vm0, %v4861_v20 }
0x1232   : > { %5599 = vmatprep.mubr.bf16.mxu1 %v12388_v52 }
0x12e9   : > { %v8073_v7 = vpop.f32.mrf.mxu1 }
0x12ea   : > { %v4957_v39 = vadd.f32 %v8073_v7, %v4558_v32 }
0x12eb   : > { %v4924_v38 = vpop.f32.mrf.mxu1 }
0x12ec   : > { %v4955_v46 = vadd.f32 %v4924_v38, %v4556_v63  ;;  %v4965_v31 = vadd.f32 %v8847_v56, %v4957_v39  ;;  %v8296_v56 = vld [vmem:[%s9663_s25 + $0xe8] ss:$16 sps:$4 sm:$0xff]  }
0x12ed   : > { %v8074_v10 = vpop.f32.mrf.mxu1 }
0x12ee   : > { %v4963_v45 = vadd.f32 %v8846_v53, %v4955_v46  ;;  %v4958_v57 = vadd.f32 %v8074_v10, %v4559_v15  ;;  %v11234_v32 = vadd.f32 %v7267_v13, %v4965_v31  ;;  %v8850_v15 = vld [vmem:[#allocation2 + $0x60] sm:$0xff] }
0x12ef   : > { %v4927_v8 = vpop.f32.mrf.mxu1  ;;  %v8298_v31 = vld [vmem:[%s9663_s25 + $0xec] ss:$16 sps:$4 sm:$0xff]  }
0x12f0   : > { %v11231_v2 = vadd.f32 %v7267_v13, %v4963_v45  ;;  %v4956_v11 = vadd.f32 %v4927_v8, %v4557_v22  ;;  %v4966_v61 = vadd.f32 %v8849_v6, %v4958_v57  ;;  %12393 = vst [vmem:[#allocation32_spill] sm:$0xff] %v11234_v32  ;;  %v5044_v22 = vmul.f32 0.0078125, %v5013_v17  ;;  %v5025_v17 = vpop.xlane.xlu0 %5024  ;;  %v8293_v57 = vld [vmem:[%s9663_s25 + $0xe0] ss:$16 sps:$4 sm:$0xff]   ;;  %v8295_v8 = vld [vmem:[%s9663_s25 + $0xe4] ss:$16 sps:$4 sm:$0xff]   ;;  %5567 = vmatprep.subr.bf16.mxu1 %v8298_v31 }
0x12f1   : > { %v8077_v16 = vpop.f32.mrf.mxu1  ;;  %v5050_v38 = vmul.f32 0.0078125, %v5025_v17  ;;  %5454 = vmatprep.subr.bf16.mxu0 %v8295_v8  ;;  %5568 = vmatpush1.bf16.msra.mxu1 %v8296_v56  ;;  %v8299_v6 = vld [vmem:[%s9663_s25 + $0xc0] ss:$16 sps:$4 sm:$0xff]  }
0x12f2   : > { %12392 = vst [vmem:[#allocation30_spill] sm:$0xff] %v11231_v2  ;;  %v4964_v33 = vadd.f32 %v8848_v54, %v4956_v11  ;;  %5028 = vadd.xlane.f32.xlu0 %v11231_v2  ;;  %v4961_v44 = vadd.f32 %v8077_v16, %v4562_v23  ;;  %v11240_v60 = vadd.f32 %v7267_v13, %v4966_v61  ;;  %v5015_v23 = vpop.xlane.xlu1 %5014  ;;  %v8301_v54 = vld [vmem:[%s9663_s25 + $0xc4] ss:$16 sps:$4 sm:$0xff]   ;;  %v8302_v61 = vld [vmem:[%s9663_s25 + $0xc8] ss:$16 sps:$4 sm:$0xff]  }
0x12f3   : > { %v4940_v51 = vpop.f32.mrf.mxu1  ;;  %v11247_v14 = vsub.f32 %v11146_v58, %v5044_v22  ;;  %v5045_v28 = vmul.f32 0.0078125, %v5015_v23  ;;  %v5048_v58 = vmul.f32 0.0078125, %v5021_v37  ;;  %v11279_v53 = vsub.f32 %v11158_v3, %v5050_v38  ;;  %5455 = vmatpush1.bf16.msra.mxu0 %v8293_v57  ;;  %v8311_v22 = vld [vmem:[%s9663_s25 + $0x80] ss:$16 sps:$4 sm:$0xff]   ;;  %v8325_v23 = vld [vmem:[%s9663_s25 + $0x44] ss:$16 sps:$4 sm:$0xff]  }
0x12f4   : > { %v11236_v0 = vadd.f32 %v7267_v13, %v4964_v33  ;;  %v4959_v63 = vadd.f32 %v4940_v51, %v4560_v41  ;;  %12395 = vst [vmem:[#allocation36_spill] sm:$0xff] %v11240_v60  ;;  %v4969_v47 = vadd.f32 %v8851_v26, %v4961_v44  ;;  %v8852_v41 = vld [vmem:[#allocation2 + $0x70] sm:$0xff]  ;;  %5456 = vmatprep.subr.bf16.mxu0 %v8301_v54  ;;  %v8307_v44 = vld [vmem:[%s9663_s25 + $0xa4] ss:$16 sps:$4 sm:$0xff]   ;;  %v8329_v37 = vld [vmem:[%s9663_s25 + $0x20] ss:$16 sps:$4 sm:$0xff]  }
0x12f5   : > { %v8078_v43 = vpop.f32.mrf.mxu1  ;;  %v11259_v40 = vsub.f32 %v11166_v49, %v5045_v28  ;;  %v5076_v20 = vmul.f32 %v11247_v14, %v11247_v14  ;;  %v11272_v49 = vsub.f32 %v10830_v62, %v5048_v58  ;;  %v5082_v16 = vmul.f32 %v11279_v53, %v11279_v53  ;;  %v8304_v33 = vld [vmem:[%s9663_s25 + $0xcc] ss:$16 sps:$4 sm:$0xff]   ;;  %v8319_v26 = vld [vmem:[%s9663_s25 + $0x64] ss:$16 sps:$4 sm:$0xff]   ;;  %v8335_v58 = vld [vmem:[%s9663_s25] ss:$16 sps:$4 sm:$0xff]  }
0x12f6   : > { %12394 = vst [vmem:[#allocation33_spill] sm:$0xff] %v11236_v0  ;;  %v4967_v55 = vadd.f32 %v8850_v15, %v4959_v63  ;;  %5032 = vadd.xlane.f32.xlu0 %v11234_v32  ;;  %5030 = vadd.xlane.f32.xlu1 %v11236_v0  ;;  %v4962_v27 = vadd.f32 %v8078_v43, %v4563_v9  ;;  %v5023_v5 = vpop.xlane.xlu1 %5022  ;;  %v8310_v63 = vld [vmem:[%s9663_s25 + $0xac] ss:$16 sps:$4 sm:$0xff]   ;;  %v8308_v43 = vld [vmem:[%s9663_s25 + $0xa8] ss:$16 sps:$4 sm:$0xff]  }
0x12f7   : > { %v4943_v21 = vpop.f32.mrf.mxu1  ;;  %v11249_v25 = vadd.f32 %v7267_v13, %v4969_v47  ;;  %v11256_v9 = vsub.f32 %v11151_v50, %v5046_v12  ;;  %v5049_v39 = vmul.f32 0.0078125, %v5023_v5  ;;  %v5077_v46 = vmul.f32 %v11259_v40, %v11259_v40  ;;  %5569 = vmatprep.subr.bf16.mxu1 %v8304_v33  ;;  %5457 = vmatpush1.bf16.msra.mxu0 %v8299_v6  ;;  %v8313_v15 = vld [vmem:[%s9663_s25 + $0x84] ss:$16 sps:$4 sm:$0xff]   ;;  %v8322_v47 = vld [vmem:[%s9663_s25 + $0x6c] ss:$16 sps:$4 sm:$0xff]  }
0x12f8   : > { %v11242_v29 = vadd.f32 %v7267_v13, %v4967_v55  ;;  %v4960_v1 = vadd.f32 %v4943_v21, %v4561_v35  ;;  %v4970_v30 = vadd.f32 %v8853_v24, %v4962_v27  ;;  %v5047_v35 = vmul.f32 0.0078125, %v5019_v19  ;;  %5570 = vmatpush1.bf16.msra.mxu1 %v8302_v61  ;;  %v8305_v19 = vld [vmem:[%s9663_s25 + $0xa0] ss:$16 sps:$4 sm:$0xff]   ;;  %5458 = vmatprep.subr.bf16.mxu0 %v8307_v44  ;;  %v8316_v55 = vld [vmem:[%s9663_s25 + $0x8c] ss:$16 sps:$4 sm:$0xff]  }
0x12f9   : > { %12397 = vst [vmem:[#allocation38_spill] sm:$0xff] %v11249_v25  ;;  %v5078_v50 = vmul.f32 %v11256_v9, %v11256_v9  ;;  %v11282_v45 = vsub.f32 %v11170_v42, %v5049_v39  ;;  %5571 = vmatprep.subr.bf16.mxu1 %v8310_v63  ;;  %v8314_v21 = vld [vmem:[%s9663_s25 + $0x88] ss:$16 sps:$4 sm:$0xff]   ;;  %v8317_v27 = vld [vmem:[%s9663_s25 + $0x60] ss:$16 sps:$4 sm:$0xff]  }
0x12fa   : > { %12396 = vst [vmem:[#allocation37_spill] sm:$0xff] %v11242_v29  ;;  %v4968_v34 = vadd.f32 %v8852_v41, %v4960_v1  ;;  %5034 = vadd.xlane.f32.xlu1 %v11240_v60  ;;  %5036 = vadd.xlane.f32.xlu0 %v11242_v29  ;;  %v11261_v36 = vadd.f32 %v7267_v13, %v4970_v30  ;;  %v5027_v10 = vpop.xlane.xlu1 %5026  ;;  %v8320_v1 = vld [vmem:[%s9663_s25 + $0x68] ss:$16 sps:$4 sm:$0xff]   ;;  %v8328_v41 = vld [vmem:[%s9663_s25 + $0x4c] ss:$16 sps:$4 sm:$0xff]  }
0x12fb   : > { %v11267_v7 = vsub.f32 %v11154_v4, %v5047_v35  ;;  %v5051_v59 = vmul.f32 0.0078125, %v5027_v10  ;;  %v5081_v11 = vmul.f32 %v11282_v45, %v11282_v45  ;;  %5459 = vmatpush1.bf16.msra.mxu0 %v8305_v19  ;;  %v8326_v12 = vld [vmem:[%s9663_s25 + $0x48] ss:$16 sps:$4 sm:$0xff]   ;;  %v8331_v28 = vld [vmem:[%s9663_s25 + $0x24] ss:$16 sps:$4 sm:$0xff]  }
0x12fc   : > { %v11251_v48 = vadd.f32 %v7267_v13, %v4968_v34  ;;  %12399 = vst [vmem:[#allocation40_spill] sm:$0xff] %v11261_v36  ;;  %v5080_v13 = vmul.f32 %v11272_v49, %v11272_v49  ;;  %5572 = vmatpush1.bf16.msra.mxu1 %v8308_v43  ;;  %5460 = vmatprep.subr.bf16.mxu0 %v8313_v15  ;;  %v8323_v34 = vld [vmem:[%s9663_s25 + $0x40] ss:$16 sps:$4 sm:$0xff]   ;;  %v8332_v24 = vld [vmem:[%s9663_s25 + $0x28] ss:$16 sps:$4 sm:$0xff]  }
0x12fd   : > { %v5079_v4 = vmul.f32 %v11267_v7, %v11267_v7  ;;  %v11291_v3 = vsub.f32 %v10832_v18, %v5051_v59  ;;  %5573 = vmatprep.subr.bf16.mxu1 %v8316_v55  ;;  %v8334_v30 = vld [vmem:[%s9663_s25 + $0x2c] ss:$16 sps:$4 sm:$0xff]   ;;  %v8337_v35 = vld [vmem:[%s9663_s25 + $0x4] ss:$16 sps:$4 sm:$0xff]  }
0x12fe   : > { %12398 = vst [vmem:[#allocation39_spill] sm:$0xff] %v11251_v48  ;;  %5040 = vadd.xlane.f32.xlu0 %v11249_v25  ;;  %5038 = vadd.xlane.f32.xlu1 %v11251_v48  ;;  %v8340_v5 = vld [vmem:[%s9663_s25 + $0xc] ss:$16 sps:$4 sm:$0xff]  }
0x12ff   : > { %v5083_v51 = vmul.f32 %v11291_v3, %v11291_v3  ;;  %5461 = vmatpush1.bf16.msra.mxu0 %v8311_v22 }
0x1300   : > { %5574 = vmatpush1.bf16.msra.mxu1 %v8314_v21  ;;  %5462 = vmatprep.subr.bf16.mxu0 %v8319_v26 }
0x1301   : > { %5575 = vmatprep.subr.bf16.mxu1 %v8322_v47 }
0x1302   : > { %5042 = vadd.xlane.f32.xlu1 %v11261_v36  ;;  %5092 = vadd.xlane.f32.xlu0 %v5076_v20  ;;  %v8338_v20 = vld [vmem:[%s9663_s25 + $0x8] ss:$16 sps:$4 sm:$0xff]   ;;  %s12401_s25 = scalar_lea.vmem [#allocation15], %s9638_s19 }
0x1303   : > { %5463 = vmatpush1.bf16.msra.mxu0 %v8317_v27 }
0x1304   : > { %5576 = vmatpush1.bf16.msra.mxu1 %v8320_v1  ;;  %5464 = vmatprep.subr.bf16.mxu0 %v8325_v23 }
0x1305   : > { %5577 = vmatprep.subr.bf16.mxu1 %v8328_v41 }
0x1306   : > { %5094 = vadd.xlane.f32.xlu1 %v5077_v46  ;;  %5096 = vadd.xlane.f32.xlu0 %v5078_v50 }
0x1307   : > { %5465 = vmatpush1.bf16.msra.mxu0 %v8323_v34 }
0x1308   : > { %5578 = vmatpush1.bf16.msra.mxu1 %v8326_v12  ;;  %5466 = vmatprep.subr.bf16.mxu0 %v8331_v28 }
0x1309   : > { %5579 = vmatprep.subr.bf16.mxu1 %v8334_v30 }
0x130a   : > { %5098 = vadd.xlane.f32.xlu1 %v5079_v4  ;;  %5100 = vadd.xlane.f32.xlu0 %v5080_v13 }
0x130b   : > { %5467 = vmatpush1.bf16.msra.mxu0 %v8329_v37 }
0x130c   : > { %5468 = vmatprep.subr.bf16.mxu0 %v8337_v35  ;;  %5580 = vmatpush1.bf16.msra.mxu1 %v8332_v24 }
0x130d   : > { %5581 = vmatprep.subr.bf16.mxu1 %v8340_v5 }
0x130e   : > { %5102 = vadd.xlane.f32.xlu1 %v5081_v11  ;;  %5104 = vadd.xlane.f32.xlu0 %v5082_v16 }
0x130f   : > { %5469 = vmatpush1.bf16.msra.mxu0 %v8335_v58 }
0x1310   : > { %5582 = vmatpush1.bf16.msra.mxu1 %v8338_v20 }
0x1312   : > { %5106 = vadd.xlane.f32.xlu1 %v5083_v51 }
0x137b   : > { %v5029_v17 = vpop.xlane.xlu0 %5028 }
0x137c   : > { %v5052_v50 = vmul.f32 0.0078125, %v5029_v17 }
0x137e   : > { %v11328_v38 = vsub.f32 %v11231_v2, %v5052_v50 }
0x137f   : > { %v5031_v39 = vpop.xlane.xlu1 %5030  ;;  %v5033_v46 = vpop.xlane.xlu0 %5032 }
0x1380   : > { %v5053_v10 = vmul.f32 0.0078125, %v5031_v39  ;;  %v5054_v4 = vmul.f32 0.0078125, %v5033_v46  ;;  %v5084_v59 = vmul.f32 %v11328_v38, %v11328_v38 }
0x1382   : > { %v11333_v13 = vsub.f32 %v11236_v0, %v5053_v10  ;;  %v11336_v57 = vsub.f32 %v11234_v32, %v5054_v4  ;;  %5108 = vadd.xlane.f32.xlu0 %v5084_v59 }
0x1383   : > { %v5035_v8 = vpop.xlane.xlu1 %5034  ;;  %v5037_v56 = vpop.xlane.xlu0 %5036 }
0x1384   : > { %v5055_v31 = vmul.f32 0.0078125, %v5035_v8  ;;  %v5056_v11 = vmul.f32 0.0078125, %v5037_v56  ;;  %v5085_v16 = vmul.f32 %v11333_v13, %v11333_v13  ;;  %v5086_v54 = vmul.f32 %v11336_v57, %v11336_v57 }
0x1386   : > { %v11343_v33 = vsub.f32 %v11240_v60, %v5055_v31  ;;  %v11346_v6 = vsub.f32 %v11242_v29, %v5056_v11  ;;  %5110 = vadd.xlane.f32.xlu1 %v5085_v16  ;;  %5112 = vadd.xlane.f32.xlu0 %v5086_v54  ;;  %v11370_v54 = vld [vmem:[%s12400_s12] ss:$0 sm:$0xff] }
0x1387   : > { %v5039_v61 = vpop.xlane.xlu1 %5038  ;;  %v5041_v51 = vpop.xlane.xlu0 %5040 }
0x1388   : > { %v5057_v44 = vmul.f32 0.0078125, %v5039_v61  ;;  %v5058_v63 = vmul.f32 0.0078125, %v5041_v51  ;;  %v5087_v19 = vmul.f32 %v11343_v33, %v11343_v33  ;;  %v5088_v43 = vmul.f32 %v11346_v6, %v11346_v6 }
0x138a   : > { %v11353_v15 = vsub.f32 %v11251_v48, %v5057_v44  ;;  %v11356_v55 = vsub.f32 %v11249_v25, %v5058_v63  ;;  %5114 = vadd.xlane.f32.xlu1 %v5087_v19  ;;  %5116 = vadd.xlane.f32.xlu0 %v5088_v43 }
0x138b   : > { %v5043_v22 = vpop.xlane.xlu1 %5042  ;;  %v5093_v21 = vpop.xlane.xlu0 %5092 }
0x138c   : > { %v5059_v26 = vmul.f32 0.0078125, %v5043_v22  ;;  %v5124_v47 = vmul.f32 0.0078125, %v5093_v21  ;;  %v5089_v27 = vmul.f32 %v11353_v15, %v11353_v15  ;;  %v5090_v1 = vmul.f32 %v11356_v55, %v11356_v55  ;;  %v11376_v22 = vld [vmem:[%s12401_s25] ss:$0 sm:$0xff] }
0x138e   : > { %v11363_v23 = vsub.f32 %v11261_v36, %v5059_v26  ;;  %v5140_v41 = vadd.f32 1e-05, %v5124_v47  ;;  %5118 = vadd.xlane.f32.xlu1 %v5089_v27  ;;  %5120 = vadd.xlane.f32.xlu0 %v5090_v1 }
0x138f   : > { %v5095_v34 = vpop.xlane.xlu1 %5094  ;;  %v5097_v12 = vpop.xlane.xlu0 %5096 }
0x1390   : > { %8661 = vrsqrt.f32 %v5140_v41  ;;  %v5125_v37 = vmul.f32 0.0078125, %v5095_v34  ;;  %v5126_v28 = vmul.f32 0.0078125, %v5097_v12  ;;  %v5091_v24 = vmul.f32 %v11363_v23, %v11363_v23 }
0x1392   : > { %v5141_v30 = vadd.f32 1e-05, %v5125_v37  ;;  %v5142_v35 = vadd.f32 1e-05, %v5126_v28  ;;  %5122 = vadd.xlane.f32.xlu1 %v5091_v24 }
0x1393   : > { %v5099_v5 = vpop.xlane.xlu1 %5098  ;;  %v5101_v58 = vpop.xlane.xlu0 %5100 }
0x1394   : > { %8663 = vrsqrt.f32 %v5141_v30  ;;  %v5127_v20 = vmul.f32 0.0078125, %v5099_v5  ;;  %v5128_v50 = vmul.f32 0.0078125, %v5101_v58 }
0x1395   : > { %8665 = vrsqrt.f32 %v5142_v35 }
0x1396   : > { %v5143_v17 = vadd.f32 1e-05, %v5127_v20  ;;  %v5144_v10 = vadd.f32 1e-05, %v5128_v50 }
0x1397   : > { %v5103_v39 = vpop.xlane.xlu1 %5102  ;;  %v5105_v59 = vpop.xlane.xlu0 %5104 }
0x1398   : > { %8667 = vrsqrt.f32 %v5143_v17  ;;  %v5129_v46 = vmul.f32 0.0078125, %v5103_v39  ;;  %v5130_v11 = vmul.f32 0.0078125, %v5105_v59  ;;  %v8341_v59 = vld [vmem:[%s9695_s0 + $0x78] sm:$0xff]  }
0x1399   : > { %7567 = vmatprep.subr.bf16.mxu0 %v8341_v59  ;;  %v8367_v59 = vld [vmem:[%s9695_s0 + $0x8] sm:$0xff]  }
0x139a   : > { %v5145_v4 = vadd.f32 1e-05, %v5129_v46  ;;  %v5146_v44 = vadd.f32 1e-05, %v5130_v11  ;;  %v8345_v11 = vld [vmem:[%s9695_s0 + $0x70] sm:$0xff]  }
0x139b   : > { %v5107_v8 = vpop.xlane.xlu1 %5106 }
0x139c   : > { %8669 = vrsqrt.f32 %v5145_v4  ;;  %v5131_v56 = vmul.f32 0.0078125, %v5107_v8  ;;  %v8342_v8 = vld [vmem:[%s9695_s0 + $0xf8] sm:$0xff]  }
0x139d   : > { %v8662_v31 = vpop.eup %8661  ;;  %8671 = vrsqrt.f32 %v5144_v10  ;;  %7631 = vmatprep.subr.bf16.mxu1 %v8342_v8  ;;  %v8368_v8 = vld [vmem:[%s9695_s0 + $0x88] sm:$0xff]  }
0x139e   : > { %v5172_v16 = vmul.f32 %v8662_v31, %v11247_v14  ;;  %v5147_v61 = vadd.f32 1e-05, %v5131_v56  ;;  %v8343_v56 = vld [vmem:[%s9695_s0 + $0x38] sm:$0xff]  }
0x139f   : > { %v8344_v31 = vld [vmem:[%s9695_s0 + $0xb8] sm:$0xff]  }
0x13a0   : > { %v5194_v19 = vmul.f32 %v11370_v54, %v5172_v16  ;;  %8673 = vrsqrt.f32 %v5147_v61  ;;  %v8346_v16 = vld [vmem:[%s9695_s0 + $0xf0] sm:$0xff]  }
0x13a1   : > { %v8664_v51 = vpop.eup %8663  ;;  %8675 = vrsqrt.f32 %v5146_v44  ;;  %v8347_v61 = vld [vmem:[%s9695_s0 + $0x30] sm:$0xff]   ;;  %v8349_v44 = vld [vmem:[%s9695_s0 + $0x68] sm:$0xff]  }
0x13a2   : > { %v5173_v63 = vmul.f32 %v8664_v51, %v11259_v40  ;;  %v8666_v43 = vpop.eup %8665  ;;  %v5216_v14 = vadd.f32 %v11376_v22, %v5194_v19  ;;  %v8348_v51 = vld [vmem:[%s9695_s0 + $0xb0] sm:$0xff]   ;;  %v8351_v19 = vld [vmem:[%s9695_s0 + $0x28] sm:$0xff]  }
0x13a3   : > { %v5174_v27 = vmul.f32 %v8666_v43, %v11256_v9  ;;  %v8352_v43 = vld [vmem:[%s9695_s0 + $0xa8] sm:$0xff]  }
0x13a4   : > { %v5195_v21 = vmul.f32 %v11370_v54, %v5173_v63  ;;  %v8350_v63 = vld [vmem:[%s9695_s0 + $0xe8] sm:$0xff]  }
0x13a5   : > { %v8668_v26 = vpop.eup %8667  ;;  %v5196_v12 = vmul.f32 %v11370_v54, %v5174_v27 }
0x13a6   : > { %v5217_v47 = vadd.f32 %v11376_v22, %v5195_v21  ;;  %v5175_v1 = vmul.f32 %v8668_v26, %v11267_v7  ;;  %v8353_v21 = vld [vmem:[%s9695_s0 + $0x60] sm:$0xff]  }
0x13a7   : > { %v5218_v9 = vadd.f32 %v11376_v22, %v5196_v12  ;;  %v8354_v26 = vld [vmem:[%s9695_s0 + $0xe0] sm:$0xff]   ;;  %v8360_v12 = vld [vmem:[%s9695_s0 + $0x98] sm:$0xff]  }
0x13a8   : > { %v5232_v40 = vpack.c.bf16 %v5217_v47, %v5216_v14  ;;  %v5197_v41 = vmul.f32 %v11370_v54, %v5175_v1  ;;  %v8355_v14 = vld [vmem:[%s9695_s0 + $0x20] sm:$0xff]  }
0x13a9   : > { %v8670_v34 = vpop.eup %8669  ;;  %v8356_v47 = vld [vmem:[%s9695_s0 + $0xa0] sm:$0xff]  }
0x13aa   : > { %5487 = vmatmul.mubr.bf16.vlgmr.msra.gmra.mxu0 %v5232_v40  ;;  %5600 = vmatmul.mubr.bf16.vlgmr.msra.gmra.mxu1 %v5232_v40  ;;  %v8672_v37 = vpop.eup %8671  ;;  %v5219_v28 = vadd.f32 %v11376_v22, %v5197_v41  ;;  %v5177_v24 = vmul.f32 %v8670_v34, %v11282_v45  ;;  %v8357_v40 = vld [vmem:[%s9695_s0 + $0x58] sm:$0xff]  }
0x13ab   : > { %5496 = vmatprep.mubr.bf16.mxu0 %v12388_v52  ;;  %5609 = vmatprep.mubr.bf16.mxu1 %v12388_v52  ;;  %v5176_v7 = vmul.f32 %v8672_v37, %v11272_v49  ;;  %v8358_v41 = vld [vmem:[%s9695_s0 + $0xd8] sm:$0xff]  }
0x13ac   : > { %v5233_v30 = vpack.c.bf16 %v5219_v28, %v5218_v9  ;;  %v5199_v35 = vmul.f32 %v11370_v54, %v5177_v24  ;;  %7568 = vmatpush3.bf16.msra.mxu0 %v8343_v56  ;;  %7632 = vmatpush3.bf16.msra.mxu1 %v8344_v31  ;;  %v8359_v34 = vld [vmem:[%s9695_s0 + $0x18] sm:$0xff]  }
0x13ad   : > { %v8674_v5 = vpop.eup %8673  ;;  %v5198_v20 = vmul.f32 %v11370_v54, %v5176_v7  ;;  %7569 = vmatprep.subr.bf16.mxu0 %v8345_v11  ;;  %7633 = vmatprep.subr.bf16.mxu1 %v8346_v16 }
0x13ae   : > { %v8676_v58 = vpop.eup %8675  ;;  %v5221_v17 = vadd.f32 %v11376_v22, %v5199_v35  ;;  %v5179_v45 = vmul.f32 %v8674_v5, %v11291_v3  ;;  %v8361_v5 = vld [vmem:[%s9695_s0 + $0x50] sm:$0xff]  }
0x13af   : > { %v5220_v50 = vadd.f32 %v11376_v22, %v5198_v20  ;;  %v5178_v49 = vmul.f32 %v8676_v58, %v11279_v53  ;;  %v8362_v58 = vld [vmem:[%s9695_s0 + $0xd0] sm:$0xff]  }
0x13b0   : > { %v5201_v46 = vmul.f32 %v11370_v54, %v5179_v45  ;;  %7570 = vmatpush3.bf16.msra.mxu0 %v8347_v61  ;;  %7634 = vmatpush3.bf16.msra.mxu1 %v8348_v51  ;;  %v8363_v45 = vld [vmem:[%s9695_s0 + $0x10] sm:$0xff]   ;;  %v8369_v61 = vld [vmem:[%s9695_s0 + $0x40] sm:$0xff]  }
0x13b1   : > { %v5234_v39 = vpack.c.bf16 %v5221_v17, %v5220_v50  ;;  %v5200_v10 = vmul.f32 %v11370_v54, %v5178_v49  ;;  %7571 = vmatprep.subr.bf16.mxu0 %v8349_v44  ;;  %7635 = vmatprep.subr.bf16.mxu1 %v8350_v63  ;;  %v8364_v50 = vld [vmem:[%s9695_s0 + $0x90] sm:$0xff]   ;;  %v8370_v51 = vld [vmem:[%s9695_s0 + $0xc0] sm:$0xff]  }
0x13b2   : > { %5497 = vmatmul.mubr.bf16.gmra.mxu0 %v5233_v30  ;;  %5610 = vmatmul.mubr.bf16.gmra.mxu1 %v5233_v30  ;;  %v5223_v3 = vadd.f32 %v11376_v22, %v5201_v46  ;;  %v8371_v63 = vld [vmem:[%s9695_s0] sm:$0xff]  }
0x13b3   : > { %5506 = vmatprep.mubr.bf16.mxu0 %v12388_v52  ;;  %5619 = vmatprep.mubr.bf16.mxu1 %v12388_v52  ;;  %v5222_v53 = vadd.f32 %v11376_v22, %v5200_v10 }
0x13b4   : > { %7572 = vmatpush3.bf16.msra.mxu0 %v8351_v19  ;;  %7636 = vmatpush3.bf16.msra.mxu1 %v8352_v43  ;;  %v8372_v19 = vld [vmem:[%s9695_s0 + $0x80] sm:$0xff]  }
0x13b5   : > { %v5235_v4 = vpack.c.bf16 %v5223_v3, %v5222_v53  ;;  %7573 = vmatprep.subr.bf16.mxu0 %v8353_v21  ;;  %7637 = vmatprep.subr.bf16.mxu1 %v8354_v26  ;;  %v8365_v3 = vld [vmem:[%s9695_s0 + $0x48] sm:$0xff]  }
0x13b6   : > { %v8366_v53 = vld [vmem:[%s9695_s0 + $0xc8] sm:$0xff]  }
0x13b8   : > { %7574 = vmatpush3.bf16.msra.mxu0 %v8355_v14  ;;  %7638 = vmatpush3.bf16.msra.mxu1 %v8356_v47 }
0x13b9   : > { %7575 = vmatprep.subr.bf16.mxu0 %v8357_v40  ;;  %7639 = vmatprep.subr.bf16.mxu1 %v8358_v41 }
0x13ba   : > { %5507 = vmatmul.mubr.bf16.gmra.mxu0 %v5234_v39  ;;  %5620 = vmatmul.mubr.bf16.gmra.mxu1 %v5234_v39 }
0x13bb   : > { %5516 = vmatprep.mubr.bf16.mxu0 %v12388_v52  ;;  %5629 = vmatprep.mubr.bf16.mxu1 %v12388_v52 }
0x13bc   : > { %7576 = vmatpush3.bf16.msra.mxu0 %v8359_v34  ;;  %7640 = vmatpush3.bf16.msra.mxu1 %v8360_v12 }
0x13bd   : > { %7577 = vmatprep.subr.bf16.mxu0 %v8361_v5  ;;  %7641 = vmatprep.subr.bf16.mxu1 %v8362_v58 }
0x13c0   : > { %7578 = vmatpush3.bf16.msra.mxu0 %v8363_v45  ;;  %7642 = vmatpush3.bf16.msra.mxu1 %v8364_v50 }
0x13c1   : > { %7579 = vmatprep.subr.bf16.mxu0 %v8365_v3  ;;  %7643 = vmatprep.subr.bf16.mxu1 %v8366_v53 }
0x13c2   : > { %5517 = vmatmul.mubr.bf16.gmra.mxu0 %v5235_v4  ;;  %5630 = vmatmul.mubr.bf16.gmra.mxu1 %v5235_v4 }
0x13c3   : > { %5526 = vmatprep.mubr.bf16.mxu0 %v12388_v52  ;;  %5639 = vmatprep.mubr.bf16.mxu1 %v12388_v52 }
0x13c4   : > { %7580 = vmatpush3.bf16.msra.mxu0 %v8367_v59  ;;  %7644 = vmatpush3.bf16.msra.mxu1 %v8368_v8  ;;  %v5272_v8 = vld [vmem:[%s9693_s1] sm:$0xf] }
0x13c5   : > { %7581 = vmatprep.subr.bf16.mxu0 %v8369_v61  ;;  %7645 = vmatprep.subr.bf16.mxu1 %v8370_v51 }
0x13c8   : > { %7582 = vmatpush3.bf16.msra.mxu0 %v8371_v63  ;;  %7646 = vmatpush3.bf16.msra.mxu1 %v8372_v19 }
0x140b   : > { %v5109_v27 = vpop.xlane.xlu0 %5108 }
0x140c   : > { %v5132_v1 = vmul.f32 0.0078125, %v5109_v27 }
0x140e   : > { %v5148_v37 = vadd.f32 1e-05, %v5132_v1 }
0x140f   : > { %v5111_v28 = vpop.xlane.xlu1 %5110  ;;  %v5113_v24 = vpop.xlane.xlu0 %5112 }
0x1410   : > { %8677 = vrsqrt.f32 %v5148_v37  ;;  %v5133_v9 = vmul.f32 0.0078125, %v5111_v28  ;;  %v5134_v7 = vmul.f32 0.0078125, %v5113_v24 }
0x1412   : > { %v5149_v30 = vadd.f32 1e-05, %v5133_v9  ;;  %v5150_v35 = vadd.f32 1e-05, %v5134_v7 }
0x1413   : > { %v5115_v20 = vpop.xlane.xlu1 %5114  ;;  %v5117_v17 = vpop.xlane.xlu0 %5116 }
0x1414   : > { %8679 = vrsqrt.f32 %v5149_v30  ;;  %v5135_v49 = vmul.f32 0.0078125, %v5115_v20  ;;  %v5136_v46 = vmul.f32 0.0078125, %v5117_v17 }
0x1415   : > { %8681 = vrsqrt.f32 %v5150_v35 }
0x1416   : > { %v5151_v39 = vadd.f32 1e-05, %v5135_v49  ;;  %v5152_v56 = vadd.f32 1e-05, %v5136_v46 }
0x1417   : > { %v5119_v10 = vpop.xlane.xlu1 %5118  ;;  %v5121_v11 = vpop.xlane.xlu0 %5120 }
0x1418   : > { %8683 = vrsqrt.f32 %v5151_v39  ;;  %v5137_v4 = vmul.f32 0.0078125, %v5119_v10  ;;  %v5138_v21 = vmul.f32 0.0078125, %v5121_v11 }
0x141a   : > { %v5153_v31 = vadd.f32 1e-05, %v5137_v4  ;;  %v5154_v27 = vadd.f32 1e-05, %v5138_v21 }
0x141b   : > { %v5123_v16 = vpop.xlane.xlu1 %5122 }
0x141c   : > { %8685 = vrsqrt.f32 %v5153_v31  ;;  %v5139_v44 = vmul.f32 0.0078125, %v5123_v16 }
0x141d   : > { %v8678_v43 = vpop.eup %8677  ;;  %8687 = vrsqrt.f32 %v5152_v56 }
0x141e   : > { %v5180_v26 = vmul.f32 %v8678_v43, %v11328_v38  ;;  %v5155_v14 = vadd.f32 1e-05, %v5139_v44 }
0x1420   : > { %v5202_v40 = vmul.f32 %v11370_v54, %v5180_v26  ;;  %8689 = vrsqrt.f32 %v5155_v14 }
0x1421   : > { %v8680_v47 = vpop.eup %8679  ;;  %8691 = vrsqrt.f32 %v5154_v27 }
0x1422   : > { %v5181_v1 = vmul.f32 %v8680_v47, %v11333_v13  ;;  %v8682_v41 = vpop.eup %8681  ;;  %v5224_v37 = vadd.f32 %v11376_v22, %v5202_v40 }
0x1423   : > { %v5182_v38 = vmul.f32 %v8682_v41, %v11336_v57 }
0x1424   : > { %v5203_v34 = vmul.f32 %v11370_v54, %v5181_v1 }
0x1425   : > { %v8684_v12 = vpop.eup %8683  ;;  %v5204_v30 = vmul.f32 %v11370_v54, %v5182_v38 }
0x1426   : > { %v5225_v28 = vadd.f32 %v11376_v22, %v5203_v34  ;;  %v5183_v24 = vmul.f32 %v8684_v12, %v11343_v33 }
0x1427   : > { %v5226_v57 = vadd.f32 %v11376_v22, %v5204_v30 }
0x1428   : > { %v5236_v9 = vpack.c.bf16 %v5225_v28, %v5224_v37  ;;  %v5205_v7 = vmul.f32 %v11370_v54, %v5183_v24 }
0x1429   : > { %v8686_v13 = vpop.eup %8685 }
0x142a   : > { %5527 = vmatmul.mubr.bf16.gmra.mxu0 %v5236_v9  ;;  %5640 = vmatmul.mubr.bf16.gmra.mxu1 %v5236_v9  ;;  %v8688_v35 = vpop.eup %8687  ;;  %v5227_v5 = vadd.f32 %v11376_v22, %v5205_v7  ;;  %v5185_v58 = vmul.f32 %v8686_v13, %v11353_v15 }
0x142b   : > { %5536 = vmatprep.mubr.bf16.mxu0 %v12388_v52  ;;  %5649 = vmatprep.mubr.bf16.mxu1 %v12388_v52  ;;  %v5184_v33 = vmul.f32 %v8688_v35, %v11346_v6 }
0x142c   : > { %v5237_v20 = vpack.c.bf16 %v5227_v5, %v5226_v57  ;;  %v5207_v17 = vmul.f32 %v11370_v54, %v5185_v58 }
0x142d   : > { %v8690_v45 = vpop.eup %8689  ;;  %v5206_v49 = vmul.f32 %v11370_v54, %v5184_v33 }
0x142e   : > { %v8692_v50 = vpop.eup %8691  ;;  %v5229_v39 = vadd.f32 %v11376_v22, %v5207_v17  ;;  %v5187_v15 = vmul.f32 %v8690_v45, %v11363_v23 }
0x142f   : > { %v5228_v6 = vadd.f32 %v11376_v22, %v5206_v49  ;;  %v5186_v46 = vmul.f32 %v8692_v50, %v11356_v55  ;;  %v12402_v55 = vld [vmem:[#allocation29_spill] sm:$0xff] }
0x1430   : > { %v5209_v3 = vmul.f32 %v11370_v54, %v5187_v15  ;;  %v12403_v56 = vsub.s32 0, %v12402_v55  ;;  %v12405_v11 = vsub.s32 2, %v12402_v55  ;;  %v5288_v43 = vsub.s32 3, %v12402_v55 }
0x1431   : > { %v5238_v10 = vpack.c.bf16 %v5229_v39, %v5228_v6  ;;  %v5208_v53 = vmul.f32 %v11370_v54, %v5186_v46  ;;  %v12407_v9 = vsub.s32 1, %v12402_v55 }
0x1432   : > { %5537 = vmatmul.mubr.bf16.gmra.mxu0 %v5237_v20  ;;  %5650 = vmatmul.mubr.bf16.gmra.mxu1 %v5237_v20  ;;  %v5231_v4 = vadd.f32 %v11376_v22, %v5209_v3  ;;  %v11472_v31 = vrot.slane %v5272_v8, %v12403_v56  ;;  %v11476_v16 = vrot.slane %v5272_v8, %v12405_v11 }
0x1433   : > { %5546 = vmatprep.mubr.bf16.mxu0 %v12388_v52  ;;  %5659 = vmatprep.mubr.bf16.mxu1 %v12388_v52  ;;  %v5230_v59 = vadd.f32 %v11376_v22, %v5208_v53  ;;  %v11488_v7 = vrot.slane %v5272_v8, %v12407_v9  ;;  %v11490_v13 = vrot.slane %v5272_v8, %v5288_v43 }
0x1434   : > { %12404 = vst [vmem:[#allocation29_spill] sm:$0xff] %v11472_v31  ;;  %12406 = vst [vmem:[#allocation41_spill] sm:$0xff] %v11476_v16 }
0x1435   : > { %v5239_v23 = vpack.c.bf16 %v5231_v4, %v5230_v59 }
0x143a   : > { %5547 = vmatmul.mubr.bf16.gmra.mxu0 %v5238_v10  ;;  %5660 = vmatmul.mubr.bf16.gmra.mxu1 %v5238_v10 }
0x143b   : > { %5556 = vmatprep.mubr.bf16.mxu0 %v12388_v52  ;;  %5669 = vmatprep.mubr.bf16.mxu1 %v12388_v52 }
0x1442   : > { %5557 = vmatmul.mubr.bf16.gmra.mxu0 %v5239_v23  ;;  %5670 = vmatmul.mubr.bf16.gmra.mxu1 %v5239_v23 }
0x146a   : > { %v5488_v54 = vpop.f32.mrf.mxu0  ;;  %v5601_v61 = vpop.f32.mrf.mxu1 }
0x146b   : > { %v5489_v52 = vadd.f32 %v5488_v54, %v11472_v31  ;;  %v5602_v51 = vadd.f32 %v5601_v61, %v11476_v16 }
0x146c   : > { %v5490_v44 = vpop.f32.mrf.mxu0  ;;  %v5603_v22 = vpop.f32.mrf.mxu1 }
0x146d   : > { %v5744_v63 = vmul.f32 0.044715, %v5489_v52  ;;  %v5746_v19 = vmul.f32 0.044715, %v5602_v51  ;;  %v11500_v39 = vadd.f32 %v5490_v44, %v11488_v7  ;;  %v11503_v15 = vadd.f32 %v5603_v22, %v11490_v13 }
0x146e   : > { %v5492_v21 = vpop.f32.mrf.mxu0  ;;  %v5605_v26 = vpop.f32.mrf.mxu1  ;;  %v11508_v59 = vmul.f32 0.5, %v5489_v52  ;;  %v11510_v23 = vmul.f32 0.5, %v5602_v51 }
0x146f   : > { %v5808_v14 = vmul.f32 %v5744_v63, %v5489_v52  ;;  %v5810_v47 = vmul.f32 %v5746_v19, %v5602_v51  ;;  %v5493_v27 = vadd.f32 %v5492_v21, %v11472_v31  ;;  %v11483_v1 = vadd.f32 %v5605_v26, %v11476_v16 }
0x1470   : > { %v5494_v40 = vpop.f32.mrf.mxu0  ;;  %v5607_v41 = vpop.f32.mrf.mxu1  ;;  %v5745_v11 = vmul.f32 0.044715, %v11500_v39  ;;  %v5747_v54 = vmul.f32 0.044715, %v11503_v15 }
0x1471   : > { %v5872_v34 = vmul.f32 %v5808_v14, %v5489_v52  ;;  %v5748_v12 = vmul.f32 0.044715, %v5493_v27  ;;  %v5874_v37 = vmul.f32 %v5810_v47, %v5602_v51  ;;  %v5750_v28 = vmul.f32 0.044715, %v11483_v1 }
0x1472   : > { %v5498_v38 = vpop.f32.mrf.mxu0  ;;  %v5611_v24 = vpop.f32.mrf.mxu1  ;;  %v11519_v22 = vadd.f32 %v5494_v40, %v11488_v7 }
0x1473   : > { %v5812_v30 = vmul.f32 %v5748_v12, %v5493_v27  ;;  %v5936_v58 = vadd.f32 %v5872_v34, %v5489_v52  ;;  %v5814_v57 = vmul.f32 %v5750_v28, %v11483_v1  ;;  %v5938_v33 = vadd.f32 %v5874_v37, %v5602_v51 }
0x1474   : > { %v5500_v35 = vpop.f32.mrf.mxu0  ;;  %v5613_v5 = vpop.f32.mrf.mxu1  ;;  %v11494_v17 = vadd.f32 %v5498_v38, %v11472_v31  ;;  %v11497_v45 = vadd.f32 %v5611_v24, %v11476_v16  ;;  %v11522_v52 = vadd.f32 %v5607_v41, %v11490_v13  ;;  %v11537_v41 = vmul.f32 0.5, %v11500_v39 }
0x1475   : > { %v5876_v20 = vmul.f32 %v5812_v30, %v5493_v27  ;;  %v6000_v3 = vmul.f32 0.7978846, %v5936_v58  ;;  %v5878_v53 = vmul.f32 %v5814_v57, %v11483_v1  ;;  %v6002_v8 = vmul.f32 0.7978846, %v5938_v33 }
0x1476   : > { %v5502_v50 = vpop.f32.mrf.mxu0  ;;  %v5615_v49 = vpop.f32.mrf.mxu1  ;;  %v5752_v6 = vmul.f32 0.044715, %v11494_v17  ;;  %v5754_v4 = vmul.f32 0.044715, %v11497_v45  ;;  %v11530_v21 = vadd.f32 %v5500_v35, %v11488_v7  ;;  %v11533_v26 = vadd.f32 %v5613_v5, %v11490_v13 }
0x1477   : > { %v5940_v55 = vadd.f32 %v5876_v20, %v5493_v27  ;;  %v11516_v44 = vadd.f32 %v5502_v50, %v11472_v31  ;;  %v11526_v63 = vadd.f32 %v5615_v49, %v11476_v16  ;;  %8693 = vtanh.f32 %v6000_v3 }
0x1478   : > { %v5504_v46 = vpop.f32.mrf.mxu0  ;;  %v5617_v10 = vpop.f32.mrf.mxu1  ;;  %v5816_v61 = vmul.f32 %v5752_v6, %v11494_v17  ;;  %v5818_v51 = vmul.f32 %v5754_v4, %v11497_v45  ;;  %v5942_v43 = vadd.f32 %v5878_v53, %v11483_v1  ;;  %8695 = vtanh.f32 %v6002_v8 }
0x1479   : > { %v6004_v47 = vmul.f32 0.7978846, %v5940_v55  ;;  %v5756_v40 = vmul.f32 0.044715, %v11516_v44  ;;  %v11539_v34 = vmul.f32 0.5, %v5493_v27  ;;  %v11544_v28 = vmul.f32 0.5, %v11503_v15 }
0x147a   : > { %v5508_v56 = vpop.f32.mrf.mxu0  ;;  %v5621_v19 = vpop.f32.mrf.mxu1  ;;  %v5880_v12 = vmul.f32 %v5816_v61, %v11494_v17  ;;  %v5758_v37 = vmul.f32 0.044715, %v11526_v63  ;;  %v5749_v38 = vmul.f32 0.044715, %v11519_v22  ;;  %v5751_v24 = vmul.f32 0.044715, %v11522_v52 }
0x147b   : > { %v5882_v9 = vmul.f32 %v5818_v51, %v11497_v45  ;;  %v11550_v30 = vadd.f32 %v5508_v56, %v11472_v31  ;;  %v6006_v5 = vmul.f32 0.7978846, %v5942_v43  ;;  %v5753_v27 = vmul.f32 0.044715, %v11530_v21 }
0x147c   : > { %v5510_v14 = vpop.f32.mrf.mxu0  ;;  %v5623_v35 = vpop.f32.mrf.mxu1  ;;  %v5755_v58 = vmul.f32 0.044715, %v11533_v26  ;;  %v5809_v33 = vmul.f32 %v5745_v11, %v11500_v39  ;;  %8697 = vtanh.f32 %v6004_v47  ;;  %v5820_v20 = vmul.f32 %v5756_v40, %v11516_v44 }
0x147d   : > { %v11557_v50 = vadd.f32 %v5504_v46, %v11488_v7  ;;  %v5811_v49 = vmul.f32 %v5747_v54, %v11503_v15  ;;  %v5944_v6 = vadd.f32 %v5880_v12, %v11494_v17  ;;  %v5822_v3 = vmul.f32 %v5758_v37, %v11526_v63 }
0x147e   : > { %v5512_v57 = vpop.f32.mrf.mxu0  ;;  %v11563_v53 = vadd.f32 %v5621_v19, %v11476_v16  ;;  %v5813_v4 = vmul.f32 %v5749_v38, %v11519_v22  ;;  %v5946_v8 = vadd.f32 %v5882_v9, %v11497_v45  ;;  %v11568_v55 = vadd.f32 %v5617_v10, %v11490_v13  ;;  %v5625_v46 = vpop.f32.mrf.mxu1 }
0x147f   : > { %v5760_v56 = vmul.f32 0.044715, %v11550_v30  ;;  %8699 = vtanh.f32 %v6006_v5  ;;  %v5815_v11 = vmul.f32 %v5751_v24, %v11522_v52  ;;  %v5817_v54 = vmul.f32 %v5753_v27, %v11530_v21 }
0x1480   : > { %v5819_v61 = vmul.f32 %v5755_v58, %v11533_v26  ;;  %v5514_v51 = vpop.f32.mrf.mxu0  ;;  %v11575_v19 = vmul.f32 %v5809_v33, %v11500_v39  ;;  %v11578_v43 = vmul.f32 0.5, %v11483_v1  ;;  %v5884_v10 = vmul.f32 %v5820_v20, %v11516_v44  ;;  %v5627_v27 = vpop.f32.mrf.mxu1 }
0x1481   : > { %v5757_v47 = vmul.f32 0.044715, %v11557_v50  ;;  %v11583_v40 = vmul.f32 %v5811_v49, %v11503_v15  ;;  %v6008_v12 = vmul.f32 0.7978846, %v5944_v6  ;;  %v5886_v37 = vmul.f32 %v5822_v3, %v11526_v63 }
0x1482   : > { %v5762_v38 = vmul.f32 0.044715, %v11563_v53  ;;  %v11588_v24 = vmul.f32 %v5813_v4, %v11519_v22  ;;  %v6010_v9 = vmul.f32 0.7978846, %v5946_v8  ;;  %v5759_v5 = vmul.f32 0.044715, %v11568_v55  ;;  %v5518_v6 = vpop.f32.mrf.mxu0 }
0x1483   : > { %v5824_v1 = vmul.f32 %v5760_v56, %v11550_v30  ;;  %v11593_v58 = vmul.f32 %v5815_v11, %v11522_v52  ;;  %v11596_v33 = vmul.f32 %v5817_v54, %v11530_v21  ;;  %v11599_v20 = vmul.f32 %v5819_v61, %v11533_v26 }
0x1484   : > { %v11602_v49 = vadd.f32 %v5512_v57, %v11472_v31  ;;  %v8694_v3 = vpop.eup %8693  ;;  %v5948_v4 = vadd.f32 %v5884_v10, %v11516_v44  ;;  %v5821_v8 = vmul.f32 %v5757_v47, %v11557_v50  ;;  %v11607_v56 = vadd.f32 %v5510_v14, %v11488_v7  ;;  %v5631_v14 = vpop.f32.mrf.mxu1 }
0x1485   : > { %v11610_v11 = vadd.f32 %v5625_v46, %v11476_v16  ;;  %v8696_v54 = vpop.eup %8695  ;;  %8701 = vtanh.f32 %v6008_v12  ;;  %v5950_v61 = vadd.f32 %v5886_v37, %v11526_v63  ;;  %v5826_v36 = vmul.f32 %v5762_v38, %v11563_v53  ;;  %v5520_v38 = vpop.f32.mrf.mxu0 }
0x1486   : > { %v5764_v57 = vmul.f32 0.044715, %v11602_v49  ;;  %8703 = vtanh.f32 %v6010_v9  ;;  %v5823_v25 = vmul.f32 %v5759_v5, %v11568_v55  ;;  %v5888_v10 = vmul.f32 %v5824_v1, %v11550_v30  ;;  %v5633_v0 = vpop.f32.mrf.mxu1 }
0x1487   : > { %v5766_v47 = vmul.f32 0.044715, %v11610_v11  ;;  %v6128_v48 = vadd.f32 1.0, %v8694_v3  ;;  %v11619_v46 = vadd.f32 %v5623_v35, %v11490_v13  ;;  %v11623_v37 = vadd.f32 %v5518_v6, %v11472_v31  ;;  %v5522_v18 = vpop.f32.mrf.mxu0 }
0x1488   : > { %v5828_v12 = vmul.f32 %v5764_v57, %v11602_v49  ;;  %v6130_v29 = vadd.f32 1.0, %v8696_v54  ;;  %v6012_v60 = vmul.f32 0.7978846, %v5948_v4  ;;  %v11626_v9 = vmul.f32 %v5821_v8, %v11557_v50 }
0x1489   : > { %12408 = vst [vmem:[#allocation42_spill] sm:$0xff] %v11623_v37  ;;  %v5761_v5 = vmul.f32 0.044715, %v11607_v56  ;;  %v8698_v1 = vpop.eup %8697  ;;  %v6014_v32 = vmul.f32 0.7978846, %v5950_v61  ;;  %v5890_v3 = vmul.f32 %v5826_v36, %v11563_v53  ;;  %v11631_v35 = vadd.f32 %v5514_v51, %v11488_v7 }
0x148a   : > { %v5768_v57 = vmul.f32 0.044715, %v11623_v37  ;;  %v11635_v6 = vmul.f32 %v5823_v25, %v11568_v55  ;;  %v5952_v54 = vadd.f32 %v5888_v10, %v11550_v30  ;;  %v5830_v4 = vmul.f32 %v5766_v47, %v11610_v11 }
0x148b   : > { %v11640_v8 = vadd.f32 %v5631_v14, %v11476_v16  ;;  %v11643_v61 = vmul.f32 %v6128_v48, %v11508_v59  ;;  %v5763_v36 = vmul.f32 0.044715, %v11619_v46  ;;  %v5892_v51 = vmul.f32 %v5828_v12, %v11602_v49 }
0x148c   : > { %v5832_v2 = vmul.f32 %v5768_v57, %v11623_v37  ;;  %v8700_v25 = vpop.eup %8699  ;;  %v11649_v42 = vmul.f32 %v6130_v29, %v11510_v23  ;;  %v6132_v10 = vadd.f32 1.0, %v8698_v1  ;;  %8705 = vtanh.f32 %v6012_v60  ;;  %v5635_v23 = vpop.f32.mrf.mxu1 }
0x148d   : > { %v5825_v47 = vmul.f32 %v5761_v5, %v11607_v56  ;;  %8707 = vtanh.f32 %v6014_v32  ;;  %v5954_v14 = vadd.f32 %v5890_v3, %v11563_v53  ;;  %v5765_v48 = vmul.f32 0.044715, %v11631_v35 }
0x148e   : > { %v11655_v59 = vadd.f32 %v5627_v27, %v11490_v13  ;;  %v6016_v12 = vmul.f32 0.7978846, %v5952_v54  ;;  %v5894_v57 = vmul.f32 %v5830_v4, %v11610_v11  ;;  %v5770_v62 = vmul.f32 0.044715, %v11640_v8 }
0x148f   : > { %v11660_v29 = vadd.f32 %v5522_v18, %v11472_v31  ;;  %v6134_v60 = vadd.f32 1.0, %v8700_v25  ;;  %v11663_v5 = vmul.f32 %v5763_v36, %v11619_v46  ;;  %v5956_v32 = vadd.f32 %v5892_v51, %v11602_v49 }
0x1490   : > { %v5896_v1 = vmul.f32 %v5832_v2, %v11623_v37  ;;  %v11668_v27 = vmul.f32 %v6132_v10, %v11539_v34  ;;  %v11671_v3 = vmul.f32 %v5825_v47, %v11607_v56  ;;  %v11674_v54 = vadd.f32 %v5520_v38, %v11488_v7 }
0x1491   : > { %v5772_v18 = vmul.f32 0.044715, %v11660_v29  ;;  %v6018_v4 = vmul.f32 0.7978846, %v5954_v14  ;;  %v5829_v25 = vmul.f32 %v5765_v48, %v11631_v35  ;;  %v5767_v36 = vmul.f32 0.044715, %v11655_v59 }
0x1492   : > { %v11680_v51 = vadd.f32 %v5635_v23, %v11476_v16  ;;  %v11682_v2 = vpop.eup %8701  ;;  %8709 = vtanh.f32 %v6016_v12  ;;  %v5958_v34 = vadd.f32 %v5894_v57, %v11610_v11  ;;  %v5834_v10 = vmul.f32 %v5770_v62, %v11640_v8 }
0x1493   : > { %v5937_v38 = vadd.f32 %v11575_v19, %v11500_v39  ;;  %v11688_v47 = vpop.eup %8703  ;;  %v11691_v14 = vmul.f32 %v6134_v60, %v11578_v43  ;;  %v6020_v48 = vmul.f32 0.7978846, %v5956_v32  ;;  %v5960_v31 = vadd.f32 %v5896_v1, %v11623_v37  ;;  %v5524_v37 = vpop.f32.mrf.mxu0 }
0x1494   : > { %v11695_v23 = vadd.f32 %v5633_v0, %v11490_v13  ;;  %v5769_v12 = vmul.f32 0.044715, %v11674_v54  ;;  %v5836_v57 = vmul.f32 %v5772_v18, %v11660_v29  ;;  %v5941_v62 = vadd.f32 %v11588_v24, %v11519_v22 }
0x1495   : > { %v6001_v16 = vmul.f32 0.7978846, %v5937_v38  ;;  %8711 = vtanh.f32 %v6018_v4  ;;  %v5893_v39 = vmul.f32 %v5829_v25, %v11631_v35  ;;  %v5831_v19 = vmul.f32 %v5767_v36, %v11655_v59 }
0x1496   : > { %v5774_v43 = vmul.f32 0.044715, %v11680_v51  ;;  %v6022_v60 = vmul.f32 0.7978846, %v5958_v34  ;;  %v5898_v32 = vmul.f32 %v5834_v10, %v11640_v8  ;;  %v6005_v0 = vmul.f32 0.7978846, %v5941_v62  ;;  %v5637_v34 = vpop.f32.mrf.mxu1 }
0x1497   : > { %8713 = vtanh.f32 %v6001_v16  ;;  %v6024_v1 = vmul.f32 0.7978846, %v5960_v31  ;;  %v5939_v18 = vadd.f32 %v11583_v40, %v11503_v15  ;;  %v5943_v24 = vadd.f32 %v11593_v58, %v11522_v52 }
0x1498   : > { %8715 = vtanh.f32 %v6020_v48  ;;  %v5833_v4 = vmul.f32 %v5769_v12, %v11674_v54  ;;  %v5771_v25 = vmul.f32 0.044715, %v11695_v23  ;;  %v5900_v36 = vmul.f32 %v5836_v57, %v11660_v29 }
0x1499   : > { %8717 = vtanh.f32 %v6005_v0  ;;  %v11712_v10 = vpop.eup %8705  ;;  %v5838_v16 = vmul.f32 %v5774_v43, %v11680_v51  ;;  %v6003_v31 = vmul.f32 0.7978846, %v5939_v18  ;;  %v6007_v38 = vmul.f32 0.7978846, %v5943_v24 }
0x149a   : > { %v5945_v15 = vadd.f32 %v11596_v33, %v11530_v21  ;;  %v11717_v40 = vpop.eup %8707  ;;  %8719 = vtanh.f32 %v6022_v60  ;;  %v5962_v58 = vadd.f32 %v5898_v32, %v11640_v8  ;;  %v11721_v48 = vadd.f32 %v5524_v37, %v11488_v7 }
0x149b   : > { %v5949_v12 = vadd.f32 %v11626_v9, %v11557_v50  ;;  %8721 = vtanh.f32 %v6024_v1  ;;  %v11726_v57 = vadd.f32 %v5637_v34, %v11490_v13  ;;  %v5947_v43 = vadd.f32 %v11599_v20, %v11533_v26 }
0x149c   : > { %v6009_v62 = vmul.f32 0.7978846, %v5945_v15  ;;  %v5964_v33 = vadd.f32 %v5900_v36, %v11660_v29  ;;  %8723 = vtanh.f32 %v6003_v31  ;;  %v5951_v32 = vadd.f32 %v11635_v6, %v11568_v55 }
0x149d   : > { %v6013_v60 = vmul.f32 0.7978846, %v5949_v12  ;;  %v5835_v37 = vmul.f32 %v5771_v25, %v11695_v23  ;;  %v5902_v0 = vmul.f32 %v5838_v16, %v11680_v51  ;;  %8725 = vtanh.f32 %v6007_v38 }
0x149e   : > { %v6011_v9 = vmul.f32 0.7978846, %v5947_v43  ;;  %v6026_v1 = vmul.f32 0.7978846, %v5962_v58  ;;  %v5773_v18 = vmul.f32 0.044715, %v11721_v48  ;;  %8727 = vtanh.f32 %v6009_v62 }
0x149f   : > { %v6015_v24 = vmul.f32 0.7978846, %v5951_v32  ;;  %v11736_v34 = vpop.eup %8709  ;;  %v5891_v20 = vmul.f32 %v11663_v5, %v11619_v46  ;;  %v5895_v36 = vmul.f32 %v5831_v19, %v11655_v59  ;;  %v5775_v6 = vmul.f32 0.044715, %v11726_v57 }
0x14a0   : > { %8729 = vtanh.f32 %v6013_v60  ;;  %v6256_v25 = vpack.c.bf16 %v11668_v27, %v11643_v61  ;;  %v6028_v31 = vmul.f32 0.7978846, %v5964_v33  ;;  %v5897_v38 = vmul.f32 %v5833_v4, %v11674_v54 }
0x14a1   : > { %8731 = vtanh.f32 %v6011_v9  ;;  %v5966_v15 = vadd.f32 %v5902_v0, %v11680_v51  ;;  %v5953_v5 = vadd.f32 %v11671_v3, %v11607_v56  ;;  %v11753_v58 = vmul.f32 %v5835_v37, %v11695_v23 }
0x14a2   : > { %8733 = vtanh.f32 %v6015_v24  ;;  %v11750_v19 = vpop.eup %8711  ;;  %v5837_v12 = vmul.f32 %v5773_v18, %v11721_v48  ;;  %v5957_v62 = vadd.f32 %v5893_v39, %v11631_v35  ;;  %v5839_v33 = vmul.f32 %v5775_v6, %v11726_v57 }
0x14a3   : > { %8735 = vtanh.f32 %v6026_v1  ;;  %v6017_v4 = vmul.f32 0.7978846, %v5953_v5  ;;  %v5955_v60 = vadd.f32 %v5891_v20, %v11619_v46  ;;  %v5959_v32 = vadd.f32 %v5895_v36, %v11655_v59 }
0x14a4   : > { %v8714_v43 = vpop.eup %8713  ;;  %8737 = vtanh.f32 %v6028_v31  ;;  %v5685_v3 = vmul.f32 0.5, %v11519_v22  ;;  %v6021_v37 = vmul.f32 0.7978846, %v5957_v62  ;;  %v6030_v24 = vmul.f32 0.7978846, %v5966_v15 }
0x14a5   : > { %v11760_v0 = vpop.eup %8715  ;;  %v6129_v9 = vadd.f32 1.0, %v8714_v43  ;;  %8739 = vtanh.f32 %v6017_v4  ;;  %v6019_v18 = vmul.f32 0.7978846, %v5955_v60  ;;  %v6023_v39 = vmul.f32 0.7978846, %v5959_v32 }
0x14a6   : > { %v8718_v1 = vpop.eup %8717  ;;  %v5901_v16 = vmul.f32 %v5837_v12, %v11721_v48  ;;  %v5687_v5 = vmul.f32 0.5, %v11522_v52  ;;  %8741 = vtanh.f32 %v6021_v37  ;;  %v5903_v36 = vmul.f32 %v5839_v33, %v11726_v57 }
0x14a7   : > { %v6133_v6 = vadd.f32 1.0, %v8718_v1  ;;  %v11765_v20 = vpop.eup %8719  ;;  %v5689_v31 = vmul.f32 0.5, %v11530_v21  ;;  %v5693_v22 = vmul.f32 0.5, %v11557_v50  ;;  %8743 = vtanh.f32 %v6019_v18 }
0x14a8   : > { %v11770_v62 = vpop.eup %8721  ;;  %v6193_v15 = vmul.f32 %v6129_v9, %v11537_v41  ;;  %v6140_v12 = vadd.f32 1.0, %v11712_v10  ;;  %8745 = vtanh.f32 %v6023_v39  ;;  %v5691_v52 = vmul.f32 0.5, %v11533_v26 }
0x14a9   : > { %v6197_v43 = vmul.f32 %v6133_v6, %v5685_v3  ;;  %v8724_v4 = vpop.eup %8723  ;;  %8747 = vtanh.f32 %v6030_v24  ;;  %v5695_v60 = vmul.f32 0.5, %v11568_v55  ;;  %v5688_v33 = vmul.f32 0.5, %v11494_v17 }
0x14aa   : > { %v8726_v21 = vpop.eup %8725  ;;  %v6131_v50 = vadd.f32 1.0, %v8724_v4  ;;  %v5692_v37 = vmul.f32 0.5, %v11516_v44  ;;  %v5961_v1 = vadd.f32 %v5897_v38, %v11674_v54  ;;  %v6136_v10 = vadd.f32 1.0, %v11682_v2 }
0x14ab   : > { %v6257_v32 = vpack.c.bf16 %v6197_v43, %v6193_v15  ;;  %v8728_v41 = vpop.eup %8727  ;;  %v6135_v3 = vadd.f32 1.0, %v8726_v21  ;;  %v5690_v9 = vmul.f32 0.5, %v11497_v45  ;;  %v5965_v24 = vadd.f32 %v5901_v16, %v11721_v48 }
0x14ac   : > { %v6137_v55 = vadd.f32 1.0, %v8728_v41  ;;  %v6204_v18 = vmul.f32 %v6140_v12, %v5692_v37  ;;  %v6138_v17 = vadd.f32 1.0, %v11688_v47  ;;  %v6025_v39 = vmul.f32 0.7978846, %v5961_v1 }
0x14ad   : > { %v8730_v26 = vpop.eup %8729  ;;  %6583 = vmatprep.mubr.bf16.mxu0 %v6257_v32  ;;  %v6195_v44 = vmul.f32 %v6131_v50, %v11544_v28  ;;  %v6199_v15 = vmul.f32 %v6135_v3, %v5687_v5  ;;  %v6029_v38 = vmul.f32 0.7978846, %v5965_v24  ;;  %v6142_v4 = vadd.f32 1.0, %v11717_v40 }
0x14ae   : > { %v8732_v6 = vpop.eup %8731  ;;  %6584 = vmatmul.mubr.bf16.vlgmr.msra.gmra.mxu0 %v6256_v25  ;;  %v6141_v2 = vadd.f32 1.0, %v8730_v26  ;;  %v6201_v43 = vmul.f32 %v6137_v55, %v5689_v31  ;;  %8749 = vtanh.f32 %v6025_v39  ;;  %v6200_v28 = vmul.f32 %v6136_v10, %v5688_v33 }
0x14af   : > { %v8734_v45 = vpop.eup %8733  ;;  %v6139_v16 = vadd.f32 1.0, %v8732_v6  ;;  %v6259_v47 = vpack.c.bf16 %v6199_v15, %v6195_v44  ;;  %8751 = vtanh.f32 %v6029_v38  ;;  %v5694_v5 = vmul.f32 0.5, %v11526_v63 }
0x14b0   : > { %v11788_v12 = vpop.eup %8735  ;;  %v6205_v21 = vmul.f32 %v6141_v2, %v5693_v22  ;;  %v6143_v32 = vadd.f32 1.0, %v8734_v45  ;;  %v5963_v61 = vadd.f32 %v11753_v58, %v11695_v23  ;;  %v5967_v27 = vadd.f32 %v5903_v36, %v11726_v57 }
0x14b1   : > { %v8738_v25 = vpop.eup %8737  ;;  %6680 = vmatprep.mubr.bf16.mxu1 %v6259_v47  ;;  %v6203_v50 = vmul.f32 %v6139_v16, %v5691_v52  ;;  %v5697_v37 = vmul.f32 0.5, %v11607_v56  ;;  %v12409_v22 = vpack.c.bf16 %v11691_v14, %v11649_v42  ;;  %v6260_v33 = vpack.c.bf16 %v6204_v18, %v6200_v28 }
0x14b2   : > { %v6261_v31 = vpack.c.bf16 %v6205_v21, %v6201_v43  ;;  %v6207_v40 = vmul.f32 %v6143_v32, %v5695_v60  ;;  %v8740_v1 = vpop.eup %8739  ;;  %v6202_v41 = vmul.f32 %v6138_v17, %v5690_v9  ;;  %v6027_v63 = vmul.f32 0.7978846, %v5963_v61 }
0x14b3   : > { %6681 = vmatmul.mubr.bf16.vlgmr.msra.gmra.mxu1 %v12409_v22  ;;  %v6031_v3 = vmul.f32 0.7978846, %v5967_v27  ;;  %v8742_v10 = vpop.eup %8741  ;;  %v6206_v36 = vmul.f32 %v6142_v4, %v5694_v5  ;;  %v6145_v24 = vadd.f32 1.0, %v8740_v1  ;;  %v6148_v26 = vadd.f32 1.0, %v11760_v0 }
0x14b4   : > { %6591 = vmatprep.mubr.bf16.mxu0 %v6261_v31  ;;  %v6263_v58 = vpack.c.bf16 %v6207_v40, %v6203_v50  ;;  %v8744_v52 = vpop.eup %8743  ;;  %v5701_v60 = vmul.f32 0.5, %v11631_v35  ;;  %v6149_v56 = vadd.f32 1.0, %v8742_v10  ;;  %v5699_v55 = vmul.f32 0.5, %v11619_v46 }
0x14b5   : > { %8753 = vtanh.f32 %v6027_v63  ;;  %v8746_v42 = vpop.eup %8745  ;;  %v6147_v14 = vadd.f32 1.0, %v8744_v52  ;;  %v5700_v9 = vmul.f32 0.5, %v11602_v49  ;;  %v6144_v18 = vadd.f32 1.0, %v11736_v34 }
0x14b6   : > { %6688 = vmatprep.mubr.bf16.mxu1 %v6263_v58  ;;  %6592 = vmatmul.mubr.bf16.gmra.mxu0 %v6260_v33  ;;  %8755 = vtanh.f32 %v6031_v3  ;;  %v8748_v17 = vpop.eup %8747  ;;  %v6209_v39 = vmul.f32 %v6145_v24, %v5697_v37  ;;  %v6213_v6 = vmul.f32 %v6149_v56, %v5701_v60  ;;  %v5703_v0 = vmul.f32 0.5, %v11655_v59 }
0x14b7   : > { %v6151_v44 = vadd.f32 1.0, %v8746_v42  ;;  %v6262_v35 = vpack.c.bf16 %v6206_v36, %v6202_v41  ;;  %v5696_v15 = vmul.f32 0.5, %v11550_v30  ;;  %v6212_v46 = vmul.f32 %v6148_v26, %v5700_v9 }
0x14b8   : > { %v6265_v2 = vpack.c.bf16 %v6213_v6, %v6209_v39  ;;  %v6211_v38 = vmul.f32 %v6147_v14, %v5699_v55  ;;  %v6150_v43 = vadd.f32 1.0, %v11765_v20  ;;  %v5702_v34 = vmul.f32 0.5, %v11610_v11  ;;  %v12411_v14 = vld [vmem:[#allocation29_spill] sm:$0xff] }
0x14b9   : > { %v6215_v45 = vmul.f32 %v6151_v44, %v5703_v0  ;;  %v6208_v16 = vmul.f32 %v6144_v18, %v5696_v15  ;;  %v6146_v4 = vadd.f32 1.0, %v11750_v19  ;;  %v6156_v21 = vadd.f32 1.0, %v8738_v25  ;;  %v12410_v25 = vld [vmem:[#allocation42_spill] sm:$0xff] }
0x14ba   : > { %6599 = vmatprep.mubr.bf16.mxu0 %v6265_v2  ;;  %v5698_v30 = vmul.f32 0.5, %v11563_v53  ;;  %v6214_v28 = vmul.f32 %v6150_v43, %v5702_v34  ;;  %v5705_v5 = vmul.f32 0.5, %v11674_v54  ;;  %v5709_v20 = vmul.f32 0.5, %v11721_v48 }
0x14bb   : > { %6689 = vmatmul.mubr.bf16.gmra.mxu1 %v6262_v35  ;;  %v6267_v49 = vpack.c.bf16 %v6215_v45, %v6211_v38  ;;  %v8750_v47 = vpop.eup %8749  ;;  %v6264_v59 = vpack.c.bf16 %v6212_v46, %v6208_v16  ;;  %v5708_v31 = vmul.f32 0.5, %v11660_v29  ;;  %v6152_v11 = vadd.f32 1.0, %v11770_v62 }
0x14bc   : > { %v8752_v32 = vpop.eup %8751  ;;  %v6153_v61 = vadd.f32 1.0, %v8750_v47  ;;  %v6210_v19 = vmul.f32 %v6146_v4, %v5698_v30  ;;  %v5704_v37 = vmul.f32 0.5, %v12410_v25  ;;  %v6158_v53 = vadd.f32 1.0, %v8748_v17 }
0x14bd   : > { %6696 = vmatprep.mubr.bf16.mxu1 %v6267_v49  ;;  %v6157_v27 = vadd.f32 1.0, %v8752_v32  ;;  %v6220_v1 = vmul.f32 %v6156_v21, %v5708_v31  ;;  %v5710_v48 = vmul.f32 0.5, %v11680_v51  ;;  %v6154_v29 = vadd.f32 1.0, %v11788_v12 }
0x14be   : > { %6600 = vmatmul.mubr.bf16.gmra.mxu0 %v6264_v59  ;;  %v6217_v50 = vmul.f32 %v6153_v61, %v5705_v5  ;;  %v6266_v22 = vpack.c.bf16 %v6214_v28, %v6210_v19  ;;  %v6216_v54 = vmul.f32 %v6152_v11, %v5704_v37  ;;  %v5707_v62 = vmul.f32 0.5, %v11695_v23  ;;  %v12412_v23 = vld [vmem:[#allocation41_spill] sm:$0xff] }
0x14bf   : > { %v6221_v40 = vmul.f32 %v6157_v27, %v5709_v20  ;;  %v5711_v10 = vmul.f32 0.5, %v11726_v57  ;;  %v5706_v24 = vmul.f32 0.5, %v11640_v8  ;;  %v6222_v26 = vmul.f32 %v6158_v53, %v5710_v48 }
0x14c0   : > { %v6268_v36 = vpack.c.bf16 %v6220_v1, %v6216_v54 }
0x14c1   : > { %v6269_v41 = vpack.c.bf16 %v6221_v40, %v6217_v50  ;;  %v6218_v56 = vmul.f32 %v6154_v29, %v5706_v24 }
0x14c2   : > { %v8754_v33 = vpop.eup %8753 }
0x14c3   : > { %v8756_v63 = vpop.eup %8755  ;;  %6697 = vmatmul.mubr.bf16.gmra.mxu1 %v6266_v22  ;;  %v6155_v3 = vadd.f32 1.0, %v8754_v33  ;;  %6607 = vmatprep.mubr.bf16.mxu0 %v6269_v41  ;;  %v6270_v42 = vpack.c.bf16 %v6222_v26, %v6218_v56 }
0x14c4   : > { %v6159_v58 = vadd.f32 1.0, %v8756_v63 }
0x14c5   : > { %v6219_v52 = vmul.f32 %v6155_v3, %v5707_v62 }
0x14c6   : > { %v6223_v60 = vmul.f32 %v6159_v58, %v5711_v10  ;;  %6608 = vmatmul.mubr.bf16.gmra.mxu0 %v6268_v36 }
0x14c8   : > { %v6271_v55 = vpack.c.bf16 %v6223_v60, %v6219_v52 }
0x14ca   : > { %6704 = vmatprep.mubr.bf16.mxu1 %v6271_v55 }
0x14cb   : > { %6705 = vmatmul.mubr.bf16.gmra.mxu1 %v6270_v42 }
0x14ea   : > { %v5528_v51 = vpop.f32.mrf.mxu0  ;;  %v5641_v12 = vpop.f32.mrf.mxu1 }
0x14eb   : > { %v5529_v9 = vadd.f32 %v5528_v51, %v12411_v14  ;;  %v5642_v18 = vadd.f32 %v5641_v12, %v12412_v23 }
0x14ec   : > { %v5530_v57 = vpop.f32.mrf.mxu0  ;;  %v5643_v17 = vpop.f32.mrf.mxu1 }
0x14ed   : > { %v5776_v39 = vmul.f32 0.044715, %v5529_v9  ;;  %v5778_v6 = vmul.f32 0.044715, %v5642_v18  ;;  %v11828_v38 = vadd.f32 %v5530_v57, %v11488_v7  ;;  %v11834_v32 = vadd.f32 %v5643_v17, %v11490_v13 }
0x14ee   : > { %v5532_v8 = vpop.f32.mrf.mxu0  ;;  %v5645_v0 = vpop.f32.mrf.mxu1  ;;  %v11853_v1 = vmul.f32 0.5, %v5529_v9  ;;  %v11858_v41 = vmul.f32 0.5, %v5642_v18 }
0x14ef   : > { %v5840_v44 = vmul.f32 %v5776_v39, %v5529_v9  ;;  %v11822_v35 = vadd.f32 %v5532_v8, %v12411_v14  ;;  %v11825_v15 = vadd.f32 %v5645_v0, %v12412_v23  ;;  %v5842_v45 = vmul.f32 %v5778_v6, %v5642_v18 }
0x14f0   : > { %v5534_v46 = vpop.f32.mrf.mxu0  ;;  %v5647_v2 = vpop.f32.mrf.mxu1  ;;  %v5777_v21 = vmul.f32 0.044715, %v11828_v38  ;;  %v5779_v53 = vmul.f32 0.044715, %v11834_v32  ;;  %v11870_v24 = vmul.f32 0.5, %v11828_v38 }
0x14f1   : > { %v5904_v49 = vmul.f32 %v5840_v44, %v5529_v9  ;;  %v5780_v34 = vmul.f32 0.044715, %v11822_v35  ;;  %v5782_v4 = vmul.f32 0.044715, %v11825_v15  ;;  %v5906_v5 = vmul.f32 %v5842_v45, %v5642_v18 }
0x14f2   : > { %v5538_v43 = vpop.f32.mrf.mxu0  ;;  %v5651_v16 = vpop.f32.mrf.mxu1  ;;  %v11843_v61 = vadd.f32 %v5534_v46, %v11488_v7  ;;  %v11846_v20 = vadd.f32 %v5647_v2, %v11490_v13  ;;  %v5841_v22 = vmul.f32 %v5777_v21, %v11828_v38  ;;  %v5843_v51 = vmul.f32 %v5779_v53, %v11834_v32 }
0x14f3   : > { %v11837_v30 = vadd.f32 %v5538_v43, %v12411_v14  ;;  %v11840_v28 = vadd.f32 %v5651_v16, %v12412_v23  ;;  %v5968_v11 = vadd.f32 %v5904_v49, %v5529_v9  ;;  %v5844_v19 = vmul.f32 %v5780_v34, %v11822_v35 }
0x14f4   : > { %v5540_v47 = vpop.f32.mrf.mxu0  ;;  %v5653_v59 = vpop.f32.mrf.mxu1  ;;  %v5846_v50 = vmul.f32 %v5782_v4, %v11825_v15  ;;  %v5970_v54 = vadd.f32 %v5906_v5, %v5642_v18  ;;  %v5781_v63 = vmul.f32 0.044715, %v11843_v61  ;;  %v5783_v3 = vmul.f32 0.044715, %v11846_v20 }
0x14f5   : > { %v5784_v40 = vmul.f32 0.044715, %v11837_v30  ;;  %v5786_v33 = vmul.f32 0.044715, %v11840_v28  ;;  %v6032_v10 = vmul.f32 0.7978846, %v5968_v11  ;;  %v5908_v58 = vmul.f32 %v5844_v19, %v11822_v35 }
0x14f6   : > { %v5542_v27 = vpop.f32.mrf.mxu0  ;;  %v5655_v31 = vpop.f32.mrf.mxu1  ;;  %v5910_v26 = vmul.f32 %v5846_v50, %v11825_v15  ;;  %v11875_v60 = vadd.f32 %v5540_v47, %v11488_v7  ;;  %v11883_v9 = vadd.f32 %v5653_v59, %v11490_v13  ;;  %v11886_v18 = vmul.f32 0.5, %v11834_v32 }
0x14f7   : > { %v11863_v48 = vadd.f32 %v5542_v27, %v12411_v14  ;;  %v11867_v36 = vadd.f32 %v5655_v31, %v12412_v23  ;;  %v5848_v52 = vmul.f32 %v5784_v40, %v11837_v30  ;;  %v5850_v12 = vmul.f32 %v5786_v33, %v11840_v28 }
0x14f8   : > { %v5544_v25 = vpop.f32.mrf.mxu0  ;;  %v11851_v37 = vpop.f32.mrf.mxu1  ;;  %v6034_v57 = vmul.f32 0.7978846, %v5970_v54  ;;  %v11889_v17 = vmul.f32 %v5841_v22, %v11828_v38  ;;  %v5845_v39 = vmul.f32 %v5781_v63, %v11843_v61  ;;  %v5847_v6 = vmul.f32 %v5783_v3, %v11846_v20 }
0x14f9   : > { %v5788_v56 = vmul.f32 0.044715, %v11863_v48  ;;  %v5972_v0 = vadd.f32 %v5908_v58, %v11822_v35  ;;  %v5790_v46 = vmul.f32 0.044715, %v11867_v36  ;;  %8757 = vtanh.f32 %v6032_v10 }
0x14fa   : > { %v5548_v29 = vpop.f32.mrf.mxu0  ;;  %v5661_v62 = vpop.f32.mrf.mxu1  ;;  %v5974_v43 = vadd.f32 %v5910_v26, %v11825_v15  ;;  %v5912_v16 = vmul.f32 %v5848_v52, %v11837_v30  ;;  %v5785_v49 = vmul.f32 0.044715, %v11875_v60  ;;  %v5914_v34 = vmul.f32 %v5850_v12, %v11840_v28 }
0x14fb   : > { %v5852_v44 = vmul.f32 %v5788_v56, %v11863_v48  ;;  %v11897_v2 = vadd.f32 %v5548_v29, %v12411_v14  ;;  %v5787_v4 = vmul.f32 0.044715, %v11883_v9  ;;  %v11906_v59 = vadd.f32 %v5661_v62, %v12412_v23 }
0x14fc   : > { %v5550_v55 = vpop.f32.mrf.mxu0  ;;  %v11878_v42 = vpop.f32.mrf.mxu1  ;;  %8759 = vtanh.f32 %v6034_v57  ;;  %v11909_v5 = vmul.f32 %v5843_v51, %v11834_v32  ;;  %v11912_v27 = vmul.f32 %v5845_v39, %v11843_v61  ;;  %v11915_v31 = vadd.f32 %v5544_v25, %v11488_v7 }
0x14fd   : > { %12413 = vst [vmem:[#allocation42_spill] sm:$0xff] %v11897_v2  ;;  %v5792_v47 = vmul.f32 0.044715, %v11897_v2  ;;  %12414 = vst [vmem:[#allocation29_spill] sm:$0xff] %v11906_v59  ;;  %v6036_v11 = vmul.f32 0.7978846, %v5972_v0  ;;  %v5916_v19 = vmul.f32 %v5852_v44, %v11863_v48  ;;  %v5854_v50 = vmul.f32 %v5790_v46, %v11867_v36 }
0x14fe   : > { %v5552_v8 = vpop.f32.mrf.mxu0  ;;  %v5665_v45 = vpop.f32.mrf.mxu1  ;;  %v5794_v40 = vmul.f32 0.044715, %v11906_v59  ;;  %v6038_v53 = vmul.f32 0.7978846, %v5974_v43  ;;  %v11923_v33 = vmul.f32 %v5847_v6, %v11846_v20  ;;  %v5849_v54 = vmul.f32 %v5785_v49, %v11875_v60 }
0x14ff   : > { %v11927_v63 = vadd.f32 %v5552_v8, %v12411_v14  ;;  %v5976_v25 = vadd.f32 %v5912_v16, %v11837_v30  ;;  %v5978_v3 = vadd.f32 %v5914_v34, %v11840_v28  ;;  %v5851_v29 = vmul.f32 %v5787_v4, %v11883_v9 }
0x1500   : > { %v5554_v21 = vpop.f32.mrf.mxu0  ;;  %v11920_v22 = vpop.f32.mrf.mxu1  ;;  %v5856_v62 = vmul.f32 %v5792_v47, %v11897_v2  ;;  %v5789_v58 = vmul.f32 0.044715, %v11915_v31  ;;  %v11936_v26 = vadd.f32 %v11851_v37, %v11490_v13  ;;  %v5858_v52 = vmul.f32 %v5794_v40, %v11906_v59 }
0x1501   : > { %12415 = vst [vmem:[#allocation41_spill] sm:$0xff] %v11927_v63  ;;  %v5796_v56 = vmul.f32 0.044715, %v11927_v63  ;;  %8761 = vtanh.f32 %v6036_v11  ;;  %v5980_v51 = vadd.f32 %v5916_v19, %v11863_v48  ;;  %v5918_v12 = vmul.f32 %v5854_v50, %v11867_v36 }
0x1502   : > { %v5558_v10 = vpop.f32.mrf.mxu0  ;;  %v11943_v57 = vadd.f32 %v5665_v45, %v12412_v23  ;;  %v5671_v39 = vpop.f32.mrf.mxu1  ;;  %8763 = vtanh.f32 %v6038_v53  ;;  %v11946_v6 = vmul.f32 %v5849_v54, %v11875_v60  ;;  %v11949_v37 = vadd.f32 %v5550_v55, %v11488_v7 }
0x1503   : > { %v5860_v8 = vmul.f32 %v5796_v56, %v11927_v63  ;;  %v6040_v0 = vmul.f32 0.7978846, %v5976_v25  ;;  %v6042_v44 = vmul.f32 0.7978846, %v5978_v3  ;;  %v5920_v46 = vmul.f32 %v5856_v62, %v11897_v2 }
0x1504   : > { %12416 = vst [vmem:[#allocation43_spill] sm:$0xff] %v11943_v57  ;;  %v5798_v43 = vmul.f32 0.044715, %v11943_v57  ;;  %v5560_v16 = vpop.f32.mrf.mxu0  ;;  %v11955_v45 = vmul.f32 %v5851_v29, %v11883_v9  ;;  %v5853_v49 = vmul.f32 %v5789_v58, %v11915_v31  ;;  %v5791_v34 = vmul.f32 0.044715, %v11936_v26  ;;  %v5673_v50 = vpop.f32.mrf.mxu1 }
0x1505   : > { %v5922_v4 = vmul.f32 %v5858_v52, %v11906_v59  ;;  %v6044_v55 = vmul.f32 0.7978846, %v5980_v51  ;;  %v5982_v47 = vadd.f32 %v5918_v12, %v11867_v36  ;;  %v11963_v11 = vadd.f32 %v11878_v42, %v11490_v13 }
0x1506   : > { %v11966_v19 = vadd.f32 %v5558_v10, %v12411_v14  ;;  %v5793_v40 = vmul.f32 0.044715, %v11949_v37  ;;  %v5924_v53 = vmul.f32 %v5860_v8, %v11927_v63  ;;  %v5862_v54 = vmul.f32 %v5798_v43, %v11943_v57  ;;  %v11974_v3 = vpop.eup %8757  ;;  %v5562_v10 = vpop.f32.mrf.mxu0 }
0x1507   : > { %v11972_v25 = vadd.f32 %v5671_v39, %v12412_v23  ;;  %8765 = vtanh.f32 %v6040_v0  ;;  %v5984_v29 = vadd.f32 %v5920_v46, %v11897_v2  ;;  %v11978_v42 = vadd.f32 %v5554_v21, %v11488_v7  ;;  %v5675_v21 = vpop.f32.mrf.mxu1 }
0x1508   : > { %12417 = vst [vmem:[#allocation44_spill] sm:$0xff] %v11966_v19  ;;  %v5800_v62 = vmul.f32 0.044715, %v11966_v19  ;;  %8767 = vtanh.f32 %v6042_v44  ;;  %v5855_v58 = vmul.f32 %v5791_v34, %v11936_v26  ;;  %v5986_v52 = vadd.f32 %v5922_v4, %v11906_v59 }
0x1509   : > { %v5802_v56 = vmul.f32 0.044715, %v11972_v25  ;;  %v11984_v51 = vpop.eup %8759  ;;  %8769 = vtanh.f32 %v6044_v55  ;;  %v6046_v12 = vmul.f32 0.7978846, %v5982_v47  ;;  %v5795_v39 = vmul.f32 0.044715, %v11963_v11 }
0x150a   : > { %v5864_v8 = vmul.f32 %v5800_v62, %v11966_v19  ;;  %v5857_v0 = vmul.f32 %v5793_v40, %v11949_v37  ;;  %v5988_v46 = vadd.f32 %v5924_v53, %v11927_v63  ;;  %v5926_v44 = vmul.f32 %v5862_v54, %v11943_v57 }
0x150b   : > { %v11992_v43 = vadd.f32 %v5562_v10, %v12411_v14  ;;  %v6048_v34 = vmul.f32 0.7978846, %v5984_v29  ;;  %v5797_v4 = vmul.f32 0.044715, %v11978_v42  ;;  %v11997_v55 = vadd.f32 %v11920_v22, %v11490_v13 }
0x150c   : > { %v5866_v47 = vmul.f32 %v5802_v56, %v11972_v25  ;;  %v6050_v62 = vmul.f32 0.7978846, %v5986_v52  ;;  %v5928_v59 = vmul.f32 %v5864_v8, %v11966_v19  ;;  %v12003_v53 = vadd.f32 %v5675_v21, %v12412_v23 }
0x150d   : > { %v5804_v40 = vmul.f32 0.044715, %v11992_v43  ;;  %8771 = vtanh.f32 %v6046_v12  ;;  %v5917_v14 = vmul.f32 %v5853_v49, %v11915_v31  ;;  %v12007_v54 = vmul.f32 %v5855_v58, %v11936_v26 }
0x150e   : > { %v5859_v29 = vmul.f32 %v5795_v39, %v11963_v11  ;;  %v12010_v22 = vpop.eup %8761  ;;  %v6052_v10 = vmul.f32 0.7978846, %v5988_v46  ;;  %v5990_v52 = vadd.f32 %v5926_v44, %v11943_v57  ;;  %v12014_v56 = vadd.f32 %v5560_v16, %v11488_v7  ;;  %v5564_v39 = vpop.f32.mrf.mxu0 }
0x150f   : > { %v5806_v8 = vmul.f32 0.044715, %v12003_v53  ;;  %v12017_v23 = vpop.eup %8763  ;;  %8773 = vtanh.f32 %v6048_v34  ;;  %v12020_v49 = vmul.f32 %v5857_v0, %v11949_v37  ;;  %v5930_v58 = vmul.f32 %v5866_v47, %v11972_v25  ;;  %v5677_v57 = vpop.f32.mrf.mxu1 }
0x1510   : > { %v5868_v12 = vmul.f32 %v5804_v40, %v11992_v43  ;;  %8775 = vtanh.f32 %v6050_v62  ;;  %v5861_v21 = vmul.f32 %v5797_v4, %v11978_v42  ;;  %v5799_v46 = vmul.f32 0.044715, %v11997_v55 }
0x1511   : > { %v5992_v16 = vadd.f32 %v5928_v59, %v11966_v19  ;;  %v12028_v44 = vadd.f32 %v5673_v50, %v11490_v13  ;;  %v5870_v34 = vmul.f32 %v5806_v8, %v12003_v53  ;;  %v5969_v0 = vadd.f32 %v11889_v17, %v11828_v38 }
0x1512   : > { %v5973_v47 = vadd.f32 %v11912_v27, %v11843_v61  ;;  %8777 = vtanh.f32 %v6052_v10  ;;  %v6054_v62 = vmul.f32 0.7978846, %v5990_v52  ;;  %v5801_v4 = vmul.f32 0.044715, %v12014_v56 }
0x1513   : > { %v12037_v40 = vadd.f32 %v5564_v39, %v11488_v7  ;;  %v5994_v59 = vadd.f32 %v5930_v58, %v11972_v25  ;;  %v5932_v50 = vmul.f32 %v5868_v12, %v11992_v43  ;;  %v6033_v19 = vmul.f32 0.7978846, %v5969_v0 }
0x1514   : > { %v6037_v8 = vmul.f32 0.7978846, %v5973_v47  ;;  %v12041_v2 = vpop.eup %8765  ;;  %v6056_v63 = vmul.f32 0.7978846, %v5992_v16  ;;  %v12044_v38 = vadd.f32 %v5677_v57, %v11490_v13  ;;  %v5971_v17 = vadd.f32 %v11909_v5, %v11834_v32 }
0x1515   : > { %v5975_v27 = vadd.f32 %v11923_v33, %v11846_v20  ;;  %v12050_v7 = vpop.eup %8767  ;;  %v5863_v10 = vmul.f32 %v5799_v46, %v11997_v55  ;;  %v5803_v52 = vmul.f32 0.044715, %v12028_v44  ;;  %v5934_v58 = vmul.f32 %v5870_v34, %v12003_v53 }
0x1516   : > { %8779 = vtanh.f32 %v6033_v19  ;;  %v12055_v12 = vpop.eup %8769  ;;  %v5865_v13 = vmul.f32 %v5801_v4, %v12014_v56  ;;  %v6035_v57 = vmul.f32 0.7978846, %v5971_v17  ;;  %v6058_v32 = vmul.f32 0.7978846, %v5994_v59 }
0x1517   : > { %8781 = vtanh.f32 %v6054_v62  ;;  %v6039_v39 = vmul.f32 0.7978846, %v5975_v27  ;;  %v5996_v5 = vadd.f32 %v5932_v50, %v11992_v43  ;;  %v5805_v33 = vmul.f32 0.044715, %v12037_v40 }
0x1518   : > { %8783 = vtanh.f32 %v6037_v8  ;;  %v5923_v46 = vmul.f32 %v5859_v29, %v11963_v11  ;;  %v5925_v16 = vmul.f32 %v5861_v21, %v11978_v42  ;;  %v5807_v19 = vmul.f32 0.044715, %v12044_v38 }
0x1519   : > { %8785 = vtanh.f32 %v6056_v63  ;;  %v5867_v34 = vmul.f32 %v5803_v52, %v12028_v44  ;;  %v5998_v0 = vadd.f32 %v5934_v58, %v12003_v53  ;;  %v5977_v47 = vadd.f32 %v11946_v6, %v11875_v60 }
0x151a   : > { %8787 = vtanh.f32 %v6035_v57  ;;  %v12067_v62 = vpop.eup %8771  ;;  %v5927_v4 = vmul.f32 %v5863_v10, %v11997_v55  ;;  %v12071_v59 = vmul.f32 %v5865_v13, %v12014_v56  ;;  %v5981_v63 = vadd.f32 %v5917_v14, %v11915_v31 }
0x151b   : > { %8789 = vtanh.f32 %v6039_v39  ;;  %v6060_v29 = vmul.f32 0.7978846, %v5996_v5  ;;  %v5869_v21 = vmul.f32 %v5805_v33, %v12037_v40  ;;  %v6041_v50 = vmul.f32 0.7978846, %v5977_v47 }
0x151c   : > { %8791 = vtanh.f32 %v6058_v32  ;;  %v12075_v8 = vpop.eup %8773  ;;  %v5871_v17 = vmul.f32 %v5807_v19, %v12044_v38  ;;  %v6045_v6 = vmul.f32 0.7978846, %v5981_v63  ;;  %v5979_v27 = vadd.f32 %v11955_v45, %v11883_v9 }
0x151d   : > { %v5983_v10 = vadd.f32 %v12007_v54, %v11936_v26  ;;  %v12082_v52 = vpop.eup %8775  ;;  %v12085_v14 = vmul.f32 %v5867_v34, %v12028_v44  ;;  %v6062_v58 = vmul.f32 0.7978846, %v5998_v0  ;;  %v6160_v13 = vadd.f32 1.0, %v11974_v3 }
0x151e   : > { %8793 = vtanh.f32 %v6041_v50  ;;  %v6164_v57 = vadd.f32 1.0, %v12010_v22  ;;  %v6043_v39 = vmul.f32 0.7978846, %v5979_v27  ;;  %v12092_v45 = vmul.f32 %v5869_v21, %v12037_v40 }
0x151f   : > { %8795 = vtanh.f32 %v6045_v6  ;;  %v6047_v32 = vmul.f32 0.7978846, %v5983_v10  ;;  %v12089_v5 = vpop.eup %8777  ;;  %v5717_v54 = vmul.f32 0.5, %v11843_v61  ;;  %v5719_v33 = vmul.f32 0.5, %v11846_v20 }
0x1520   : > { %8797 = vtanh.f32 %v6060_v29  ;;  %v12097_v19 = vmul.f32 %v5871_v17, %v12044_v38  ;;  %v5716_v3 = vmul.f32 0.5, %v11822_v35  ;;  %v6162_v22 = vadd.f32 1.0, %v11984_v51 }
0x1521   : > { %8799 = vtanh.f32 %v6043_v39  ;;  %v6224_v34 = vmul.f32 %v6160_v13, %v11853_v1  ;;  %v6166_v0 = vadd.f32 1.0, %v12017_v23  ;;  %v5985_v47 = vadd.f32 %v12020_v49, %v11949_v37 }
0x1522   : > { %8801 = vtanh.f32 %v6047_v32  ;;  %v6228_v61 = vmul.f32 %v6164_v57, %v5716_v3  ;;  %v5718_v20 = vmul.f32 0.5, %v11825_v15  ;;  %v5989_v29 = vadd.f32 %v5925_v16, %v11978_v42 }
0x1523   : > { %v8780_v63 = vpop.eup %8779  ;;  %8803 = vtanh.f32 %v6062_v58  ;;  %v5721_v51 = vmul.f32 0.5, %v11875_v60  ;;  %v6049_v50 = vmul.f32 0.7978846, %v5985_v47  ;;  %v5987_v1 = vadd.f32 %v5923_v46, %v11963_v11 }
0x1524   : > { %v12107_v21 = vpop.eup %8781  ;;  %v6161_v35 = vadd.f32 1.0, %v8780_v63  ;;  %v6226_v17 = vmul.f32 %v6162_v22, %v11858_v41  ;;  %v5725_v49 = vmul.f32 0.5, %v11915_v31  ;;  %v6053_v6 = vmul.f32 0.7978846, %v5989_v29 }
0x1525   : > { %v8784_v23 = vpop.eup %8783  ;;  %v5991_v27 = vadd.f32 %v5927_v4, %v11997_v55  ;;  %v6230_v16 = vmul.f32 %v6166_v0, %v5718_v20  ;;  %8805 = vtanh.f32 %v6049_v50  ;;  %v6051_v58 = vmul.f32 0.7978846, %v5987_v1 }
0x1526   : > { %v12114_v10 = vpop.eup %8785  ;;  %v6165_v15 = vadd.f32 1.0, %v8784_v23  ;;  %v6272_v57 = vpack.c.bf16 %v6228_v61, %v6224_v34  ;;  %v6168_v60 = vadd.f32 1.0, %v12041_v2  ;;  %8807 = vtanh.f32 %v6053_v6 }
0x1527   : > { %v8788_v13 = vpop.eup %8787  ;;  %v6055_v46 = vmul.f32 0.7978846, %v5991_v27  ;;  %v6225_v41 = vmul.f32 %v6161_v35, %v11870_v24  ;;  %8809 = vtanh.f32 %v6051_v58  ;;  %v5723_v22 = vmul.f32 0.5, %v11883_v9 }
0x1528   : > { %v8790_v39 = vpop.eup %8789  ;;  %v6229_v32 = vmul.f32 %v6165_v15, %v5717_v54  ;;  %v6163_v31 = vadd.f32 1.0, %v8788_v13  ;;  %v5727_v0 = vmul.f32 0.5, %v11936_v26  ;;  %v6274_v34 = vpack.c.bf16 %v6230_v16, %v6226_v17 }
0x1529   : > { %v12118_v3 = vpop.eup %8791  ;;  %v6167_v4 = vadd.f32 1.0, %v8790_v39  ;;  %8811 = vtanh.f32 %v6055_v46  ;;  %v5720_v2 = vmul.f32 0.5, %v11837_v30  ;;  %v6172_v63 = vadd.f32 1.0, %v12055_v12 }
0x152a   : > { %v6273_v47 = vpack.c.bf16 %v6229_v32, %v6225_v41  ;;  %v6227_v24 = vmul.f32 %v6163_v31, %v11886_v18  ;;  %v5724_v20 = vmul.f32 0.5, %v11863_v48  ;;  %v6170_v29 = vadd.f32 1.0, %v12050_v7 }
0x152b   : > { %v8794_v61 = vpop.eup %8793  ;;  %v6231_v54 = vmul.f32 %v6167_v4, %v5719_v33  ;;  %v6232_v50 = vmul.f32 %v6168_v60, %v5720_v2  ;;  %v5722_v26 = vmul.f32 0.5, %v11840_v28  ;;  %v5993_v1 = vadd.f32 %v12071_v59, %v12014_v56 }
0x152c   : > { %v8796_v35 = vpop.eup %8795  ;;  %6615 = vmatprep.mubr.bf16.mxu0 %v6273_v47  ;;  %v6169_v9 = vadd.f32 1.0, %v8794_v61  ;;  %v5726_v18 = vmul.f32 0.5, %v11867_v36  ;;  %v6174_v48 = vadd.f32 1.0, %v12067_v62  ;;  %v6236_v7 = vmul.f32 %v6172_v63, %v5724_v20 }
0x152d   : > { %v12130_v30 = vpop.eup %8797  ;;  %v6275_v12 = vpack.c.bf16 %v6231_v54, %v6227_v24  ;;  %6616 = vmatmul.mubr.bf16.gmra.mxu0 %v6272_v57  ;;  %v6173_v23 = vadd.f32 1.0, %v8796_v35  ;;  %v5729_v17 = vmul.f32 0.5, %v11949_v37  ;;  %v5997_v6 = vadd.f32 %v12092_v45, %v12037_v40 }
0x152e   : > { %v8800_v33 = vpop.eup %8799  ;;  %v6057_v28 = vmul.f32 0.7978846, %v5993_v1  ;;  %v6233_v59 = vmul.f32 %v6169_v9, %v5721_v51  ;;  %v6234_v58 = vmul.f32 %v6170_v29, %v5722_v26  ;;  %v5995_v62 = vadd.f32 %v12085_v14, %v12028_v44  ;;  %v12420_v26 = vld [vmem:[#allocation43_spill] sm:$0xff] }
0x152f   : > { %v8802_v27 = vpop.eup %8801  ;;  %6712 = vmatprep.mubr.bf16.mxu1 %v6275_v12  ;;  %v6237_v15 = vmul.f32 %v6173_v23, %v5725_v49  ;;  %v6171_v16 = vadd.f32 1.0, %v8800_v33  ;;  %v6061_v57 = vmul.f32 0.7978846, %v5997_v6  ;;  %v6238_v60 = vmul.f32 %v6174_v48, %v5726_v18  ;;  %v12421_v33 = vld [vmem:[#allocation29_spill] sm:$0xff] }
0x1530   : > { %v12137_v13 = vpop.eup %8803  ;;  %6713 = vmatmul.mubr.bf16.gmra.mxu1 %v6274_v34  ;;  %v6175_v36 = vadd.f32 1.0, %v8802_v27  ;;  %8813 = vtanh.f32 %v6057_v28  ;;  %v5733_v45 = vmul.f32 0.5, %v11978_v42  ;;  %v5999_v46 = vadd.f32 %v12097_v19, %v12044_v38 }
0x1531   : > { %v6277_v37 = vpack.c.bf16 %v6237_v15, %v6233_v59  ;;  %v6235_v51 = vmul.f32 %v6171_v16, %v5723_v22  ;;  %8815 = vtanh.f32 %v6061_v57  ;;  %v6059_v39 = vmul.f32 0.7978846, %v5995_v62  ;;  %v12418_v22 = vld [vmem:[#allocation41_spill] sm:$0xff] }
0x1532   : > { %v6239_v49 = vmul.f32 %v6175_v36, %v5727_v0  ;;  %v8806_v41 = vpop.eup %8805  ;;  %v6276_v32 = vpack.c.bf16 %v6236_v7, %v6232_v50  ;;  %v5731_v31 = vmul.f32 0.5, %v11963_v11  ;;  %v6180_v4 = vadd.f32 1.0, %v12089_v5  ;;  %v12419_v5 = vld [vmem:[#allocation42_spill] sm:$0xff] }
0x1533   : > { %6623 = vmatprep.mubr.bf16.mxu0 %v6277_v37  ;;  %v6063_v47 = vmul.f32 0.7978846, %v5999_v46  ;;  %v8808_v14 = vpop.eup %8807  ;;  %v6177_v2 = vadd.f32 1.0, %v8806_v41  ;;  %v5735_v42 = vmul.f32 0.5, %v11997_v55  ;;  %8817 = vtanh.f32 %v6059_v39  ;;  %v12422_v46 = vld [vmem:[#allocation44_spill] sm:$0xff] }
0x1534   : > { %v6279_v34 = vpack.c.bf16 %v6239_v49, %v6235_v51  ;;  %v8810_v63 = vpop.eup %8809  ;;  %v6181_v19 = vadd.f32 1.0, %v8808_v14  ;;  %v5732_v0 = vmul.f32 0.5, %v12418_v22  ;;  %v6176_v61 = vadd.f32 1.0, %v12075_v8 }
0x1535   : > { %6624 = vmatmul.mubr.bf16.gmra.mxu0 %v6276_v32  ;;  %8819 = vtanh.f32 %v6063_v47  ;;  %v6278_v11 = vpack.c.bf16 %v6238_v60, %v6234_v58  ;;  %v6179_v54 = vadd.f32 1.0, %v8810_v63  ;;  %v5728_v20 = vmul.f32 0.5, %v12419_v5 }
0x1536   : > { %v8812_v24 = vpop.eup %8811  ;;  %6720 = vmatprep.mubr.bf16.mxu1 %v6279_v34  ;;  %v6182_v29 = vadd.f32 1.0, %v12107_v21  ;;  %v6241_v35 = vmul.f32 %v6177_v2, %v5729_v17  ;;  %v6245_v9 = vmul.f32 %v6181_v19, %v5733_v45  ;;  %v6244_v50 = vmul.f32 %v6180_v4, %v5732_v0 }
0x1537   : > { %v6183_v55 = vadd.f32 1.0, %v8812_v24  ;;  %v5734_v1 = vmul.f32 0.5, %v12420_v26  ;;  %v6178_v12 = vadd.f32 1.0, %v12082_v52  ;;  %v6243_v8 = vmul.f32 %v6179_v54, %v5731_v31 }
0x1538   : > { %6721 = vmatmul.mubr.bf16.gmra.mxu1 %v6278_v11  ;;  %v6281_v23 = vpack.c.bf16 %v6245_v9, %v6241_v35  ;;  %v6240_v48 = vmul.f32 %v6176_v61, %v5728_v20  ;;  %v5730_v7 = vmul.f32 0.5, %v12421_v33  ;;  %v6188_v59 = vadd.f32 1.0, %v12130_v30 }
0x1539   : > { %v6247_v18 = vmul.f32 %v6183_v55, %v5735_v42  ;;  %v6246_v6 = vmul.f32 %v6182_v29, %v5734_v1  ;;  %v5740_v52 = vmul.f32 0.5, %v11992_v43  ;;  %v6184_v36 = vadd.f32 1.0, %v12114_v10  ;;  %v8854_v1 = vld [vmem:[#allocation2 + $0x30] sm:$0xff] }
0x153a   : > { %6631 = vmatprep.mubr.bf16.mxu0 %v6281_v23  ;;  %v6280_v27 = vpack.c.bf16 %v6244_v50, %v6240_v48  ;;  %v6242_v21 = vmul.f32 %v6178_v12, %v5730_v7  ;;  %v5737_v57 = vmul.f32 0.5, %v12014_v56  ;;  %v5741_v62 = vmul.f32 0.5, %v12037_v40 }
0x153b   : > { %v6283_v28 = vpack.c.bf16 %v6247_v18, %v6243_v8  ;;  %v6190_v60 = vadd.f32 1.0, %v12137_v13  ;;  %v5736_v51 = vmul.f32 0.5, %v12422_v46  ;;  %v6252_v49 = vmul.f32 %v6188_v59, %v5740_v52 }
0x153c   : > { %v6282_v15 = vpack.c.bf16 %v6246_v6, %v6242_v21  ;;  %v5742_v30 = vmul.f32 0.5, %v12003_v53  ;;  %v6186_v10 = vadd.f32 1.0, %v12118_v3  ;;  %v5739_v31 = vmul.f32 0.5, %v12028_v44 }
0x153d   : > { %v8814_v17 = vpop.eup %8813  ;;  %6728 = vmatprep.mubr.bf16.mxu1 %v6283_v28  ;;  %6632 = vmatmul.mubr.bf16.gmra.mxu0 %v6280_v27  ;;  %v5743_v56 = vmul.f32 0.5, %v12044_v38  ;;  %v6248_v4 = vmul.f32 %v6184_v36, %v5736_v51  ;;  %v5738_v47 = vmul.f32 0.5, %v11972_v25  ;;  %v12171_v38 = vld [vmem:[%s767_s29] ss:$0 sm:$0xff] }
0x153e   : > { %v6185_v16 = vadd.f32 1.0, %v8814_v17  ;;  %v8816_v58 = vpop.eup %8815  ;;  %v6254_v14 = vmul.f32 %v6190_v60, %v5742_v30  ;;  %v8855_v27 = vld [vmem:[#allocation2] sm:$0xff] }
0x153f   : > { %v6189_v37 = vadd.f32 1.0, %v8816_v58  ;;  %v6284_v53 = vpack.c.bf16 %v6252_v49, %v6248_v4  ;;  %v6250_v42 = vmul.f32 %v6186_v10, %v5738_v47 }
0x1540   : > { %6729 = vmatmul.mubr.bf16.gmra.mxu1 %v6282_v15  ;;  %v8818_v45 = vpop.eup %8817  ;;  %v6249_v41 = vmul.f32 %v6185_v16, %v5737_v57 }
0x1541   : > { %v6253_v32 = vmul.f32 %v6189_v37, %v5741_v62  ;;  %v6187_v43 = vadd.f32 1.0, %v8818_v45  ;;  %v6286_v19 = vpack.c.bf16 %v6254_v14, %v6250_v42  ;;  %v8856_v62 = vld [vmem:[#allocation2 + $0x58] sm:$0xff] }
0x1542   : > { %v8820_v39 = vpop.eup %8819 }
0x1543   : > { %v6191_v40 = vadd.f32 1.0, %v8820_v39  ;;  %v6285_v13 = vpack.c.bf16 %v6253_v32, %v6249_v41  ;;  %v6251_v34 = vmul.f32 %v6187_v43, %v5739_v31  ;;  %v8857_v32 = vld [vmem:[#allocation2 + $0x18] sm:$0xff] }
0x1545   : > { %v6255_v2 = vmul.f32 %v6191_v40, %v5743_v56  ;;  %6639 = vmatprep.mubr.bf16.mxu0 %v6285_v13 }
0x1546   : > { %6640 = vmatmul.mubr.bf16.gmra.mxu0 %v6284_v53 }
0x1547   : > { %v6287_v63 = vpack.c.bf16 %v6255_v2, %v6251_v34  ;;  %v12424_v34 = vld [vmem:[#allocation34_spill] sm:$0xff] }
0x1549   : > { %6736 = vmatprep.mubr.bf16.mxu1 %v6287_v63 }
0x154a   : > { %6737 = vmatmul.mubr.bf16.gmra.mxu1 %v6286_v19 }
0x156e   : > { %v7583_v44 = vpop.f32.mrf.mxu0 }
0x1570   : > { %v7584_v3 = vpop.f32.mrf.mxu0 }
0x1571   : > { %v7585_v25 = vadd.f32 %v7584_v3, %v7583_v44 }
0x1572   : > { %v7586_v22 = vpop.f32.mrf.mxu0 }
0x1573   : > { %v7647_v0 = vpop.f32.mrf.mxu1  ;;  %v6586_v61 = vadd.f32 %v7585_v25, %v12171_v38 }
0x1574   : > { %v7587_v24 = vpop.f32.mrf.mxu0 }
0x1575   : > { %v7648_v11 = vpop.f32.mrf.mxu1  ;;  %v7588_v54 = vadd.f32 %v7587_v24, %v7586_v22 }
0x1576   : > { %v7649_v5 = vadd.f32 %v7648_v11, %v7647_v0  ;;  %v7589_v20 = vpop.f32.mrf.mxu0  ;;  %v12425_v0 = vld [vmem:[#allocation31_spill] sm:$0xff] }
0x1577   : > { %v7650_v29 = vpop.f32.mrf.mxu1  ;;  %v6589_v9 = vadd.f32 %v7588_v54, %v12171_v38 }
0x1578   : > { %v6683_v35 = vadd.f32 %v7649_v5, %v6586_v61  ;;  %v7590_v55 = vpop.f32.mrf.mxu0 }
0x1579   : > { %v7651_v50 = vpop.f32.mrf.mxu1  ;;  %v7591_v26 = vadd.f32 %v7590_v55, %v7589_v20 }
0x157a   : > { %v12175_v12 = vadd.f32 %v8854_v1, %v6683_v35  ;;  %v7652_v23 = vadd.f32 %v7651_v50, %v7650_v29  ;;  %v7592_v8 = vpop.f32.mrf.mxu0  ;;  %v8858_v29 = vld [vmem:[#allocation2 + $0x8] sm:$0xff]  ;;  %v12426_v50 = vld [vmem:[#allocation35_spill] sm:$0xff] }
0x157b   : > { %v7653_v18 = vpop.f32.mrf.mxu1  ;;  %v6594_v33 = vadd.f32 %v7591_v26, %v12171_v38 }
0x157c   : > { %6761 = vst [vmem:[#allocation2 + $0x30] sm:$0xff] %v12175_v12  ;;  %v6686_v48 = vadd.f32 %v7652_v23, %v6589_v9  ;;  %v7593_v7 = vpop.f32.mrf.mxu0 }
0x157d   : > { %v7654_v6 = vpop.f32.mrf.mxu1  ;;  %v7594_v28 = vadd.f32 %v7593_v7, %v7592_v8 }
0x157e   : > { %v12179_v21 = vadd.f32 %v8855_v27, %v6686_v48  ;;  %v7655_v17 = vadd.f32 %v7654_v6, %v7653_v18  ;;  %v7595_v59 = vpop.f32.mrf.mxu0 }
0x157f   : > { %v7656_v15 = vpop.f32.mrf.mxu1  ;;  %v6597_v58 = vadd.f32 %v7594_v28, %v12171_v38 }
0x1580   : > { %6762 = vst [vmem:[#allocation2] sm:$0xff] %v12179_v21  ;;  %v6691_v16 = vadd.f32 %v7655_v17, %v6594_v33  ;;  %v7596_v52 = vpop.f32.mrf.mxu0 }
0x1581   : > { %v7657_v36 = vpop.f32.mrf.mxu1  ;;  %v7597_v57 = vadd.f32 %v7596_v52, %v7595_v59  ;;  %v12427_v52 = vld [vmem:[#allocation30_spill] sm:$0xff] }
0x1582   : > { %v12183_v37 = vadd.f32 %v8856_v62, %v6691_v16  ;;  %v7658_v60 = vadd.f32 %v7657_v36, %v7656_v15  ;;  %v7598_v45 = vpop.f32.mrf.mxu0 }
0x1583   : > { %v7659_v46 = vpop.f32.mrf.mxu1  ;;  %v6602_v49 = vadd.f32 %v7597_v57, %v12171_v38 }
0x1584   : > { %6763 = vst [vmem:[#allocation2 + $0x58] sm:$0xff] %v12183_v37  ;;  %v6694_v51 = vadd.f32 %v7658_v60, %v6597_v58  ;;  %v7599_v30 = vpop.f32.mrf.mxu0 }
0x1585   : > { %v7660_v39 = vpop.f32.mrf.mxu1  ;;  %v7600_v41 = vadd.f32 %v7599_v30, %v7598_v45 }
0x1586   : > { %v12187_v43 = vadd.f32 %v8857_v32, %v6694_v51  ;;  %v7661_v10 = vadd.f32 %v7660_v39, %v7659_v46  ;;  %v7601_v31 = vpop.f32.mrf.mxu0  ;;  %v12428_v39 = vld [vmem:[#allocation33_spill] sm:$0xff] }
0x1587   : > { %v7662_v56 = vpop.f32.mrf.mxu1  ;;  %v6605_v4 = vadd.f32 %v7600_v41, %v12171_v38 }
0x1588   : > { %6764 = vst [vmem:[#allocation2 + $0x18] sm:$0xff] %v12187_v43  ;;  %v6699_v40 = vadd.f32 %v7661_v10, %v6602_v49  ;;  %v7602_v13 = vpop.f32.mrf.mxu0 }
0x1589   : > { %v7663_v47 = vpop.f32.mrf.mxu1  ;;  %v7603_v14 = vadd.f32 %v7602_v13, %v7601_v31 }
0x158a   : > { %v12192_v2 = vadd.f32 %v6699_v40, %v12424_v34  ;;  %v7664_v53 = vadd.f32 %v7663_v47, %v7662_v56  ;;  %v7604_v42 = vpop.f32.mrf.mxu0 }
0x158b   : > { %v7665_v63 = vpop.f32.mrf.mxu1  ;;  %v6610_v44 = vadd.f32 %v7603_v14, %v12171_v38  ;;  %v12429_v14 = vld [vmem:[#allocation32_spill] sm:$0xff] }
0x158c   : > { %6765 = vst [vmem:[#allocation2 + $0x50] sm:$0xff] %v12192_v2  ;;  %v6702_v19 = vadd.f32 %v7664_v53, %v6605_v4  ;;  %v7605_v3 = vpop.f32.mrf.mxu0 }
0x158d   : > { %v7666_v25 = vpop.f32.mrf.mxu1  ;;  %v7606_v22 = vadd.f32 %v7605_v3, %v7604_v42 }
0x158e   : > { %v12197_v61 = vadd.f32 %v6702_v19, %v12425_v0  ;;  %v7667_v24 = vadd.f32 %v7666_v25, %v7665_v63  ;;  %v12430_v0 = vld [vmem:[#allocation36_spill] sm:$0xff] }
0x158f   : > { %v7668_v11 = vpop.f32.mrf.mxu1  ;;  %v6613_v5 = vadd.f32 %v7606_v22, %v12171_v38 }
0x1590   : > { %6766 = vst [vmem:[#allocation2 + $0x68] sm:$0xff] %v12197_v61  ;;  %v6707_v54 = vadd.f32 %v7667_v24, %v6610_v44 }
0x1591   : > { %v7669_v20 = vpop.f32.mrf.mxu1 }
0x1592   : > { %v12201_v35 = vadd.f32 %v8858_v29, %v6707_v54  ;;  %v7670_v9 = vadd.f32 %v7669_v20, %v7668_v11 }
0x1594   : > { %6767 = vst [vmem:[#allocation2 + $0x8] sm:$0xff] %v12201_v35  ;;  %v6710_v55 = vadd.f32 %v7670_v9, %v6613_v5 }
0x1596   : > { %v12205_v26 = vadd.f32 %v6710_v55, %v12426_v50  ;;  %v12431_v50 = vld [vmem:[#allocation37_spill] sm:$0xff] }
0x1598   : > { %6768 = vst [vmem:[#allocation2 + $0x48] sm:$0xff] %v12205_v26 }
0x15ed   : > { %v7607_v1 = vpop.f32.mrf.mxu0 }
0x15ef   : > { %v7608_v23 = vpop.f32.mrf.mxu0 }
0x15f0   : > { %v7671_v8 = vpop.f32.mrf.mxu1  ;;  %v7609_v18 = vadd.f32 %v7608_v23, %v7607_v1 }
0x15f1   : > { %v7610_v48 = vpop.f32.mrf.mxu0 }
0x15f2   : > { %v6618_v33 = vadd.f32 %v7609_v18, %v12171_v38  ;;  %v7672_v7 = vpop.f32.mrf.mxu1 }
0x15f3   : > { %v7673_v6 = vadd.f32 %v7672_v7, %v7671_v8  ;;  %v7611_v28 = vpop.f32.mrf.mxu0 }
0x15f4   : > { %v7674_v27 = vpop.f32.mrf.mxu1  ;;  %v7612_v17 = vadd.f32 %v7611_v28, %v7610_v48 }
0x15f5   : > { %v6715_v59 = vadd.f32 %v7673_v6, %v6618_v33  ;;  %v7613_v15 = vpop.f32.mrf.mxu0  ;;  %v12432_v6 = vld [vmem:[#allocation39_spill] sm:$0xff] }
0x15f6   : > { %v6621_v16 = vadd.f32 %v7612_v17, %v12171_v38  ;;  %v7675_v58 = vpop.f32.mrf.mxu1 }
0x15f7   : > { %v12211_v36 = vadd.f32 %v6715_v59, %v12427_v52  ;;  %v7676_v57 = vadd.f32 %v7675_v58, %v7674_v27  ;;  %v7614_v62 = vpop.f32.mrf.mxu0 }
0x15f8   : > { %v7677_v60 = vpop.f32.mrf.mxu1  ;;  %v7615_v45 = vadd.f32 %v7614_v62, %v7613_v15 }
0x15f9   : > { %6769 = vst [vmem:[#allocation2 + $0x40] sm:$0xff] %v12211_v36  ;;  %v6718_v46 = vadd.f32 %v7676_v57, %v6621_v16  ;;  %v7616_v51 = vpop.f32.mrf.mxu0 }
0x15fa   : > { %v6626_v49 = vadd.f32 %v7615_v45, %v12171_v38  ;;  %v7678_v30 = vpop.f32.mrf.mxu1  ;;  %v12433_v45 = vld [vmem:[#allocation38_spill] sm:$0xff] }
0x15fb   : > { %v12216_v41 = vadd.f32 %v6718_v46, %v12428_v39  ;;  %v7679_v32 = vadd.f32 %v7678_v30, %v7677_v60  ;;  %v7617_v10 = vpop.f32.mrf.mxu0  ;;  %v12434_v30 = vld [vmem:[#allocation40_spill] sm:$0xff] }
0x15fc   : > { %v7680_v31 = vpop.f32.mrf.mxu1  ;;  %v7618_v56 = vadd.f32 %v7617_v10, %v7616_v51 }
0x15fd   : > { %6770 = vst [vmem:[#allocation2 + $0x20] sm:$0xff] %v12216_v41  ;;  %v6723_v40 = vadd.f32 %v7679_v32, %v6626_v49  ;;  %v7619_v4 = vpop.f32.mrf.mxu0 }
0x15fe   : > { %v6629_v13 = vadd.f32 %v7618_v56, %v12171_v38  ;;  %v7681_v47 = vpop.f32.mrf.mxu1 }
0x15ff   : > { %v6755_v34 = vadd.f32 %v6723_v40, %v12429_v14  ;;  %v7682_v53 = vadd.f32 %v7681_v47, %v7680_v31  ;;  %v7620_v42 = vpop.f32.mrf.mxu0 }
0x1600   : > { %v7683_v63 = vpop.f32.mrf.mxu1  ;;  %v7621_v19 = vadd.f32 %v7620_v42, %v7619_v4 }
0x1601   : > { %6771 = vst [vmem:[#allocation2 + $0x10] sm:$0xff] %v6755_v34  ;;  %v6726_v44 = vadd.f32 %v7682_v53, %v6629_v13  ;;  %v7622_v3 = vpop.f32.mrf.mxu0 }
0x1602   : > { %v6634_v25 = vadd.f32 %v7621_v19, %v12171_v38  ;;  %v7684_v22 = vpop.f32.mrf.mxu1 }
0x1603   : > { %v6756_v24 = vadd.f32 %v6726_v44, %v12430_v0  ;;  %v7685_v11 = vadd.f32 %v7684_v22, %v7683_v63  ;;  %v7623_v54 = vpop.f32.mrf.mxu0 }
0x1604   : > { %v7686_v5 = vpop.f32.mrf.mxu1  ;;  %v7624_v20 = vadd.f32 %v7623_v54, %v7622_v3 }
0x1605   : > { %6772 = vst [vmem:[#allocation2 + $0x38] sm:$0xff] %v6756_v24  ;;  %v6731_v29 = vadd.f32 %v7685_v11, %v6634_v25 }
0x1606   : > { %v6637_v9 = vadd.f32 %v7624_v20, %v12171_v38  ;;  %v7687_v55 = vpop.f32.mrf.mxu1  ;;  %v7625_v8 = vpop.f32.mrf.mxu0 }
0x1607   : > { %v6757_v1 = vadd.f32 %v6731_v29, %v12431_v50  ;;  %v7688_v23 = vadd.f32 %v7687_v55, %v7686_v5 }
0x1608   : > { %v7626_v48 = vpop.f32.mrf.mxu0 }
0x1609   : > { %6773 = vst [vmem:[#allocation2 + $0x60] sm:$0xff] %v6757_v1  ;;  %v6734_v18 = vadd.f32 %v7688_v23, %v6637_v9  ;;  %v7627_v7 = vadd.f32 %v7626_v48, %v7625_v8 }
0x160a   : > { %v7689_v33 = vpop.f32.mrf.mxu1  ;;  %v7628_v27 = vpop.f32.mrf.mxu0 }
0x160b   : > { %v6758_v28 = vadd.f32 %v6734_v18, %v12432_v6  ;;  %v6642_v17 = vadd.f32 %v7627_v7, %v12171_v38 }
0x160c   : > { %v7690_v59 = vpop.f32.mrf.mxu1  ;;  %v7629_v16 = vpop.f32.mrf.mxu0 }
0x160d   : > { %6774 = vst [vmem:[#allocation2 + $0x70] sm:$0xff] %v6758_v28  ;;  %v7691_v15 = vadd.f32 %v7690_v59, %v7689_v33  ;;  %v7630_v52 = vadd.f32 %v7629_v16, %v7628_v27 }
0x160e   : > { %v7692_v58 = vpop.f32.mrf.mxu1 }
0x160f   : > { %v6739_v57 = vadd.f32 %v7691_v15, %v6642_v17  ;;  %v6645_v62 = vadd.f32 %v7630_v52, %v12171_v38 }
0x1610   : > { %v7693_v60 = vpop.f32.mrf.mxu1 }
0x1611   : > { %v6759_v46 = vadd.f32 %v6739_v57, %v12433_v45  ;;  %v7694_v51 = vadd.f32 %v7693_v60, %v7692_v58 }
0x1613   : > { %6775 = vst [vmem:[#allocation2 + $0x78] sm:$0xff] %v6759_v46  ;;  %v6742_v49 = vadd.f32 %v7694_v51, %v6645_v62  ;;  %6780 = sbr.rel (%p7335_p10) target bundleno = 5664 (0x1620), region = 116 }
0x1615   : > { %v6760_v39 = vadd.f32 %v6742_v49, %v12434_v30 }
0x1617   : > { %6776 = vst [vmem:[#allocation2 + $0x28] sm:$0xff] %v6760_v39 }
0x1618   : > { %6781 = vst [vmem:[#allocation19] sm:$0xff] %v12175_v12  ;;  %6782 = vst [vmem:[#allocation19 + $0x8] sm:$0xff] %v12179_v21 }
0x1619   : > { %6783 = vst [vmem:[#allocation19 + $0x10] sm:$0xff] %v12183_v37  ;;  %6784 = vst [vmem:[#allocation19 + $0x18] sm:$0xff] %v12187_v43 }
0x161a   : > { %6785 = vst [vmem:[#allocation19 + $0x20] sm:$0xff] %v12192_v2  ;;  %6786 = vst [vmem:[#allocation19 + $0x28] sm:$0xff] %v12197_v61 }
0x161b   : > { %6787 = vst [vmem:[#allocation19 + $0x30] sm:$0xff] %v12201_v35  ;;  %6788 = vst [vmem:[#allocation19 + $0x38] sm:$0xff] %v12205_v26 }
0x161c   : > { %6789 = vst [vmem:[#allocation19 + $0x40] sm:$0xff] %v12211_v36  ;;  %6790 = vst [vmem:[#allocation19 + $0x48] sm:$0xff] %v12216_v41 }
0x161d   : > { %6791 = vst [vmem:[#allocation19 + $0x50] sm:$0xff] %v6755_v34  ;;  %6792 = vst [vmem:[#allocation19 + $0x58] sm:$0xff] %v6756_v24 }
0x161e   : > { %6793 = vst [vmem:[#allocation19 + $0x60] sm:$0xff] %v6757_v1  ;;  %6794 = vst [vmem:[#allocation19 + $0x68] sm:$0xff] %v6758_v28 }
0x161f   : > { %6795 = vst [vmem:[#allocation19 + $0x70] sm:$0xff] %v6759_v46  ;;  %6796 = vst [vmem:[#allocation19 + $0x78] sm:$0xff] %v6760_v39 }
0x1620 PF: > { %p8171_p12 = scmp.eq.s32.totalorder %s9476_s15, 1  ;;  %s9210_s20 = smov [#allocation19]  }
0x1621   : > { %s6803_s6 = sshll.u32 %s9210_s20, 4  ;;  %s6804_s6 = int_to_ptr.vmem [resolvable:$true] %s6803_s6 }
0x1622   : > { %s9109_s28 = scalar_lea.vmem %s6804_s6, 2048  ;;  %p9116_p6 = scmp.lt.s32.totalorder %s6804_s6, %s6804_s6 }
0x1623   : > { %p9110_p2 = scmp.ne.s32.totalorder %s6804_s6, %s9109_s28  ;;  %p9117_p8 = scmp.lt.s32.totalorder %s9109_s28, %s9109_s28 }
0x1625   : > { %p9111_p9 = pnand %p9110_p2, %p8171_p12  ;;  %p9118_p0 = por %p9117_p8, %p9116_p6 }
0x1627   : > { %p9112_p13 = pneg %p9111_p9 }
0x1629   : > { %p9119_p7 = pnand %p9118_p0, %p9112_p13 }
0x162b   : > { %9122 = shalt.err (!%p9119_p7)
}
0x162c   : > { %s9211_s7 = smov 128   ;;  %s9212_s18 = smov 8  }
0x162d   : > { %s12435_s24 = sld [smem:[#allocation54_spill]] }
0x1633   : > { %8136 = dma.vmem_to_hbm [thread:$0]  (%p8171_p12), %s6804_s6, 2048, %s12435_s24, [#allocation6], %s9211_s7, %s9211_s7, %s9212_s18  }
0x1634   : > { %9170 = dma.done.wait (%p8171_p12), [#allocation6], 2048  }
0x1635   : > { %9172 = vsyncadd (%p8171_p12), [#allocation6], 4294965248 }
0x1636 PF: > { %s12436_s28 = sld [smem:[#allocation27_spill]]  ;;  %s12439_s25 = smov %s9179_s26 }
0x1637   : > { %s12437_s16 = sld [smem:[#allocation26_spill]] }
0x1638   : > { %s12438_s27 = sld [smem:[#allocation28_spill]] }
0x163c   : > { %p34_p1 = scmp.ge.s32.totalorder %s12436_s28, 4  }
0x163d   : > { %s12440_s26 = smov %s12437_s16 }
0x163e   :  { %36 = sbr.rel (!%p34_p1) target bundleno = 22 (0x16), region = 217 }
0x1643   :  { %6819 = vsyncpa [#allocation5], 1 }
0x1644   :  { %6821 = vsyncpa [#allocation5 + $0x1], 1 }
0x1645   :  { %6822 = vsyncpa [#allocation8], 1 }
0x1646   :  { %6824 = vsyncpa [#allocation8 + $0x1], 1 }
0x1647   :  { %6825 = vsyncpa [#allocation11], 1 }
0x1648   :  { %6827 = vsyncpa [#allocation11 + $0x1], 1 }
0x1649   :  { %6828 = vsyncpa [#allocation14], 1 }
0x164a   :  { %6830 = vsyncpa [#allocation14 + $0x1], 1 }
0x164b   :  { %6831 = vsyncpa [#allocation17], 1 }
0x164c   :  { %6833 = vsyncpa [#allocation17 + $0x1], 1 }
0x164d   :  { %6834 = vsyncpa [#allocation6], 1 }
0x164e   :  { %6836 = vsyncpa [#allocation6 + $0x1], 1 }

</bundles_post_ra>
